<compile_context>
chip_gen: v7x
topology: tpu7x:2x2x1
jax: 0.10.0
libtpu: 0.0.40
codegen_flags: <defaults>
</compile_context>

<pallas_src>
import functools

import numpy as np
import jax
import jax.numpy as jnp
from jax import lax
from jax.experimental import pallas as pl
from jax.experimental.pallas import tpu as pltpu


# ----------------------------------------------------------------------------
# In-kernel helpers (operate on flattened (H*W, C) activations in VMEM)
# ----------------------------------------------------------------------------
def _pad_rows(w):
    """Sublane-aligned row offset at which the activation interior is stored."""
    return ((w + 1 + 7) // 8) * 8


def _write_padded(vp_ref, act, pad_rows):
    """Store `act` at aligned offset `pad_rows`; keep the pad rows zeroed.

    Only the vertical zero-padding (head/tail rows) is rewritten each call; the
    interior rows are fully overwritten by `act`, so no full-buffer memset is
    needed (saves ~H*W row-stores per conv per image).
    """
    hw = act.shape[0]
    total, c = vp_ref.shape
    vp_ref[0:pad_rows, :] = jnp.zeros((pad_rows, c), vp_ref.dtype)
    vp_ref[pad_rows:pad_rows + hw, :] = act
    tail = total - (pad_rows + hw)
    vp_ref[pad_rows + hw:total, :] = jnp.zeros((tail, c), vp_ref.dtype)


def _border_masks(hw, w):
    """(HW, 1) masks of rows whose output column is not the first / not the last."""
    col = lax.broadcasted_iota(jnp.int32, (hw, 1), 0) % w
    return col != 0, col != (w - 1)


def _conv3x3_relu(vp_ref, w_ref, b_ref, hw, w, pad_rows, not_first, not_last):
    """3x3 / pad=1 conv + bias + ReLU from a padded flat buffer.

    vp_ref    : VMEM scratch, activation stored flat at rows [pad_rows, pad_rows+hw)
    w_ref     : (9, Cin, Cout)  tap-major weights
    b_ref     : (1, Cout)
    not_first : (hw, 1) bool, output rows whose column index != 0
    not_last  : (hw, 1) bool, output rows whose column index != w-1
    returns (hw, Cout) f32
    """
    cout = w_ref.shape[2]
    base = pad_rows - w - 1         # tap (oy,ox) reads rows [base+oy*w+ox, ...+hw)
    acc = jnp.zeros((hw, cout), jnp.float32)
    for oy in range(3):
        for ox in range(3):
            off = base + oy * w + ox
            tap = vp_ref[off:off + hw, :]
            if ox == 0:             # tap reads column x-1: invalid on left border
                tap = jnp.where(not_first, tap, 0.0)
            elif ox == 2:           # tap reads column x+1: invalid on right border
                tap = jnp.where(not_last, tap, 0.0)
            acc = acc + jnp.dot(tap, w_ref[oy * 3 + ox],
                                preferred_element_type=jnp.float32)
    return jnp.maximum(acc + b_ref[...], 0.0)


def _maxpool2x2(act_ref, sel_ref, h, w):
    """2x2/stride-2 max pool on a flat (h*w, C) ref.

    max of the 4 shifted slices gives, at flat row r = 2y*w + 2x, the max over the
    2x2 window; the constant 0/1 selection matrix sel (h/2*w/2, h*w-w-1) picks
    exactly those rows via a (lane-dense) matmul.
    """
    hw = h * w
    L = hw - w - 1
    m = jnp.maximum(
        jnp.maximum(act_ref[0:L, :], act_ref[1:L + 1, :]),
        jnp.maximum(act_ref[w:w + L, :], act_ref[w + 1:w + 1 + L, :]))
    return jnp.dot(sel_ref[...], m, preferred_element_type=jnp.float32)


# ----------------------------------------------------------------------------
# Kernel A: fused conv tower (conv1..conv6 + 3 max-pools), one image per step
# ----------------------------------------------------------------------------
def conv_tower_kernel(x_ref, w1, b1, w2, b2, w3, b3, w4, b4, w5, b5, w6, b6,
                      s1, s2, s3, o_ref,
                      vp1, vp2, pa, vp3, vp4, pb, vp5, vp6, pc, *, size):
    h1 = w1_ = size
    h2 = w2_ = size // 2
    h3 = w3_ = size // 4
    hw1, hw2, hw3 = h1 * w1_, h2 * w2_, h3 * w3_
    p1, p2, p3 = _pad_rows(w1_), _pad_rows(w2_), _pad_rows(w3_)

    # Border masks: one per spatial resolution, shared by both convs of a stage.
    nf1, nl1 = _border_masks(hw1, w1_)
    nf2, nl2 = _border_masks(hw2, w2_)
    nf3, nl3 = _border_masks(hw3, w3_)

    # stage 1: conv1 -> conv2 -> pool
    _write_padded(vp1, x_ref[0], p1)
    a = _conv3x3_relu(vp1, w1, b1, hw1, w1_, p1, nf1, nl1)
    _write_padded(vp2, a, p1)
    a = _conv3x3_relu(vp2, w2, b2, hw1, w1_, p1, nf1, nl1)
    pa[...] = a
    a = _maxpool2x2(pa, s1, h1, w1_)

    # stage 2: conv3 -> conv4 -> pool
    _write_padded(vp3, a, p2)
    a = _conv3x3_relu(vp3, w3, b3, hw2, w2_, p2, nf2, nl2)
    _write_padded(vp4, a, p2)
    a = _conv3x3_relu(vp4, w4, b4, hw2, w2_, p2, nf2, nl2)
    pb[...] = a
    a = _maxpool2x2(pb, s2, h2, w2_)

    # stage 3: conv5 -> conv6 -> pool
    _write_padded(vp5, a, p3)
    a = _conv3x3_relu(vp5, w5, b5, hw3, w3_, p3, nf3, nl3)
    _write_padded(vp6, a, p3)
    a = _conv3x3_relu(vp6, w6, b6, hw3, w3_, p3, nf3, nl3)
    pc[...] = a
    a = _maxpool2x2(pc, s3, h3, w3_)          # (SS, 128)

    o_ref[0] = a.astype(o_ref.dtype)


def conv_tower(x_flat, conv_params, pool_sels, size):
    """x_flat: (N, size*size, Cin) NHWC-flattened input -> (N, SS, 128) features."""
    n, hw, cin = x_flat.shape
    ss = (size // 8) ** 2
    h2 = size // 2
    h3 = size // 4

    def const_spec(shape):
        zeros = (0,) * len(shape)
        return pl.BlockSpec(shape, lambda i, _z=zeros: _z)

    in_specs = [pl.BlockSpec((1, hw, cin), lambda i: (i, 0, 0))]
    args = [x_flat]
    for (w9, b) in conv_params:
        in_specs.append(const_spec(w9.shape))
        in_specs.append(const_spec(b.shape))
        args.append(w9)
        args.append(b)
    for s in pool_sels:
        in_specs.append(const_spec(s.shape))
        args.append(s)

    def vp_rows(w_, hw_):
        return _pad_rows(w_) + hw_ + w_ + 1

    scratch = [
        pltpu.VMEM((vp_rows(size, hw), cin), jnp.float32),        # vp1
        pltpu.VMEM((vp_rows(size, hw), 32), jnp.float32),         # vp2
        pltpu.VMEM((hw, 32), jnp.float32),                        # pool-in 1
        pltpu.VMEM((vp_rows(h2, h2 * h2), 32), jnp.float32),      # vp3
        pltpu.VMEM((vp_rows(h2, h2 * h2), 64), jnp.float32),      # vp4
        pltpu.VMEM((h2 * h2, 64), jnp.float32),                   # pool-in 2
        pltpu.VMEM((vp_rows(h3, h3 * h3), 64), jnp.float32),      # vp5
        pltpu.VMEM((vp_rows(h3, h3 * h3), 128), jnp.float32),     # vp6
        pltpu.VMEM((h3 * h3, 128), jnp.float32),                  # pool-in 3
    ]

    return pl.pallas_call(
        functools.partial(conv_tower_kernel, size=size),
        out_shape=jax.ShapeDtypeStruct((n, ss, 128), jnp.float32),
        grid=(n,),
        in_specs=in_specs,
        out_specs=pl.BlockSpec((1, ss, 128), lambda i: (i, 0, 0)),
        scratch_shapes=scratch,
        compiler_params=pltpu.CompilerParams(
            dimension_semantics=("parallel",),
            vmem_limit_bytes=32 * 1024 * 1024),
    )(*args)


# ----------------------------------------------------------------------------
# Kernel B: fc1 + concatenated task heads over the whole batch
# ----------------------------------------------------------------------------
def fc_heads_kernel(f_ref, w1_ref, b1_ref, wh_ref, bh_ref, o_ref):
    h = jnp.dot(f_ref[...], w1_ref[...],
                preferred_element_type=jnp.float32) + b1_ref[...]
    h = jnp.maximum(h, 0.0)                                   # drop2: identity
    y = jnp.dot(h, wh_ref[...],
                preferred_element_type=jnp.float32) + bh_ref[...]
    o_ref[...] = y.astype(o_ref.dtype)


def fc_heads(feat2, w1, b1, wh, bh):
    n, fin = feat2.shape
    hid = w1.shape[1]
    npad = wh.shape[1]
    return pl.pallas_call(
        fc_heads_kernel,
        out_shape=jax.ShapeDtypeStruct((n, npad), jnp.float32),
        grid=(1,),
        in_specs=[
            pl.BlockSpec((n, fin), lambda i: (0, 0)),
            pl.BlockSpec((fin, hid), lambda i: (0, 0)),
            pl.BlockSpec((1, hid), lambda i: (0, 0)),
            pl.BlockSpec((hid, npad), lambda i: (0, 0)),
            pl.BlockSpec((1, npad), lambda i: (0, 0)),
        ],
        out_specs=pl.BlockSpec((n, npad), lambda i: (0, 0)),
        compiler_params=pltpu.CompilerParams(
            dimension_semantics=("arbitrary",),
            vmem_limit_bytes=32 * 1024 * 1024),
    )(feat2, w1, b1, wh, bh)


# ----------------------------------------------------------------------------
# Parameters: torch-layout init + packing into kernel layout
# ----------------------------------------------------------------------------
def init_raw_params(key, inputsize, taskcla):
    """PyTorch-equivalent shapes / init bounds, in PyTorch layouts."""
    ncha, size, _ = inputsize
    sf = size // 8
    fin = sf * sf * 128
    keys = list(jax.random.split(key, 2 * (7 + len(taskcla))))

    def conv(cin, cout):
        kw, kb = keys.pop(0), keys.pop(0)
        bound = float(1.0 / np.sqrt(cin * 9))
        w = jax.random.uniform(kw, (cout, cin, 3, 3), jnp.float32, -bound, bound)
        b = jax.random.uniform(kb, (cout,), jnp.float32, -bound, bound)
        return w, b

    def linear(fi, fo):
        kw, kb = keys.pop(0), keys.pop(0)
        bound = float(1.0 / np.sqrt(fi))
        w = jax.random.uniform(kw, (fo, fi), jnp.float32, -bound, bound)
        b = jax.random.uniform(kb, (fo,), jnp.float32, -bound, bound)
        return w, b

    raw = {
        "conv1": conv(ncha, 32), "conv2": conv(32, 32),
        "conv3": conv(32, 64), "conv4": conv(64, 64),
        "conv5": conv(64, 128), "conv6": conv(128, 128),
        "fc1": linear(fin, 256),
    }
    for t, nn_ in taskcla:
        raw[f"last{t}"] = linear(256, nn_)
    return raw


def make_pool_select(h, w):
    """0/1 matrix selecting flat row 2y*w+2x for pooled output (y, x)."""
    hh, wh = h // 2, w // 2
    L = h * w - w - 1
    s = np.zeros((hh * wh, L), np.float32)
    for y in range(hh):
        for x in range(wh):
            s[y * wh + x, 2 * y * w + 2 * x] = 1.0
    return jnp.asarray(s)


def pack_params(raw, inputsize, taskcla):
    _ncha, size, _ = inputsize
    sf = size // 8
    convs = []
    for i in range(1, 7):
        w, b = raw[f"conv{i}"]
        cout, cin = w.shape[0], w.shape[1]
        # (Cout, Cin, 3, 3) -> (ky, kx, Cin, Cout) -> (9, Cin, Cout): tap-major.
        w9 = jnp.transpose(w, (2, 3, 1, 0)).reshape(9, cin, cout)
        convs.append((w9, b.reshape(1, cout)))

    # fc1: fold the PyTorch NCHW flatten order (c, h, w) into the weight rows so
    # the kernel's (h, w, c) flatten needs no runtime transpose.
    wf, bf = raw["fc1"]                                     # (256, 128*sf*sf)
    w1 = jnp.transpose(wf.reshape(256, 128, sf, sf),
                       (0, 2, 3, 1)).reshape(256, -1).T     # (sf*sf*128, 256)
    b1 = bf.reshape(1, 256)

    # Concatenate all task heads into one lane-dense matmul, zero-padded to 128.
    wh_list, bh_list = [], []
    for t, _n in taskcla:
        wt, bt = raw[f"last{t}"]                            # (n, 256), (n,)
        wh_list.append(wt.T)
        bh_list.append(bt)
    wh = jnp.concatenate(wh_list, axis=1)                   # (256, ntot)
    bh = jnp.concatenate(bh_list).reshape(1, -1)
    ntot = wh.shape[1]
    npad = max(128, ((ntot + 127) // 128) * 128)
    wh = jnp.pad(wh, ((0, 0), (0, npad - ntot)))
    bh = jnp.pad(bh, ((0, 0), (0, npad - ntot)))

    pool_sels = [make_pool_select(size, size),
                 make_pool_select(size // 2, size // 2),
                 make_pool_select(size // 4, size // 4)]
    return {"convs": convs, "w1": w1, "b1": b1, "wh": wh, "bh": bh,
            "pool_sels": pool_sels}


# ----------------------------------------------------------------------------
# Forward pass (mirrors Net.forward; dropout = identity at inference)
# ----------------------------------------------------------------------------
def net_forward(x_nchw, packed, taskcla, size):
    n, cin = x_nchw.shape[0], x_nchw.shape[1]
    # NCHW -> flattened NHWC (tiny input; one-time glue).
    x_flat = jnp.transpose(x_nchw, (0, 2, 3, 1)).reshape(n, size * size, cin)
    feat = conv_tower(x_flat, packed["convs"], packed["pool_sels"], size)
    feat2 = feat.reshape(n, -1)              # contiguous merge: free, no transpose
    y_all = fc_heads(feat2, packed["w1"], packed["b1"], packed["wh"], packed["bh"])
    outs, off = [], 0
    for _t, nt in taskcla:
        outs.append(y_all[:, off:off + nt])
        off += nt
    return outs


# ----------------------------------------------------------------------------
# Pure-JAX reference (PyTorch semantics, NCHW) for a correctness sanity check
# ----------------------------------------------------------------------------
def reference_forward(x_nchw, raw, taskcla):
    h = x_nchw
    for i in range(1, 7):
        w, b = raw[f"conv{i}"]
        h = lax.conv_general_dilated(
            h, w, window_strides=(1, 1), padding=((1, 1), (1, 1)),
            dimension_numbers=("NCHW", "OIHW", "NCHW"),
            precision=lax.Precision.HIGHEST)
        h = jnp.maximum(h + b[None, :, None, None], 0.0)
        if i in (2, 4, 6):
            h = lax.reduce_window(h, -jnp.inf, lax.max,
                                  (1, 1, 2, 2), (1, 1, 2, 2), "VALID")
    n = h.shape[0]
    hf = h.reshape(n, -1)
    wf, bf = raw["fc1"]
    hf = jnp.maximum(jnp.dot(hf, wf.T, precision=lax.Precision.HIGHEST) + bf, 0.0)
    outs = []
    for t, _nt in taskcla:
        wt, bt = raw[f"last{t}"]
        outs.append(jnp.dot(hf, wt.T, precision=lax.Precision.HIGHEST) + bt)
    return outs


# ----------------------------------------------------------------------------
# Demo
# ----------------------------------------------------------------------------
if __name__ == "__main__":
    key = jax.random.PRNGKey(0)
    inputsize = (4, 16, 16)                 # (channels, H, W) -- small CIFAR-like
    taskcla = [(0, 10), (1, 5)]
    batch = 2
    size = inputsize[1]
    assert size % 8 == 0, "spatial size must be divisible by 8 (three 2x2 pools)"

    raw = init_raw_params(key, inputsize, taskcla)
    packed = pack_params(raw, inputsize, taskcla)

    x = jax.random.normal(jax.random.fold_in(key, 123),
                          (batch,) + inputsize, jnp.float32)     # NCHW

    fwd = jax.jit(lambda xx: net_forward(xx, packed, taskcla, size))
    ys = [jax.block_until_ready(y) for y in fwd(x)]

    expected = [(batch, nt) for _t, nt in taskcla]
    got = [tuple(y.shape) for y in ys]
    assert got == expected, (got, expected)

    # Correctness sanity check against a pure-JAX (PyTorch-semantics) reference.
    refs = reference_forward(x, raw, taskcla)
    for y, r in zip(ys, refs):
        np.testing.assert_allclose(np.asarray(y), np.asarray(r),
                                   rtol=2e-2, atol=2e-2)

    print("KERNEL_OK")
</pallas_src>

<mosaic_0001>
module attributes {stable_mosaic.version = 11 : i64} {
  func.func @fc_heads_kernel(%arg0: i32, %arg1: memref<2x512xf32, #tpu.memory_space<vmem>>, %arg2: memref<512x256xf32, #tpu.memory_space<vmem>>, %arg3: memref<1x256xf32, #tpu.memory_space<vmem>>, %arg4: memref<256x128xf32, #tpu.memory_space<vmem>>, %arg5: memref<1x128xf32, #tpu.memory_space<vmem>>, %arg6: memref<2x128xf32, #tpu.memory_space<vmem>>) attributes {dimension_semantics = [#tpu.dimension_semantics<arbitrary>], iteration_bounds = array<i64: 1>, scalar_prefetch = 0 : i64, scratch_operands = 0 : i64, tpu.core_type = #tpu.core_type<tc>, window_params = [{pipeline_mode = #tpu.pipeline_mode<synchronous>, transform_indices = @transform_0, window_bounds = array<i64: 2, 512>}, {pipeline_mode = #tpu.pipeline_mode<synchronous>, transform_indices = @transform_1, window_bounds = array<i64: 512, 256>}, {pipeline_mode = #tpu.pipeline_mode<synchronous>, transform_indices = @transform_2, window_bounds = array<i64: 1, 256>}, {pipeline_mode = #tpu.pipeline_mode<synchronous>, transform_indices = @transform_3, window_bounds = array<i64: 256, 128>}, {pipeline_mode = #tpu.pipeline_mode<synchronous>, transform_indices = @transform_4, window_bounds = array<i64: 1, 128>}, {pipeline_mode = #tpu.pipeline_mode<synchronous>, transform_indices = @transform_5, window_bounds = array<i64: 2, 128>}]} {
    %c0 = arith.constant 0 : index
    %c0_0 = arith.constant 0 : index
    %0 = vector.load %arg1[%c0, %c0_0] : memref<2x512xf32, #tpu.memory_space<vmem>>, vector<2x512xf32>
    %c0_1 = arith.constant 0 : index
    %c0_2 = arith.constant 0 : index
    %1 = vector.load %arg2[%c0_1, %c0_2] : memref<512x256xf32, #tpu.memory_space<vmem>>, vector<512x256xf32>
    %cst = arith.constant dense<0.000000e+00> : vector<2x256xf32>
    %2 = tpu.matmul %0, %1, %cst {dimension_numbers = #tpu.dot_dimension_numbers<[1], [0], [0], [1], [0, 0, 1, 1], [], []>} : vector<2x512xf32>, vector<512x256xf32>, vector<2x256xf32> -> vector<2x256xf32>
    %c0_3 = arith.constant 0 : index
    %c0_4 = arith.constant 0 : index
    %3 = vector.load %arg3[%c0_3, %c0_4] : memref<1x256xf32, #tpu.memory_space<vmem>>, vector<1x256xf32>
    %4 = vector.broadcast %3 : vector<1x256xf32> to vector<2x256xf32>
    %5 = arith.addf %2, %4 : vector<2x256xf32>
    %cst_5 = arith.constant 0.000000e+00 : f32
    %6 = vector.broadcast %cst_5 : f32 to vector<2x256xf32>
    %7 = arith.maximumf %5, %6 : vector<2x256xf32>
    %c0_6 = arith.constant 0 : index
    %c0_7 = arith.constant 0 : index
    %8 = vector.load %arg4[%c0_6, %c0_7] : memref<256x128xf32, #tpu.memory_space<vmem>>, vector<256x128xf32>
    %cst_8 = arith.constant dense<0.000000e+00> : vector<2x128xf32>
    %9 = tpu.matmul %7, %8, %cst_8 {dimension_numbers = #tpu.dot_dimension_numbers<[1], [0], [0], [1], [0, 0, 1, 1], [], []>} : vector<2x256xf32>, vector<256x128xf32>, vector<2x128xf32> -> vector<2x128xf32>
    %c0_9 = arith.constant 0 : index
    %c0_10 = arith.constant 0 : index
    %10 = vector.load %arg5[%c0_9, %c0_10] : memref<1x128xf32, #tpu.memory_space<vmem>>, vector<1x128xf32>
    %11 = vector.broadcast %10 : vector<1x128xf32> to vector<2x128xf32>
    %12 = arith.addf %9, %11 : vector<2x128xf32>
    %c0_11 = arith.constant 0 : index
    %c0_12 = arith.constant 0 : index
    %13 = vector.load %arg6[%c0_11, %c0_12] : memref<2x128xf32, #tpu.memory_space<vmem>>, vector<2x128xf32>
    tpu.vector_store %arg6[%c0_11, %c0_12], %12 {strides = array<i32>} : memref<2x128xf32, #tpu.memory_space<vmem>>, vector<2x128xf32>,
    return
  }
  func.func @transform_0(%arg0: i32) -> (i32, i32) {
    %c0_i32 = arith.constant 0 : i32
    %c0_i32_0 = arith.constant 0 : i32
    %c0_i32_1 = arith.constant 0 : i32
    return %c0_i32, %c0_i32_0 : i32, i32
  }
  func.func @transform_1(%arg0: i32) -> (i32, i32) {
    %c0_i32 = arith.constant 0 : i32
    %c0_i32_0 = arith.constant 0 : i32
    %c0_i32_1 = arith.constant 0 : i32
    return %c0_i32, %c0_i32_0 : i32, i32
  }
  func.func @transform_2(%arg0: i32) -> (i32, i32) {
    %c0_i32 = arith.constant 0 : i32
    %c0_i32_0 = arith.constant 0 : i32
    %c0_i32_1 = arith.constant 0 : i32
    return %c0_i32, %c0_i32_0 : i32, i32
  }
  func.func @transform_3(%arg0: i32) -> (i32, i32) {
    %c0_i32 = arith.constant 0 : i32
    %c0_i32_0 = arith.constant 0 : i32
    %c0_i32_1 = arith.constant 0 : i32
    return %c0_i32, %c0_i32_0 : i32, i32
  }
  func.func @transform_4(%arg0: i32) -> (i32, i32) {
    %c0_i32 = arith.constant 0 : i32
    %c0_i32_0 = arith.constant 0 : i32
    %c0_i32_1 = arith.constant 0 : i32
    return %c0_i32, %c0_i32_0 : i32, i32
  }
  func.func @transform_5(%arg0: i32) -> (i32, i32) {
    %c0_i32 = arith.constant 0 : i32
    %c0_i32_0 = arith.constant 0 : i32
    %c0_i32_1 = arith.constant 0 : i32
    return %c0_i32, %c0_i32_0 : i32, i32
  }
}

module attributes {stable_mosaic.version = 11 : i64} {
  func.func @conv_tower_kernel(%arg0: i32, %arg1: memref<1x256x4xf32, #tpu.memory_space<vmem>>, %arg2: memref<9x4x32xf32, #tpu.memory_space<vmem>>, %arg3: memref<1x32xf32, #tpu.memory_space<vmem>>, %arg4: memref<9x32x32xf32, #tpu.memory_space<vmem>>, %arg5: memref<1x32xf32, #tpu.memory_space<vmem>>, %arg6: memref<9x32x64xf32, #tpu.memory_space<vmem>>, %arg7: memref<1x64xf32, #tpu.memory_space<vmem>>, %arg8: memref<9x64x64xf32, #tpu.memory_space<vmem>>, %arg9: memref<1x64xf32, #tpu.memory_space<vmem>>, %arg10: memref<9x64x128xf32, #tpu.memory_space<vmem>>, %arg11: memref<1x128xf32, #tpu.memory_space<vmem>>, %arg12: memref<9x128x128xf32, #tpu.memory_space<vmem>>, %arg13: memref<1x128xf32, #tpu.memory_space<vmem>>, %arg14: memref<64x239xf32, #tpu.memory_space<vmem>>, %arg15: memref<16x55xf32, #tpu.memory_space<vmem>>, %arg16: memref<4x11xf32, #tpu.memory_space<vmem>>, %arg17: memref<1x4x128xf32, #tpu.memory_space<vmem>>, %arg18: memref<297x4xf32, #tpu.memory_space<vmem>>, %arg19: memref<297x32xf32, #tpu.memory_space<vmem>>, %arg20: memref<256x32xf32, #tpu.memory_space<vmem>>, %arg21: memref<89x32xf32, #tpu.memory_space<vmem>>, %arg22: memref<89x64xf32, #tpu.memory_space<vmem>>, %arg23: memref<64x64xf32, #tpu.memory_space<vmem>>, %arg24: memref<29x64xf32, #tpu.memory_space<vmem>>, %arg25: memref<29x128xf32, #tpu.memory_space<vmem>>, %arg26: memref<16x128xf32, #tpu.memory_space<vmem>>) attributes {dimension_semantics = [#tpu.dimension_semantics<parallel>], iteration_bounds = array<i64: 2>, scalar_prefetch = 0 : i64, scratch_operands = 9 : i64, tpu.core_type = #tpu.core_type<tc>, window_params = [{transform_indices = @transform_0, window_bounds = array<i64: 1, 256, 4>}, {pipeline_mode = #tpu.pipeline_mode<synchronous>, transform_indices = @transform_1, window_bounds = array<i64: 9, 4, 32>}, {pipeline_mode = #tpu.pipeline_mode<synchronous>, transform_indices = @transform_2, window_bounds = array<i64: 1, 32>}, {pipeline_mode = #tpu.pipeline_mode<synchronous>, transform_indices = @transform_3, window_bounds = array<i64: 9, 32, 32>}, {pipeline_mode = #tpu.pipeline_mode<synchronous>, transform_indices = @transform_4, window_bounds = array<i64: 1, 32>}, {pipeline_mode = #tpu.pipeline_mode<synchronous>, transform_indices = @transform_5, window_bounds = array<i64: 9, 32, 64>}, {pipeline_mode = #tpu.pipeline_mode<synchronous>, transform_indices = @transform_6, window_bounds = array<i64: 1, 64>}, {pipeline_mode = #tpu.pipeline_mode<synchronous>, transform_indices = @transform_7, window_bounds = array<i64: 9, 64, 64>}, {pipeline_mode = #tpu.pipeline_mode<synchronous>, transform_indices = @transform_8, window_bounds = array<i64: 1, 64>}, {pipeline_mode = #tpu.pipeline_mode<synchronous>, transform_indices = @transform_9, window_bounds = array<i64: 9, 64, 128>}, {pipeline_mode = #tpu.pipeline_mode<synchronous>, transform_indices = @transform_10, window_bounds = array<i64: 1, 128>}, {pipeline_mode = #tpu.pipeline_mode<synchronous>, transform_indices = @transform_11, window_bounds = array<i64: 9, 128, 128>}, {pipeline_mode = #tpu.pipeline_mode<synchronous>, transform_indices = @transform_12, window_bounds = array<i64: 1, 128>}, {pipeline_mode = #tpu.pipeline_mode<synchronous>, transform_indices = @transform_13, window_bounds = array<i64: 64, 239>}, {pipeline_mode = #tpu.pipeline_mode<synchronous>, transform_indices = @transform_14, window_bounds = array<i64: 16, 55>}, {pipeline_mode = #tpu.pipeline_mode<synchronous>, transform_indices = @transform_15, window_bounds = array<i64: 4, 11>}, {transform_indices = @transform_16, window_bounds = array<i64: 1, 4, 128>}]} {
    %0 = tpu.iota {dimensions = array<i32: 0>} : vector<256x1xi32>
    %c16_i32 = arith.constant 16 : i32
    %c0_i32 = arith.constant 0 : i32
    %1 = arith.cmpi eq, %c16_i32, %c0_i32 : i32
    %c1_i32 = arith.constant 1 : i32
    %2 = arith.select %1, %c1_i32, %c16_i32 : i32
    %3 = vector.broadcast %2 : i32 to vector<256x1xi32>
    %4 = arith.remsi %0, %3 : vector<256x1xi32>
    %c0_i32_0 = arith.constant 0 : i32
    %5 = vector.broadcast %c0_i32_0 : i32 to vector<256x1xi32>
    %6 = arith.cmpi ne, %4, %5 : vector<256x1xi32>
    %c0_i32_1 = arith.constant 0 : i32
    %7 = vector.broadcast %c0_i32_1 : i32 to vector<256x1xi32>
    %8 = arith.cmpi slt, %4, %7 : vector<256x1xi32>
    %c0_i32_2 = arith.constant 0 : i32
    %9 = arith.cmpi slt, %2, %c0_i32_2 : i32
    %10 = vector.broadcast %9 : i1 to vector<256x1xi1>
    %11 = vector.broadcast %10 : vector<256x1xi1> to vector<256x1xi1>
    %12 = arith.xori %8, %11 : vector<256x1xi1>
    %13 = arith.andi %12, %6 : vector<256x1xi1>
    %14 = vector.broadcast %2 : i32 to vector<256x1xi32>
    %15 = arith.addi %4, %14 : vector<256x1xi32>
    %16 = arith.select %13, %15, %4 : vector<256x1xi1>, vector<256x1xi32>
    %c0_i32_3 = arith.constant 0 : i32
    %17 = vector.broadcast %c0_i32_3 : i32 to vector<256x1xi32>
    %18 = arith.cmpi ne, %16, %17 : vector<256x1xi32>
    %c15_i32 = arith.constant 15 : i32
    %19 = vector.broadcast %c15_i32 : i32 to vector<256x1xi32>
    %20 = arith.cmpi ne, %16, %19 : vector<256x1xi32>
    %21 = tpu.iota {dimensions = array<i32: 0>} : vector<64x1xi32>
    %c8_i32 = arith.constant 8 : i32
    %c0_i32_4 = arith.constant 0 : i32
    %22 = arith.cmpi eq, %c8_i32, %c0_i32_4 : i32
    %c1_i32_5 = arith.constant 1 : i32
    %23 = arith.select %22, %c1_i32_5, %c8_i32 : i32
    %24 = vector.broadcast %23 : i32 to vector<64x1xi32>
    %25 = arith.remsi %21, %24 : vector<64x1xi32>
    %c0_i32_6 = arith.constant 0 : i32
    %26 = vector.broadcast %c0_i32_6 : i32 to vector<64x1xi32>
    %27 = arith.cmpi ne, %25, %26 : vector<64x1xi32>
    %c0_i32_7 = arith.constant 0 : i32
    %28 = vector.broadcast %c0_i32_7 : i32 to vector<64x1xi32>
    %29 = arith.cmpi slt, %25, %28 : vector<64x1xi32>
    %c0_i32_8 = arith.constant 0 : i32
    %30 = arith.cmpi slt, %23, %c0_i32_8 : i32
    %31 = vector.broadcast %30 : i1 to vector<64x1xi1>
    %32 = vector.broadcast %31 : vector<64x1xi1> to vector<64x1xi1>
    %33 = arith.xori %29, %32 : vector<64x1xi1>
    %34 = arith.andi %33, %27 : vector<64x1xi1>
    %35 = vector.broadcast %23 : i32 to vector<64x1xi32>
    %36 = arith.addi %25, %35 : vector<64x1xi32>
    %37 = arith.select %34, %36, %25 : vector<64x1xi1>, vector<64x1xi32>
    %c0_i32_9 = arith.constant 0 : i32
    %38 = vector.broadcast %c0_i32_9 : i32 to vector<64x1xi32>
    %39 = arith.cmpi ne, %37, %38 : vector<64x1xi32>
    %c7_i32 = arith.constant 7 : i32
    %40 = vector.broadcast %c7_i32 : i32 to vector<64x1xi32>
    %41 = arith.cmpi ne, %37, %40 : vector<64x1xi32>
    %42 = tpu.iota {dimensions = array<i32: 0>} : vector<16x1xi32>
    %c4_i32 = arith.constant 4 : i32
    %c0_i32_10 = arith.constant 0 : i32
    %43 = arith.cmpi eq, %c4_i32, %c0_i32_10 : i32
    %c1_i32_11 = arith.constant 1 : i32
    %44 = arith.select %43, %c1_i32_11, %c4_i32 : i32
    %45 = vector.broadcast %44 : i32 to vector<16x1xi32>
    %46 = arith.remsi %42, %45 : vector<16x1xi32>
    %c0_i32_12 = arith.constant 0 : i32
    %47 = vector.broadcast %c0_i32_12 : i32 to vector<16x1xi32>
    %48 = arith.cmpi ne, %46, %47 : vector<16x1xi32>
    %c0_i32_13 = arith.constant 0 : i32
    %49 = vector.broadcast %c0_i32_13 : i32 to vector<16x1xi32>
    %50 = arith.cmpi slt, %46, %49 : vector<16x1xi32>
    %c0_i32_14 = arith.constant 0 : i32
    %51 = arith.cmpi slt, %44, %c0_i32_14 : i32
    %52 = vector.broadcast %51 : i1 to vector<16x1xi1>
    %53 = vector.broadcast %52 : vector<16x1xi1> to vector<16x1xi1>
    %54 = arith.xori %50, %53 : vector<16x1xi1>
    %55 = arith.andi %54, %48 : vector<16x1xi1>
    %56 = vector.broadcast %44 : i32 to vector<16x1xi32>
    %57 = arith.addi %46, %56 : vector<16x1xi32>
    %58 = arith.select %55, %57, %46 : vector<16x1xi1>, vector<16x1xi32>
    %c0_i32_15 = arith.constant 0 : i32
    %59 = vector.broadcast %c0_i32_15 : i32 to vector<16x1xi32>
    %60 = arith.cmpi ne, %58, %59 : vector<16x1xi32>
    %c3_i32 = arith.constant 3 : i32
    %61 = vector.broadcast %c3_i32 : i32 to vector<16x1xi32>
    %62 = arith.cmpi ne, %58, %61 : vector<16x1xi32>
    %c0 = arith.constant 0 : index
    %c0_16 = arith.constant 0 : index
    %c0_17 = arith.constant 0 : index
    %63 = vector.load %arg1[%c0, %c0_16, %c0_17] : memref<1x256x4xf32, #tpu.memory_space<vmem>>, vector<1x256x4xf32>
    %64 = vector.shape_cast %63 : vector<1x256x4xf32> to vector<256x4xf32>
    %cst = arith.constant 0.000000e+00 : f32
    %65 = vector.broadcast %cst : f32 to vector<24x4xf32>
    %c0_18 = arith.constant 0 : index
    %c0_19 = arith.constant 0 : index
    %66 = vector.load %arg18[%c0_18, %c0_19] : memref<297x4xf32, #tpu.memory_space<vmem>>, vector<24x4xf32>
    tpu.vector_store %arg18[%c0_18, %c0_19], %65 {strides = array<i32>} : memref<297x4xf32, #tpu.memory_space<vmem>>, vector<24x4xf32>,
    %c24 = arith.constant 24 : index
    %c0_20 = arith.constant 0 : index
    %67 = vector.load %arg18[%c24, %c0_20] : memref<297x4xf32, #tpu.memory_space<vmem>>, vector<256x4xf32>
    tpu.vector_store %arg18[%c24, %c0_20], %64 {strides = array<i32>} : memref<297x4xf32, #tpu.memory_space<vmem>>, vector<256x4xf32>,
    %cst_21 = arith.constant 0.000000e+00 : f32
    %68 = vector.broadcast %cst_21 : f32 to vector<17x4xf32>
    %c280 = arith.constant 280 : index
    %c0_22 = arith.constant 0 : index
    %69 = vector.load %arg18[%c280, %c0_22] : memref<297x4xf32, #tpu.memory_space<vmem>>, vector<17x4xf32>
    tpu.vector_store %arg18[%c280, %c0_22], %68 {strides = array<i32>} : memref<297x4xf32, #tpu.memory_space<vmem>>, vector<17x4xf32>,
    %cst_23 = arith.constant 0.000000e+00 : f32
    %70 = vector.broadcast %cst_23 : f32 to vector<256x32xf32>
    %c7 = arith.constant 7 : index
    %c0_24 = arith.constant 0 : index
    %71 = vector.load %arg18[%c7, %c0_24] : memref<297x4xf32, #tpu.memory_space<vmem>>, vector<256x4xf32>
    %cst_25 = arith.constant 0.000000e+00 : f32
    %72 = vector.shape_cast %18 : vector<256x1xi1> to vector<256x1xi1>
    %73 = vector.broadcast %72 : vector<256x1xi1> to vector<256x4xi1>
    %74 = vector.broadcast %cst_25 : f32 to vector<256x4xf32>
    %75 = arith.select %73, %71, %74 : vector<256x4xi1>, vector<256x4xf32>
    %c0_26 = arith.constant 0 : index
    %c0_27 = arith.constant 0 : index
    %c0_28 = arith.constant 0 : index
    %76 = vector.load %arg2[%c0_26, %c0_27, %c0_28] : memref<9x4x32xf32, #tpu.memory_space<vmem>>, vector<1x4x32xf32>
    %77 = vector.shape_cast %76 : vector<1x4x32xf32> to vector<4x32xf32>
    %cst_29 = arith.constant dense<0.000000e+00> : vector<256x32xf32>
    %78 = tpu.matmul %75, %77, %cst_29 {dimension_numbers = #tpu.dot_dimension_numbers<[1], [0], [0], [1], [0, 0, 1, 1], [], []>} : vector<256x4xf32>, vector<4x32xf32>, vector<256x32xf32> -> vector<256x32xf32>
    %79 = arith.addf %70, %78 : vector<256x32xf32>
    %c8 = arith.constant 8 : index
    %c0_30 = arith.constant 0 : index
    %80 = vector.load %arg18[%c8, %c0_30] : memref<297x4xf32, #tpu.memory_space<vmem>>, vector<256x4xf32>
    %c1 = arith.constant 1 : index
    %c0_31 = arith.constant 0 : index
    %c0_32 = arith.constant 0 : index
    %81 = vector.load %arg2[%c1, %c0_31, %c0_32] : memref<9x4x32xf32, #tpu.memory_space<vmem>>, vector<1x4x32xf32>
    %82 = vector.shape_cast %81 : vector<1x4x32xf32> to vector<4x32xf32>
    %cst_33 = arith.constant dense<0.000000e+00> : vector<256x32xf32>
    %83 = tpu.matmul %80, %82, %cst_33 {dimension_numbers = #tpu.dot_dimension_numbers<[1], [0], [0], [1], [0, 0, 1, 1], [], []>} : vector<256x4xf32>, vector<4x32xf32>, vector<256x32xf32> -> vector<256x32xf32>
    %84 = arith.addf %79, %83 : vector<256x32xf32>
    %c9 = arith.constant 9 : index
    %c0_34 = arith.constant 0 : index
    %85 = vector.load %arg18[%c9, %c0_34] : memref<297x4xf32, #tpu.memory_space<vmem>>, vector<256x4xf32>
    %cst_35 = arith.constant 0.000000e+00 : f32
    %86 = vector.shape_cast %20 : vector<256x1xi1> to vector<256x1xi1>
    %87 = vector.broadcast %86 : vector<256x1xi1> to vector<256x4xi1>
    %88 = vector.broadcast %cst_35 : f32 to vector<256x4xf32>
    %89 = arith.select %87, %85, %88 : vector<256x4xi1>, vector<256x4xf32>
    %c2 = arith.constant 2 : index
    %c0_36 = arith.constant 0 : index
    %c0_37 = arith.constant 0 : index
    %90 = vector.load %arg2[%c2, %c0_36, %c0_37] : memref<9x4x32xf32, #tpu.memory_space<vmem>>, vector<1x4x32xf32>
    %91 = vector.shape_cast %90 : vector<1x4x32xf32> to vector<4x32xf32>
    %cst_38 = arith.constant dense<0.000000e+00> : vector<256x32xf32>
    %92 = tpu.matmul %89, %91, %cst_38 {dimension_numbers = #tpu.dot_dimension_numbers<[1], [0], [0], [1], [0, 0, 1, 1], [], []>} : vector<256x4xf32>, vector<4x32xf32>, vector<256x32xf32> -> vector<256x32xf32>
    %93 = arith.addf %84, %92 : vector<256x32xf32>
    %c23 = arith.constant 23 : index
    %c0_39 = arith.constant 0 : index
    %94 = vector.load %arg18[%c23, %c0_39] : memref<297x4xf32, #tpu.memory_space<vmem>>, vector<256x4xf32>
    %cst_40 = arith.constant 0.000000e+00 : f32
    %95 = vector.shape_cast %18 : vector<256x1xi1> to vector<256x1xi1>
    %96 = vector.broadcast %95 : vector<256x1xi1> to vector<256x4xi1>
    %97 = vector.broadcast %cst_40 : f32 to vector<256x4xf32>
    %98 = arith.select %96, %94, %97 : vector<256x4xi1>, vector<256x4xf32>
    %c3 = arith.constant 3 : index
    %c0_41 = arith.constant 0 : index
    %c0_42 = arith.constant 0 : index
    %99 = vector.load %arg2[%c3, %c0_41, %c0_42] : memref<9x4x32xf32, #tpu.memory_space<vmem>>, vector<1x4x32xf32>
    %100 = vector.shape_cast %99 : vector<1x4x32xf32> to vector<4x32xf32>
    %cst_43 = arith.constant dense<0.000000e+00> : vector<256x32xf32>
    %101 = tpu.matmul %98, %100, %cst_43 {dimension_numbers = #tpu.dot_dimension_numbers<[1], [0], [0], [1], [0, 0, 1, 1], [], []>} : vector<256x4xf32>, vector<4x32xf32>, vector<256x32xf32> -> vector<256x32xf32>
    %102 = arith.addf %93, %101 : vector<256x32xf32>
    %c24_44 = arith.constant 24 : index
    %c0_45 = arith.constant 0 : index
    %103 = vector.load %arg18[%c24_44, %c0_45] : memref<297x4xf32, #tpu.memory_space<vmem>>, vector<256x4xf32>
    %c4 = arith.constant 4 : index
    %c0_46 = arith.constant 0 : index
    %c0_47 = arith.constant 0 : index
    %104 = vector.load %arg2[%c4, %c0_46, %c0_47] : memref<9x4x32xf32, #tpu.memory_space<vmem>>, vector<1x4x32xf32>
    %105 = vector.shape_cast %104 : vector<1x4x32xf32> to vector<4x32xf32>
    %cst_48 = arith.constant dense<0.000000e+00> : vector<256x32xf32>
    %106 = tpu.matmul %103, %105, %cst_48 {dimension_numbers = #tpu.dot_dimension_numbers<[1], [0], [0], [1], [0, 0, 1, 1], [], []>} : vector<256x4xf32>, vector<4x32xf32>, vector<256x32xf32> -> vector<256x32xf32>
    %107 = arith.addf %102, %106 : vector<256x32xf32>
    %c25 = arith.constant 25 : index
    %c0_49 = arith.constant 0 : index
    %108 = vector.load %arg18[%c25, %c0_49] : memref<297x4xf32, #tpu.memory_space<vmem>>, vector<256x4xf32>
    %cst_50 = arith.constant 0.000000e+00 : f32
    %109 = vector.shape_cast %20 : vector<256x1xi1> to vector<256x1xi1>
    %110 = vector.broadcast %109 : vector<256x1xi1> to vector<256x4xi1>
    %111 = vector.broadcast %cst_50 : f32 to vector<256x4xf32>
    %112 = arith.select %110, %108, %111 : vector<256x4xi1>, vector<256x4xf32>
    %c5 = arith.constant 5 : index
    %c0_51 = arith.constant 0 : index
    %c0_52 = arith.constant 0 : index
    %113 = vector.load %arg2[%c5, %c0_51, %c0_52] : memref<9x4x32xf32, #tpu.memory_space<vmem>>, vector<1x4x32xf32>
    %114 = vector.shape_cast %113 : vector<1x4x32xf32> to vector<4x32xf32>
    %cst_53 = arith.constant dense<0.000000e+00> : vector<256x32xf32>
    %115 = tpu.matmul %112, %114, %cst_53 {dimension_numbers = #tpu.dot_dimension_numbers<[1], [0], [0], [1], [0, 0, 1, 1], [], []>} : vector<256x4xf32>, vector<4x32xf32>, vector<256x32xf32> -> vector<256x32xf32>
    %116 = arith.addf %107, %115 : vector<256x32xf32>
    %c39 = arith.constant 39 : index
    %c0_54 = arith.constant 0 : index
    %117 = vector.load %arg18[%c39, %c0_54] : memref<297x4xf32, #tpu.memory_space<vmem>>, vector<256x4xf32>
    %cst_55 = arith.constant 0.000000e+00 : f32
    %118 = vector.shape_cast %18 : vector<256x1xi1> to vector<256x1xi1>
    %119 = vector.broadcast %118 : vector<256x1xi1> to vector<256x4xi1>
    %120 = vector.broadcast %cst_55 : f32 to vector<256x4xf32>
    %121 = arith.select %119, %117, %120 : vector<256x4xi1>, vector<256x4xf32>
    %c6 = arith.constant 6 : index
    %c0_56 = arith.constant 0 : index
    %c0_57 = arith.constant 0 : index
    %122 = vector.load %arg2[%c6, %c0_56, %c0_57] : memref<9x4x32xf32, #tpu.memory_space<vmem>>, vector<1x4x32xf32>
    %123 = vector.shape_cast %122 : vector<1x4x32xf32> to vector<4x32xf32>
    %cst_58 = arith.constant dense<0.000000e+00> : vector<256x32xf32>
    %124 = tpu.matmul %121, %123, %cst_58 {dimension_numbers = #tpu.dot_dimension_numbers<[1], [0], [0], [1], [0, 0, 1, 1], [], []>} : vector<256x4xf32>, vector<4x32xf32>, vector<256x32xf32> -> vector<256x32xf32>
    %125 = arith.addf %116, %124 : vector<256x32xf32>
    %c40 = arith.constant 40 : index
    %c0_59 = arith.constant 0 : index
    %126 = vector.load %arg18[%c40, %c0_59] : memref<297x4xf32, #tpu.memory_space<vmem>>, vector<256x4xf32>
    %c7_60 = arith.constant 7 : index
    %c0_61 = arith.constant 0 : index
    %c0_62 = arith.constant 0 : index
    %127 = vector.load %arg2[%c7_60, %c0_61, %c0_62] : memref<9x4x32xf32, #tpu.memory_space<vmem>>, vector<1x4x32xf32>
    %128 = vector.shape_cast %127 : vector<1x4x32xf32> to vector<4x32xf32>
    %cst_63 = arith.constant dense<0.000000e+00> : vector<256x32xf32>
    %129 = tpu.matmul %126, %128, %cst_63 {dimension_numbers = #tpu.dot_dimension_numbers<[1], [0], [0], [1], [0, 0, 1, 1], [], []>} : vector<256x4xf32>, vector<4x32xf32>, vector<256x32xf32> -> vector<256x32xf32>
    %130 = arith.addf %125, %129 : vector<256x32xf32>
    %c41 = arith.constant 41 : index
    %c0_64 = arith.constant 0 : index
    %131 = vector.load %arg18[%c41, %c0_64] : memref<297x4xf32, #tpu.memory_space<vmem>>, vector<256x4xf32>
    %cst_65 = arith.constant 0.000000e+00 : f32
    %132 = vector.shape_cast %20 : vector<256x1xi1> to vector<256x1xi1>
    %133 = vector.broadcast %132 : vector<256x1xi1> to vector<256x4xi1>
    %134 = vector.broadcast %cst_65 : f32 to vector<256x4xf32>
    %135 = arith.select %133, %131, %134 : vector<256x4xi1>, vector<256x4xf32>
    %c8_66 = arith.constant 8 : index
    %c0_67 = arith.constant 0 : index
    %c0_68 = arith.constant 0 : index
    %136 = vector.load %arg2[%c8_66, %c0_67, %c0_68] : memref<9x4x32xf32, #tpu.memory_space<vmem>>, vector<1x4x32xf32>
    %137 = vector.shape_cast %136 : vector<1x4x32xf32> to vector<4x32xf32>
    %cst_69 = arith.constant dense<0.000000e+00> : vector<256x32xf32>
    %138 = tpu.matmul %135, %137, %cst_69 {dimension_numbers = #tpu.dot_dimension_numbers<[1], [0], [0], [1], [0, 0, 1, 1], [], []>} : vector<256x4xf32>, vector<4x32xf32>, vector<256x32xf32> -> vector<256x32xf32>
    %139 = arith.addf %130, %138 : vector<256x32xf32>
    %c0_70 = arith.constant 0 : index
    %c0_71 = arith.constant 0 : index
    %140 = vector.load %arg3[%c0_70, %c0_71] : memref<1x32xf32, #tpu.memory_space<vmem>>, vector<1x32xf32>
    %141 = vector.broadcast %140 : vector<1x32xf32> to vector<256x32xf32>
    %142 = arith.addf %139, %141 : vector<256x32xf32>
    %cst_72 = arith.constant 0.000000e+00 : f32
    %143 = vector.broadcast %cst_72 : f32 to vector<256x32xf32>
    %144 = arith.maximumf %142, %143 : vector<256x32xf32>
    %cst_73 = arith.constant 0.000000e+00 : f32
    %145 = vector.broadcast %cst_73 : f32 to vector<24x32xf32>
    %c0_74 = arith.constant 0 : index
    %c0_75 = arith.constant 0 : index
    %146 = vector.load %arg19[%c0_74, %c0_75] : memref<297x32xf32, #tpu.memory_space<vmem>>, vector<24x32xf32>
    tpu.vector_store %arg19[%c0_74, %c0_75], %145 {strides = array<i32>} : memref<297x32xf32, #tpu.memory_space<vmem>>, vector<24x32xf32>,
    %c24_76 = arith.constant 24 : index
    %c0_77 = arith.constant 0 : index
    %147 = vector.load %arg19[%c24_76, %c0_77] : memref<297x32xf32, #tpu.memory_space<vmem>>, vector<256x32xf32>
    tpu.vector_store %arg19[%c24_76, %c0_77], %144 {strides = array<i32>} : memref<297x32xf32, #tpu.memory_space<vmem>>, vector<256x32xf32>,
    %cst_78 = arith.constant 0.000000e+00 : f32
    %148 = vector.broadcast %cst_78 : f32 to vector<17x32xf32>
    %c280_79 = arith.constant 280 : index
    %c0_80 = arith.constant 0 : index
    %149 = vector.load %arg19[%c280_79, %c0_80] : memref<297x32xf32, #tpu.memory_space<vmem>>, vector<17x32xf32>
    tpu.vector_store %arg19[%c280_79, %c0_80], %148 {strides = array<i32>} : memref<297x32xf32, #tpu.memory_space<vmem>>, vector<17x32xf32>,
    %cst_81 = arith.constant 0.000000e+00 : f32
    %150 = vector.broadcast %cst_81 : f32 to vector<256x32xf32>
    %c7_82 = arith.constant 7 : index
    %c0_83 = arith.constant 0 : index
    %151 = vector.load %arg19[%c7_82, %c0_83] : memref<297x32xf32, #tpu.memory_space<vmem>>, vector<256x32xf32>
    %cst_84 = arith.constant 0.000000e+00 : f32
    %152 = vector.shape_cast %18 : vector<256x1xi1> to vector<256x1xi1>
    %153 = vector.broadcast %152 : vector<256x1xi1> to vector<256x32xi1>
    %154 = vector.broadcast %cst_84 : f32 to vector<256x32xf32>
    %155 = arith.select %153, %151, %154 : vector<256x32xi1>, vector<256x32xf32>
    %c0_85 = arith.constant 0 : index
    %c0_86 = arith.constant 0 : index
    %c0_87 = arith.constant 0 : index
    %156 = vector.load %arg4[%c0_85, %c0_86, %c0_87] : memref<9x32x32xf32, #tpu.memory_space<vmem>>, vector<1x32x32xf32>
    %157 = vector.shape_cast %156 : vector<1x32x32xf32> to vector<32x32xf32>
    %cst_88 = arith.constant dense<0.000000e+00> : vector<256x32xf32>
    %158 = tpu.matmul %155, %157, %cst_88 {dimension_numbers = #tpu.dot_dimension_numbers<[1], [0], [0], [1], [0, 0, 1, 1], [], []>} : vector<256x32xf32>, vector<32x32xf32>, vector<256x32xf32> -> vector<256x32xf32>
    %159 = arith.addf %150, %158 : vector<256x32xf32>
    %c8_89 = arith.constant 8 : index
    %c0_90 = arith.constant 0 : index
    %160 = vector.load %arg19[%c8_89, %c0_90] : memref<297x32xf32, #tpu.memory_space<vmem>>, vector<256x32xf32>
    %c1_91 = arith.constant 1 : index
    %c0_92 = arith.constant 0 : index
    %c0_93 = arith.constant 0 : index
    %161 = vector.load %arg4[%c1_91, %c0_92, %c0_93] : memref<9x32x32xf32, #tpu.memory_space<vmem>>, vector<1x32x32xf32>
    %162 = vector.shape_cast %161 : vector<1x32x32xf32> to vector<32x32xf32>
    %cst_94 = arith.constant dense<0.000000e+00> : vector<256x32xf32>
    %163 = tpu.matmul %160, %162, %cst_94 {dimension_numbers = #tpu.dot_dimension_numbers<[1], [0], [0], [1], [0, 0, 1, 1], [], []>} : vector<256x32xf32>, vector<32x32xf32>, vector<256x32xf32> -> vector<256x32xf32>
    %164 = arith.addf %159, %163 : vector<256x32xf32>
    %c9_95 = arith.constant 9 : index
    %c0_96 = arith.constant 0 : index
    %165 = vector.load %arg19[%c9_95, %c0_96] : memref<297x32xf32, #tpu.memory_space<vmem>>, vector<256x32xf32>
    %cst_97 = arith.constant 0.000000e+00 : f32
    %166 = vector.shape_cast %20 : vector<256x1xi1> to vector<256x1xi1>
    %167 = vector.broadcast %166 : vector<256x1xi1> to vector<256x32xi1>
    %168 = vector.broadcast %cst_97 : f32 to vector<256x32xf32>
    %169 = arith.select %167, %165, %168 : vector<256x32xi1>, vector<256x32xf32>
    %c2_98 = arith.constant 2 : index
    %c0_99 = arith.constant 0 : index
    %c0_100 = arith.constant 0 : index
    %170 = vector.load %arg4[%c2_98, %c0_99, %c0_100] : memref<9x32x32xf32, #tpu.memory_space<vmem>>, vector<1x32x32xf32>
    %171 = vector.shape_cast %170 : vector<1x32x32xf32> to vector<32x32xf32>
    %cst_101 = arith.constant dense<0.000000e+00> : vector<256x32xf32>
    %172 = tpu.matmul %169, %171, %cst_101 {dimension_numbers = #tpu.dot_dimension_numbers<[1], [0], [0], [1], [0, 0, 1, 1], [], []>} : vector<256x32xf32>, vector<32x32xf32>, vector<256x32xf32> -> vector<256x32xf32>
    %173 = arith.addf %164, %172 : vector<256x32xf32>
    %c23_102 = arith.constant 23 : index
    %c0_103 = arith.constant 0 : index
    %174 = vector.load %arg19[%c23_102, %c0_103] : memref<297x32xf32, #tpu.memory_space<vmem>>, vector<256x32xf32>
    %cst_104 = arith.constant 0.000000e+00 : f32
    %175 = vector.shape_cast %18 : vector<256x1xi1> to vector<256x1xi1>
    %176 = vector.broadcast %175 : vector<256x1xi1> to vector<256x32xi1>
    %177 = vector.broadcast %cst_104 : f32 to vector<256x32xf32>
    %178 = arith.select %176, %174, %177 : vector<256x32xi1>, vector<256x32xf32>
    %c3_105 = arith.constant 3 : index
    %c0_106 = arith.constant 0 : index
    %c0_107 = arith.constant 0 : index
    %179 = vector.load %arg4[%c3_105, %c0_106, %c0_107] : memref<9x32x32xf32, #tpu.memory_space<vmem>>, vector<1x32x32xf32>
    %180 = vector.shape_cast %179 : vector<1x32x32xf32> to vector<32x32xf32>
    %cst_108 = arith.constant dense<0.000000e+00> : vector<256x32xf32>
    %181 = tpu.matmul %178, %180, %cst_108 {dimension_numbers = #tpu.dot_dimension_numbers<[1], [0], [0], [1], [0, 0, 1, 1], [], []>} : vector<256x32xf32>, vector<32x32xf32>, vector<256x32xf32> -> vector<256x32xf32>
    %182 = arith.addf %173, %181 : vector<256x32xf32>
    %c24_109 = arith.constant 24 : index
    %c0_110 = arith.constant 0 : index
    %183 = vector.load %arg19[%c24_109, %c0_110] : memref<297x32xf32, #tpu.memory_space<vmem>>, vector<256x32xf32>
    %c4_111 = arith.constant 4 : index
    %c0_112 = arith.constant 0 : index
    %c0_113 = arith.constant 0 : index
    %184 = vector.load %arg4[%c4_111, %c0_112, %c0_113] : memref<9x32x32xf32, #tpu.memory_space<vmem>>, vector<1x32x32xf32>
    %185 = vector.shape_cast %184 : vector<1x32x32xf32> to vector<32x32xf32>
    %cst_114 = arith.constant dense<0.000000e+00> : vector<256x32xf32>
    %186 = tpu.matmul %183, %185, %cst_114 {dimension_numbers = #tpu.dot_dimension_numbers<[1], [0], [0], [1], [0, 0, 1, 1], [], []>} : vector<256x32xf32>, vector<32x32xf32>, vector<256x32xf32> -> vector<256x32xf32>
    %187 = arith.addf %182, %186 : vector<256x32xf32>
    %c25_115 = arith.constant 25 : index
    %c0_116 = arith.constant 0 : index
    %188 = vector.load %arg19[%c25_115, %c0_116] : memref<297x32xf32, #tpu.memory_space<vmem>>, vector<256x32xf32>
    %cst_117 = arith.constant 0.000000e+00 : f32
    %189 = vector.shape_cast %20 : vector<256x1xi1> to vector<256x1xi1>
    %190 = vector.broadcast %189 : vector<256x1xi1> to vector<256x32xi1>
    %191 = vector.broadcast %cst_117 : f32 to vector<256x32xf32>
    %192 = arith.select %190, %188, %191 : vector<256x32xi1>, vector<256x32xf32>
    %c5_118 = arith.constant 5 : index
    %c0_119 = arith.constant 0 : index
    %c0_120 = arith.constant 0 : index
    %193 = vector.load %arg4[%c5_118, %c0_119, %c0_120] : memref<9x32x32xf32, #tpu.memory_space<vmem>>, vector<1x32x32xf32>
    %194 = vector.shape_cast %193 : vector<1x32x32xf32> to vector<32x32xf32>
    %cst_121 = arith.constant dense<0.000000e+00> : vector<256x32xf32>
    %195 = tpu.matmul %192, %194, %cst_121 {dimension_numbers = #tpu.dot_dimension_numbers<[1], [0], [0], [1], [0, 0, 1, 1], [], []>} : vector<256x32xf32>, vector<32x32xf32>, vector<256x32xf32> -> vector<256x32xf32>
    %196 = arith.addf %187, %195 : vector<256x32xf32>
    %c39_122 = arith.constant 39 : index
    %c0_123 = arith.constant 0 : index
    %197 = vector.load %arg19[%c39_122, %c0_123] : memref<297x32xf32, #tpu.memory_space<vmem>>, vector<256x32xf32>
    %cst_124 = arith.constant 0.000000e+00 : f32
    %198 = vector.shape_cast %18 : vector<256x1xi1> to vector<256x1xi1>
    %199 = vector.broadcast %198 : vector<256x1xi1> to vector<256x32xi1>
    %200 = vector.broadcast %cst_124 : f32 to vector<256x32xf32>
    %201 = arith.select %199, %197, %200 : vector<256x32xi1>, vector<256x32xf32>
    %c6_125 = arith.constant 6 : index
    %c0_126 = arith.constant 0 : index
    %c0_127 = arith.constant 0 : index
    %202 = vector.load %arg4[%c6_125, %c0_126, %c0_127] : memref<9x32x32xf32, #tpu.memory_space<vmem>>, vector<1x32x32xf32>
    %203 = vector.shape_cast %202 : vector<1x32x32xf32> to vector<32x32xf32>
    %cst_128 = arith.constant dense<0.000000e+00> : vector<256x32xf32>
    %204 = tpu.matmul %201, %203, %cst_128 {dimension_numbers = #tpu.dot_dimension_numbers<[1], [0], [0], [1], [0, 0, 1, 1], [], []>} : vector<256x32xf32>, vector<32x32xf32>, vector<256x32xf32> -> vector<256x32xf32>
    %205 = arith.addf %196, %204 : vector<256x32xf32>
    %c40_129 = arith.constant 40 : index
    %c0_130 = arith.constant 0 : index
    %206 = vector.load %arg19[%c40_129, %c0_130] : memref<297x32xf32, #tpu.memory_space<vmem>>, vector<256x32xf32>
    %c7_131 = arith.constant 7 : index
    %c0_132 = arith.constant 0 : index
    %c0_133 = arith.constant 0 : index
    %207 = vector.load %arg4[%c7_131, %c0_132, %c0_133] : memref<9x32x32xf32, #tpu.memory_space<vmem>>, vector<1x32x32xf32>
    %208 = vector.shape_cast %207 : vector<1x32x32xf32> to vector<32x32xf32>
    %cst_134 = arith.constant dense<0.000000e+00> : vector<256x32xf32>
    %209 = tpu.matmul %206, %208, %cst_134 {dimension_numbers = #tpu.dot_dimension_numbers<[1], [0], [0], [1], [0, 0, 1, 1], [], []>} : vector<256x32xf32>, vector<32x32xf32>, vector<256x32xf32> -> vector<256x32xf32>
    %210 = arith.addf %205, %209 : vector<256x32xf32>
    %c41_135 = arith.constant 41 : index
    %c0_136 = arith.constant 0 : index
    %211 = vector.load %arg19[%c41_135, %c0_136] : memref<297x32xf32, #tpu.memory_space<vmem>>, vector<256x32xf32>
    %cst_137 = arith.constant 0.000000e+00 : f32
    %212 = vector.shape_cast %20 : vector<256x1xi1> to vector<256x1xi1>
    %213 = vector.broadcast %212 : vector<256x1xi1> to vector<256x32xi1>
    %214 = vector.broadcast %cst_137 : f32 to vector<256x32xf32>
    %215 = arith.select %213, %211, %214 : vector<256x32xi1>, vector<256x32xf32>
    %c8_138 = arith.constant 8 : index
    %c0_139 = arith.constant 0 : index
    %c0_140 = arith.constant 0 : index
    %216 = vector.load %arg4[%c8_138, %c0_139, %c0_140] : memref<9x32x32xf32, #tpu.memory_space<vmem>>, vector<1x32x32xf32>
    %217 = vector.shape_cast %216 : vector<1x32x32xf32> to vector<32x32xf32>
    %cst_141 = arith.constant dense<0.000000e+00> : vector<256x32xf32>
    %218 = tpu.matmul %215, %217, %cst_141 {dimension_numbers = #tpu.dot_dimension_numbers<[1], [0], [0], [1], [0, 0, 1, 1], [], []>} : vector<256x32xf32>, vector<32x32xf32>, vector<256x32xf32> -> vector<256x32xf32>
    %219 = arith.addf %210, %218 : vector<256x32xf32>
    %c0_142 = arith.constant 0 : index
    %c0_143 = arith.constant 0 : index
    %220 = vector.load %arg5[%c0_142, %c0_143] : memref<1x32xf32, #tpu.memory_space<vmem>>, vector<1x32xf32>
    %221 = vector.broadcast %220 : vector<1x32xf32> to vector<256x32xf32>
    %222 = arith.addf %219, %221 : vector<256x32xf32>
    %cst_144 = arith.constant 0.000000e+00 : f32
    %223 = vector.broadcast %cst_144 : f32 to vector<256x32xf32>
    %224 = arith.maximumf %222, %223 : vector<256x32xf32>
    %c0_145 = arith.constant 0 : index
    %c0_146 = arith.constant 0 : index
    %225 = vector.load %arg20[%c0_145, %c0_146] : memref<256x32xf32, #tpu.memory_space<vmem>>, vector<256x32xf32>
    tpu.vector_store %arg20[%c0_145, %c0_146], %224 {strides = array<i32>} : memref<256x32xf32, #tpu.memory_space<vmem>>, vector<256x32xf32>,
    %c0_147 = arith.constant 0 : index
    %c0_148 = arith.constant 0 : index
    %226 = vector.load %arg20[%c0_147, %c0_148] : memref<256x32xf32, #tpu.memory_space<vmem>>, vector<239x32xf32>
    %c1_149 = arith.constant 1 : index
    %c0_150 = arith.constant 0 : index
    %227 = vector.load %arg20[%c1_149, %c0_150] : memref<256x32xf32, #tpu.memory_space<vmem>>, vector<239x32xf32>
    %228 = arith.maximumf %226, %227 : vector<239x32xf32>
    %c16 = arith.constant 16 : index
    %c0_151 = arith.constant 0 : index
    %229 = vector.load %arg20[%c16, %c0_151] : memref<256x32xf32, #tpu.memory_space<vmem>>, vector<239x32xf32>
    %c17 = arith.constant 17 : index
    %c0_152 = arith.constant 0 : index
    %230 = vector.load %arg20[%c17, %c0_152] : memref<256x32xf32, #tpu.memory_space<vmem>>, vector<239x32xf32>
    %231 = arith.maximumf %229, %230 : vector<239x32xf32>
    %232 = arith.maximumf %228, %231 : vector<239x32xf32>
    %c0_153 = arith.constant 0 : index
    %c0_154 = arith.constant 0 : index
    %233 = vector.load %arg14[%c0_153, %c0_154] : memref<64x239xf32, #tpu.memory_space<vmem>>, vector<64x239xf32>
    %cst_155 = arith.constant dense<0.000000e+00> : vector<64x32xf32>
    %234 = tpu.matmul %233, %232, %cst_155 {dimension_numbers = #tpu.dot_dimension_numbers<[1], [0], [0], [1], [0, 0, 1, 1], [], []>} : vector<64x239xf32>, vector<239x32xf32>, vector<64x32xf32> -> vector<64x32xf32>
    %cst_156 = arith.constant 0.000000e+00 : f32
    %235 = vector.broadcast %cst_156 : f32 to vector<16x32xf32>
    %c0_157 = arith.constant 0 : index
    %c0_158 = arith.constant 0 : index
    %236 = vector.load %arg21[%c0_157, %c0_158] : memref<89x32xf32, #tpu.memory_space<vmem>>, vector<16x32xf32>
    tpu.vector_store %arg21[%c0_157, %c0_158], %235 {strides = array<i32>} : memref<89x32xf32, #tpu.memory_space<vmem>>, vector<16x32xf32>,
    %c16_159 = arith.constant 16 : index
    %c0_160 = arith.constant 0 : index
    %237 = vector.load %arg21[%c16_159, %c0_160] : memref<89x32xf32, #tpu.memory_space<vmem>>, vector<64x32xf32>
    tpu.vector_store %arg21[%c16_159, %c0_160], %234 {strides = array<i32>} : memref<89x32xf32, #tpu.memory_space<vmem>>, vector<64x32xf32>,
    %cst_161 = arith.constant 0.000000e+00 : f32
    %238 = vector.broadcast %cst_161 : f32 to vector<9x32xf32>
    %c80 = arith.constant 80 : index
    %c0_162 = arith.constant 0 : index
    %239 = vector.load %arg21[%c80, %c0_162] : memref<89x32xf32, #tpu.memory_space<vmem>>, vector<9x32xf32>
    tpu.vector_store %arg21[%c80, %c0_162], %238 {strides = array<i32>} : memref<89x32xf32, #tpu.memory_space<vmem>>, vector<9x32xf32>,
    %cst_163 = arith.constant 0.000000e+00 : f32
    %240 = vector.broadcast %cst_163 : f32 to vector<64x64xf32>
    %c7_164 = arith.constant 7 : index
    %c0_165 = arith.constant 0 : index
    %241 = vector.load %arg21[%c7_164, %c0_165] : memref<89x32xf32, #tpu.memory_space<vmem>>, vector<64x32xf32>
    %cst_166 = arith.constant 0.000000e+00 : f32
    %242 = vector.shape_cast %39 : vector<64x1xi1> to vector<64x1xi1>
    %243 = vector.broadcast %242 : vector<64x1xi1> to vector<64x32xi1>
    %244 = vector.broadcast %cst_166 : f32 to vector<64x32xf32>
    %245 = arith.select %243, %241, %244 : vector<64x32xi1>, vector<64x32xf32>
    %c0_167 = arith.constant 0 : index
    %c0_168 = arith.constant 0 : index
    %c0_169 = arith.constant 0 : index
    %246 = vector.load %arg6[%c0_167, %c0_168, %c0_169] : memref<9x32x64xf32, #tpu.memory_space<vmem>>, vector<1x32x64xf32>
    %247 = vector.shape_cast %246 : vector<1x32x64xf32> to vector<32x64xf32>
    %cst_170 = arith.constant dense<0.000000e+00> : vector<64x64xf32>
    %248 = tpu.matmul %245, %247, %cst_170 {dimension_numbers = #tpu.dot_dimension_numbers<[1], [0], [0], [1], [0, 0, 1, 1], [], []>} : vector<64x32xf32>, vector<32x64xf32>, vector<64x64xf32> -> vector<64x64xf32>
    %249 = arith.addf %240, %248 : vector<64x64xf32>
    %c8_171 = arith.constant 8 : index
    %c0_172 = arith.constant 0 : index
    %250 = vector.load %arg21[%c8_171, %c0_172] : memref<89x32xf32, #tpu.memory_space<vmem>>, vector<64x32xf32>
    %c1_173 = arith.constant 1 : index
    %c0_174 = arith.constant 0 : index
    %c0_175 = arith.constant 0 : index
    %251 = vector.load %arg6[%c1_173, %c0_174, %c0_175] : memref<9x32x64xf32, #tpu.memory_space<vmem>>, vector<1x32x64xf32>
    %252 = vector.shape_cast %251 : vector<1x32x64xf32> to vector<32x64xf32>
    %cst_176 = arith.constant dense<0.000000e+00> : vector<64x64xf32>
    %253 = tpu.matmul %250, %252, %cst_176 {dimension_numbers = #tpu.dot_dimension_numbers<[1], [0], [0], [1], [0, 0, 1, 1], [], []>} : vector<64x32xf32>, vector<32x64xf32>, vector<64x64xf32> -> vector<64x64xf32>
    %254 = arith.addf %249, %253 : vector<64x64xf32>
    %c9_177 = arith.constant 9 : index
    %c0_178 = arith.constant 0 : index
    %255 = vector.load %arg21[%c9_177, %c0_178] : memref<89x32xf32, #tpu.memory_space<vmem>>, vector<64x32xf32>
    %cst_179 = arith.constant 0.000000e+00 : f32
    %256 = vector.shape_cast %41 : vector<64x1xi1> to vector<64x1xi1>
    %257 = vector.broadcast %256 : vector<64x1xi1> to vector<64x32xi1>
    %258 = vector.broadcast %cst_179 : f32 to vector<64x32xf32>
    %259 = arith.select %257, %255, %258 : vector<64x32xi1>, vector<64x32xf32>
    %c2_180 = arith.constant 2 : index
    %c0_181 = arith.constant 0 : index
    %c0_182 = arith.constant 0 : index
    %260 = vector.load %arg6[%c2_180, %c0_181, %c0_182] : memref<9x32x64xf32, #tpu.memory_space<vmem>>, vector<1x32x64xf32>
    %261 = vector.shape_cast %260 : vector<1x32x64xf32> to vector<32x64xf32>
    %cst_183 = arith.constant dense<0.000000e+00> : vector<64x64xf32>
    %262 = tpu.matmul %259, %261, %cst_183 {dimension_numbers = #tpu.dot_dimension_numbers<[1], [0], [0], [1], [0, 0, 1, 1], [], []>} : vector<64x32xf32>, vector<32x64xf32>, vector<64x64xf32> -> vector<64x64xf32>
    %263 = arith.addf %254, %262 : vector<64x64xf32>
    %c15 = arith.constant 15 : index
    %c0_184 = arith.constant 0 : index
    %264 = vector.load %arg21[%c15, %c0_184] : memref<89x32xf32, #tpu.memory_space<vmem>>, vector<64x32xf32>
    %cst_185 = arith.constant 0.000000e+00 : f32
    %265 = vector.shape_cast %39 : vector<64x1xi1> to vector<64x1xi1>
    %266 = vector.broadcast %265 : vector<64x1xi1> to vector<64x32xi1>
    %267 = vector.broadcast %cst_185 : f32 to vector<64x32xf32>
    %268 = arith.select %266, %264, %267 : vector<64x32xi1>, vector<64x32xf32>
    %c3_186 = arith.constant 3 : index
    %c0_187 = arith.constant 0 : index
    %c0_188 = arith.constant 0 : index
    %269 = vector.load %arg6[%c3_186, %c0_187, %c0_188] : memref<9x32x64xf32, #tpu.memory_space<vmem>>, vector<1x32x64xf32>
    %270 = vector.shape_cast %269 : vector<1x32x64xf32> to vector<32x64xf32>
    %cst_189 = arith.constant dense<0.000000e+00> : vector<64x64xf32>
    %271 = tpu.matmul %268, %270, %cst_189 {dimension_numbers = #tpu.dot_dimension_numbers<[1], [0], [0], [1], [0, 0, 1, 1], [], []>} : vector<64x32xf32>, vector<32x64xf32>, vector<64x64xf32> -> vector<64x64xf32>
    %272 = arith.addf %263, %271 : vector<64x64xf32>
    %c16_190 = arith.constant 16 : index
    %c0_191 = arith.constant 0 : index
    %273 = vector.load %arg21[%c16_190, %c0_191] : memref<89x32xf32, #tpu.memory_space<vmem>>, vector<64x32xf32>
    %c4_192 = arith.constant 4 : index
    %c0_193 = arith.constant 0 : index
    %c0_194 = arith.constant 0 : index
    %274 = vector.load %arg6[%c4_192, %c0_193, %c0_194] : memref<9x32x64xf32, #tpu.memory_space<vmem>>, vector<1x32x64xf32>
    %275 = vector.shape_cast %274 : vector<1x32x64xf32> to vector<32x64xf32>
    %cst_195 = arith.constant dense<0.000000e+00> : vector<64x64xf32>
    %276 = tpu.matmul %273, %275, %cst_195 {dimension_numbers = #tpu.dot_dimension_numbers<[1], [0], [0], [1], [0, 0, 1, 1], [], []>} : vector<64x32xf32>, vector<32x64xf32>, vector<64x64xf32> -> vector<64x64xf32>
    %277 = arith.addf %272, %276 : vector<64x64xf32>
    %c17_196 = arith.constant 17 : index
    %c0_197 = arith.constant 0 : index
    %278 = vector.load %arg21[%c17_196, %c0_197] : memref<89x32xf32, #tpu.memory_space<vmem>>, vector<64x32xf32>
    %cst_198 = arith.constant 0.000000e+00 : f32
    %279 = vector.shape_cast %41 : vector<64x1xi1> to vector<64x1xi1>
    %280 = vector.broadcast %279 : vector<64x1xi1> to vector<64x32xi1>
    %281 = vector.broadcast %cst_198 : f32 to vector<64x32xf32>
    %282 = arith.select %280, %278, %281 : vector<64x32xi1>, vector<64x32xf32>
    %c5_199 = arith.constant 5 : index
    %c0_200 = arith.constant 0 : index
    %c0_201 = arith.constant 0 : index
    %283 = vector.load %arg6[%c5_199, %c0_200, %c0_201] : memref<9x32x64xf32, #tpu.memory_space<vmem>>, vector<1x32x64xf32>
    %284 = vector.shape_cast %283 : vector<1x32x64xf32> to vector<32x64xf32>
    %cst_202 = arith.constant dense<0.000000e+00> : vector<64x64xf32>
    %285 = tpu.matmul %282, %284, %cst_202 {dimension_numbers = #tpu.dot_dimension_numbers<[1], [0], [0], [1], [0, 0, 1, 1], [], []>} : vector<64x32xf32>, vector<32x64xf32>, vector<64x64xf32> -> vector<64x64xf32>
    %286 = arith.addf %277, %285 : vector<64x64xf32>
    %c23_203 = arith.constant 23 : index
    %c0_204 = arith.constant 0 : index
    %287 = vector.load %arg21[%c23_203, %c0_204] : memref<89x32xf32, #tpu.memory_space<vmem>>, vector<64x32xf32>
    %cst_205 = arith.constant 0.000000e+00 : f32
    %288 = vector.shape_cast %39 : vector<64x1xi1> to vector<64x1xi1>
    %289 = vector.broadcast %288 : vector<64x1xi1> to vector<64x32xi1>
    %290 = vector.broadcast %cst_205 : f32 to vector<64x32xf32>
    %291 = arith.select %289, %287, %290 : vector<64x32xi1>, vector<64x32xf32>
    %c6_206 = arith.constant 6 : index
    %c0_207 = arith.constant 0 : index
    %c0_208 = arith.constant 0 : index
    %292 = vector.load %arg6[%c6_206, %c0_207, %c0_208] : memref<9x32x64xf32, #tpu.memory_space<vmem>>, vector<1x32x64xf32>
    %293 = vector.shape_cast %292 : vector<1x32x64xf32> to vector<32x64xf32>
    %cst_209 = arith.constant dense<0.000000e+00> : vector<64x64xf32>
    %294 = tpu.matmul %291, %293, %cst_209 {dimension_numbers = #tpu.dot_dimension_numbers<[1], [0], [0], [1], [0, 0, 1, 1], [], []>} : vector<64x32xf32>, vector<32x64xf32>, vector<64x64xf32> -> vector<64x64xf32>
    %295 = arith.addf %286, %294 : vector<64x64xf32>
    %c24_210 = arith.constant 24 : index
    %c0_211 = arith.constant 0 : index
    %296 = vector.load %arg21[%c24_210, %c0_211] : memref<89x32xf32, #tpu.memory_space<vmem>>, vector<64x32xf32>
    %c7_212 = arith.constant 7 : index
    %c0_213 = arith.constant 0 : index
    %c0_214 = arith.constant 0 : index
    %297 = vector.load %arg6[%c7_212, %c0_213, %c0_214] : memref<9x32x64xf32, #tpu.memory_space<vmem>>, vector<1x32x64xf32>
    %298 = vector.shape_cast %297 : vector<1x32x64xf32> to vector<32x64xf32>
    %cst_215 = arith.constant dense<0.000000e+00> : vector<64x64xf32>
    %299 = tpu.matmul %296, %298, %cst_215 {dimension_numbers = #tpu.dot_dimension_numbers<[1], [0], [0], [1], [0, 0, 1, 1], [], []>} : vector<64x32xf32>, vector<32x64xf32>, vector<64x64xf32> -> vector<64x64xf32>
    %300 = arith.addf %295, %299 : vector<64x64xf32>
    %c25_216 = arith.constant 25 : index
    %c0_217 = arith.constant 0 : index
    %301 = vector.load %arg21[%c25_216, %c0_217] : memref<89x32xf32, #tpu.memory_space<vmem>>, vector<64x32xf32>
    %cst_218 = arith.constant 0.000000e+00 : f32
    %302 = vector.shape_cast %41 : vector<64x1xi1> to vector<64x1xi1>
    %303 = vector.broadcast %302 : vector<64x1xi1> to vector<64x32xi1>
    %304 = vector.broadcast %cst_218 : f32 to vector<64x32xf32>
    %305 = arith.select %303, %301, %304 : vector<64x32xi1>, vector<64x32xf32>
    %c8_219 = arith.constant 8 : index
    %c0_220 = arith.constant 0 : index
    %c0_221 = arith.constant 0 : index
    %306 = vector.load %arg6[%c8_219, %c0_220, %c0_221] : memref<9x32x64xf32, #tpu.memory_space<vmem>>, vector<1x32x64xf32>
    %307 = vector.shape_cast %306 : vector<1x32x64xf32> to vector<32x64xf32>
    %cst_222 = arith.constant dense<0.000000e+00> : vector<64x64xf32>
    %308 = tpu.matmul %305, %307, %cst_222 {dimension_numbers = #tpu.dot_dimension_numbers<[1], [0], [0], [1], [0, 0, 1, 1], [], []>} : vector<64x32xf32>, vector<32x64xf32>, vector<64x64xf32> -> vector<64x64xf32>
    %309 = arith.addf %300, %308 : vector<64x64xf32>
    %c0_223 = arith.constant 0 : index
    %c0_224 = arith.constant 0 : index
    %310 = vector.load %arg7[%c0_223, %c0_224] : memref<1x64xf32, #tpu.memory_space<vmem>>, vector<1x64xf32>
    %311 = vector.broadcast %310 : vector<1x64xf32> to vector<64x64xf32>
    %312 = arith.addf %309, %311 : vector<64x64xf32>
    %cst_225 = arith.constant 0.000000e+00 : f32
    %313 = vector.broadcast %cst_225 : f32 to vector<64x64xf32>
    %314 = arith.maximumf %312, %313 : vector<64x64xf32>
    %cst_226 = arith.constant 0.000000e+00 : f32
    %315 = vector.broadcast %cst_226 : f32 to vector<16x64xf32>
    %c0_227 = arith.constant 0 : index
    %c0_228 = arith.constant 0 : index
    %316 = vector.load %arg22[%c0_227, %c0_228] : memref<89x64xf32, #tpu.memory_space<vmem>>, vector<16x64xf32>
    tpu.vector_store %arg22[%c0_227, %c0_228], %315 {strides = array<i32>} : memref<89x64xf32, #tpu.memory_space<vmem>>, vector<16x64xf32>,
    %c16_229 = arith.constant 16 : index
    %c0_230 = arith.constant 0 : index
    %317 = vector.load %arg22[%c16_229, %c0_230] : memref<89x64xf32, #tpu.memory_space<vmem>>, vector<64x64xf32>
    tpu.vector_store %arg22[%c16_229, %c0_230], %314 {strides = array<i32>} : memref<89x64xf32, #tpu.memory_space<vmem>>, vector<64x64xf32>,
    %cst_231 = arith.constant 0.000000e+00 : f32
    %318 = vector.broadcast %cst_231 : f32 to vector<9x64xf32>
    %c80_232 = arith.constant 80 : index
    %c0_233 = arith.constant 0 : index
    %319 = vector.load %arg22[%c80_232, %c0_233] : memref<89x64xf32, #tpu.memory_space<vmem>>, vector<9x64xf32>
    tpu.vector_store %arg22[%c80_232, %c0_233], %318 {strides = array<i32>} : memref<89x64xf32, #tpu.memory_space<vmem>>, vector<9x64xf32>,
    %cst_234 = arith.constant 0.000000e+00 : f32
    %320 = vector.broadcast %cst_234 : f32 to vector<64x64xf32>
    %c7_235 = arith.constant 7 : index
    %c0_236 = arith.constant 0 : index
    %321 = vector.load %arg22[%c7_235, %c0_236] : memref<89x64xf32, #tpu.memory_space<vmem>>, vector<64x64xf32>
    %cst_237 = arith.constant 0.000000e+00 : f32
    %322 = vector.shape_cast %39 : vector<64x1xi1> to vector<64x1xi1>
    %323 = vector.broadcast %322 : vector<64x1xi1> to vector<64x64xi1>
    %324 = vector.broadcast %cst_237 : f32 to vector<64x64xf32>
    %325 = arith.select %323, %321, %324 : vector<64x64xi1>, vector<64x64xf32>
    %c0_238 = arith.constant 0 : index
    %c0_239 = arith.constant 0 : index
    %c0_240 = arith.constant 0 : index
    %326 = vector.load %arg8[%c0_238, %c0_239, %c0_240] : memref<9x64x64xf32, #tpu.memory_space<vmem>>, vector<1x64x64xf32>
    %327 = vector.shape_cast %326 : vector<1x64x64xf32> to vector<64x64xf32>
    %cst_241 = arith.constant dense<0.000000e+00> : vector<64x64xf32>
    %328 = tpu.matmul %325, %327, %cst_241 {dimension_numbers = #tpu.dot_dimension_numbers<[1], [0], [0], [1], [0, 0, 1, 1], [], []>} : vector<64x64xf32>, vector<64x64xf32>, vector<64x64xf32> -> vector<64x64xf32>
    %329 = arith.addf %320, %328 : vector<64x64xf32>
    %c8_242 = arith.constant 8 : index
    %c0_243 = arith.constant 0 : index
    %330 = vector.load %arg22[%c8_242, %c0_243] : memref<89x64xf32, #tpu.memory_space<vmem>>, vector<64x64xf32>
    %c1_244 = arith.constant 1 : index
    %c0_245 = arith.constant 0 : index
    %c0_246 = arith.constant 0 : index
    %331 = vector.load %arg8[%c1_244, %c0_245, %c0_246] : memref<9x64x64xf32, #tpu.memory_space<vmem>>, vector<1x64x64xf32>
    %332 = vector.shape_cast %331 : vector<1x64x64xf32> to vector<64x64xf32>
    %cst_247 = arith.constant dense<0.000000e+00> : vector<64x64xf32>
    %333 = tpu.matmul %330, %332, %cst_247 {dimension_numbers = #tpu.dot_dimension_numbers<[1], [0], [0], [1], [0, 0, 1, 1], [], []>} : vector<64x64xf32>, vector<64x64xf32>, vector<64x64xf32> -> vector<64x64xf32>
    %334 = arith.addf %329, %333 : vector<64x64xf32>
    %c9_248 = arith.constant 9 : index
    %c0_249 = arith.constant 0 : index
    %335 = vector.load %arg22[%c9_248, %c0_249] : memref<89x64xf32, #tpu.memory_space<vmem>>, vector<64x64xf32>
    %cst_250 = arith.constant 0.000000e+00 : f32
    %336 = vector.shape_cast %41 : vector<64x1xi1> to vector<64x1xi1>
    %337 = vector.broadcast %336 : vector<64x1xi1> to vector<64x64xi1>
    %338 = vector.broadcast %cst_250 : f32 to vector<64x64xf32>
    %339 = arith.select %337, %335, %338 : vector<64x64xi1>, vector<64x64xf32>
    %c2_251 = arith.constant 2 : index
    %c0_252 = arith.constant 0 : index
    %c0_253 = arith.constant 0 : index
    %340 = vector.load %arg8[%c2_251, %c0_252, %c0_253] : memref<9x64x64xf32, #tpu.memory_space<vmem>>, vector<1x64x64xf32>
    %341 = vector.shape_cast %340 : vector<1x64x64xf32> to vector<64x64xf32>
    %cst_254 = arith.constant dense<0.000000e+00> : vector<64x64xf32>
    %342 = tpu.matmul %339, %341, %cst_254 {dimension_numbers = #tpu.dot_dimension_numbers<[1], [0], [0], [1], [0, 0, 1, 1], [], []>} : vector<64x64xf32>, vector<64x64xf32>, vector<64x64xf32> -> vector<64x64xf32>
    %343 = arith.addf %334, %342 : vector<64x64xf32>
    %c15_255 = arith.constant 15 : index
    %c0_256 = arith.constant 0 : index
    %344 = vector.load %arg22[%c15_255, %c0_256] : memref<89x64xf32, #tpu.memory_space<vmem>>, vector<64x64xf32>
    %cst_257 = arith.constant 0.000000e+00 : f32
    %345 = vector.shape_cast %39 : vector<64x1xi1> to vector<64x1xi1>
    %346 = vector.broadcast %345 : vector<64x1xi1> to vector<64x64xi1>
    %347 = vector.broadcast %cst_257 : f32 to vector<64x64xf32>
    %348 = arith.select %346, %344, %347 : vector<64x64xi1>, vector<64x64xf32>
    %c3_258 = arith.constant 3 : index
    %c0_259 = arith.constant 0 : index
    %c0_260 = arith.constant 0 : index
    %349 = vector.load %arg8[%c3_258, %c0_259, %c0_260] : memref<9x64x64xf32, #tpu.memory_space<vmem>>, vector<1x64x64xf32>
    %350 = vector.shape_cast %349 : vector<1x64x64xf32> to vector<64x64xf32>
    %cst_261 = arith.constant dense<0.000000e+00> : vector<64x64xf32>
    %351 = tpu.matmul %348, %350, %cst_261 {dimension_numbers = #tpu.dot_dimension_numbers<[1], [0], [0], [1], [0, 0, 1, 1], [], []>} : vector<64x64xf32>, vector<64x64xf32>, vector<64x64xf32> -> vector<64x64xf32>
    %352 = arith.addf %343, %351 : vector<64x64xf32>
    %c16_262 = arith.constant 16 : index
    %c0_263 = arith.constant 0 : index
    %353 = vector.load %arg22[%c16_262, %c0_263] : memref<89x64xf32, #tpu.memory_space<vmem>>, vector<64x64xf32>
    %c4_264 = arith.constant 4 : index
    %c0_265 = arith.constant 0 : index
    %c0_266 = arith.constant 0 : index
    %354 = vector.load %arg8[%c4_264, %c0_265, %c0_266] : memref<9x64x64xf32, #tpu.memory_space<vmem>>, vector<1x64x64xf32>
    %355 = vector.shape_cast %354 : vector<1x64x64xf32> to vector<64x64xf32>
    %cst_267 = arith.constant dense<0.000000e+00> : vector<64x64xf32>
    %356 = tpu.matmul %353, %355, %cst_267 {dimension_numbers = #tpu.dot_dimension_numbers<[1], [0], [0], [1], [0, 0, 1, 1], [], []>} : vector<64x64xf32>, vector<64x64xf32>, vector<64x64xf32> -> vector<64x64xf32>
    %357 = arith.addf %352, %356 : vector<64x64xf32>
    %c17_268 = arith.constant 17 : index
    %c0_269 = arith.constant 0 : index
    %358 = vector.load %arg22[%c17_268, %c0_269] : memref<89x64xf32, #tpu.memory_space<vmem>>, vector<64x64xf32>
    %cst_270 = arith.constant 0.000000e+00 : f32
    %359 = vector.shape_cast %41 : vector<64x1xi1> to vector<64x1xi1>
    %360 = vector.broadcast %359 : vector<64x1xi1> to vector<64x64xi1>
    %361 = vector.broadcast %cst_270 : f32 to vector<64x64xf32>
    %362 = arith.select %360, %358, %361 : vector<64x64xi1>, vector<64x64xf32>
    %c5_271 = arith.constant 5 : index
    %c0_272 = arith.constant 0 : index
    %c0_273 = arith.constant 0 : index
    %363 = vector.load %arg8[%c5_271, %c0_272, %c0_273] : memref<9x64x64xf32, #tpu.memory_space<vmem>>, vector<1x64x64xf32>
    %364 = vector.shape_cast %363 : vector<1x64x64xf32> to vector<64x64xf32>
    %cst_274 = arith.constant dense<0.000000e+00> : vector<64x64xf32>
    %365 = tpu.matmul %362, %364, %cst_274 {dimension_numbers = #tpu.dot_dimension_numbers<[1], [0], [0], [1], [0, 0, 1, 1], [], []>} : vector<64x64xf32>, vector<64x64xf32>, vector<64x64xf32> -> vector<64x64xf32>
    %366 = arith.addf %357, %365 : vector<64x64xf32>
    %c23_275 = arith.constant 23 : index
    %c0_276 = arith.constant 0 : index
    %367 = vector.load %arg22[%c23_275, %c0_276] : memref<89x64xf32, #tpu.memory_space<vmem>>, vector<64x64xf32>
    %cst_277 = arith.constant 0.000000e+00 : f32
    %368 = vector.shape_cast %39 : vector<64x1xi1> to vector<64x1xi1>
    %369 = vector.broadcast %368 : vector<64x1xi1> to vector<64x64xi1>
    %370 = vector.broadcast %cst_277 : f32 to vector<64x64xf32>
    %371 = arith.select %369, %367, %370 : vector<64x64xi1>, vector<64x64xf32>
    %c6_278 = arith.constant 6 : index
    %c0_279 = arith.constant 0 : index
    %c0_280 = arith.constant 0 : index
    %372 = vector.load %arg8[%c6_278, %c0_279, %c0_280] : memref<9x64x64xf32, #tpu.memory_space<vmem>>, vector<1x64x64xf32>
    %373 = vector.shape_cast %372 : vector<1x64x64xf32> to vector<64x64xf32>
    %cst_281 = arith.constant dense<0.000000e+00> : vector<64x64xf32>
    %374 = tpu.matmul %371, %373, %cst_281 {dimension_numbers = #tpu.dot_dimension_numbers<[1], [0], [0], [1], [0, 0, 1, 1], [], []>} : vector<64x64xf32>, vector<64x64xf32>, vector<64x64xf32> -> vector<64x64xf32>
    %375 = arith.addf %366, %374 : vector<64x64xf32>
    %c24_282 = arith.constant 24 : index
    %c0_283 = arith.constant 0 : index
    %376 = vector.load %arg22[%c24_282, %c0_283] : memref<89x64xf32, #tpu.memory_space<vmem>>, vector<64x64xf32>
    %c7_284 = arith.constant 7 : index
    %c0_285 = arith.constant 0 : index
    %c0_286 = arith.constant 0 : index
    %377 = vector.load %arg8[%c7_284, %c0_285, %c0_286] : memref<9x64x64xf32, #tpu.memory_space<vmem>>, vector<1x64x64xf32>
    %378 = vector.shape_cast %377 : vector<1x64x64xf32> to vector<64x64xf32>
    %cst_287 = arith.constant dense<0.000000e+00> : vector<64x64xf32>
    %379 = tpu.matmul %376, %378, %cst_287 {dimension_numbers = #tpu.dot_dimension_numbers<[1], [0], [0], [1], [0, 0, 1, 1], [], []>} : vector<64x64xf32>, vector<64x64xf32>, vector<64x64xf32> -> vector<64x64xf32>
    %380 = arith.addf %375, %379 : vector<64x64xf32>
    %c25_288 = arith.constant 25 : index
    %c0_289 = arith.constant 0 : index
    %381 = vector.load %arg22[%c25_288, %c0_289] : memref<89x64xf32, #tpu.memory_space<vmem>>, vector<64x64xf32>
    %cst_290 = arith.constant 0.000000e+00 : f32
    %382 = vector.shape_cast %41 : vector<64x1xi1> to vector<64x1xi1>
    %383 = vector.broadcast %382 : vector<64x1xi1> to vector<64x64xi1>
    %384 = vector.broadcast %cst_290 : f32 to vector<64x64xf32>
    %385 = arith.select %383, %381, %384 : vector<64x64xi1>, vector<64x64xf32>
    %c8_291 = arith.constant 8 : index
    %c0_292 = arith.constant 0 : index
    %c0_293 = arith.constant 0 : index
    %386 = vector.load %arg8[%c8_291, %c0_292, %c0_293] : memref<9x64x64xf32, #tpu.memory_space<vmem>>, vector<1x64x64xf32>
    %387 = vector.shape_cast %386 : vector<1x64x64xf32> to vector<64x64xf32>
    %cst_294 = arith.constant dense<0.000000e+00> : vector<64x64xf32>
    %388 = tpu.matmul %385, %387, %cst_294 {dimension_numbers = #tpu.dot_dimension_numbers<[1], [0], [0], [1], [0, 0, 1, 1], [], []>} : vector<64x64xf32>, vector<64x64xf32>, vector<64x64xf32> -> vector<64x64xf32>
    %389 = arith.addf %380, %388 : vector<64x64xf32>
    %c0_295 = arith.constant 0 : index
    %c0_296 = arith.constant 0 : index
    %390 = vector.load %arg9[%c0_295, %c0_296] : memref<1x64xf32, #tpu.memory_space<vmem>>, vector<1x64xf32>
    %391 = vector.broadcast %390 : vector<1x64xf32> to vector<64x64xf32>
    %392 = arith.addf %389, %391 : vector<64x64xf32>
    %cst_297 = arith.constant 0.000000e+00 : f32
    %393 = vector.broadcast %cst_297 : f32 to vector<64x64xf32>
    %394 = arith.maximumf %392, %393 : vector<64x64xf32>
    %c0_298 = arith.constant 0 : index
    %c0_299 = arith.constant 0 : index
    %395 = vector.load %arg23[%c0_298, %c0_299] : memref<64x64xf32, #tpu.memory_space<vmem>>, vector<64x64xf32>
    tpu.vector_store %arg23[%c0_298, %c0_299], %394 {strides = array<i32>} : memref<64x64xf32, #tpu.memory_space<vmem>>, vector<64x64xf32>,
    %c0_300 = arith.constant 0 : index
    %c0_301 = arith.constant 0 : index
    %396 = vector.load %arg23[%c0_300, %c0_301] : memref<64x64xf32, #tpu.memory_space<vmem>>, vector<55x64xf32>
    %c1_302 = arith.constant 1 : index
    %c0_303 = arith.constant 0 : index
    %397 = vector.load %arg23[%c1_302, %c0_303] : memref<64x64xf32, #tpu.memory_space<vmem>>, vector<55x64xf32>
    %398 = arith.maximumf %396, %397 : vector<55x64xf32>
    %c8_304 = arith.constant 8 : index
    %c0_305 = arith.constant 0 : index
    %399 = vector.load %arg23[%c8_304, %c0_305] : memref<64x64xf32, #tpu.memory_space<vmem>>, vector<55x64xf32>
    %c9_306 = arith.constant 9 : index
    %c0_307 = arith.constant 0 : index
    %400 = vector.load %arg23[%c9_306, %c0_307] : memref<64x64xf32, #tpu.memory_space<vmem>>, vector<55x64xf32>
    %401 = arith.maximumf %399, %400 : vector<55x64xf32>
    %402 = arith.maximumf %398, %401 : vector<55x64xf32>
    %c0_308 = arith.constant 0 : index
    %c0_309 = arith.constant 0 : index
    %403 = vector.load %arg15[%c0_308, %c0_309] : memref<16x55xf32, #tpu.memory_space<vmem>>, vector<16x55xf32>
    %cst_310 = arith.constant dense<0.000000e+00> : vector<16x64xf32>
    %404 = tpu.matmul %403, %402, %cst_310 {dimension_numbers = #tpu.dot_dimension_numbers<[1], [0], [0], [1], [0, 0, 1, 1], [], []>} : vector<16x55xf32>, vector<55x64xf32>, vector<16x64xf32> -> vector<16x64xf32>
    %cst_311 = arith.constant 0.000000e+00 : f32
    %405 = vector.broadcast %cst_311 : f32 to vector<8x64xf32>
    %c0_312 = arith.constant 0 : index
    %c0_313 = arith.constant 0 : index
    %406 = vector.load %arg24[%c0_312, %c0_313] : memref<29x64xf32, #tpu.memory_space<vmem>>, vector<8x64xf32>
    tpu.vector_store %arg24[%c0_312, %c0_313], %405 {strides = array<i32>} : memref<29x64xf32, #tpu.memory_space<vmem>>, vector<8x64xf32>,
    %c8_314 = arith.constant 8 : index
    %c0_315 = arith.constant 0 : index
    %407 = vector.load %arg24[%c8_314, %c0_315] : memref<29x64xf32, #tpu.memory_space<vmem>>, vector<16x64xf32>
    tpu.vector_store %arg24[%c8_314, %c0_315], %404 {strides = array<i32>} : memref<29x64xf32, #tpu.memory_space<vmem>>, vector<16x64xf32>,
    %cst_316 = arith.constant 0.000000e+00 : f32
    %408 = vector.broadcast %cst_316 : f32 to vector<5x64xf32>
    %c24_317 = arith.constant 24 : index
    %c0_318 = arith.constant 0 : index
    %409 = vector.load %arg24[%c24_317, %c0_318] : memref<29x64xf32, #tpu.memory_space<vmem>>, vector<5x64xf32>
    tpu.vector_store %arg24[%c24_317, %c0_318], %408 {strides = array<i32>} : memref<29x64xf32, #tpu.memory_space<vmem>>, vector<5x64xf32>,
    %cst_319 = arith.constant 0.000000e+00 : f32
    %410 = vector.broadcast %cst_319 : f32 to vector<16x128xf32>
    %c3_320 = arith.constant 3 : index
    %c0_321 = arith.constant 0 : index
    %411 = vector.load %arg24[%c3_320, %c0_321] : memref<29x64xf32, #tpu.memory_space<vmem>>, vector<16x64xf32>
    %cst_322 = arith.constant 0.000000e+00 : f32
    %412 = vector.shape_cast %60 : vector<16x1xi1> to vector<16x1xi1>
    %413 = vector.broadcast %412 : vector<16x1xi1> to vector<16x64xi1>
    %414 = vector.broadcast %cst_322 : f32 to vector<16x64xf32>
    %415 = arith.select %413, %411, %414 : vector<16x64xi1>, vector<16x64xf32>
    %c0_323 = arith.constant 0 : index
    %c0_324 = arith.constant 0 : index
    %c0_325 = arith.constant 0 : index
    %416 = vector.load %arg10[%c0_323, %c0_324, %c0_325] : memref<9x64x128xf32, #tpu.memory_space<vmem>>, vector<1x64x128xf32>
    %417 = vector.shape_cast %416 : vector<1x64x128xf32> to vector<64x128xf32>
    %cst_326 = arith.constant dense<0.000000e+00> : vector<16x128xf32>
    %418 = tpu.matmul %415, %417, %cst_326 {dimension_numbers = #tpu.dot_dimension_numbers<[1], [0], [0], [1], [0, 0, 1, 1], [], []>} : vector<16x64xf32>, vector<64x128xf32>, vector<16x128xf32> -> vector<16x128xf32>
    %419 = arith.addf %410, %418 : vector<16x128xf32>
    %c4_327 = arith.constant 4 : index
    %c0_328 = arith.constant 0 : index
    %420 = vector.load %arg24[%c4_327, %c0_328] : memref<29x64xf32, #tpu.memory_space<vmem>>, vector<16x64xf32>
    %c1_329 = arith.constant 1 : index
    %c0_330 = arith.constant 0 : index
    %c0_331 = arith.constant 0 : index
    %421 = vector.load %arg10[%c1_329, %c0_330, %c0_331] : memref<9x64x128xf32, #tpu.memory_space<vmem>>, vector<1x64x128xf32>
    %422 = vector.shape_cast %421 : vector<1x64x128xf32> to vector<64x128xf32>
    %cst_332 = arith.constant dense<0.000000e+00> : vector<16x128xf32>
    %423 = tpu.matmul %420, %422, %cst_332 {dimension_numbers = #tpu.dot_dimension_numbers<[1], [0], [0], [1], [0, 0, 1, 1], [], []>} : vector<16x64xf32>, vector<64x128xf32>, vector<16x128xf32> -> vector<16x128xf32>
    %424 = arith.addf %419, %423 : vector<16x128xf32>
    %c5_333 = arith.constant 5 : index
    %c0_334 = arith.constant 0 : index
    %425 = vector.load %arg24[%c5_333, %c0_334] : memref<29x64xf32, #tpu.memory_space<vmem>>, vector<16x64xf32>
    %cst_335 = arith.constant 0.000000e+00 : f32
    %426 = vector.shape_cast %62 : vector<16x1xi1> to vector<16x1xi1>
    %427 = vector.broadcast %426 : vector<16x1xi1> to vector<16x64xi1>
    %428 = vector.broadcast %cst_335 : f32 to vector<16x64xf32>
    %429 = arith.select %427, %425, %428 : vector<16x64xi1>, vector<16x64xf32>
    %c2_336 = arith.constant 2 : index
    %c0_337 = arith.constant 0 : index
    %c0_338 = arith.constant 0 : index
    %430 = vector.load %arg10[%c2_336, %c0_337, %c0_338] : memref<9x64x128xf32, #tpu.memory_space<vmem>>, vector<1x64x128xf32>
    %431 = vector.shape_cast %430 : vector<1x64x128xf32> to vector<64x128xf32>
    %cst_339 = arith.constant dense<0.000000e+00> : vector<16x128xf32>
    %432 = tpu.matmul %429, %431, %cst_339 {dimension_numbers = #tpu.dot_dimension_numbers<[1], [0], [0], [1], [0, 0, 1, 1], [], []>} : vector<16x64xf32>, vector<64x128xf32>, vector<16x128xf32> -> vector<16x128xf32>
    %433 = arith.addf %424, %432 : vector<16x128xf32>
    %c7_340 = arith.constant 7 : index
    %c0_341 = arith.constant 0 : index
    %434 = vector.load %arg24[%c7_340, %c0_341] : memref<29x64xf32, #tpu.memory_space<vmem>>, vector<16x64xf32>
    %cst_342 = arith.constant 0.000000e+00 : f32
    %435 = vector.shape_cast %60 : vector<16x1xi1> to vector<16x1xi1>
    %436 = vector.broadcast %435 : vector<16x1xi1> to vector<16x64xi1>
    %437 = vector.broadcast %cst_342 : f32 to vector<16x64xf32>
    %438 = arith.select %436, %434, %437 : vector<16x64xi1>, vector<16x64xf32>
    %c3_343 = arith.constant 3 : index
    %c0_344 = arith.constant 0 : index
    %c0_345 = arith.constant 0 : index
    %439 = vector.load %arg10[%c3_343, %c0_344, %c0_345] : memref<9x64x128xf32, #tpu.memory_space<vmem>>, vector<1x64x128xf32>
    %440 = vector.shape_cast %439 : vector<1x64x128xf32> to vector<64x128xf32>
    %cst_346 = arith.constant dense<0.000000e+00> : vector<16x128xf32>
    %441 = tpu.matmul %438, %440, %cst_346 {dimension_numbers = #tpu.dot_dimension_numbers<[1], [0], [0], [1], [0, 0, 1, 1], [], []>} : vector<16x64xf32>, vector<64x128xf32>, vector<16x128xf32> -> vector<16x128xf32>
    %442 = arith.addf %433, %441 : vector<16x128xf32>
    %c8_347 = arith.constant 8 : index
    %c0_348 = arith.constant 0 : index
    %443 = vector.load %arg24[%c8_347, %c0_348] : memref<29x64xf32, #tpu.memory_space<vmem>>, vector<16x64xf32>
    %c4_349 = arith.constant 4 : index
    %c0_350 = arith.constant 0 : index
    %c0_351 = arith.constant 0 : index
    %444 = vector.load %arg10[%c4_349, %c0_350, %c0_351] : memref<9x64x128xf32, #tpu.memory_space<vmem>>, vector<1x64x128xf32>
    %445 = vector.shape_cast %444 : vector<1x64x128xf32> to vector<64x128xf32>
    %cst_352 = arith.constant dense<0.000000e+00> : vector<16x128xf32>
    %446 = tpu.matmul %443, %445, %cst_352 {dimension_numbers = #tpu.dot_dimension_numbers<[1], [0], [0], [1], [0, 0, 1, 1], [], []>} : vector<16x64xf32>, vector<64x128xf32>, vector<16x128xf32> -> vector<16x128xf32>
    %447 = arith.addf %442, %446 : vector<16x128xf32>
    %c9_353 = arith.constant 9 : index
    %c0_354 = arith.constant 0 : index
    %448 = vector.load %arg24[%c9_353, %c0_354] : memref<29x64xf32, #tpu.memory_space<vmem>>, vector<16x64xf32>
    %cst_355 = arith.constant 0.000000e+00 : f32
    %449 = vector.shape_cast %62 : vector<16x1xi1> to vector<16x1xi1>
    %450 = vector.broadcast %449 : vector<16x1xi1> to vector<16x64xi1>
    %451 = vector.broadcast %cst_355 : f32 to vector<16x64xf32>
    %452 = arith.select %450, %448, %451 : vector<16x64xi1>, vector<16x64xf32>
    %c5_356 = arith.constant 5 : index
    %c0_357 = arith.constant 0 : index
    %c0_358 = arith.constant 0 : index
    %453 = vector.load %arg10[%c5_356, %c0_357, %c0_358] : memref<9x64x128xf32, #tpu.memory_space<vmem>>, vector<1x64x128xf32>
    %454 = vector.shape_cast %453 : vector<1x64x128xf32> to vector<64x128xf32>
    %cst_359 = arith.constant dense<0.000000e+00> : vector<16x128xf32>
    %455 = tpu.matmul %452, %454, %cst_359 {dimension_numbers = #tpu.dot_dimension_numbers<[1], [0], [0], [1], [0, 0, 1, 1], [], []>} : vector<16x64xf32>, vector<64x128xf32>, vector<16x128xf32> -> vector<16x128xf32>
    %456 = arith.addf %447, %455 : vector<16x128xf32>
    %c11 = arith.constant 11 : index
    %c0_360 = arith.constant 0 : index
    %457 = vector.load %arg24[%c11, %c0_360] : memref<29x64xf32, #tpu.memory_space<vmem>>, vector<16x64xf32>
    %cst_361 = arith.constant 0.000000e+00 : f32
    %458 = vector.shape_cast %60 : vector<16x1xi1> to vector<16x1xi1>
    %459 = vector.broadcast %458 : vector<16x1xi1> to vector<16x64xi1>
    %460 = vector.broadcast %cst_361 : f32 to vector<16x64xf32>
    %461 = arith.select %459, %457, %460 : vector<16x64xi1>, vector<16x64xf32>
    %c6_362 = arith.constant 6 : index
    %c0_363 = arith.constant 0 : index
    %c0_364 = arith.constant 0 : index
    %462 = vector.load %arg10[%c6_362, %c0_363, %c0_364] : memref<9x64x128xf32, #tpu.memory_space<vmem>>, vector<1x64x128xf32>
    %463 = vector.shape_cast %462 : vector<1x64x128xf32> to vector<64x128xf32>
    %cst_365 = arith.constant dense<0.000000e+00> : vector<16x128xf32>
    %464 = tpu.matmul %461, %463, %cst_365 {dimension_numbers = #tpu.dot_dimension_numbers<[1], [0], [0], [1], [0, 0, 1, 1], [], []>} : vector<16x64xf32>, vector<64x128xf32>, vector<16x128xf32> -> vector<16x128xf32>
    %465 = arith.addf %456, %464 : vector<16x128xf32>
    %c12 = arith.constant 12 : index
    %c0_366 = arith.constant 0 : index
    %466 = vector.load %arg24[%c12, %c0_366] : memref<29x64xf32, #tpu.memory_space<vmem>>, vector<16x64xf32>
    %c7_367 = arith.constant 7 : index
    %c0_368 = arith.constant 0 : index
    %c0_369 = arith.constant 0 : index
    %467 = vector.load %arg10[%c7_367, %c0_368, %c0_369] : memref<9x64x128xf32, #tpu.memory_space<vmem>>, vector<1x64x128xf32>
    %468 = vector.shape_cast %467 : vector<1x64x128xf32> to vector<64x128xf32>
    %cst_370 = arith.constant dense<0.000000e+00> : vector<16x128xf32>
    %469 = tpu.matmul %466, %468, %cst_370 {dimension_numbers = #tpu.dot_dimension_numbers<[1], [0], [0], [1], [0, 0, 1, 1], [], []>} : vector<16x64xf32>, vector<64x128xf32>, vector<16x128xf32> -> vector<16x128xf32>
    %470 = arith.addf %465, %469 : vector<16x128xf32>
    %c13 = arith.constant 13 : index
    %c0_371 = arith.constant 0 : index
    %471 = vector.load %arg24[%c13, %c0_371] : memref<29x64xf32, #tpu.memory_space<vmem>>, vector<16x64xf32>
    %cst_372 = arith.constant 0.000000e+00 : f32
    %472 = vector.shape_cast %62 : vector<16x1xi1> to vector<16x1xi1>
    %473 = vector.broadcast %472 : vector<16x1xi1> to vector<16x64xi1>
    %474 = vector.broadcast %cst_372 : f32 to vector<16x64xf32>
    %475 = arith.select %473, %471, %474 : vector<16x64xi1>, vector<16x64xf32>
    %c8_373 = arith.constant 8 : index
    %c0_374 = arith.constant 0 : index
    %c0_375 = arith.constant 0 : index
    %476 = vector.load %arg10[%c8_373, %c0_374, %c0_375] : memref<9x64x128xf32, #tpu.memory_space<vmem>>, vector<1x64x128xf32>
    %477 = vector.shape_cast %476 : vector<1x64x128xf32> to vector<64x128xf32>
    %cst_376 = arith.constant dense<0.000000e+00> : vector<16x128xf32>
    %478 = tpu.matmul %475, %477, %cst_376 {dimension_numbers = #tpu.dot_dimension_numbers<[1], [0], [0], [1], [0, 0, 1, 1], [], []>} : vector<16x64xf32>, vector<64x128xf32>, vector<16x128xf32> -> vector<16x128xf32>
    %479 = arith.addf %470, %478 : vector<16x128xf32>
    %c0_377 = arith.constant 0 : index
    %c0_378 = arith.constant 0 : index
    %480 = vector.load %arg11[%c0_377, %c0_378] : memref<1x128xf32, #tpu.memory_space<vmem>>, vector<1x128xf32>
    %481 = vector.broadcast %480 : vector<1x128xf32> to vector<16x128xf32>
    %482 = arith.addf %479, %481 : vector<16x128xf32>
    %cst_379 = arith.constant 0.000000e+00 : f32
    %483 = vector.broadcast %cst_379 : f32 to vector<16x128xf32>
    %484 = arith.maximumf %482, %483 : vector<16x128xf32>
    %cst_380 = arith.constant 0.000000e+00 : f32
    %485 = vector.broadcast %cst_380 : f32 to vector<8x128xf32>
    %c0_381 = arith.constant 0 : index
    %c0_382 = arith.constant 0 : index
    %486 = vector.load %arg25[%c0_381, %c0_382] : memref<29x128xf32, #tpu.memory_space<vmem>>, vector<8x128xf32>
    tpu.vector_store %arg25[%c0_381, %c0_382], %485 {strides = array<i32>} : memref<29x128xf32, #tpu.memory_space<vmem>>, vector<8x128xf32>,
    %c8_383 = arith.constant 8 : index
    %c0_384 = arith.constant 0 : index
    %487 = vector.load %arg25[%c8_383, %c0_384] : memref<29x128xf32, #tpu.memory_space<vmem>>, vector<16x128xf32>
    tpu.vector_store %arg25[%c8_383, %c0_384], %484 {strides = array<i32>} : memref<29x128xf32, #tpu.memory_space<vmem>>, vector<16x128xf32>,
    %cst_385 = arith.constant 0.000000e+00 : f32
    %488 = vector.broadcast %cst_385 : f32 to vector<5x128xf32>
    %c24_386 = arith.constant 24 : index
    %c0_387 = arith.constant 0 : index
    %489 = vector.load %arg25[%c24_386, %c0_387] : memref<29x128xf32, #tpu.memory_space<vmem>>, vector<5x128xf32>
    tpu.vector_store %arg25[%c24_386, %c0_387], %488 {strides = array<i32>} : memref<29x128xf32, #tpu.memory_space<vmem>>, vector<5x128xf32>,
    %cst_388 = arith.constant 0.000000e+00 : f32
    %490 = vector.broadcast %cst_388 : f32 to vector<16x128xf32>
    %c3_389 = arith.constant 3 : index
    %c0_390 = arith.constant 0 : index
    %491 = vector.load %arg25[%c3_389, %c0_390] : memref<29x128xf32, #tpu.memory_space<vmem>>, vector<16x128xf32>
    %cst_391 = arith.constant 0.000000e+00 : f32
    %492 = vector.shape_cast %60 : vector<16x1xi1> to vector<16x1xi1>
    %493 = vector.broadcast %492 : vector<16x1xi1> to vector<16x128xi1>
    %494 = vector.broadcast %cst_391 : f32 to vector<16x128xf32>
    %495 = arith.select %493, %491, %494 : vector<16x128xi1>, vector<16x128xf32>
    %c0_392 = arith.constant 0 : index
    %c0_393 = arith.constant 0 : index
    %c0_394 = arith.constant 0 : index
    %496 = vector.load %arg12[%c0_392, %c0_393, %c0_394] : memref<9x128x128xf32, #tpu.memory_space<vmem>>, vector<1x128x128xf32>
    %497 = vector.shape_cast %496 : vector<1x128x128xf32> to vector<128x128xf32>
    %cst_395 = arith.constant dense<0.000000e+00> : vector<16x128xf32>
    %498 = tpu.matmul %495, %497, %cst_395 {dimension_numbers = #tpu.dot_dimension_numbers<[1], [0], [0], [1], [0, 0, 1, 1], [], []>} : vector<16x128xf32>, vector<128x128xf32>, vector<16x128xf32> -> vector<16x128xf32>
    %499 = arith.addf %490, %498 : vector<16x128xf32>
    %c4_396 = arith.constant 4 : index
    %c0_397 = arith.constant 0 : index
    %500 = vector.load %arg25[%c4_396, %c0_397] : memref<29x128xf32, #tpu.memory_space<vmem>>, vector<16x128xf32>
    %c1_398 = arith.constant 1 : index
    %c0_399 = arith.constant 0 : index
    %c0_400 = arith.constant 0 : index
    %501 = vector.load %arg12[%c1_398, %c0_399, %c0_400] : memref<9x128x128xf32, #tpu.memory_space<vmem>>, vector<1x128x128xf32>
    %502 = vector.shape_cast %501 : vector<1x128x128xf32> to vector<128x128xf32>
    %cst_401 = arith.constant dense<0.000000e+00> : vector<16x128xf32>
    %503 = tpu.matmul %500, %502, %cst_401 {dimension_numbers = #tpu.dot_dimension_numbers<[1], [0], [0], [1], [0, 0, 1, 1], [], []>} : vector<16x128xf32>, vector<128x128xf32>, vector<16x128xf32> -> vector<16x128xf32>
    %504 = arith.addf %499, %503 : vector<16x128xf32>
    %c5_402 = arith.constant 5 : index
    %c0_403 = arith.constant 0 : index
    %505 = vector.load %arg25[%c5_402, %c0_403] : memref<29x128xf32, #tpu.memory_space<vmem>>, vector<16x128xf32>
    %cst_404 = arith.constant 0.000000e+00 : f32
    %506 = vector.shape_cast %62 : vector<16x1xi1> to vector<16x1xi1>
    %507 = vector.broadcast %506 : vector<16x1xi1> to vector<16x128xi1>
    %508 = vector.broadcast %cst_404 : f32 to vector<16x128xf32>
    %509 = arith.select %507, %505, %508 : vector<16x128xi1>, vector<16x128xf32>
    %c2_405 = arith.constant 2 : index
    %c0_406 = arith.constant 0 : index
    %c0_407 = arith.constant 0 : index
    %510 = vector.load %arg12[%c2_405, %c0_406, %c0_407] : memref<9x128x128xf32, #tpu.memory_space<vmem>>, vector<1x128x128xf32>
    %511 = vector.shape_cast %510 : vector<1x128x128xf32> to vector<128x128xf32>
    %cst_408 = arith.constant dense<0.000000e+00> : vector<16x128xf32>
    %512 = tpu.matmul %509, %511, %cst_408 {dimension_numbers = #tpu.dot_dimension_numbers<[1], [0], [0], [1], [0, 0, 1, 1], [], []>} : vector<16x128xf32>, vector<128x128xf32>, vector<16x128xf32> -> vector<16x128xf32>
    %513 = arith.addf %504, %512 : vector<16x128xf32>
    %c7_409 = arith.constant 7 : index
    %c0_410 = arith.constant 0 : index
    %514 = vector.load %arg25[%c7_409, %c0_410] : memref<29x128xf32, #tpu.memory_space<vmem>>, vector<16x128xf32>
    %cst_411 = arith.constant 0.000000e+00 : f32
    %515 = vector.shape_cast %60 : vector<16x1xi1> to vector<16x1xi1>
    %516 = vector.broadcast %515 : vector<16x1xi1> to vector<16x128xi1>
    %517 = vector.broadcast %cst_411 : f32 to vector<16x128xf32>
    %518 = arith.select %516, %514, %517 : vector<16x128xi1>, vector<16x128xf32>
    %c3_412 = arith.constant 3 : index
    %c0_413 = arith.constant 0 : index
    %c0_414 = arith.constant 0 : index
    %519 = vector.load %arg12[%c3_412, %c0_413, %c0_414] : memref<9x128x128xf32, #tpu.memory_space<vmem>>, vector<1x128x128xf32>
    %520 = vector.shape_cast %519 : vector<1x128x128xf32> to vector<128x128xf32>
    %cst_415 = arith.constant dense<0.000000e+00> : vector<16x128xf32>
    %521 = tpu.matmul %518, %520, %cst_415 {dimension_numbers = #tpu.dot_dimension_numbers<[1], [0], [0], [1], [0, 0, 1, 1], [], []>} : vector<16x128xf32>, vector<128x128xf32>, vector<16x128xf32> -> vector<16x128xf32>
    %522 = arith.addf %513, %521 : vector<16x128xf32>
    %c8_416 = arith.constant 8 : index
    %c0_417 = arith.constant 0 : index
    %523 = vector.load %arg25[%c8_416, %c0_417] : memref<29x128xf32, #tpu.memory_space<vmem>>, vector<16x128xf32>
    %c4_418 = arith.constant 4 : index
    %c0_419 = arith.constant 0 : index
    %c0_420 = arith.constant 0 : index
    %524 = vector.load %arg12[%c4_418, %c0_419, %c0_420] : memref<9x128x128xf32, #tpu.memory_space<vmem>>, vector<1x128x128xf32>
    %525 = vector.shape_cast %524 : vector<1x128x128xf32> to vector<128x128xf32>
    %cst_421 = arith.constant dense<0.000000e+00> : vector<16x128xf32>
    %526 = tpu.matmul %523, %525, %cst_421 {dimension_numbers = #tpu.dot_dimension_numbers<[1], [0], [0], [1], [0, 0, 1, 1], [], []>} : vector<16x128xf32>, vector<128x128xf32>, vector<16x128xf32> -> vector<16x128xf32>
    %527 = arith.addf %522, %526 : vector<16x128xf32>
    %c9_422 = arith.constant 9 : index
    %c0_423 = arith.constant 0 : index
    %528 = vector.load %arg25[%c9_422, %c0_423] : memref<29x128xf32, #tpu.memory_space<vmem>>, vector<16x128xf32>
    %cst_424 = arith.constant 0.000000e+00 : f32
    %529 = vector.shape_cast %62 : vector<16x1xi1> to vector<16x1xi1>
    %530 = vector.broadcast %529 : vector<16x1xi1> to vector<16x128xi1>
    %531 = vector.broadcast %cst_424 : f32 to vector<16x128xf32>
    %532 = arith.select %530, %528, %531 : vector<16x128xi1>, vector<16x128xf32>
    %c5_425 = arith.constant 5 : index
    %c0_426 = arith.constant 0 : index
    %c0_427 = arith.constant 0 : index
    %533 = vector.load %arg12[%c5_425, %c0_426, %c0_427] : memref<9x128x128xf32, #tpu.memory_space<vmem>>, vector<1x128x128xf32>
    %534 = vector.shape_cast %533 : vector<1x128x128xf32> to vector<128x128xf32>
    %cst_428 = arith.constant dense<0.000000e+00> : vector<16x128xf32>
    %535 = tpu.matmul %532, %534, %cst_428 {dimension_numbers = #tpu.dot_dimension_numbers<[1], [0], [0], [1], [0, 0, 1, 1], [], []>} : vector<16x128xf32>, vector<128x128xf32>, vector<16x128xf32> -> vector<16x128xf32>
    %536 = arith.addf %527, %535 : vector<16x128xf32>
    %c11_429 = arith.constant 11 : index
    %c0_430 = arith.constant 0 : index
    %537 = vector.load %arg25[%c11_429, %c0_430] : memref<29x128xf32, #tpu.memory_space<vmem>>, vector<16x128xf32>
    %cst_431 = arith.constant 0.000000e+00 : f32
    %538 = vector.shape_cast %60 : vector<16x1xi1> to vector<16x1xi1>
    %539 = vector.broadcast %538 : vector<16x1xi1> to vector<16x128xi1>
    %540 = vector.broadcast %cst_431 : f32 to vector<16x128xf32>
    %541 = arith.select %539, %537, %540 : vector<16x128xi1>, vector<16x128xf32>
    %c6_432 = arith.constant 6 : index
    %c0_433 = arith.constant 0 : index
    %c0_434 = arith.constant 0 : index
    %542 = vector.load %arg12[%c6_432, %c0_433, %c0_434] : memref<9x128x128xf32, #tpu.memory_space<vmem>>, vector<1x128x128xf32>
    %543 = vector.shape_cast %542 : vector<1x128x128xf32> to vector<128x128xf32>
    %cst_435 = arith.constant dense<0.000000e+00> : vector<16x128xf32>
    %544 = tpu.matmul %541, %543, %cst_435 {dimension_numbers = #tpu.dot_dimension_numbers<[1], [0], [0], [1], [0, 0, 1, 1], [], []>} : vector<16x128xf32>, vector<128x128xf32>, vector<16x128xf32> -> vector<16x128xf32>
    %545 = arith.addf %536, %544 : vector<16x128xf32>
    %c12_436 = arith.constant 12 : index
    %c0_437 = arith.constant 0 : index
    %546 = vector.load %arg25[%c12_436, %c0_437] : memref<29x128xf32, #tpu.memory_space<vmem>>, vector<16x128xf32>
    %c7_438 = arith.constant 7 : index
    %c0_439 = arith.constant 0 : index
    %c0_440 = arith.constant 0 : index
    %547 = vector.load %arg12[%c7_438, %c0_439, %c0_440] : memref<9x128x128xf32, #tpu.memory_space<vmem>>, vector<1x128x128xf32>
    %548 = vector.shape_cast %547 : vector<1x128x128xf32> to vector<128x128xf32>
    %cst_441 = arith.constant dense<0.000000e+00> : vector<16x128xf32>
    %549 = tpu.matmul %546, %548, %cst_441 {dimension_numbers = #tpu.dot_dimension_numbers<[1], [0], [0], [1], [0, 0, 1, 1], [], []>} : vector<16x128xf32>, vector<128x128xf32>, vector<16x128xf32> -> vector<16x128xf32>
    %550 = arith.addf %545, %549 : vector<16x128xf32>
    %c13_442 = arith.constant 13 : index
    %c0_443 = arith.constant 0 : index
    %551 = vector.load %arg25[%c13_442, %c0_443] : memref<29x128xf32, #tpu.memory_space<vmem>>, vector<16x128xf32>
    %cst_444 = arith.constant 0.000000e+00 : f32
    %552 = vector.shape_cast %62 : vector<16x1xi1> to vector<16x1xi1>
    %553 = vector.broadcast %552 : vector<16x1xi1> to vector<16x128xi1>
    %554 = vector.broadcast %cst_444 : f32 to vector<16x128xf32>
    %555 = arith.select %553, %551, %554 : vector<16x128xi1>, vector<16x128xf32>
    %c8_445 = arith.constant 8 : index
    %c0_446 = arith.constant 0 : index
    %c0_447 = arith.constant 0 : index
    %556 = vector.load %arg12[%c8_445, %c0_446, %c0_447] : memref<9x128x128xf32, #tpu.memory_space<vmem>>, vector<1x128x128xf32>
    %557 = vector.shape_cast %556 : vector<1x128x128xf32> to vector<128x128xf32>
    %cst_448 = arith.constant dense<0.000000e+00> : vector<16x128xf32>
    %558 = tpu.matmul %555, %557, %cst_448 {dimension_numbers = #tpu.dot_dimension_numbers<[1], [0], [0], [1], [0, 0, 1, 1], [], []>} : vector<16x128xf32>, vector<128x128xf32>, vector<16x128xf32> -> vector<16x128xf32>
    %559 = arith.addf %550, %558 : vector<16x128xf32>
    %c0_449 = arith.constant 0 : index
    %c0_450 = arith.constant 0 : index
    %560 = vector.load %arg13[%c0_449, %c0_450] : memref<1x128xf32, #tpu.memory_space<vmem>>, vector<1x128xf32>
    %561 = vector.broadcast %560 : vector<1x128xf32> to vector<16x128xf32>
    %562 = arith.addf %559, %561 : vector<16x128xf32>
    %cst_451 = arith.constant 0.000000e+00 : f32
    %563 = vector.broadcast %cst_451 : f32 to vector<16x128xf32>
    %564 = arith.maximumf %562, %563 : vector<16x128xf32>
    %c0_452 = arith.constant 0 : index
    %c0_453 = arith.constant 0 : index
    %565 = vector.load %arg26[%c0_452, %c0_453] : memref<16x128xf32, #tpu.memory_space<vmem>>, vector<16x128xf32>
    tpu.vector_store %arg26[%c0_452, %c0_453], %564 {strides = array<i32>} : memref<16x128xf32, #tpu.memory_space<vmem>>, vector<16x128xf32>,
    %c0_454 = arith.constant 0 : index
    %c0_455 = arith.constant 0 : index
    %566 = vector.load %arg26[%c0_454, %c0_455] : memref<16x128xf32, #tpu.memory_space<vmem>>, vector<11x128xf32>
    %c1_456 = arith.constant 1 : index
    %c0_457 = arith.constant 0 : index
    %567 = vector.load %arg26[%c1_456, %c0_457] : memref<16x128xf32, #tpu.memory_space<vmem>>, vector<11x128xf32>
    %568 = arith.maximumf %566, %567 : vector<11x128xf32>
    %c4_458 = arith.constant 4 : index
    %c0_459 = arith.constant 0 : index
    %569 = vector.load %arg26[%c4_458, %c0_459] : memref<16x128xf32, #tpu.memory_space<vmem>>, vector<11x128xf32>
    %c5_460 = arith.constant 5 : index
    %c0_461 = arith.constant 0 : index
    %570 = vector.load %arg26[%c5_460, %c0_461] : memref<16x128xf32, #tpu.memory_space<vmem>>, vector<11x128xf32>
    %571 = arith.maximumf %569, %570 : vector<11x128xf32>
    %572 = arith.maximumf %568, %571 : vector<11x128xf32>
    %c0_462 = arith.constant 0 : index
    %c0_463 = arith.constant 0 : index
    %573 = vector.load %arg16[%c0_462, %c0_463] : memref<4x11xf32, #tpu.memory_space<vmem>>, vector<4x11xf32>
    %cst_464 = arith.constant dense<0.000000e+00> : vector<4x128xf32>
    %574 = tpu.matmul %573, %572, %cst_464 {dimension_numbers = #tpu.dot_dimension_numbers<[1], [0], [0], [1], [0, 0, 1, 1], [], []>} : vector<4x11xf32>, vector<11x128xf32>, vector<4x128xf32> -> vector<4x128xf32>
    %c0_465 = arith.constant 0 : index
    %c0_466 = arith.constant 0 : index
    %c0_467 = arith.constant 0 : index
    %575 = vector.load %arg17[%c0_465, %c0_466, %c0_467] : memref<1x4x128xf32, #tpu.memory_space<vmem>>, vector<1x4x128xf32>
    %576 = vector.shape_cast %575 : vector<1x4x128xf32> to vector<4x128xf32>
    %577 = vector.shape_cast %574 : vector<4x128xf32> to vector<1x4x128xf32>
    tpu.vector_store %arg17[%c0_465, %c0_466, %c0_467], %577 {strides = array<i32>} : memref<1x4x128xf32, #tpu.memory_space<vmem>>, vector<1x4x128xf32>,
    return
  }
  func.func @transform_0(%arg0: i32) -> (i32, i32, i32) {
    %c0_i32 = arith.constant 0 : i32
    %c0_i32_0 = arith.constant 0 : i32
    %c0_i32_1 = arith.constant 0 : i32
    return %arg0, %c0_i32, %c0_i32_0 : i32, i32, i32
  }
  func.func @transform_1(%arg0: i32) -> (i32, i32, i32) {
    %c0_i32 = arith.constant 0 : i32
    %c0_i32_0 = arith.constant 0 : i32
    %c0_i32_1 = arith.constant 0 : i32
    %c0_i32_2 = arith.constant 0 : i32
    return %c0_i32, %c0_i32_0, %c0_i32_1 : i32, i32, i32
  }
  func.func @transform_2(%arg0: i32) -> (i32, i32) {
    %c0_i32 = arith.constant 0 : i32
    %c0_i32_0 = arith.constant 0 : i32
    %c0_i32_1 = arith.constant 0 : i32
    return %c0_i32, %c0_i32_0 : i32, i32
  }
  func.func @transform_3(%arg0: i32) -> (i32, i32, i32) {
    %c0_i32 = arith.constant 0 : i32
    %c0_i32_0 = arith.constant 0 : i32
    %c0_i32_1 = arith.constant 0 : i32
    %c0_i32_2 = arith.constant 0 : i32
    return %c0_i32, %c0_i32_0, %c0_i32_1 : i32, i32, i32
  }
  func.func @transform_4(%arg0: i32) -> (i32, i32) {
    %c0_i32 = arith.constant 0 : i32
    %c0_i32_0 = arith.constant 0 : i32
    %c0_i32_1 = arith.constant 0 : i32
    return %c0_i32, %c0_i32_0 : i32, i32
  }
  func.func @transform_5(%arg0: i32) -> (i32, i32, i32) {
    %c0_i32 = arith.constant 0 : i32
    %c0_i32_0 = arith.constant 0 : i32
    %c0_i32_1 = arith.constant 0 : i32
    %c0_i32_2 = arith.constant 0 : i32
    return %c0_i32, %c0_i32_0, %c0_i32_1 : i32, i32, i32
  }
  func.func @transform_6(%arg0: i32) -> (i32, i32) {
    %c0_i32 = arith.constant 0 : i32
    %c0_i32_0 = arith.constant 0 : i32
    %c0_i32_1 = arith.constant 0 : i32
    return %c0_i32, %c0_i32_0 : i32, i32
  }
  func.func @transform_7(%arg0: i32) -> (i32, i32, i32) {
    %c0_i32 = arith.constant 0 : i32
    %c0_i32_0 = arith.constant 0 : i32
    %c0_i32_1 = arith.constant 0 : i32
    %c0_i32_2 = arith.constant 0 : i32
    return %c0_i32, %c0_i32_0, %c0_i32_1 : i32, i32, i32
  }
  func.func @transform_8(%arg0: i32) -> (i32, i32) {
    %c0_i32 = arith.constant 0 : i32
    %c0_i32_0 = arith.constant 0 : i32
    %c0_i32_1 = arith.constant 0 : i32
    return %c0_i32, %c0_i32_0 : i32, i32
  }
  func.func @transform_9(%arg0: i32) -> (i32, i32, i32) {
    %c0_i32 = arith.constant 0 : i32
    %c0_i32_0 = arith.constant 0 : i32
    %c0_i32_1 = arith.constant 0 : i32
    %c0_i32_2 = arith.constant 0 : i32
    return %c0_i32, %c0_i32_0, %c0_i32_1 : i32, i32, i32
  }
  func.func @transform_10(%arg0: i32) -> (i32, i32) {
    %c0_i32 = arith.constant 0 : i32
    %c0_i32_0 = arith.constant 0 : i32
    %c0_i32_1 = arith.constant 0 : i32
    return %c0_i32, %c0_i32_0 : i32, i32
  }
  func.func @transform_11(%arg0: i32) -> (i32, i32, i32) {
    %c0_i32 = arith.constant 0 : i32
    %c0_i32_0 = arith.constant 0 : i32
    %c0_i32_1 = arith.constant 0 : i32
    %c0_i32_2 = arith.constant 0 : i32
    return %c0_i32, %c0_i32_0, %c0_i32_1 : i32, i32, i32
  }
  func.func @transform_12(%arg0: i32) -> (i32, i32) {
    %c0_i32 = arith.constant 0 : i32
    %c0_i32_0 = arith.constant 0 : i32
    %c0_i32_1 = arith.constant 0 : i32
    return %c0_i32, %c0_i32_0 : i32, i32
  }
  func.func @transform_13(%arg0: i32) -> (i32, i32) {
    %c0_i32 = arith.constant 0 : i32
    %c0_i32_0 = arith.constant 0 : i32
    %c0_i32_1 = arith.constant 0 : i32
    return %c0_i32, %c0_i32_0 : i32, i32
  }
  func.func @transform_14(%arg0: i32) -> (i32, i32) {
    %c0_i32 = arith.constant 0 : i32
    %c0_i32_0 = arith.constant 0 : i32
    %c0_i32_1 = arith.constant 0 : i32
    return %c0_i32, %c0_i32_0 : i32, i32
  }
  func.func @transform_15(%arg0: i32) -> (i32, i32) {
    %c0_i32 = arith.constant 0 : i32
    %c0_i32_0 = arith.constant 0 : i32
    %c0_i32_1 = arith.constant 0 : i32
    return %c0_i32, %c0_i32_0 : i32, i32
  }
  func.func @transform_16(%arg0: i32) -> (i32, i32, i32) {
    %c0_i32 = arith.constant 0 : i32
    %c0_i32_0 = arith.constant 0 : i32
    %c0_i32_1 = arith.constant 0 : i32
    return %arg0, %c0_i32, %c0_i32_0 : i32, i32, i32
  }
}

</mosaic_0001>

<bundles_post_ra>
// kernel: _lambda_.3
= control target key start
LH: loop header
LB: loop body
LE: loop exit
PB: predicated region body
PF: predicated region fallthrough
CT: control target
= control target key end

     0   :  { %s1181_s1 = inlined_call_operand.vmem [shape: f32[512,256], index: 1, kind: input, shape index: {}]   ;;  %s1182_s0 = inlined_call_operand.vmem [shape: f32[2,512], index: 0, kind: input, shape index: {}]   ;;  %s1183_s3 = inlined_call_operand.vmem [shape: f32[256,128], index: 3, kind: input, shape index: {}]   ;;  %s1184_s2 = inlined_call_operand.vmem [shape: f32[1,256], index: 2, kind: input, shape index: {}]   ;;  %s1185_s4 = inlined_call_operand.vmem [shape: f32[1,128], index: 4, kind: input, shape index: {}]   ;;  %s1186_s5 = inlined_call_operand.vmem [shape: f32[2,128], index: 5, kind: output, shape index: {}]  }
   0x1   :  { %v22_v0 = vld [vmem:[%s1181_s1 + $0x8] sm:$0xff]  ;;  %v24_v1 = vld [vmem:[%s1181_s1 + $0x18] sm:$0xff]  ;;  %v21_v2 = vld [vmem:[%s1181_s1] sm:$0xff] }
   0x2   :  { %v477_v3 = vpack.c.bf16 %v24_v1, %v22_v0  ;;  %v23_v4 = vld [vmem:[%s1181_s1 + $0x10] sm:$0xff]  ;;  %v86_v5 = vld [vmem:[%s1181_s1 + $0x208] sm:$0xff]  ;;  %v88_v6 = vld [vmem:[%s1181_s1 + $0x218] sm:$0xff] }
   0x3   :  { %v479_v7 = vpack.c.bf16 %v23_v4, %v21_v2  ;;  %v541_v8 = vpack.c.bf16 %v88_v6, %v86_v5  ;;  %v85_v9 = vld [vmem:[%s1181_s1 + $0x200] sm:$0xff]  ;;  %v87_v10 = vld [vmem:[%s1181_s1 + $0x210] sm:$0xff]  ;;  %v26_v11 = vld [vmem:[%s1181_s1 + $0x28] sm:$0xff] }
   0x4   :  { %478 = vmatprep.subr.bf16.mxu1 %v477_v3  ;;  %v543_v12 = vpack.c.bf16 %v87_v10, %v85_v9  ;;  %v28_v13 = vld [vmem:[%s1181_s1 + $0x38] sm:$0xff]  ;;  %v25_v14 = vld [vmem:[%s1181_s1 + $0x20] sm:$0xff]  ;;  %v27_v15 = vld [vmem:[%s1181_s1 + $0x30] sm:$0xff] }
   0x5   :  { %480 = vmatpush1.bf16.msra.mxu1 %v479_v7  ;;  %542 = vmatprep.subr.bf16.mxu0 %v541_v8  ;;  %v481_v16 = vpack.c.bf16 %v28_v13, %v26_v11  ;;  %v483_v17 = vpack.c.bf16 %v27_v15, %v25_v14  ;;  %v90_v18 = vld [vmem:[%s1181_s1 + $0x228] sm:$0xff]  ;;  %v92_v19 = vld [vmem:[%s1181_s1 + $0x238] sm:$0xff]  ;;  %v89_v20 = vld [vmem:[%s1181_s1 + $0x220] sm:$0xff] }
   0x6   :  { %544 = vmatpush1.bf16.msra.mxu0 %v543_v12  ;;  %v545_v21 = vpack.c.bf16 %v92_v19, %v90_v18  ;;  %v91_v22 = vld [vmem:[%s1181_s1 + $0x230] sm:$0xff]  ;;  %v30_v23 = vld [vmem:[%s1181_s1 + $0x48] sm:$0xff]  ;;  %v32_v24 = vld [vmem:[%s1181_s1 + $0x58] sm:$0xff] }
   0x7   :  { %482 = vmatprep.subr.bf16.mxu1 %v481_v16  ;;  %v547_v25 = vpack.c.bf16 %v91_v22, %v89_v20  ;;  %v485_v26 = vpack.c.bf16 %v32_v24, %v30_v23  ;;  %v29_v27 = vld [vmem:[%s1181_s1 + $0x40] sm:$0xff]  ;;  %v31_v28 = vld [vmem:[%s1181_s1 + $0x50] sm:$0xff]  ;;  %v94_v29 = vld [vmem:[%s1181_s1 + $0x248] sm:$0xff] }
   0x8   :  { %546 = vmatprep.subr.bf16.mxu0 %v545_v21  ;;  %v96_v30 = vld [vmem:[%s1181_s1 + $0x258] sm:$0xff]  ;;  %v93_v31 = vld [vmem:[%s1181_s1 + $0x240] sm:$0xff]  ;;  %v95_v32 = vld [vmem:[%s1181_s1 + $0x250] sm:$0xff]  ;;  %v487_v33 = vpack.c.bf16 %v31_v28, %v29_v27 }
   0x9   :  { %484 = vmatpush1.bf16.msra.mxu1 %v483_v17  ;;  %v549_v34 = vpack.c.bf16 %v96_v30, %v94_v29  ;;  %v34_v35 = vld [vmem:[%s1181_s1 + $0x68] sm:$0xff]  ;;  %v36_v36 = vld [vmem:[%s1181_s1 + $0x78] sm:$0xff]  ;;  %v33_v37 = vld [vmem:[%s1181_s1 + $0x60] sm:$0xff]  ;;  %v551_v38 = vpack.c.bf16 %v95_v32, %v93_v31 }
   0xa   :  { %548 = vmatpush1.bf16.msra.mxu0 %v547_v25  ;;  %486 = vmatprep.subr.bf16.mxu1 %v485_v26  ;;  %v489_v39 = vpack.c.bf16 %v36_v36, %v34_v35  ;;  %v35_v40 = vld [vmem:[%s1181_s1 + $0x70] sm:$0xff]  ;;  %v98_v41 = vld [vmem:[%s1181_s1 + $0x268] sm:$0xff]  ;;  %v100_v42 = vld [vmem:[%s1181_s1 + $0x278] sm:$0xff] }
   0xb   :  { %550 = vmatprep.subr.bf16.mxu0 %v549_v34  ;;  %v553_v43 = vpack.c.bf16 %v100_v42, %v98_v41  ;;  %v97_v44 = vld [vmem:[%s1181_s1 + $0x260] sm:$0xff]  ;;  %v99_v45 = vld [vmem:[%s1181_s1 + $0x270] sm:$0xff]  ;;  %v38_v46 = vld [vmem:[%s1181_s1 + $0x88] sm:$0xff]  ;;  %v491_v48 = vpack.c.bf16 %v35_v40, %v33_v37 }
   0xc   :  { %v40_v47 = vld [vmem:[%s1181_s1 + $0x98] sm:$0xff]  ;;  %v102_v49 = vld [vmem:[%s1181_s1 + $0x288] sm:$0xff]  ;;  %v555_v51 = vpack.c.bf16 %v99_v45, %v97_v44  ;;  %v37_v53 = vld [vmem:[%s1181_s1 + $0x80] sm:$0xff] }
   0xd   :  { %488 = vmatpush1.bf16.msra.mxu1 %v487_v33  ;;  %v104_v50 = vld [vmem:[%s1181_s1 + $0x298] sm:$0xff]  ;;  %v493_v52 = vpack.c.bf16 %v40_v47, %v38_v46  ;;  %v39_v54 = vld [vmem:[%s1181_s1 + $0x90] sm:$0xff]  ;;  %v101_v55 = vld [vmem:[%s1181_s1 + $0x280] sm:$0xff]  ;;  %v151_v46 = vlaneseq  ;;  %v643_v47 = vmov 1983009808  }
   0xe   :  { %552 = vmatpush1.bf16.msra.mxu0 %v551_v38  ;;  %490 = vmatprep.subr.bf16.mxu1 %v489_v39  ;;  %v557_v56 = vpack.c.bf16 %v104_v50, %v102_v49  ;;  %v103_v57 = vld [vmem:[%s1181_s1 + $0x290] sm:$0xff]  ;;  %v42_v58 = vld [vmem:[%s1181_s1 + $0xa8] sm:$0xff]  ;;  %v44_v59 = vld [vmem:[%s1181_s1 + $0xb8] sm:$0xff]  ;;  %v495_v62 = vpack.c.bf16 %v39_v54, %v37_v53 }
   0xf   :  { %554 = vmatprep.subr.bf16.mxu0 %v553_v43  ;;  %v106_v60 = vld [vmem:[%s1181_s1 + $0x2a8] sm:$0xff]  ;;  %v108_v61 = vld [vmem:[%s1181_s1 + $0x2b8] sm:$0xff]  ;;  %v559_v63 = vpack.c.bf16 %v103_v57, %v101_v55  ;;  %v497_v0 = vpack.c.bf16 %v44_v59, %v42_v58  ;;  %v41_v1 = vld [vmem:[%s1181_s1 + $0xa0] sm:$0xff] }
  0x10   :  { %v43_v2 = vld [vmem:[%s1181_s1 + $0xb0] sm:$0xff]  ;;  %v105_v3 = vld [vmem:[%s1181_s1 + $0x2a0] sm:$0xff]  ;;  %v561_v4 = vpack.c.bf16 %v108_v61, %v106_v60  ;;  %v46_v6 = vld [vmem:[%s1181_s1 + $0xc8] sm:$0xff]  ;;  %v926_v61 = vshrl.u32 %v151_v46, 7 }
  0x11   :  { %492 = vmatpush1.bf16.msra.mxu1 %v491_v48  ;;  %v107_v5 = vld [vmem:[%s1181_s1 + $0x2b0] sm:$0xff]  ;;  %v48_v7 = vld [vmem:[%s1181_s1 + $0xd8] sm:$0xff]  ;;  %v110_v8 = vld [vmem:[%s1181_s1 + $0x2c8] sm:$0xff]  ;;  %v499_v10 = vpack.c.bf16 %v43_v2, %v41_v1  ;;  %v164_v48 = vunpack.c.l.s4 %v643_v47 }
  0x12   :  { %556 = vmatpush1.bf16.msra.mxu0 %v555_v51  ;;  %494 = vmatprep.subr.bf16.mxu1 %v493_v52  ;;  %v112_v9 = vld [vmem:[%s1181_s1 + $0x2d8] sm:$0xff]  ;;  %v563_v11 = vpack.c.bf16 %v107_v5, %v105_v3  ;;  %v501_v12 = vpack.c.bf16 %v48_v7, %v46_v6  ;;  %v45_v13 = vld [vmem:[%s1181_s1 + $0xc0] sm:$0xff]  ;;  %v47_v14 = vld [vmem:[%s1181_s1 + $0xd0] sm:$0xff] }
  0x13   :  { %558 = vmatprep.subr.bf16.mxu0 %v557_v56  ;;  %v109_v15 = vld [vmem:[%s1181_s1 + $0x2c0] sm:$0xff]  ;;  %v565_v16 = vpack.c.bf16 %v112_v9, %v110_v8  ;;  %v111_v17 = vld [vmem:[%s1181_s1 + $0x2d0] sm:$0xff]  ;;  %v50_v18 = vld [vmem:[%s1181_s1 + $0xe8] sm:$0xff]  ;;  %v503_v22 = vpack.c.bf16 %v47_v14, %v45_v13 }
  0x14   :  { %v52_v19 = vld [vmem:[%s1181_s1 + $0xf8] sm:$0xff]  ;;  %v114_v20 = vld [vmem:[%s1181_s1 + $0x2e8] sm:$0xff]  ;;  %v567_v23 = vpack.c.bf16 %v111_v17, %v109_v15  ;;  %v49_v25 = vld [vmem:[%s1181_s1 + $0xe0] sm:$0xff] }
  0x15   :  { %496 = vmatpush1.bf16.msra.mxu1 %v495_v62  ;;  %v116_v21 = vld [vmem:[%s1181_s1 + $0x2f8] sm:$0xff]  ;;  %v505_v24 = vpack.c.bf16 %v52_v19, %v50_v18  ;;  %v51_v26 = vld [vmem:[%s1181_s1 + $0xf0] sm:$0xff]  ;;  %v113_v27 = vld [vmem:[%s1181_s1 + $0x2e0] sm:$0xff]  ;;  %v165_v62 = vunpack.c.0.s8 %v164_v48 }
  0x16   :  { %560 = vmatpush1.bf16.msra.mxu0 %v559_v63  ;;  %498 = vmatprep.subr.bf16.mxu1 %v497_v0  ;;  %v569_v28 = vpack.c.bf16 %v116_v21, %v114_v20  ;;  %v115_v29 = vld [vmem:[%s1181_s1 + $0x2f0] sm:$0xff]  ;;  %v54_v30 = vld [vmem:[%s1181_s1 + $0x108] sm:$0xff]  ;;  %v56_v31 = vld [vmem:[%s1181_s1 + $0x118] sm:$0xff]  ;;  %v507_v34 = vpack.c.bf16 %v51_v26, %v49_v25 }
  0x17   :  { %562 = vmatprep.subr.bf16.mxu0 %v561_v4  ;;  %v118_v32 = vld [vmem:[%s1181_s1 + $0x308] sm:$0xff]  ;;  %v120_v33 = vld [vmem:[%s1181_s1 + $0x318] sm:$0xff]  ;;  %v571_v35 = vpack.c.bf16 %v115_v29, %v113_v27  ;;  %v509_v36 = vpack.c.bf16 %v56_v31, %v54_v30  ;;  %v53_v37 = vld [vmem:[%s1181_s1 + $0x100] sm:$0xff] }
  0x18   :  { %v55_v38 = vld [vmem:[%s1181_s1 + $0x110] sm:$0xff]  ;;  %v117_v39 = vld [vmem:[%s1181_s1 + $0x300] sm:$0xff]  ;;  %v573_v40 = vpack.c.bf16 %v120_v33, %v118_v32  ;;  %v58_v42 = vld [vmem:[%s1181_s1 + $0x128] sm:$0xff] }
  0x19   :  { %500 = vmatpush1.bf16.msra.mxu1 %v499_v10  ;;  %v119_v41 = vld [vmem:[%s1181_s1 + $0x310] sm:$0xff]  ;;  %v60_v43 = vld [vmem:[%s1181_s1 + $0x138] sm:$0xff]  ;;  %v122_v44 = vld [vmem:[%s1181_s1 + $0x328] sm:$0xff]  ;;  %v511_v49 = vpack.c.bf16 %v55_v38, %v53_v37 }
  0x1a   :  { %564 = vmatpush1.bf16.msra.mxu0 %v563_v11  ;;  %502 = vmatprep.subr.bf16.mxu1 %v501_v12  ;;  %v124_v45 = vld [vmem:[%s1181_s1 + $0x338] sm:$0xff]  ;;  %v575_v50 = vpack.c.bf16 %v119_v41, %v117_v39  ;;  %v513_v51 = vpack.c.bf16 %v60_v43, %v58_v42  ;;  %v57_v52 = vld [vmem:[%s1181_s1 + $0x120] sm:$0xff]  ;;  %v59_v53 = vld [vmem:[%s1181_s1 + $0x130] sm:$0xff]  ;;  %v168_v11 = vsub.s32 %v165_v62, %v926_v61 }
  0x1b   :  { %566 = vmatprep.subr.bf16.mxu0 %v565_v16  ;;  %v121_v54 = vld [vmem:[%s1181_s1 + $0x320] sm:$0xff]  ;;  %v577_v55 = vpack.c.bf16 %v124_v45, %v122_v44  ;;  %v123_v56 = vld [vmem:[%s1181_s1 + $0x330] sm:$0xff]  ;;  %v62_v57 = vld [vmem:[%s1181_s1 + $0x148] sm:$0xff]  ;;  %v515_v63 = vpack.c.bf16 %v59_v53, %v57_v52 }
  0x1c   :  { %v64_v58 = vld [vmem:[%s1181_s1 + $0x158] sm:$0xff]  ;;  %v126_v59 = vld [vmem:[%s1181_s1 + $0x348] sm:$0xff]  ;;  %v579_v0 = vpack.c.bf16 %v123_v56, %v121_v54  ;;  %v61_v2 = vld [vmem:[%s1181_s1 + $0x140] sm:$0xff] }
  0x1d   :  { %504 = vmatpush1.bf16.msra.mxu1 %v503_v22  ;;  %v128_v60 = vld [vmem:[%s1181_s1 + $0x358] sm:$0xff]  ;;  %v517_v1 = vpack.c.bf16 %v64_v58, %v62_v57  ;;  %v63_v3 = vld [vmem:[%s1181_s1 + $0x150] sm:$0xff]  ;;  %v125_v4 = vld [vmem:[%s1181_s1 + $0x340] sm:$0xff] }
  0x1e   :  { %568 = vmatpush1.bf16.msra.mxu0 %v567_v23  ;;  %506 = vmatprep.subr.bf16.mxu1 %v505_v24  ;;  %v581_v5 = vpack.c.bf16 %v128_v60, %v126_v59  ;;  %v127_v6 = vld [vmem:[%s1181_s1 + $0x350] sm:$0xff]  ;;  %v66_v7 = vld [vmem:[%s1181_s1 + $0x168] sm:$0xff]  ;;  %v68_v8 = vld [vmem:[%s1181_s1 + $0x178] sm:$0xff]  ;;  %v519_v12 = vpack.c.bf16 %v63_v3, %v61_v2 }
  0x1f   :  { %570 = vmatprep.subr.bf16.mxu0 %v569_v28  ;;  %v130_v9 = vld [vmem:[%s1181_s1 + $0x368] sm:$0xff]  ;;  %v132_v10 = vld [vmem:[%s1181_s1 + $0x378] sm:$0xff]  ;;  %v65_v13 = vld [vmem:[%s1181_s1 + $0x160] sm:$0xff]  ;;  %v583_v14 = vpack.c.bf16 %v127_v6, %v125_v4  ;;  %v521_v15 = vpack.c.bf16 %v68_v8, %v66_v7 }
  0x20   :  { %v67_v16 = vld [vmem:[%s1181_s1 + $0x170] sm:$0xff]  ;;  %v129_v17 = vld [vmem:[%s1181_s1 + $0x360] sm:$0xff]  ;;  %v585_v19 = vpack.c.bf16 %v132_v10, %v130_v9  ;;  %v70_v20 = vld [vmem:[%s1181_s1 + $0x188] sm:$0xff] }
  0x21   :  { %508 = vmatpush1.bf16.msra.mxu1 %v507_v34  ;;  %v131_v18 = vld [vmem:[%s1181_s1 + $0x370] sm:$0xff]  ;;  %v72_v21 = vld [vmem:[%s1181_s1 + $0x198] sm:$0xff]  ;;  %v20_v22 = vld [vmem:[%s1182_s0] sm:$0xff]  ;;  %v523_v27 = vpack.c.bf16 %v67_v16, %v65_v13 }
  0x22   :  { %572 = vmatpush1.bf16.msra.mxu0 %v571_v35  ;;  %510 = vmatprep.subr.bf16.mxu1 %v509_v36  ;;  %v134_v23 = vld [vmem:[%s1181_s1 + $0x388] sm:$0xff]  ;;  %v136_v24 = vld [vmem:[%s1181_s1 + $0x398] sm:$0xff]  ;;  %v980_v25 = vrot.slane %v20_v22, %v168_v11  ;;  %v162_v26 = vcombine.high %v20_v22, %v20_v22  ;;  %v587_v28 = vpack.c.bf16 %v131_v18, %v129_v17  ;;  %v69_v30 = vld [vmem:[%s1181_s1 + $0x180] sm:$0xff] }
  0x23   :  { %574 = vmatprep.subr.bf16.mxu0 %v573_v40  ;;  %v525_v29 = vpack.c.bf16 %v72_v21, %v70_v20  ;;  %v71_v31 = vld [vmem:[%s1181_s1 + $0x190] sm:$0xff]  ;;  %v133_v32 = vld [vmem:[%s1181_s1 + $0x380] sm:$0xff]  ;;  %v589_v35 = vpack.c.bf16 %v136_v24, %v134_v23  ;;  %v74_v37 = vld [vmem:[%s1181_s1 + $0x1a8] sm:$0xff] }
  0x24   :  { %v177_v33 = vcombine.high %v980_v25, %v980_v25  ;;  %v993_v34 = vrot.slane %v162_v26, %v168_v11  ;;  %v135_v36 = vld [vmem:[%s1181_s1 + $0x390] sm:$0xff]  ;;  %v76_v38 = vld [vmem:[%s1181_s1 + $0x1b8] sm:$0xff]  ;;  %v138_v39 = vld [vmem:[%s1181_s1 + $0x3a8] sm:$0xff]  ;;  %v527_v42 = vpack.c.bf16 %v71_v31, %v69_v30 }
  0x25   :  { %512 = vmatpush1.bf16.msra.mxu1 %v511_v49  ;;  %v140_v40 = vld [vmem:[%s1181_s1 + $0x3b8] sm:$0xff]  ;;  %v591_v43 = vpack.c.bf16 %v135_v36, %v133_v32  ;;  %v529_v44 = vpack.c.bf16 %v76_v38, %v74_v37  ;;  %v73_v45 = vld [vmem:[%s1181_s1 + $0x1a0] sm:$0xff]  ;;  %v75_v46 = vld [vmem:[%s1181_s1 + $0x1b0] sm:$0xff] }
  0x26   :  { %576 = vmatpush1.bf16.msra.mxu0 %v575_v50  ;;  %514 = vmatprep.subr.bf16.mxu1 %v513_v51  ;;  %v178_v41 = vcombine.high %v993_v34, %v993_v34  ;;  %v137_v47 = vld [vmem:[%s1181_s1 + $0x3a0] sm:$0xff]  ;;  %v593_v48 = vpack.c.bf16 %v140_v40, %v138_v39  ;;  %v139_v49 = vld [vmem:[%s1181_s1 + $0x3b0] sm:$0xff]  ;;  %v78_v50 = vld [vmem:[%s1181_s1 + $0x1c8] sm:$0xff]  ;;  %v531_v54 = vpack.c.bf16 %v75_v46, %v73_v45 }
  0x27   :  { %578 = vmatprep.subr.bf16.mxu0 %v577_v55  ;;  %247 = vmatprep.mubr.f32.mxu1 %v177_v33  ;;  %v80_v51 = vld [vmem:[%s1181_s1 + $0x1d8] sm:$0xff]  ;;  %v142_v52 = vld [vmem:[%s1181_s1 + $0x3c8] sm:$0xff]  ;;  %v595_v55 = vpack.c.bf16 %v139_v49, %v137_v47  ;;  %v77_v57 = vld [vmem:[%s1181_s1 + $0x1c0] sm:$0xff] }
  0x28   :  { %318 = vmatprep.mubr.f32.mxu0 %v178_v41  ;;  %v144_v53 = vld [vmem:[%s1181_s1 + $0x3d8] sm:$0xff]  ;;  %v533_v56 = vpack.c.bf16 %v80_v51, %v78_v50  ;;  %v79_v58 = vld [vmem:[%s1181_s1 + $0x1d0] sm:$0xff]  ;;  %v141_v59 = vld [vmem:[%s1181_s1 + $0x3c0] sm:$0xff] }
  0x29   :  { %516 = vmatpush1.bf16.msra.mxu1 %v515_v63  ;;  %v597_v60 = vpack.c.bf16 %v144_v53, %v142_v52  ;;  %v143_v62 = vld [vmem:[%s1181_s1 + $0x3d0] sm:$0xff]  ;;  %v82_v63 = vld [vmem:[%s1181_s1 + $0x1e8] sm:$0xff]  ;;  %v148_v2 = vld [vmem:[%s1181_s1 + $0x3f8] sm:$0xff]  ;;  %v535_v3 = vpack.c.bf16 %v79_v58, %v77_v57 }
  0x2a   :  { %580 = vmatpush1.bf16.msra.mxu0 %v579_v0  ;;  %518 = vmatprep.subr.bf16.mxu1 %v517_v1  ;;  %v84_v0 = vld [vmem:[%s1181_s1 + $0x1f8] sm:$0xff]  ;;  %v146_v1 = vld [vmem:[%s1181_s1 + $0x3e8] sm:$0xff]  ;;  %v599_v4 = vpack.c.bf16 %v143_v62, %v141_v59  ;;  %v81_v6 = vld [vmem:[%s1181_s1 + $0x1e0] sm:$0xff]  ;;  %v153_v62 = vsub.s32 0, %v926_v61 }
  0x2b   :  { %582 = vmatprep.subr.bf16.mxu0 %v581_v5  ;;  %v537_v5 = vpack.c.bf16 %v84_v0, %v82_v63  ;;  %v83_v7 = vld [vmem:[%s1181_s1 + $0x1f0] sm:$0xff]  ;;  %v145_v8 = vld [vmem:[%s1181_s1 + $0x3e0] sm:$0xff]  ;;  %v601_v9 = vpack.c.bf16 %v148_v2, %v146_v1  ;;  %v328_v17 = vld [vmem:[%s1183_s3 + $0x8] sm:$0xff]  ;;  %v157_v0 = vsub.s32 1, %v926_v61 }
  0x2c   :  { %v147_v10 = vld [vmem:[%s1181_s1 + $0x3f0] sm:$0xff]  ;;  %v343_v11 = vld [vmem:[%s1183_s3 + $0x80] sm:$0xff]  ;;  %v539_v13 = vpack.c.bf16 %v83_v7, %v81_v6  ;;  %v330_v23 = vld [vmem:[%s1183_s3 + $0x18] sm:$0xff] }
  0x2d   :  { %520 = vmatpush1.bf16.msra.mxu1 %v519_v12  ;;  %v344_v12 = vld [vmem:[%s1183_s3 + $0x88] sm:$0xff]  ;;  %v327_v16 = vld [vmem:[%s1183_s3] sm:$0xff]  ;;  %v345_v18 = vld [vmem:[%s1183_s3 + $0x90] sm:$0xff] }
  0x2e   :  { %584 = vmatpush1.bf16.msra.mxu0 %v583_v14  ;;  %522 = vmatprep.subr.bf16.mxu1 %v521_v15  ;;  %v603_v14 = vpack.c.bf16 %v147_v10, %v145_v8  ;;  %v605_v15 = vpack.c.bf16 %v344_v12, %v343_v11  ;;  %v607_v20 = vpack.c.bf16 %v328_v17, %v327_v16  ;;  %v329_v22 = vld [vmem:[%s1183_s3 + $0x10] sm:$0xff]  ;;  %v347_v24 = vld [vmem:[%s1183_s3 + $0xa0] sm:$0xff]  ;;  %v348_v26 = vld [vmem:[%s1183_s3 + $0xa8] sm:$0xff] }
  0x2f   :  { %586 = vmatprep.subr.bf16.mxu0 %v585_v19  ;;  %v346_v19 = vld [vmem:[%s1183_s3 + $0x98] sm:$0xff]  ;;  %v332_v30 = vld [vmem:[%s1183_s3 + $0x28] sm:$0xff]  ;;  %v349_v31 = vld [vmem:[%s1183_s3 + $0xb0] sm:$0xff] }
  0x30   :  { %v609_v21 = vpack.c.bf16 %v346_v19, %v345_v18  ;;  %v351_v36 = vld [vmem:[%s1183_s3 + $0xc0] sm:$0xff]  ;;  %v352_v37 = vld [vmem:[%s1183_s3 + $0xc8] sm:$0xff]  ;;  %v337_v46 = vld [vmem:[%s1183_s3 + $0x50] sm:$0xff] }
  0x31   :  { %524 = vmatpush1.bf16.msra.mxu1 %v523_v27  ;;  %v611_v27 = vpack.c.bf16 %v330_v23, %v329_v22  ;;  %v621_v39 = vpack.c.bf16 %v352_v37, %v351_v36  ;;  %v335_v40 = vld [vmem:[%s1183_s3 + $0x40] sm:$0xff]  ;;  %v336_v41 = vld [vmem:[%s1183_s3 + $0x48] sm:$0xff]  ;;  %v338_v47 = vld [vmem:[%s1183_s3 + $0x58] sm:$0xff] }
  0x32   :  { %588 = vmatpush1.bf16.msra.mxu0 %v587_v28  ;;  %526 = vmatprep.subr.bf16.mxu1 %v525_v29  ;;  %v613_v28 = vpack.c.bf16 %v348_v26, %v347_v24  ;;  %v331_v29 = vld [vmem:[%s1183_s3 + $0x20] sm:$0xff]  ;;  %v356_v50 = vld [vmem:[%s1183_s3 + $0xe8] sm:$0xff]  ;;  %v341_v58 = vld [vmem:[%s1183_s3 + $0x70] sm:$0xff] }
  0x33   :  { %590 = vmatprep.subr.bf16.mxu0 %v589_v35  ;;  %v615_v32 = vpack.c.bf16 %v332_v30, %v331_v29  ;;  %v334_v35 = vld [vmem:[%s1183_s3 + $0x38] sm:$0xff]  ;;  %v355_v49 = vld [vmem:[%s1183_s3 + $0xe0] sm:$0xff]  ;;  %v340_v53 = vld [vmem:[%s1183_s3 + $0x68] sm:$0xff] }
  0x34   :  { %v629_v51 = vpack.c.bf16 %v356_v50, %v355_v49  ;;  %v339_v52 = vld [vmem:[%s1183_s3 + $0x60] sm:$0xff]  ;;  %v342_v59 = vld [vmem:[%s1183_s3 + $0x78] sm:$0xff] }
  0x35   :  { %528 = vmatpush1.bf16.msra.mxu1 %v527_v42  ;;  %v353_v42 = vld [vmem:[%s1183_s3 + $0xd0] sm:$0xff]  ;;  %v149_v63 = vld [vmem:[%s1184_s2] sm:$0x3] }
  0x36   :  { %592 = vmatpush1.bf16.msra.mxu0 %v591_v43  ;;  %530 = vmatprep.subr.bf16.mxu1 %v529_v44  ;;  %v354_v43 = vld [vmem:[%s1183_s3 + $0xd8] sm:$0xff]  ;;  %v623_v44 = vpack.c.bf16 %v336_v41, %v335_v40  ;;  %v154_v1 = vrot.slane %v149_v63, %v153_v62  ;;  %v158_v2 = vrot.slane %v149_v63, %v157_v0 }
  0x37   :  { %594 = vmatprep.subr.bf16.mxu0 %v593_v48  ;;  %v625_v45 = vpack.c.bf16 %v354_v43, %v353_v42  ;;  %v627_v48 = vpack.c.bf16 %v338_v47, %v337_v46 }
  0x39   :  { %532 = vmatpush1.bf16.msra.mxu1 %v531_v54  ;;  %v631_v54 = vpack.c.bf16 %v340_v53, %v339_v52 }
  0x3a   :  { %596 = vmatpush1.bf16.msra.mxu0 %v595_v55  ;;  %534 = vmatprep.subr.bf16.mxu1 %v533_v56  ;;  %v357_v55 = vld [vmem:[%s1183_s3 + $0xf0] sm:$0xff]  ;;  %v358_v56 = vld [vmem:[%s1183_s3 + $0xf8] sm:$0xff] }
  0x3b   :  { %598 = vmatprep.subr.bf16.mxu0 %v597_v60  ;;  %v633_v57 = vpack.c.bf16 %v358_v56, %v357_v55  ;;  %v635_v60 = vpack.c.bf16 %v342_v59, %v341_v58 }
  0x3d   :  { %536 = vmatpush1.bf16.msra.mxu1 %v535_v3 }
  0x3e   :  { %600 = vmatpush1.bf16.msra.mxu0 %v599_v4  ;;  %538 = vmatprep.subr.bf16.mxu1 %v537_v5 }
  0x3f   :  { %602 = vmatprep.subr.bf16.mxu0 %v601_v9 }
  0x41   :  { %540 = vmatpush1.bf16.msra.mxu1 %v539_v13 }
  0x42   :  { %604 = vmatpush1.bf16.msra.mxu0 %v603_v14  ;;  %606 = vmatprep.subr.bf16.mxu1 %v605_v15  ;;  %v441_v14 = vld [vmem:[%s1185_s4] ss:$0 sm:$0xff] }
  0x44   :  { %248 = vmatmul.mubr.f32.vlgmr.msra.gmra.mrb[0].mxu1 %v980_v25  ;;  %v350_v25 = vld [vmem:[%s1183_s3 + $0xb8] sm:$0xff] }
  0x45   :  { %319 = vmatmul.mubr.f32.vlgmr.msra.gmra.mrb[0].mxu0 %v993_v34  ;;  %608 = vmatpush3.bf16.msra.mxu1 %v607_v20  ;;  %v617_v33 = vpack.c.bf16 %v350_v25, %v349_v31  ;;  %v333_v34 = vld [vmem:[%s1183_s3 + $0x30] sm:$0xff] }
  0x46   :  { %610 = vmatprep.subr.bf16.mxu1 %v609_v21  ;;  %v619_v38 = vpack.c.bf16 %v334_v35, %v333_v34 }
  0x49   :  { %612 = vmatpush3.bf16.msra.mxu1 %v611_v27 }
  0x4a   :  { %614 = vmatprep.subr.bf16.mxu1 %v613_v28 }
  0x4d   :  { %616 = vmatpush3.bf16.msra.mxu1 %v615_v32 }
  0x4e   :  { %618 = vmatprep.subr.bf16.mxu1 %v617_v33 }
  0x51   :  { %620 = vmatpush3.bf16.msra.mxu1 %v619_v38 }
  0x52   :  { %622 = vmatprep.subr.bf16.mxu1 %v621_v39 }
  0x55   :  { %624 = vmatpush3.bf16.msra.mxu1 %v623_v44 }
  0x56   :  { %626 = vmatprep.subr.bf16.mxu1 %v625_v45 }
  0x59   :  { %628 = vmatpush3.bf16.msra.mxu1 %v627_v48 }
  0x5a   :  { %630 = vmatprep.subr.bf16.mxu1 %v629_v51 }
  0x5d   :  { %632 = vmatpush3.bf16.msra.mxu1 %v631_v54 }
  0x5e   :  { %634 = vmatprep.subr.bf16.mxu1 %v633_v57 }
  0x61   :  { %636 = vmatpush3.bf16.msra.mxu1 %v635_v60 }
 0x117   :  { %v249_v3 = vpop.f32.mrb[0].mxu1 }
 0x118   :  { %v250_v4 = vadd.f32 %v249_v3, %v154_v1  ;;  %v251_v5 = vpop.f32.mrb[1].mxu1  ;;  %v320_v6 = vpop.f32.mrb[0].mxu0 }
 0x119   :  { %v252_v7 = vadd.f32 %v251_v5, %v158_v2  ;;  %v322_v8 = vpop.f32.mrb[1].mxu0 }
 0x11a   :  { %v321_v9 = vadd.f32 %v320_v6, %v250_v4 }
 0x11b   :  { %v323_v10 = vadd.f32 %v322_v8, %v252_v7 }
 0x11c   :  { %v325_v12 = vmax.f32 %v321_v9, 0.0 }
 0x11d   :  { %v326_v11 = vmax.f32 %v323_v10, 0.0 }
 0x11f   :  { %430 = vmatprep.mubr.f32.mxu1 %v326_v11 }
 0x120   :  { %431 = vmatmul.mubr.f32.vlgmr.msra.gmra.mrb[2].mxu1 %v325_v12 }
 0x1f3   :  { %v474_v13 = vpop.f32.mrb[2].mxu1 }
 0x1f4   :  { %v475_v61 = vpop.f32.mrb[3].mxu1 }
 0x1f5   :  { %v476_v15 = vadd.f32 %v475_v61, %v474_v13 }
 0x1f7   :  { %v433_v16 = vadd.f32 %v476_v15, %v441_v14 }
 0x1f9   :  { %436 = vst [vmem:[%s1186_s5] sm:$0x3] %v433_v16 }

// kernel: _lambda_.2
= control target key start
LH: loop header
LB: loop body
LE: loop exit
PB: predicated region body
PF: predicated region fallthrough
CT: control target
= control target key end

     0   :  { %s24169_s0 = inlined_call_operand.vmem [shape: f32[2,256,4], index: 0, kind: input, shape index: {}]   ;;  %s24170_s1 = inlined_call_operand.hbm [shape: f32[9,4,32], index: 1, kind: input, shape index: {}]   ;;  %s24171_s2 = inlined_call_operand.hbm [shape: f32[1,32], index: 2, kind: input, shape index: {}]   ;;  %s24172_s3 = inlined_call_operand.hbm [shape: f32[9,32,32], index: 3, kind: input, shape index: {}]   ;;  %s24173_s4 = inlined_call_operand.hbm [shape: f32[1,32], index: 4, kind: input, shape index: {}]   ;;  %s24174_s5 = inlined_call_operand.hbm [shape: f32[9,32,64], index: 5, kind: input, shape index: {}]   ;;  %s24175_s6 = inlined_call_operand.hbm [shape: f32[1,64], index: 6, kind: input, shape index: {}]   ;;  %s24176_s7 = inlined_call_operand.hbm [shape: f32[9,64,64], index: 7, kind: input, shape index: {}]   ;;  %s24177_s8 = inlined_call_operand.hbm [shape: f32[1,64], index: 8, kind: input, shape index: {}]   ;;  %s24178_s9 = inlined_call_operand.vmem [shape: f32[9,64,128], index: 9, kind: input, shape index: {}]   ;;  %s24179_s10 = inlined_call_operand.hbm [shape: f32[1,128], index: 10, kind: input, shape index: {}]   ;;  %s24180_s11 = inlined_call_operand.hbm [shape: f32[9,128,128], index: 11, kind: input, shape index: {}]   ;;  %s24181_s12 = inlined_call_operand.hbm [shape: f32[1,128], index: 12, kind: input, shape index: {}]   ;;  %s24182_s13 = inlined_call_operand.vmem [shape: f32[64,239], index: 13, kind: input, shape index: {}]   ;;  %s24183_s14 = inlined_call_operand.hbm [shape: f32[16,55], index: 14, kind: input, shape index: {}]   ;;  %s24184_s15 = inlined_call_operand.vmem [shape: f32[4,11], index: 15, kind: input, shape index: {}]   ;;  %s24185_s16 = inlined_call_operand.vmem [shape: f32[2,4,128], index: 16, kind: output, shape index: {}]  }
   0x1   :  { %24483 = sst [smem:[#allocation118_spill]] %s24169_s0 }
   0x2   :  { %24484 = sst [smem:[#allocation119_spill]] %s24171_s2 }
   0x3   :  { %24485 = sst [smem:[#allocation120_spill]] %s24173_s4 }
   0x4   :  { %24486 = sst [smem:[#allocation121_spill]] %s24175_s6 }
   0x5   :  { %24487 = sst [smem:[#allocation122_spill]] %s24184_s15 }
   0x6   :  { %24488 = sst [smem:[#allocation123_spill]] %s24185_s16 }
   0x7   :  { %21 = vsyncpa [#allocation12], 0 }
   0x8   :  { %22 = vsyncpa [#allocation14], 0 }
   0x9   :  { %23 = vsyncpa [#allocation17], 0 }
   0xa   :  { %24 = vsyncpa [#allocation20], 0 }
   0xb   :  { %25 = vsyncpa [#allocation23], 0 }
   0xc   :  { %26 = vsyncpa [#allocation26], 0 }
   0xd   :  { %27 = vsyncpa [#allocation29], 0  ;;  %s20317_s21 = smov 0  }
   0xe LB: > { %24489 = sst [smem:[#allocation37_spill]] %s20210_s21  ;;  %s20212_s22 = smov [#allocation13]   ;;  %s20210_s21 = sphi %s20317_s21, %s33_s21  }
   0xf   : > { %s431_s23 = sshll.u32 %s20212_s22, 4  ;;  %s20323_s24 = sadd.s32 4294967295, %s20210_s21   ;;  %s20328_s23 = int_to_ptr.vmem [resolvable:$true] %s431_s23 }
  0x10   : > { %p14334_p0 = scmp.ge.s32.totalorder %s20210_s21, 1  ;;  %p405_p1 = scmp.lt.s32.totalorder %s20210_s21, 3 }
  0x11   : > { %p24187_p2 = scmp.eq.s32.totalorder %s20323_s24, 0  ;;  %s20213_s26 = smov [#allocation16]  }
  0x12   : > { %p20330_p3 = pnand %p14334_p0, %p405_p1  ;;  %s455_s27 = sshll.u32 %s20213_s26, 4  ;;  %s20336_s27 = int_to_ptr.vmem [resolvable:$true] %s455_s27 }
  0x13   : > { %s20214_s28 = smov [#allocation19]   ;;  %s20215_s0 = smov [#allocation22]  }
  0x14   : > { %s24490_s25 = scalar_select %p20330_p3, 1, 0 }
  0x15   : > { %p19747_p4 = pneg %p20330_p3  ;;  %s479_s29 = sshll.u32 %s20214_s28, 4  ;;  %s20344_s29 = int_to_ptr.vmem [resolvable:$true] %s479_s29 }
  0x16   : > { %s503_s17 = sshll.u32 %s20215_s0, 4  ;;  %s24492_s2 = sld [smem:[#allocation119_spill]]  ;;  %s20346_s17 = int_to_ptr.vmem [resolvable:$true] %s503_s17 }
  0x17   : > { %p20340_p5 = pnand %p24187_p2, %p19747_p4 }
  0x19   : > { %p20356_p7 = pneg %p20340_p5 }
  0x1c   : > { %s19840_s20 = scalar_lea.hbm %s24492_s2, 16 }
  0x1d   : > { %p19841_p6 = scmp.ne.s32.totalorder %s24492_s2, %s19840_s20  ;;  %p19847_p10 = scmp.lt.u32.totalorder %s19840_s20, %s24492_s2 }
  0x1f   : > { %p19843_p8 = pnand %p20356_p7, %p19841_p6 }
  0x21   : > { %p19844_p9 = pneg %p19843_p8 }
  0x23   : > { %p19849_p11 = pnand %p19847_p10, %p19844_p9 }
  0x25   : > { %19852 = shalt.err (!%p19849_p11)
}
  0x26   : > { %s19853_s18 = scalar_lea.vmem %s20328_s23, 16  ;;  %s19860_s19 = scalar_lea.vmem %s20328_s23, 32 }
  0x27   : > { %p19854_p12 = scmp.ne.s32.totalorder %s20328_s23, %s19853_s18  ;;  %p19861_p1 = scmp.lt.s32.totalorder %s20328_s23, %s20328_s23 }
  0x28   : > { %p19862_p4 = scmp.lt.s32.totalorder %s19860_s19, %s19853_s18 }
  0x29   : > { %p19856_p13 = pnand %p19854_p12, %p20356_p7 }
  0x2a   : > { %p19863_p6 = por %p19862_p4, %p19861_p1 }
  0x2b   : > { %p19857_p0 = pneg %p19856_p13 }
  0x2d   : > { %p19864_p8 = pnand %p19863_p6, %p19857_p0 }
  0x2f   : > { %19867 = shalt.err (!%p19864_p8)
}
  0x30   : > { %19753 = dma.hbm_to_vmem [thread:$0]  (!%p20340_p5), %s24492_s2, 16, %s20328_s23, [#allocation14]  }
  0x31   : > { %s24494_s4 = sld [smem:[#allocation120_spill]] }
  0x37   : > { %s19868_s0 = scalar_lea.hbm %s24494_s4, 16 }
  0x38   : > { %p19869_p9 = scmp.ne.s32.totalorder %s24494_s4, %s19868_s0  ;;  %p19875_p12 = scmp.lt.u32.totalorder %s19868_s0, %s24494_s4 }
  0x3a   : > { %p19871_p10 = pnand %p19869_p9, %p20356_p7 }
  0x3c   : > { %p19872_p11 = pneg %p19871_p10 }
  0x3e   : > { %p19877_p13 = pnand %p19875_p12, %p19872_p11 }
  0x40   : > { %19880 = shalt.err (!%p19877_p13)
}
  0x41   : > { %s19881_s23 = scalar_lea.vmem %s20336_s27, 16  ;;  %s19888_s15 = scalar_lea.vmem %s20336_s27, 32 }
  0x42   : > { %p19882_p0 = scmp.ne.s32.totalorder %s20336_s27, %s19881_s23  ;;  %p19889_p6 = scmp.lt.s32.totalorder %s20336_s27, %s20336_s27 }
  0x43   : > { %p19890_p8 = scmp.lt.s32.totalorder %s19888_s15, %s19881_s23 }
  0x44   : > { %p19884_p1 = pnand %p19882_p0, %p20356_p7 }
  0x45   : > { %p19891_p9 = por %p19890_p8, %p19889_p6 }
  0x46   : > { %p19885_p4 = pneg %p19884_p1 }
  0x48   : > { %p19892_p10 = pnand %p19891_p9, %p19885_p4 }
  0x4a   : > { %19895 = shalt.err (!%p19892_p10)
}
  0x4b   : > { %19759 = dma.hbm_to_vmem [thread:$0]  (!%p20340_p5), %s24494_s4, 16, %s20336_s27, [#allocation17]  }
  0x4c   : > { %s24495_s6 = sld [smem:[#allocation121_spill]] }
  0x52   : > { %s19896_s26 = scalar_lea.hbm %s24495_s6, 16 }
  0x53   : > { %p19897_p11 = scmp.ne.s32.totalorder %s24495_s6, %s19896_s26  ;;  %p19903_p0 = scmp.lt.u32.totalorder %s19896_s26, %s24495_s6 }
  0x55   : > { %p19899_p12 = pnand %p19897_p11, %p20356_p7 }
  0x57   : > { %p19900_p13 = pneg %p19899_p12 }
  0x59   : > { %p19905_p1 = pnand %p19903_p0, %p19900_p13 }
  0x5b   : > { %19908 = shalt.err (!%p19905_p1)
}
  0x5c   : > { %s19909_s27 = scalar_lea.vmem %s20344_s29, 16  ;;  %s19916_s15 = scalar_lea.vmem %s20344_s29, 32 }
  0x5d   : > { %p19910_p4 = scmp.ne.s32.totalorder %s20344_s29, %s19909_s27  ;;  %p19917_p9 = scmp.lt.s32.totalorder %s20344_s29, %s20344_s29 }
  0x5e   : > { %p19918_p10 = scmp.lt.s32.totalorder %s19916_s15, %s19909_s27 }
  0x5f   : > { %p19912_p6 = pnand %p19910_p4, %p20356_p7 }
  0x60   : > { %p19919_p11 = por %p19918_p10, %p19917_p9 }
  0x61   : > { %p19913_p8 = pneg %p19912_p6 }
  0x63   : > { %p19920_p12 = pnand %p19919_p11, %p19913_p8 }
  0x65   : > { %19923 = shalt.err (!%p19920_p12)
}
  0x66   : > { %19765 = dma.hbm_to_vmem [thread:$0]  (!%p20340_p5), %s24495_s6, 16, %s20344_s29, [#allocation20]  }
  0x67   : > { %s19924_s26 = scalar_lea.hbm %s24177_s8, 16 }
  0x68   : > { %p19925_p13 = scmp.ne.s32.totalorder %s24177_s8, %s19924_s26  ;;  %p19931_p4 = scmp.lt.u32.totalorder %s19924_s26, %s24177_s8 }
  0x6a   : > { %p19927_p0 = pnand %p19925_p13, %p20356_p7 }
  0x6c   : > { %p19928_p1 = pneg %p19927_p0 }
  0x6e   : > { %p19933_p6 = pnand %p19931_p4, %p19928_p1 }
  0x70   : > { %19936 = shalt.err (!%p19933_p6)
}
  0x71   : > { %s19937_s29 = scalar_lea.vmem %s20346_s17, 16  ;;  %s19944_s27 = scalar_lea.vmem %s20346_s17, 32 }
  0x72   : > { %p19938_p8 = scmp.ne.s32.totalorder %s20346_s17, %s19937_s29  ;;  %p19945_p11 = scmp.lt.s32.totalorder %s20346_s17, %s20346_s17 }
  0x73   : > { %p19946_p12 = scmp.lt.s32.totalorder %s19944_s27, %s19937_s29 }
  0x74   : > { %p19940_p9 = pnand %p19938_p8, %p20356_p7 }
  0x75   : > { %p19947_p13 = por %p19946_p12, %p19945_p11 }
  0x76   : > { %p19941_p10 = pneg %p19940_p9 }
  0x78   : > { %p19948_p0 = pnand %p19947_p13, %p19941_p10 }
  0x7a   : > { %19951 = shalt.err (!%p19948_p0)
}
  0x7b   : > { %19771 = dma.hbm_to_vmem [thread:$0]  (!%p20340_p5), %s24177_s8, 16, %s20346_s17, [#allocation23]  }
  0x7c   : > { %s20216_s21 = smov [#allocation25]   ;;  %s20217_s22 = smov [#allocation11]  }
  0x7d   : > { %s527_s20 = sshll.u32 %s20216_s21, 4  ;;  %s417_s26 = sshll.u32 %s20217_s22, 4  ;;  %s528_s20 = int_to_ptr.vmem [resolvable:$true] %s527_s20  ;;  %s418_s26 = int_to_ptr.vmem [resolvable:$true] %s417_s26 }
  0x7e   : > { %s19952_s19 = scalar_lea.hbm %s24180_s11, 18432 }
  0x7f   : > { %p19953_p1 = scmp.ne.s32.totalorder %s24180_s11, %s19952_s19  ;;  %p19959_p8 = scmp.lt.u32.totalorder %s19952_s19, %s24180_s11 }
  0x81   : > { %p19955_p4 = pnand %p19953_p1, %p20356_p7 }
  0x83   : > { %p19956_p6 = pneg %p19955_p4 }
  0x85   : > { %p19961_p9 = pnand %p19959_p8, %p19956_p6 }
  0x87   : > { %19964 = shalt.err (!%p19961_p9)
}
  0x88   : > { %s19965_s17 = scalar_lea.vmem %s528_s20, 18432  ;;  %p19973_p13 = scmp.lt.s32.totalorder %s528_s20, %s528_s20 }
  0x89   : > { %p19966_p10 = scmp.ne.s32.totalorder %s528_s20, %s19965_s17  ;;  %p19974_p0 = scmp.lt.s32.totalorder %s19965_s17, %s19965_s17 }
  0x8b   : > { %p19968_p11 = pnand %p19966_p10, %p20356_p7  ;;  %p19975_p2 = por %p19974_p0, %p19973_p13 }
  0x8d   : > { %p19969_p12 = pneg %p19968_p11 }
  0x8f   : > { %p19976_p3 = pnand %p19975_p2, %p19969_p12 }
  0x91   : > { %19979 = shalt.err (!%p19976_p3)
}
  0x92   : > { %s24189_s16 = smov 128   ;;  %s24191_s21 = smov 8  }
  0x93   : > { %19777 = dma.hbm_to_vmem [thread:$0]  (!%p20340_p5), %s24180_s11, 18432, %s528_s20, [#allocation26], %s24189_s16, %s24189_s16, %s24191_s21  }
  0x94   : > { %s19980_s23 = scalar_lea.hbm %s24170_s1, 576 }
  0x95   : > { %p19981_p2 = scmp.ne.s32.totalorder %s24170_s1, %s19980_s23  ;;  %p19987_p4 = scmp.lt.u32.totalorder %s19980_s23, %s24170_s1 }
  0x97   : > { %p19983_p3 = pnand %p19981_p2, %p20356_p7 }
  0x99   : > { %p19984_p1 = pneg %p19983_p3 }
  0x9b   : > { %p19989_p6 = pnand %p19987_p4, %p19984_p1 }
  0x9d   : > { %19992 = shalt.err (!%p19989_p6)
}
  0x9e   : > { %s19993_s22 = scalar_lea.vmem %s418_s26, 576  ;;  %p20001_p11 = scmp.lt.s32.totalorder %s418_s26, %s418_s26 }
  0x9f   : > { %p19994_p8 = scmp.ne.s32.totalorder %s418_s26, %s19993_s22  ;;  %p20002_p12 = scmp.lt.s32.totalorder %s19993_s22, %s19993_s22 }
  0xa1   : > { %p19996_p9 = pnand %p19994_p8, %p20356_p7  ;;  %p20003_p13 = por %p20002_p12, %p20001_p11 }
  0xa3   : > { %p19997_p10 = pneg %p19996_p9 }
  0xa5   : > { %p20004_p0 = pnand %p20003_p13, %p19997_p10 }
  0xa7   : > { %20007 = shalt.err (!%p20004_p0)
}
  0xa8   : > { %s20220_s20 = smov 64   ;;  %s20221_s0 = smov 4  }
  0xa9   : > { %19750 = dma.hbm_to_vmem [thread:$0]  (!%p20340_p5), %s24170_s1, 576, %s418_s26, [#allocation12], %s20220_s20, %s20220_s20, %s20221_s0  }
  0xaa   : > { %s20222_s23 = smov [#allocation15]   ;;  %s20223_s27 = smov [#allocation18]  }
  0xab   : > { %s441_s29 = sshll.u32 %s20222_s23, 4  ;;  %s465_s15 = sshll.u32 %s20223_s27, 4  ;;  %s442_s29 = int_to_ptr.vmem [resolvable:$true] %s441_s29  ;;  %s466_s15 = int_to_ptr.vmem [resolvable:$true] %s465_s15 }
  0xac   : > { %s20008_s22 = scalar_lea.hbm %s24172_s3, 4608 }
  0xad   : > { %p20009_p2 = scmp.ne.s32.totalorder %s24172_s3, %s20008_s22  ;;  %p20015_p4 = scmp.lt.u32.totalorder %s20008_s22, %s24172_s3 }
  0xaf   : > { %p20011_p3 = pnand %p20009_p2, %p20356_p7 }
  0xb1   : > { %p20012_p1 = pneg %p20011_p3 }
  0xb3   : > { %p20017_p6 = pnand %p20015_p4, %p20012_p1 }
  0xb5   : > { %20020 = shalt.err (!%p20017_p6)
}
  0xb6   : > { %s20021_s26 = scalar_lea.vmem %s442_s29, 4608  ;;  %p20029_p11 = scmp.lt.s32.totalorder %s442_s29, %s442_s29 }
  0xb7   : > { %p20022_p8 = scmp.ne.s32.totalorder %s442_s29, %s20021_s26  ;;  %p20030_p12 = scmp.lt.s32.totalorder %s20021_s26, %s20021_s26 }
  0xb9   : > { %p20024_p9 = pnand %p20022_p8, %p20356_p7  ;;  %p20031_p13 = por %p20030_p12, %p20029_p11 }
  0xbb   : > { %p20025_p10 = pneg %p20024_p9 }
  0xbd   : > { %p20032_p0 = pnand %p20031_p13, %p20025_p10 }
  0xbf   : > { %20035 = shalt.err (!%p20032_p0)
}
  0xc0   : > { %s24496_s2 = smov 8   ;;  %s24497_s16 = smov 128  }
  0xc1   : > { %19756 = dma.hbm_to_vmem [thread:$0]  (!%p20340_p5), %s24172_s3, 4608, %s442_s29, [#allocation14], %s24497_s16, %s24497_s16, %s24496_s2  }
  0xc2   : > { %s20036_s0 = scalar_lea.hbm %s24174_s5, 4608 }
  0xc3   : > { %p20037_p2 = scmp.ne.s32.totalorder %s24174_s5, %s20036_s0  ;;  %p20043_p4 = scmp.lt.u32.totalorder %s20036_s0, %s24174_s5 }
  0xc5   : > { %p20039_p3 = pnand %p20037_p2, %p20356_p7 }
  0xc7   : > { %p20040_p1 = pneg %p20039_p3 }
  0xc9   : > { %p20045_p6 = pnand %p20043_p4, %p20040_p1 }
  0xcb   : > { %20048 = shalt.err (!%p20045_p6)
}
  0xcc   : > { %s20049_s17 = scalar_lea.vmem %s466_s15, 4608  ;;  %p20057_p11 = scmp.lt.s32.totalorder %s466_s15, %s466_s15 }
  0xcd   : > { %p20050_p8 = scmp.ne.s32.totalorder %s466_s15, %s20049_s17  ;;  %p20058_p12 = scmp.lt.s32.totalorder %s20049_s17, %s20049_s17 }
  0xcf   : > { %p20052_p9 = pnand %p20050_p8, %p20356_p7  ;;  %p20059_p13 = por %p20058_p12, %p20057_p11 }
  0xd1   : > { %p20053_p10 = pneg %p20052_p9 }
  0xd3   : > { %p20060_p0 = pnand %p20059_p13, %p20053_p10 }
  0xd5   : > { %20063 = shalt.err (!%p20060_p0)
}
  0xd6   : > { %19762 = dma.hbm_to_vmem [thread:$0]  (!%p20340_p5), %s24174_s5, 4608, %s466_s15, [#allocation17], %s24497_s16, %s24497_s16, %s24496_s2  }
  0xd7   : > { %s20224_s26 = smov [#allocation21]   ;;  %s20225_s6 = smov [#allocation24]  }
  0xd8   : > { %s489_s4 = sshll.u32 %s20224_s26, 4  ;;  %s517_s21 = sshll.u32 %s20225_s6, 4  ;;  %s490_s4 = int_to_ptr.vmem [resolvable:$true] %s489_s4  ;;  %s518_s21 = int_to_ptr.vmem [resolvable:$true] %s517_s21 }
  0xd9   : > { %s20064_s18 = scalar_lea.hbm %s24176_s7, 9216 }
  0xda   : > { %p20065_p2 = scmp.ne.s32.totalorder %s24176_s7, %s20064_s18  ;;  %p20071_p4 = scmp.lt.u32.totalorder %s20064_s18, %s24176_s7 }
  0xdc   : > { %p20067_p3 = pnand %p20065_p2, %p20356_p7 }
  0xde   : > { %p20068_p1 = pneg %p20067_p3 }
  0xe0   : > { %p20073_p6 = pnand %p20071_p4, %p20068_p1 }
  0xe2   : > { %20076 = shalt.err (!%p20073_p6)
}
  0xe3   : > { %s20077_s15 = scalar_lea.vmem %s490_s4, 9216  ;;  %p20085_p11 = scmp.lt.s32.totalorder %s490_s4, %s490_s4 }
  0xe4   : > { %p20078_p8 = scmp.ne.s32.totalorder %s490_s4, %s20077_s15  ;;  %p20086_p12 = scmp.lt.s32.totalorder %s20077_s15, %s20077_s15 }
  0xe6   : > { %p20080_p9 = pnand %p20078_p8, %p20356_p7  ;;  %p20087_p13 = por %p20086_p12, %p20085_p11 }
  0xe8   : > { %p20081_p10 = pneg %p20080_p9 }
  0xea   : > { %p20088_p0 = pnand %p20087_p13, %p20081_p10 }
  0xec   : > { %20091 = shalt.err (!%p20088_p0)
}
  0xed   : > { %19768 = dma.hbm_to_vmem [thread:$0]  (!%p20340_p5), %s24176_s7, 9216, %s490_s4, [#allocation20], %s24497_s16, %s24497_s16, %s24496_s2  }
  0xee   : > { %s20092_s20 = scalar_lea.hbm %s24179_s10, 16 }
  0xef   : > { %p20093_p2 = scmp.ne.s32.totalorder %s24179_s10, %s20092_s20  ;;  %p20099_p4 = scmp.lt.u32.totalorder %s20092_s20, %s24179_s10 }
  0xf1   : > { %p20095_p3 = pnand %p20093_p2, %p20356_p7 }
  0xf3   : > { %p20096_p1 = pneg %p20095_p3 }
  0xf5   : > { %p20101_p6 = pnand %p20099_p4, %p20096_p1 }
  0xf7   : > { %20104 = shalt.err (!%p20101_p6)
}
  0xf8   : > { %s20105_s27 = scalar_lea.vmem %s518_s21, 16  ;;  %s20112_s4 = scalar_lea.vmem %s518_s21, 32 }
  0xf9   : > { %p20106_p8 = scmp.ne.s32.totalorder %s518_s21, %s20105_s27  ;;  %p20113_p11 = scmp.lt.s32.totalorder %s518_s21, %s518_s21 }
  0xfa   : > { %p20114_p12 = scmp.lt.s32.totalorder %s20112_s4, %s20105_s27 }
  0xfb   : > { %p20108_p9 = pnand %p20106_p8, %p20356_p7 }
  0xfc   : > { %p20115_p13 = por %p20114_p12, %p20113_p11 }
  0xfd   : > { %p20109_p10 = pneg %p20108_p9 }
  0xff   : > { %p20116_p0 = pnand %p20115_p13, %p20109_p10 }
 0x101   : > { %20119 = shalt.err (!%p20116_p0)
}
 0x102   : > { %19774 = dma.hbm_to_vmem [thread:$0]  (!%p20340_p5), %s24179_s10, 16, %s518_s21, [#allocation23]  }
 0x103   : > { %s20226_s29 = smov [#allocation27]   ;;  %s20227_s26 = smov [#allocation28]  }
 0x104   : > { %s541_s22 = sshll.u32 %s20226_s29, 4  ;;  %s554_s6 = sshll.u32 %s20227_s26, 4  ;;  %s542_s22 = int_to_ptr.vmem [resolvable:$true] %s541_s22  ;;  %s555_s6 = int_to_ptr.vmem [resolvable:$true] %s554_s6 }
 0x105   : > { %s20120_s18 = scalar_lea.hbm %s24181_s12, 16 }
 0x106   : > { %p20121_p2 = scmp.ne.s32.totalorder %s24181_s12, %s20120_s18  ;;  %p20127_p4 = scmp.lt.u32.totalorder %s20120_s18, %s24181_s12 }
 0x108   : > { %p20123_p3 = pnand %p20121_p2, %p20356_p7 }
 0x10a   : > { %p20124_p1 = pneg %p20123_p3 }
 0x10c   : > { %p20129_p6 = pnand %p20127_p4, %p20124_p1 }
 0x10e   : > { %20132 = shalt.err (!%p20129_p6)
}
 0x10f   : > { %s20133_s21 = scalar_lea.vmem %s542_s22, 16  ;;  %s20140_s17 = scalar_lea.vmem %s542_s22, 32 }
 0x110   : > { %p20134_p8 = scmp.ne.s32.totalorder %s542_s22, %s20133_s21  ;;  %p20141_p11 = scmp.lt.s32.totalorder %s542_s22, %s542_s22 }
 0x111   : > { %p20142_p12 = scmp.lt.s32.totalorder %s20140_s17, %s20133_s21 }
 0x112   : > { %p20136_p9 = pnand %p20134_p8, %p20356_p7 }
 0x113   : > { %p20143_p13 = por %p20142_p12, %p20141_p11 }
 0x114   : > { %p20137_p10 = pneg %p20136_p9 }
 0x116   : > { %p20144_p0 = pnand %p20143_p13, %p20137_p10 }
 0x118   : > { %20147 = shalt.err (!%p20144_p0)
}
 0x119   : > { %19780 = dma.hbm_to_vmem [thread:$0]  (!%p20340_p5), %s24181_s12, 16, %s542_s22, [#allocation26]  }
 0x11a   : > { %s20148_s0 = scalar_lea.hbm %s24183_s14, 256 }
 0x11b   : > { %p20149_p2 = scmp.ne.s32.totalorder %s24183_s14, %s20148_s0  ;;  %p20155_p4 = scmp.lt.u32.totalorder %s20148_s0, %s24183_s14 }
 0x11d   : > { %p20151_p3 = pnand %p20149_p2, %p20356_p7 }
 0x11f   : > { %p20152_p1 = pneg %p20151_p3 }
 0x121   : > { %p20157_p6 = pnand %p20155_p4, %p20152_p1 }
 0x123   : > { %20160 = shalt.err (!%p20157_p6)
}
 0x124   : > { %s20161_s4 = scalar_lea.vmem %s555_s6, 256  ;;  %p20169_p11 = scmp.lt.s32.totalorder %s555_s6, %s555_s6 }
 0x125   : > { %p20162_p8 = scmp.ne.s32.totalorder %s555_s6, %s20161_s4  ;;  %p20170_p12 = scmp.lt.s32.totalorder %s20161_s4, %s20161_s4 }
 0x127   : > { %p20164_p9 = pnand %p20162_p8, %p20356_p7  ;;  %p20171_p13 = por %p20170_p12, %p20169_p11 }
 0x129   : > { %p20165_p10 = pneg %p20164_p9 }
 0x12b   : > { %p20172_p0 = pnand %p20171_p13, %p20165_p10 }
 0x12d   : > { %20175 = shalt.err (!%p20172_p0)
}
 0x12e   : > { %19783 = dma.hbm_to_vmem [thread:$0]  (!%p20340_p5), %s24183_s14, 256, %s555_s6, [#allocation29], %s24497_s16, %s24497_s16, %s24496_s2  }
 0x12f   : > { %p24498_p2 = scmp.ne.s32.totalorder %s24490_s25, 0 }
 0x131   : > { %581 = sbr.rel (%p24498_p2) target bundleno = 4065 (0xfe1), region = 84 }
 0x138   : > { %p24499_p7 = scmp.eq.s32.totalorder %s20323_s24, 0 }
 0x13a   : > { %20181 = dma.done.wait (%p24499_p7), [#allocation12], 576   ;;  %p24500_p3 = pmov %p24499_p7 }
 0x13c   : > { %20183 = vsyncadd (%p24500_p3), [#allocation12], 4294966720  ;;  %p24501_p1 = pmov %p24500_p3 }
 0x13e   : > { %20185 = dma.done.wait (%p24501_p1), [#allocation14], 4624   ;;  %p24502_p4 = pmov %p24501_p1 }
 0x13f   : > { %p24503_p6 = pmov %p24501_p1 }
 0x140   : > { %20187 = vsyncadd (%p24502_p4), [#allocation14], 4294962672 }
 0x141   : > { %20189 = dma.done.wait (%p24503_p6), [#allocation17], 4624   ;;  %p24504_p5 = pmov %p24501_p1 }
 0x142   : > { %p24505_p8 = pmov %p24501_p1 }
 0x143   : > { %20191 = vsyncadd (%p24504_p5), [#allocation17], 4294962672 }
 0x144   : > { %20193 = dma.done.wait (%p24505_p8), [#allocation20], 9232   ;;  %p24506_p9 = pmov %p24501_p1 }
 0x145   : > { %p24507_p10 = pmov %p24501_p1 }
 0x146   : > { %20195 = vsyncadd (%p24506_p9), [#allocation20], 4294958064 }
 0x147   : > { %20197 = dma.done.wait (%p24507_p10), [#allocation23], 32   ;;  %p24508_p11 = pmov %p24501_p1 }
 0x148   : > { %p24509_p12 = pmov %p24501_p1 }
 0x149   : > { %20199 = vsyncadd (%p24508_p11), [#allocation23], 4294967264 }
 0x14a   : > { %20201 = dma.done.wait (%p24509_p12), [#allocation26], 18448   ;;  %p24510_p13 = pmov %p24501_p1 }
 0x14b   : > { %p24511_p0 = pmov %p24501_p1 }
 0x14c   : > { %20203 = vsyncadd (%p24510_p13), [#allocation26], 4294948848 }
 0x14d   : > { %20205 = dma.done.wait (%p24511_p0), [#allocation29], 256   ;;  %p24512_p2 = pmov %p24511_p0 }
 0x14e   : > { %v683_v0 = vlaneseq  ;;  %vm24198_vm0 = vcmask 31744   ;;  %p674_p7 = scmp.lt.s32.totalorder %s20323_s24, 1  ;;  %v20228_v1 = vmov 0.0   ;;  %vm24193_vm1 = vcmask 1043456   ;;  %s24514_s2 = sld [smem:[#allocation118_spill]] }
 0x14f   : > { %20207 = vsyncadd (%p24512_p2), [#allocation29], 4294967040  ;;  %1337 = vst.msk [vmem:[#allocation2] sm:$0xff] %vm24198_vm0, %v20228_v1  ;;  %v24516_v5 = vmov 0  ;;  %v20664_v6 = vld [vmem:[#allocation11] sm:$0xf] }
 0x150   : > { %1338 = vst.msk [vmem:[#allocation2 + $0x8] sm:$0xff] %vm24198_vm0, %v20228_v1  ;;  %1339 = vst.msk [vmem:[#allocation2 + $0x10] sm:$0xff] %vm24198_vm0, %v20228_v1  ;;  %v20645_v2 = vshrl.u32 %v683_v0, 7  ;;  %s25293_s24 = smov (!%p674_p7, %s20323_s24), 1  ;;  %16397 = vmatprep.subr.msk.mxu0 %vm24193_vm1, %v20664_v6  ;;  %v2317_v12 = vld [vmem:[#allocation11 + $0x8] sm:$0xf] }
 0x151   : > { %1372 = vst.msk [vmem:[#allocation2 + $0x118] sm:$0xff] %vm24198_vm0, %v20228_v1  ;;  %1373 = vst.msk [vmem:[#allocation2 + $0x120] sm:$0xff] %vm24198_vm0, %v20228_v1  ;;  %s15209_s25 = sshll.u32 %s25293_s24, 8  ;;  %16398 = vmatpush3.msk.msra.mxu0 %vm24193_vm1, %v20664_v6  ;;  %v24521_v29 = vmov 0  ;;  %v24523_v40 = vmov 0  ;;  %v24525_v47 = vmov 0 }
 0x152   : > { %13180 = vst [vmem:[#allocation9] sm:$0xff] %v20228_v1  ;;  %13183 = vst [vmem:[#allocation9 + $0x18] sm:$0x1f] %v20228_v1  ;;  %v720_v3 = vand.u32 15, %v20645_v2  ;;  %v20658_v4 = vadd.s32 16, %v20645_v2  ;;  %v20669_v9 = vadd.s32 32, %v20645_v2  ;;  %16447 = vmatprep.subr.msk.mxu0 %vm24193_vm1, %v2317_v12 }
 0x153   : > { %24513 = vst [vmem:[#allocation38_spill] sm:$0xff] %v20645_v2  ;;  %24518 = vst [vmem:[#allocation40_spill] sm:$0xff] %v20664_v6  ;;  %v20683_v17 = vadd.s32 48, %v20645_v2  ;;  %v692_v31 = vadd.s32 64, %v20645_v2  ;;  %v694_v50 = vadd.s32 80, %v20645_v2  ;;  %v24527_v54 = vmov 0 }
 0x154   : > { %s20655_s16 = scalar_lea.vmem %s24514_s2, %s15209_s25  ;;  %24515 = vst [vmem:[#allocation39_spill] sm:$0xff] %v20658_v4  ;;  %vm20660_vm2 = vcmp.ne.s32.totalorder %v720_v3, 0  ;;  %24519 = vst [vmem:[#allocation41_spill] sm:$0xff] %v20669_v9  ;;  %v734_v14 = vand.u32 15, %v20658_v4  ;;  %v748_v22 = vand.u32 15, %v20669_v9  ;;  %v696_v57 = vadd.s32 96, %v20645_v2 }
 0x155   : > { %v24517_v5 = vsel %vm20660_vm2, 4294967295, %v24516_v5  ;;  %v1304_v7 = vld [vmem:[%s20655_s16] sm:$0xff]  ;;  %v1305_v8 = vld [vmem:[%s20655_s16 + $0x8] sm:$0xff]  ;;  %v1306_v15 = vld [vmem:[%s20655_s16 + $0x10] sm:$0xff]  ;;  %24520 = vst [vmem:[#allocation42_spill] sm:$0xff] %v20683_v17  ;;  %v762_v30 = vand.u32 15, %v20683_v17 }
 0x156   : > { %1340 = vst.msk [vmem:[#allocation2 + $0x18] sm:$0xff] %vm24198_vm0, %v1304_v7  ;;  %1341 = vst.msk [vmem:[#allocation2 + $0x20] sm:$0xff] %vm24198_vm0, %v1305_v8  ;;  %v1307_v16 = vld [vmem:[%s20655_s16 + $0x18] sm:$0xff]  ;;  %v1308_v18 = vld [vmem:[%s20655_s16 + $0x20] sm:$0xff]  ;;  %vm20709_vm3 = vcmp.ne.s32.totalorder %v734_v14, 0  ;;  %vm20731_vm4 = vcmp.ne.s32.totalorder %v748_v22, 0 }
 0x157   : > { %v1376_v10 = vld [vmem:[#allocation2 + $0x7] sm:$0xff]  ;;  %v1377_v11 = vld [vmem:[#allocation2 + $0xf] sm:$0xff]  ;;  %1342 = vst.msk [vmem:[#allocation2 + $0x28] sm:$0xff] %vm24198_vm0, %v1306_v15  ;;  %1343 = vst.msk [vmem:[#allocation2 + $0x30] sm:$0xff] %vm24198_vm0, %v1307_v16  ;;  %v24522_v29 = vsel %vm20709_vm3, 4294967295, %v24521_v29  ;;  %v24524_v40 = vsel %vm20731_vm4, 4294967295, %v24523_v40 }
 0x158   : > { %v1472_v13 = vsel %vm20660_vm2, %v1376_v10, 0.0  ;;  %1344 = vst.msk [vmem:[#allocation2 + $0x38] sm:$0xff] %vm24198_vm0, %v1308_v18  ;;  %v1309_v19 = vld [vmem:[%s20655_s16 + $0x28] sm:$0xff]  ;;  %v1310_v20 = vld [vmem:[%s20655_s16 + $0x30] sm:$0xff]  ;;  %v1311_v21 = vld [vmem:[%s20655_s16 + $0x38] sm:$0xff]  ;;  %vm20749_vm5 = vcmp.ne.s32.totalorder %v762_v30, 0 }
 0x159   : > { %16399 = vmatprep.mubr.msk.f32.mxu0 %vm24198_vm0, %v1472_v13  ;;  %1345 = vst.msk [vmem:[#allocation2 + $0x40] sm:$0xff] %vm24198_vm0, %v1309_v19  ;;  %1346 = vst.msk [vmem:[#allocation2 + $0x48] sm:$0xff] %vm24198_vm0, %v1310_v20  ;;  %v1312_v23 = vld [vmem:[%s20655_s16 + $0x40] sm:$0xff]  ;;  %v1313_v24 = vld [vmem:[%s20655_s16 + $0x48] sm:$0xff]  ;;  %v24526_v47 = vsel %vm20749_vm5, 4294967295, %v24525_v47  ;;  %v776_v49 = vand.u32 15, %v692_v31 }
 0x15a   : > { %16400 = vmatmul.mubr.msk.f32.vlgmr.msra.gmra.mrb[0].mxu0 %vm24198_vm0, %v1377_v11  ;;  %1347 = vst.msk [vmem:[#allocation2 + $0x50] sm:$0xff] %vm24198_vm0, %v1311_v21  ;;  %v1314_v25 = vld [vmem:[%s20655_s16 + $0x50] sm:$0xff]  ;;  %1348 = vst.msk [vmem:[#allocation2 + $0x58] sm:$0xff] %vm24198_vm0, %v1312_v23  ;;  %v1315_v26 = vld [vmem:[%s20655_s16 + $0x58] sm:$0xff]  ;;  %v790_v56 = vand.u32 15, %v694_v50  ;;  %v24529_v60 = vmov 0 }
 0x15b   : > { %16448 = vmatpush3.msk.msra.mxu0 %vm24193_vm1, %v2317_v12  ;;  %1349 = vst.msk [vmem:[#allocation2 + $0x60] sm:$0xff] %vm24198_vm0, %v1313_v24  ;;  %1350 = vst.msk [vmem:[#allocation2 + $0x68] sm:$0xff] %vm24198_vm0, %v1314_v25  ;;  %v1316_v27 = vld [vmem:[%s20655_s16 + $0x60] sm:$0xff]  ;;  %v1317_v28 = vld [vmem:[%s20655_s16 + $0x68] sm:$0xff]  ;;  %vm20770_vm6 = vcmp.ne.s32.totalorder %v776_v49, 0  ;;  %v804_v62 = vand.u32 15, %v696_v57 }
 0x15c   : > { %1351 = vst.msk [vmem:[#allocation2 + $0x70] sm:$0xff] %vm24198_vm0, %v1315_v26  ;;  %1352 = vst.msk [vmem:[#allocation2 + $0x78] sm:$0xff] %vm24198_vm0, %v1316_v27  ;;  %v1318_v32 = vld [vmem:[%s20655_s16 + $0x70] sm:$0xff]  ;;  %v1319_v33 = vld [vmem:[%s20655_s16 + $0x78] sm:$0xff]  ;;  %v24528_v54 = vsel %vm20770_vm6, 4294967295, %v24527_v54  ;;  %vm20785_vm7 = vcmp.ne.s32.totalorder %v790_v56, 0 }
 0x15d   : > { %1353 = vst.msk [vmem:[#allocation2 + $0x80] sm:$0xff] %vm24198_vm0, %v1317_v28  ;;  %v1320_v34 = vld [vmem:[%s20655_s16 + $0x80] sm:$0xff]  ;;  %1354 = vst.msk [vmem:[#allocation2 + $0x88] sm:$0xff] %vm24198_vm0, %v1318_v32  ;;  %v1321_v35 = vld [vmem:[%s20655_s16 + $0x88] sm:$0xff]  ;;  %v24530_v60 = vsel %vm20785_vm7, 4294967295, %v24529_v60  ;;  %v698_v63 = vadd.s32 112, %v20645_v2 }
 0x15e   : > { %1355 = vst.msk [vmem:[#allocation2 + $0x90] sm:$0xff] %vm24198_vm0, %v1319_v33  ;;  %1356 = vst.msk [vmem:[#allocation2 + $0x98] sm:$0xff] %vm24198_vm0, %v1320_v34  ;;  %v1322_v36 = vld [vmem:[%s20655_s16 + $0x90] sm:$0xff]  ;;  %v1323_v37 = vld [vmem:[%s20655_s16 + $0x98] sm:$0xff]  ;;  %vm20804_vm8 = vcmp.ne.s32.totalorder %v804_v62, 0  ;;  %v24531_v7 = vmov 0 }
 0x15f   : > { %v20727_v38 = vld [vmem:[#allocation2 + $0x17] sm:$0xff]  ;;  %v20729_v39 = vld [vmem:[#allocation2 + $0x1f] sm:$0xff]  ;;  %1357 = vst.msk [vmem:[#allocation2 + $0xa0] sm:$0xff] %vm24198_vm0, %v1321_v35  ;;  %1358 = vst.msk [vmem:[#allocation2 + $0xa8] sm:$0xff] %vm24198_vm0, %v1322_v36  ;;  %v24532_v7 = vsel %vm20804_vm8, 4294967295, %v24531_v7  ;;  %v818_v10 = vand.u32 15, %v698_v63 }
 0x160   : > { %1359 = vst.msk [vmem:[#allocation2 + $0xb0] sm:$0xff] %vm24198_vm0, %v1323_v37  ;;  %v1324_v41 = vld [vmem:[%s20655_s16 + $0xa0] sm:$0xff]  ;;  %v1474_v42 = vsel %vm20709_vm3, %v20727_v38, 0.0  ;;  %v1325_v43 = vld [vmem:[%s20655_s16 + $0xa8] sm:$0xff]  ;;  %v1326_v44 = vld [vmem:[%s20655_s16 + $0xb0] sm:$0xff]  ;;  %v700_v11 = vadd.s32 128, %v20645_v2 }
 0x161   : > { %1360 = vst.msk [vmem:[#allocation2 + $0xb8] sm:$0xff] %vm24198_vm0, %v1324_v41  ;;  %v1327_v45 = vld [vmem:[%s20655_s16 + $0xb8] sm:$0xff]  ;;  %16402 = vmatprep.mubr.msk.f32.mxu0 %vm24198_vm0, %v1474_v42  ;;  %v20747_v46 = vld [vmem:[#allocation2 + $0x27] sm:$0xff]  ;;  %1361 = vst.msk [vmem:[#allocation2 + $0xc0] sm:$0xff] %vm24198_vm0, %v1325_v43  ;;  %vm20819_vm9 = vcmp.ne.s32.totalorder %v818_v10, 0  ;;  %v24534_v14 = vmov 0 }
 0x162   : > { %v20753_v48 = vld [vmem:[#allocation2 + $0x37] sm:$0xff]  ;;  %1362 = vst.msk [vmem:[#allocation2 + $0xc8] sm:$0xff] %vm24198_vm0, %v1326_v44  ;;  %1363 = vst.msk [vmem:[#allocation2 + $0xd0] sm:$0xff] %vm24198_vm0, %v1327_v45  ;;  %16403 = vmatmul.mubr.msk.f32.gmra.mrb[2].mxu0 %vm24198_vm0, %v20729_v39  ;;  %v1476_v51 = vsel %vm20731_vm4, %v20747_v46, 0.0  ;;  %v20765_v52 = vld [vmem:[#allocation2 + $0x2f] sm:$0xff]  ;;  %v24535_v14 = vsel %vm20819_vm9, 4294967295, %v24534_v14 }
 0x163   : > { %16405 = vmatprep.mubr.msk.f32.mxu0 %vm24198_vm0, %v1476_v51  ;;  %v1478_v53 = vsel %vm20749_vm5, %v20753_v48, 0.0  ;;  %v20774_v55 = vld [vmem:[#allocation2 + $0x47] sm:$0xff]  ;;  %v20780_v58 = vld [vmem:[#allocation2 + $0x3f] sm:$0xff]  ;;  %v20789_v61 = vld [vmem:[#allocation2 + $0x57] sm:$0xff]  ;;  %24533 = vst [vmem:[#allocation43_spill] sm:$0xff] %v24532_v7  ;;  %v832_v16 = vand.u32 15, %v700_v11 }
 0x164   : > { %v1480_v59 = vsel %vm20770_vm6, %v20774_v55, 0.0  ;;  %v20792_v0 = vld [vmem:[#allocation11 + $0xc] sm:$0xf]  ;;  %v20799_v1 = vld [vmem:[#allocation2 + $0x4f] sm:$0xff]  ;;  %v1482_v3 = vsel %vm20785_vm7, %v20789_v61, 0.0  ;;  %v20808_v8 = vld [vmem:[#allocation2 + $0x67] sm:$0xff] }
 0x165   : > { %16497 = vmatprep.subr.msk.mxu0 %vm24193_vm1, %v20792_v0  ;;  %v20814_v12 = vld [vmem:[#allocation2 + $0x5f] sm:$0xff]  ;;  %v1484_v13 = vsel %vm20804_vm8, %v20808_v8, 0.0  ;;  %24536 = vst [vmem:[#allocation44_spill] sm:$0xff] %v24535_v14  ;;  %v20823_v15 = vld [vmem:[#allocation2 + $0x77] sm:$0xff]  ;;  %v702_v18 = vadd.s32 144, %v20645_v2  ;;  %v1329_v20 = vld [vmem:[%s20655_s16 + $0xc8] sm:$0xff] }
 0x166   : > { %16406 = vmatmul.mubr.msk.f32.gmra.mrb[4].mxu0 %vm24198_vm0, %v20765_v52  ;;  %v1328_v19 = vld [vmem:[%s20655_s16 + $0xc0] sm:$0xff]  ;;  %v1330_v21 = vld [vmem:[%s20655_s16 + $0xd0] sm:$0xff]  ;;  %v1331_v22 = vld [vmem:[%s20655_s16 + $0xd8] sm:$0xff]  ;;  %1365 = vst.msk [vmem:[#allocation2 + $0xe0] sm:$0xff] %vm24198_vm0, %v1329_v20  ;;  %v1486_v26 = vsel %vm20819_vm9, %v20823_v15, 0.0  ;;  %vm20847_vm10 = vcmp.ne.s32.totalorder %v832_v16, 0 }
 0x167   : > { %16408 = vmatprep.mubr.msk.f32.mxu0 %vm24198_vm0, %v1478_v53  ;;  %1364 = vst.msk [vmem:[#allocation2 + $0xd8] sm:$0xff] %vm24198_vm0, %v1328_v19  ;;  %v20834_v23 = vld [vmem:[#allocation2 + $0x6f] sm:$0xff]  ;;  %1366 = vst.msk [vmem:[#allocation2 + $0xe8] sm:$0xff] %vm24198_vm0, %v1330_v21  ;;  %v1332_v24 = vld [vmem:[%s20655_s16 + $0xe0] sm:$0xff]  ;;  %v24537_v28 = vmov 0  ;;  %v846_v31 = vand.u32 15, %v702_v18 }
 0x168   : > { %1367 = vst.msk [vmem:[#allocation2 + $0xf0] sm:$0xff] %vm24198_vm0, %v1331_v22  ;;  %v1333_v25 = vld [vmem:[%s20655_s16 + $0xe8] sm:$0xff]  ;;  %1368 = vst.msk [vmem:[#allocation2 + $0xf8] sm:$0xff] %vm24198_vm0, %v1332_v24  ;;  %v1334_v27 = vld [vmem:[%s20655_s16 + $0xf0] sm:$0xff]  ;;  %v24538_v28 = vsel %vm20847_vm10, 4294967295, %v24537_v28  ;;  %v704_v32 = vadd.s32 160, %v20645_v2 }
 0x169   : > { %1369 = vst.msk [vmem:[#allocation2 + $0x100] sm:$0xff] %vm24198_vm0, %v1333_v25  ;;  %24539 = vst [vmem:[#allocation45_spill] sm:$0xff] %v24538_v28  ;;  %v20851_v30 = vld [vmem:[#allocation2 + $0x87] sm:$0xff]  ;;  %v20858_v33 = vld [vmem:[#allocation2 + $0x7f] sm:$0xff]  ;;  %vm20863_vm11 = vcmp.ne.s32.totalorder %v846_v31, 0  ;;  %v24542_v35 = vmov 0 }
 0x16a   : > { %16409 = vmatmul.mubr.msk.f32.gmra.mrb[6].mxu0 %vm24198_vm0, %v20780_v58  ;;  %24540 = vst [vmem:[#allocation46_spill] sm:$0xff] %v20851_v30  ;;  %1370 = vst.msk [vmem:[#allocation2 + $0x108] sm:$0xff] %vm24198_vm0, %v1334_v27  ;;  %v1488_v34 = vsel %vm20847_vm10, %v20851_v30, 0.0  ;;  %v24543_v35 = vsel %vm20863_vm11, 4294967295, %v24542_v35  ;;  %v20867_v36 = vld [vmem:[#allocation2 + $0x97] sm:$0xff]  ;;  %v860_v37 = vand.u32 15, %v704_v32 }
 0x16b   : > { %16411 = vmatprep.mubr.msk.f32.mxu0 %vm24198_vm0, %v1480_v59  ;;  %24541 = vst [vmem:[#allocation47_spill] sm:$0xff] %v20858_v33  ;;  %24544 = vst [vmem:[#allocation48_spill] sm:$0xff] %v24543_v35  ;;  %v706_v41 = vadd.s32 176, %v20645_v2  ;;  %v20873_v42 = vld [vmem:[#allocation2 + $0x8f] sm:$0xff]  ;;  %v1490_v43 = vsel %vm20863_vm11, %v20867_v36, 0.0  ;;  %v24547_v44 = vmov 0 }
 0x16c   : > { %24545 = vst [vmem:[#allocation49_spill] sm:$0xff] %v20867_v36  ;;  %24546 = vst [vmem:[#allocation50_spill] sm:$0xff] %v20873_v42  ;;  %vm20878_vm12 = vcmp.ne.s32.totalorder %v860_v37, 0  ;;  %v20882_v45 = vld [vmem:[#allocation2 + $0xa7] sm:$0xff]  ;;  %v708_v50 = vadd.s32 192, %v20645_v2  ;;  %v20888_v51 = vld [vmem:[#allocation2 + $0x9f] sm:$0xff] }
 0x16d   : > { %v24548_v44 = vsel %vm20878_vm12, 4294967295, %v24547_v44  ;;  %24550 = vst [vmem:[#allocation52_spill] sm:$0xff] %v20882_v45  ;;  %v874_v49 = vand.u32 15, %v706_v41  ;;  %24551 = vst [vmem:[#allocation53_spill] sm:$0xff] %v20888_v51  ;;  %v1492_v53 = vsel %vm20878_vm12, %v20882_v45, 0.0  ;;  %v24552_v56 = vmov 0 }
 0x16e   : > { %16412 = vmatmul.mubr.msk.f32.gmra.mrb[8].mxu0 %vm24198_vm0, %v20799_v1  ;;  %24549 = vst [vmem:[#allocation51_spill] sm:$0xff] %v24548_v44  ;;  %v20897_v57 = vld [vmem:[#allocation2 + $0xb7] sm:$0xff]  ;;  %v888_v59 = vand.u32 15, %v708_v50  ;;  %v20902_v62 = vld [vmem:[#allocation2 + $0xaf] sm:$0xff]  ;;  %v24558_v10 = vmov 0  ;;  %v20914_v11 = vld [vmem:[#allocation2 + $0xc7] sm:$0xff] }
 0x16f   : > { %16414 = vmatprep.mubr.msk.f32.mxu0 %vm24198_vm0, %v1482_v3  ;;  %vm20893_vm13 = vcmp.ne.s32.totalorder %v874_v49, 0  ;;  %24555 = vst [vmem:[#allocation55_spill] sm:$0xff] %v20897_v57  ;;  %24556 = vst [vmem:[#allocation56_spill] sm:$0xff] %v20902_v62  ;;  %v20908_v3 = vadd.s32 8, %v20645_v2  ;;  %v20921_v16 = vld [vmem:[#allocation2 + $0xbf] sm:$0xff]  ;;  %v20928_v20 = vadd.s32 24, %v20645_v2 }
 0x170   : > { %v24553_v56 = vsel %vm20893_vm13, 4294967295, %v24552_v56  ;;  %v1494_v63 = vsel %vm20893_vm13, %v20897_v57, 0.0  ;;  %vm20910_vm14 = vcmp.ne.s32.totalorder %v888_v59, 0  ;;  %24561 = vst [vmem:[#allocation59_spill] sm:$0xff] %v20914_v11  ;;  %24562 = vst [vmem:[#allocation60_spill] sm:$0xff] %v20921_v16  ;;  %v20933_v21 = vld [vmem:[#allocation2 + $0xcf] sm:$0xff] }
 0x171   : > { %24554 = vst [vmem:[#allocation54_spill] sm:$0xff] %v24553_v56  ;;  %24557 = vst [vmem:[#allocation57_spill] sm:$0xff] %v20908_v3  ;;  %v24559_v10 = vsel %vm20910_vm14, 4294967295, %v24558_v10  ;;  %v1496_v18 = vsel %vm20910_vm14, %v20914_v11, 0.0  ;;  %v727_v19 = vand.u32 15, %v20908_v3  ;;  %v2188_v22 = vld [vmem:[#allocation2 + $0x9] sm:$0xff] }
 0x172   : > { %16415 = vmatmul.mubr.msk.f32.gmra.mrb[10].mxu0 %vm24198_vm0, %v20814_v12  ;;  %24560 = vst [vmem:[#allocation58_spill] sm:$0xff] %v24559_v10  ;;  %24563 = vst [vmem:[#allocation61_spill] sm:$0xff] %v20928_v20  ;;  %v24565_v24 = vmov 0  ;;  %v2189_v25 = vld [vmem:[#allocation2 + $0x11] sm:$0xff]  ;;  %v20941_v27 = vadd.s32 40, %v20645_v2  ;;  %v20948_v32 = vld [vmem:[#allocation2 + $0x19] sm:$0xff] }
 0x173   : > { %16417 = vmatprep.mubr.msk.f32.mxu0 %vm24198_vm0, %v1484_v13  ;;  %v1335_v13 = vld [vmem:[%s20655_s16 + $0xf8] sm:$0xff]  ;;  %24564 = vst [vmem:[#allocation62_spill] sm:$0xff] %v20933_v21  ;;  %vm20935_vm15 = vcmp.ne.s32.totalorder %v727_v19, 15  ;;  %v20954_v37 = vld [vmem:[#allocation2 + $0x21] sm:$0xff]  ;;  %v24573_v59 = vmov 0  ;;  %vm24577_vm13 = vcmask 31744  }
 0x174   : > { %1371 = vst.msk [vmem:[#allocation2 + $0x110] sm:$0xff] %vm24198_vm0, %v1335_v13  ;;  %v24566_v24 = vsel %vm20935_vm15, 4294967295, %v24565_v24  ;;  %24567 = vst [vmem:[#allocation63_spill] sm:$0xff] %v20941_v27  ;;  %v2285_v31 = vsel %vm20935_vm15, %v2189_v25, 0.0  ;;  %v755_v41 = vand.u32 15, %v20941_v27  ;;  %vm24572_vm15 = vcmask 1043456  }
 0x175   : > { %v20960_v49 = vld [vmem:[#allocation11 + $0x10] sm:$0xf]  ;;  %v697_v17 = vadd.s32 104, %v20645_v2  ;;  %v21033_v4 = vld [vmem:[#allocation2 + $0x69] sm:$0xff]  ;;  %v21039_v3 = vld [vmem:[#allocation2 + $0x71] sm:$0xff]  ;;  %v701_v6 = vadd.s32 136, %v20645_v2 }
 0x176   : > { %16418 = vmatmul.mubr.msk.f32.gmra.mrb[12].mxu0 %vm24198_vm0, %v20834_v23  ;;  %vm20972_vm14 = vcmp.ne.s32.totalorder %v755_v41, 15  ;;  %v20988_v19 = vld [vmem:[#allocation2 + $0x39] sm:$0xff]  ;;  %v20994_v25 = vld [vmem:[#allocation2 + $0x41] sm:$0xff]  ;;  %24594 = vst [vmem:[#allocation71_spill] sm:$0xff] %v21033_v4  ;;  %24598 = vst [vmem:[#allocation73_spill] sm:$0xff] %v21039_v3  ;;  %s25289_s18 = sld [smem:[#allocation122_spill]] }
 0x177   : > { %16420 = vmatprep.mubr.msk.f32.mxu0 %vm24198_vm0, %v1486_v26  ;;  %v741_v26 = vand.u32 15, %v20928_v20  ;;  %v24574_v59 = vsel %vm20972_vm14, 4294967295, %v24573_v59  ;;  %v21018_v27 = vld [vmem:[#allocation2 + $0x59] sm:$0xff]  ;;  %v21024_v9 = vld [vmem:[#allocation2 + $0x61] sm:$0xff]  ;;  %v699_v20 = vadd.s32 120, %v20645_v2  ;;  %v21397_v28 = vld [vmem:[#allocation2 + $0xb0] sm:$0xff] }
 0x178   : > { %24575 = vst [vmem:[#allocation66_spill] sm:$0xff] %v24574_v59  ;;  %24591 = vst [vmem:[#allocation70_spill] sm:$0xff] %v21024_v9  ;;  %v21383_v35 = vld [vmem:[#allocation2 + $0x98] sm:$0xff]  ;;  %v21407_v14 = vld [vmem:[#allocation2 + $0xc8] sm:$0xff]  ;;  %s14363_s19 = sshll.u32 %s25293_s24, 2  ;;  %s25290_s4 = sld [smem:[#allocation123_spill]] }
 0x179   : > { %vm20950_vm1 = vcmp.ne.s32.totalorder %v741_v26, 15  ;;  %24724 = vst [vmem:[#allocation107_spill] sm:$0xff] %v21407_v14  ;;  %v21421_v7 = vld [vmem:[#allocation2 + $0xe0] sm:$0xff] }
 0x17a   : > { %16421 = vmatmul.mubr.msk.f32.gmra.mrb[14].mxu0 %vm24198_vm0, %v20858_v33  ;;  %v2287_v50 = vsel %vm20950_vm1, %v20954_v37, 0.0 }
 0x17b   : > { %16423 = vmatprep.mubr.msk.f32.mxu0 %vm24198_vm0, %v1488_v34  ;;  %v24568_v34 = vmov 0 }
 0x17c   : > { %v24569_v34 = vsel %vm20950_vm1, 4294967295, %v24568_v34  ;;  %vm24578_vm1 = vmmov %vm24577_vm13 }
 0x17d   : > { %24570 = vst [vmem:[#allocation64_spill] sm:$0xff] %v24569_v34 }
 0x17e   : > { %16424 = vmatmul.mubr.msk.f32.gmra.mrb[16].mxu0 %vm24198_vm0, %v20873_v42  ;;  %s682_s22 = scalar_lea.vmem %s25290_s4, %s14363_s19 }
 0x17f   : > { %16426 = vmatprep.mubr.msk.f32.mxu0 %vm24198_vm0, %v1490_v43  ;;  %v20958_v43 = vadd.s32 56, %v20645_v2 }
 0x181   : > { %24571 = vst [vmem:[#allocation65_spill] sm:$0xff] %v20958_v43  ;;  %v769_v13 = vand.u32 15, %v20958_v43  ;;  %v21009_v43 = vld [vmem:[#allocation2 + $0x51] sm:$0xff] }
 0x182   : > { %16427 = vmatmul.mubr.msk.f32.gmra.mrb[18].mxu0 %vm24198_vm0, %v20888_v51 }
 0x183   : > { %16429 = vmatprep.mubr.msk.f32.mxu0 %vm24198_vm0, %v1492_v53  ;;  %v20970_v53 = vld [vmem:[#allocation2 + $0x29] sm:$0xff] }
 0x186   : > { %16430 = vmatmul.mubr.msk.f32.gmra.mrb[20].mxu0 %vm24198_vm0, %v20902_v62 }
 0x187   : > { %16432 = vmatprep.mubr.msk.f32.mxu0 %vm24198_vm0, %v1494_v63  ;;  %v20976_v63 = vld [vmem:[#allocation2 + $0x31] sm:$0xff] }
 0x18a   : > { %16433 = vmatmul.mubr.msk.f32.gmra.mrb[22].mxu0 %vm24198_vm0, %v20921_v16 }
 0x18b   : > { %16435 = vmatprep.mubr.msk.f32.mxu0 %vm24198_vm0, %v1496_v18  ;;  %v693_v18 = vadd.s32 72, %v20645_v2 }
 0x18d   : > { %v783_v26 = vand.u32 15, %v693_v18 }
 0x18e   : > { %16436 = vmatmul.mubr.msk.f32.gmra.mrb[24].mxu0 %vm24198_vm0, %v20933_v21 }
 0x18f   : > { %16449 = vmatprep.mubr.msk.f32.mxu0 %vm24198_vm0, %v2188_v22  ;;  %v24579_v22 = vmov 0 }
 0x192   : > { %16450 = vmatmul.mubr.msk.f32.vlgmr.msra.gmra.mrb[0].mxu0 %vm24198_vm0, %v2285_v31  ;;  %v695_v31 = vadd.s32 88, %v20645_v2 }
 0x193   : > { %16452 = vmatprep.mubr.msk.f32.mxu0 %vm24198_vm0, %v20948_v32  ;;  %16498 = vmatpush3.msk.msra.mxu0 %vm24572_vm15, %v20792_v0  ;;  %vm24576_vm0 = vmmov %vm24572_vm15  ;;  %v2289_v0 = vsel %vm20972_vm14, %v20976_v63, 0.0  ;;  %vm20990_vm15 = vcmp.ne.s32.totalorder %v769_v13, 15  ;;  %v24584_v13 = vmov 0 }
 0x194   : > { %16547 = vmatprep.subr.msk.mxu0 %vm24576_vm0, %v20960_v49  ;;  %v24580_v22 = vsel %vm20990_vm15, 4294967295, %v24579_v22  ;;  %vm24582_vm0 = vmmov %vm24578_vm1  ;;  %v2291_v41 = vsel %vm20990_vm15, %v20994_v25, 0.0  ;;  %v797_v18 = vand.u32 15, %v695_v31  ;;  %v811_v31 = vand.u32 15, %v697_v17 }
 0x195   : > { %24581 = vst [vmem:[#allocation67_spill] sm:$0xff] %v24580_v22  ;;  %vm24587_vm14 = vmmov %vm24582_vm0  ;;  %v825_v17 = vand.u32 15, %v699_v20  ;;  %v839_v20 = vand.u32 15, %v701_v6 }
 0x196   : > { %16453 = vmatmul.mubr.msk.f32.gmra.mrb[2].mxu0 %vm24577_vm13, %v2287_v50  ;;  %vm24583_vm13 = vmmov %vm24582_vm0  ;;  %v21003_v50 = vld [vmem:[#allocation2 + $0x49] sm:$0xff] }
 0x197   : > { %16455 = vmatprep.mubr.msk.f32.mxu0 %vm24578_vm1, %v20970_v53  ;;  %vm21005_vm1 = vcmp.ne.s32.totalorder %v783_v26, 15  ;;  %v24588_v26 = vmov 0  ;;  %vm24592_vm15 = vmmov %vm24582_vm0 }
 0x198   : > { %v24585_v13 = vsel %vm21005_vm1, 4294967295, %v24584_v13 }
 0x199   : > { %24586 = vst [vmem:[#allocation68_spill] sm:$0xff] %v24585_v13  ;;  %v21054_v13 = vld [vmem:[#allocation2 + $0x81] sm:$0xff] }
 0x19a   : > { %16456 = vmatmul.mubr.msk.f32.gmra.mrb[4].mxu0 %vm24582_vm0, %v2289_v0  ;;  %v2293_v0 = vsel %vm21005_vm1, %v21009_v43, 0.0  ;;  %24605 = vst [vmem:[#allocation76_spill] sm:$0xff] %v21054_v13 }
 0x19b   : > { %16458 = vmatprep.mubr.msk.f32.mxu0 %vm24583_vm13, %v20988_v19  ;;  %vm21020_vm13 = vcmp.ne.s32.totalorder %v797_v18, 15  ;;  %v24595_v18 = vmov 0 }
 0x19c   : > { %v24589_v26 = vsel %vm21020_vm13, 4294967295, %v24588_v26 }
 0x19d   : > { %24590 = vst [vmem:[#allocation69_spill] sm:$0xff] %v24589_v26  ;;  %v21048_v26 = vld [vmem:[#allocation2 + $0x79] sm:$0xff] }
 0x19e   : > { %16459 = vmatmul.mubr.msk.f32.gmra.mrb[6].mxu0 %vm24587_vm14, %v2291_v41  ;;  %vm24593_vm14 = vmmov %vm24582_vm0  ;;  %v2295_v41 = vsel %vm21020_vm13, %v21024_v9, 0.0  ;;  %24601 = vst [vmem:[#allocation74_spill] sm:$0xff] %v21048_v26  ;;  %v703_v9 = vadd.s32 152, %v20645_v2 }
 0x19f   : > { %16461 = vmatprep.mubr.msk.f32.mxu0 %vm24582_vm0, %v21003_v50  ;;  %vm21035_vm0 = vcmp.ne.s32.totalorder %v811_v31, 15  ;;  %vm24599_vm1 = vmmov %vm24593_vm14  ;;  %v24602_v31 = vmov 0 }
 0x1a0   : > { %v24596_v18 = vsel %vm21035_vm0, 4294967295, %v24595_v18  ;;  %vm24606_vm13 = vmmov %vm24599_vm1  ;;  %v853_v6 = vand.u32 15, %v703_v9 }
 0x1a1   : > { %24597 = vst [vmem:[#allocation72_spill] sm:$0xff] %v24596_v18  ;;  %v21063_v18 = vld [vmem:[#allocation2 + $0x89] sm:$0xff] }
 0x1a2   : > { %16462 = vmatmul.mubr.msk.f32.gmra.mrb[8].mxu0 %vm24592_vm15, %v2293_v0  ;;  %vm24600_vm15 = vmmov %vm24599_vm1  ;;  %v2297_v0 = vsel %vm21035_vm0, %v21039_v3, 0.0  ;;  %24607 = vst [vmem:[#allocation77_spill] sm:$0xff] %v21063_v18  ;;  %v21069_v3 = vld [vmem:[#allocation2 + $0x91] sm:$0xff] }
 0x1a3   : > { %16464 = vmatprep.mubr.msk.f32.mxu0 %vm24593_vm14, %v21018_v27  ;;  %vm21050_vm14 = vcmp.ne.s32.totalorder %v825_v17, 15  ;;  %v24608_v17 = vmov 0  ;;  %24611 = vst [vmem:[#allocation79_spill] sm:$0xff] %v21069_v3  ;;  %vm24612_vm0 = vmmov %vm24599_vm1 }
 0x1a4   : > { %v24603_v31 = vsel %vm21050_vm14, 4294967295, %v24602_v31 }
 0x1a5   : > { %24604 = vst [vmem:[#allocation75_spill] sm:$0xff] %v24603_v31  ;;  %v21078_v31 = vld [vmem:[#allocation2 + $0x99] sm:$0xff] }
 0x1a6   : > { %16465 = vmatmul.mubr.msk.f32.gmra.mrb[10].mxu0 %vm24599_vm1, %v2295_v41  ;;  %v2299_v41 = vsel %vm21050_vm14, %v21054_v13, 0.0  ;;  %24614 = vst [vmem:[#allocation80_spill] sm:$0xff] %v21078_v31  ;;  %v21084_v13 = vld [vmem:[#allocation2 + $0xa1] sm:$0xff]  ;;  %vm24619_vm14 = vmmov %vm24612_vm0 }
 0x1a7   : > { %16467 = vmatprep.mubr.msk.f32.mxu0 %vm24600_vm15, %v21033_v4  ;;  %vm21065_vm15 = vcmp.ne.s32.totalorder %v839_v20, 15  ;;  %v705_v4 = vadd.s32 168, %v20645_v2  ;;  %v24615_v20 = vmov 0  ;;  %24618 = vst [vmem:[#allocation82_spill] sm:$0xff] %v21084_v13 }
 0x1a8   : > { %v24609_v17 = vsel %vm21065_vm15, 4294967295, %v24608_v17 }
 0x1a9   : > { %24610 = vst [vmem:[#allocation78_spill] sm:$0xff] %v24609_v17  ;;  %v867_v9 = vand.u32 15, %v705_v4  ;;  %v21093_v17 = vld [vmem:[#allocation2 + $0xa9] sm:$0xff] }
 0x1aa   : > { %16468 = vmatmul.mubr.msk.f32.gmra.mrb[12].mxu0 %vm24606_vm13, %v2297_v0  ;;  %vm24613_vm13 = vmmov %vm24612_vm0  ;;  %v2301_v0 = vsel %vm21065_vm15, %v21069_v3, 0.0  ;;  %24620 = vst [vmem:[#allocation83_spill] sm:$0xff] %v21093_v17  ;;  %v21099_v3 = vld [vmem:[#allocation2 + $0xb1] sm:$0xff] }
 0x1ab   : > { %16470 = vmatprep.mubr.msk.f32.mxu0 %vm24599_vm1, %v21048_v26  ;;  %vm21080_vm1 = vcmp.ne.s32.totalorder %v853_v6, 15  ;;  %v707_v26 = vadd.s32 184, %v20645_v2  ;;  %v24621_v6 = vmov 0  ;;  %24624 = vst [vmem:[#allocation85_spill] sm:$0xff] %v21099_v3  ;;  %vm24625_vm15 = vmmov %vm24612_vm0 }
 0x1ac   : > { %v24616_v20 = vsel %vm21080_vm1, 4294967295, %v24615_v20 }
 0x1ad   : > { %24617 = vst [vmem:[#allocation81_spill] sm:$0xff] %v24616_v20  ;;  %v881_v4 = vand.u32 15, %v707_v26  ;;  %v21108_v20 = vld [vmem:[#allocation2 + $0xb9] sm:$0xff] }
 0x1ae   : > { %16471 = vmatmul.mubr.msk.f32.gmra.mrb[14].mxu0 %vm24612_vm0, %v2299_v41  ;;  %v2303_v41 = vsel %vm21080_vm1, %v21084_v13, 0.0  ;;  %24627 = vst [vmem:[#allocation86_spill] sm:$0xff] %v21108_v20  ;;  %v21114_v13 = vld [vmem:[#allocation2 + $0xc1] sm:$0xff] }
 0x1af   : > { %16473 = vmatprep.mubr.msk.f32.mxu0 %vm24613_vm13, %v21063_v18  ;;  %vm21095_vm13 = vcmp.ne.s32.totalorder %v867_v9, 15  ;;  %v709_v18 = vadd.s32 200, %v20645_v2  ;;  %v24628_v9 = vmov 0  ;;  %24631 = vst [vmem:[#allocation88_spill] sm:$0xff] %v21114_v13 }
 0x1b0   : > { %v24622_v6 = vsel %vm21095_vm13, 4294967295, %v24621_v6 }
 0x1b1   : > { %24623 = vst [vmem:[#allocation84_spill] sm:$0xff] %v24622_v6  ;;  %v895_v26 = vand.u32 15, %v709_v18  ;;  %v21123_v6 = vld [vmem:[#allocation2 + $0xc9] sm:$0xff] }
 0x1b2   : > { %16474 = vmatmul.mubr.msk.f32.gmra.mrb[16].mxu0 %vm24619_vm14, %v2301_v0  ;;  %vm24626_vm14 = vmmov %vm24612_vm0  ;;  %v2305_v0 = vsel %vm21095_vm13, %v21099_v3, 0.0  ;;  %v21129_v3 = vld [vmem:[#allocation2 + $0xd1] sm:$0xff] }
 0x1b3   : > { %16476 = vmatprep.mubr.msk.f32.mxu0 %vm24612_vm0, %v21078_v31  ;;  %vm21110_vm0 = vcmp.ne.s32.totalorder %v881_v4, 15  ;;  %v711_v31 = vadd.s32 216, %v20645_v2  ;;  %vm24632_vm1 = vmmov %vm24626_vm14  ;;  %v24634_v4 = vmov 0  ;;  %24637 = vst [vmem:[#allocation90_spill] sm:$0xff] %v21129_v3 }
 0x1b4   : > { %v24629_v9 = vsel %vm21110_vm0, 4294967295, %v24628_v9  ;;  %vm24638_vm13 = vmmov %vm24632_vm1 }
 0x1b5   : > { %24630 = vst [vmem:[#allocation87_spill] sm:$0xff] %v24629_v9  ;;  %v909_v18 = vand.u32 15, %v711_v31  ;;  %v21138_v9 = vld [vmem:[#allocation2 + $0xd9] sm:$0xff] }
 0x1b6   : > { %16477 = vmatmul.mubr.msk.f32.gmra.mrb[18].mxu0 %vm24625_vm15, %v2303_v41  ;;  %vm24633_vm15 = vmmov %vm24632_vm1  ;;  %v2307_v41 = vsel %vm21110_vm0, %v21114_v13, 0.0  ;;  %v21144_v13 = vld [vmem:[#allocation2 + $0xe1] sm:$0xff] }
 0x1b7   : > { %16479 = vmatprep.mubr.msk.f32.mxu0 %vm24626_vm14, %v21093_v17  ;;  %vm21125_vm14 = vcmp.ne.s32.totalorder %v895_v26, 15  ;;  %v713_v17 = vadd.s32 232, %v20645_v2  ;;  %v24639_v26 = vmov 0  ;;  %24642 = vst [vmem:[#allocation92_spill] sm:$0xff] %v21144_v13  ;;  %vm24643_vm0 = vmmov %vm24632_vm1 }
 0x1b8   : > { %v24635_v4 = vsel %vm21125_vm14, 4294967295, %v24634_v4  ;;  %vm24653_vm12 = vmmov %vm24643_vm0 }
 0x1b9   : > { %24636 = vst [vmem:[#allocation89_spill] sm:$0xff] %v24635_v4  ;;  %v923_v31 = vand.u32 15, %v713_v17  ;;  %v21153_v4 = vld [vmem:[#allocation2 + $0xe9] sm:$0xff] }
 0x1ba   : > { %16480 = vmatmul.mubr.msk.f32.gmra.mrb[20].mxu0 %vm24632_vm1, %v2305_v0  ;;  %v2309_v0 = vsel %vm21125_vm14, %v21129_v3, 0.0  ;;  %v21159_v3 = vld [vmem:[#allocation2 + $0xf1] sm:$0xff]  ;;  %vm24648_vm14 = vmmov %vm24643_vm0 }
 0x1bb   : > { %16482 = vmatprep.mubr.msk.f32.mxu0 %vm24633_vm15, %v21108_v20  ;;  %vm21140_vm15 = vcmp.ne.s32.totalorder %v909_v18, 15  ;;  %v715_v20 = vadd.s32 248, %v20645_v2  ;;  %v24645_v18 = vmov 0 }
 0x1bc   : > { %v24640_v26 = vsel %vm21140_vm15, 4294967295, %v24639_v26 }
 0x1bd   : > { %24641 = vst [vmem:[#allocation91_spill] sm:$0xff] %v24640_v26  ;;  %v937_v17 = vand.u32 15, %v715_v20  ;;  %v21167_v26 = vld [vmem:[#allocation2 + $0xf9] sm:$0xff] }
 0x1be   : > { %16483 = vmatmul.mubr.msk.f32.gmra.mrb[22].mxu0 %vm24638_vm13, %v2307_v41  ;;  %vm24644_vm13 = vmmov %vm24643_vm0  ;;  %v2311_v41 = vsel %vm21140_vm15, %v21144_v13, 0.0  ;;  %v24649_v13 = vmov 0 }
 0x1bf   : > { %16485 = vmatprep.mubr.msk.f32.mxu0 %vm24632_vm1, %v21123_v6  ;;  %vm21155_vm1 = vcmp.ne.s32.totalorder %v923_v31, 15  ;;  %v21173_v31 = vld [vmem:[#allocation2 + $0x101] sm:$0xff]  ;;  %vm24652_vm15 = vmmov %vm24643_vm0 }
 0x1c0   : > { %v24646_v18 = vsel %vm21155_vm1, 4294967295, %v24645_v18 }
 0x1c1   : > { %24647 = vst [vmem:[#allocation93_spill] sm:$0xff] %v24646_v18 }
 0x1c2   : > { %16486 = vmatmul.mubr.msk.f32.gmra.mrb[24].mxu0 %vm24643_vm0, %v2309_v0  ;;  %v2313_v0 = vsel %vm21155_vm1, %v21159_v3, 0.0 }
 0x1c3   : > { %16488 = vmatprep.mubr.msk.f32.mxu0 %vm24644_vm13, %v21138_v9  ;;  %vm21169_vm13 = vcmp.ne.s32.totalorder %v937_v17, 15  ;;  %v2708_v17 = vsel %vm20709_vm3, %v20747_v46, 0.0  ;;  %vm24659_vm3 = vmmov %vm24643_vm0  ;;  %v2714_v46 = vsel %vm20770_vm6, %v20789_v61, 0.0 }
 0x1c4   : > { %v24650_v13 = vsel %vm21169_vm13, 4294967295, %v24649_v13  ;;  %v2315_v20 = vsel %vm21169_vm13, %v21173_v31, 0.0  ;;  %vm24657_vm13 = vcmask 1043456  }
 0x1c5   : > { %24651 = vst [vmem:[#allocation94_spill] sm:$0xff] %v24650_v13 }
 0x1c6   : > { %16489 = vmatmul.mubr.msk.f32.gmra.mrb[26].mxu0 %vm24648_vm14, %v2311_v41  ;;  %v2706_v41 = vsel %vm20660_vm2, %v20727_v38, 0.0  ;;  %vm24654_vm14 = vmmov %vm24643_vm0  ;;  %v2710_v38 = vsel %vm20731_vm4, %v20753_v48, 0.0 }
 0x1c7   : > { %16491 = vmatprep.mubr.msk.f32.mxu0 %vm24643_vm0, %v21153_v4 }
 0x1ca   : > { %16492 = vmatmul.mubr.msk.f32.gmra.mrb[28].mxu0 %vm24652_vm15, %v2313_v0  ;;  %v21189_v0 = vld [vmem:[#allocation11 + $0x14] sm:$0xf]  ;;  %vm24656_vm15 = vmmov %vm24643_vm0 }
 0x1cb   : > { %16494 = vmatprep.mubr.msk.f32.mxu0 %vm24653_vm12, %v21167_v26  ;;  %vm24655_vm12 = vmmov %vm24643_vm0 }
 0x1ce   : > { %16495 = vmatmul.mubr.msk.f32.gmra.mrb[30].mxu0 %vm24654_vm14, %v2315_v20  ;;  %vm24658_vm14 = vmmov %vm24657_vm13  ;;  %v2720_v20 = vsel %vm20819_vm9, %v20851_v30, 0.0  ;;  %v21423_v30 = vld [vmem:[#allocation2 + $0xe8] sm:$0xff] }
 0x1cf   : > { %16499 = vmatprep.mubr.msk.f32.mxu0 %vm24643_vm0, %v2706_v41  ;;  %v2722_v41 = vsel %vm20847_vm10, %v20867_v36, 0.0  ;;  %v21413_v36 = vld [vmem:[#allocation2 + $0xd0] sm:$0xff]  ;;  %24730 = vst [vmem:[#allocation110_spill] sm:$0xff] %v21423_v30 }
 0x1d0   : > { %24726 = vst [vmem:[#allocation108_spill] sm:$0xff] %v21413_v36 }
 0x1d2   : > { %16500 = vmatmul.mubr.msk.f32.vlgmr.msra.gmra.mrb[0].mxu0 %vm24655_vm12, %v20729_v39  ;;  %v2712_v39 = vsel %vm20749_vm5, %v20774_v55, 0.0  ;;  %vm24660_vm12 = vmmov %vm24643_vm0 }
 0x1d3   : > { %16502 = vmatprep.mubr.msk.f32.mxu0 %vm24656_vm15, %v2708_v17  ;;  %16548 = vmatpush3.msk.msra.mxu0 %vm24657_vm13, %v20960_v49  ;;  %vm24661_vm13 = vmmov %vm24643_vm0  ;;  %v2718_v49 = vsel %vm20804_vm8, %v20823_v15, 0.0  ;;  %v2724_v17 = vsel %vm20863_vm11, %v20882_v45, 0.0  ;;  %v21399_v45 = vld [vmem:[#allocation2 + $0xb8] sm:$0xff] }
 0x1d4   : > { %16597 = vmatprep.subr.msk.mxu0 %vm24658_vm14, %v21189_v0  ;;  %vm24662_vm15 = vmmov %vm24643_vm0 }
 0x1d5   : > { %vm24663_vm14 = vmmov %vm24643_vm0 }
 0x1d6   : > { %16503 = vmatmul.mubr.msk.f32.gmra.mrb[2].mxu0 %vm24643_vm0, %v20765_v52  ;;  %v2716_v52 = vsel %vm20785_vm7, %v20808_v8, 0.0 }
 0x1d7   : > { %16505 = vmatprep.mubr.msk.f32.mxu0 %vm24659_vm3, %v2710_v38  ;;  %vm24664_vm3 = vmmov %vm24643_vm0 }
 0x1da   : > { %16506 = vmatmul.mubr.msk.f32.gmra.mrb[4].mxu0 %vm24660_vm12, %v20780_v58  ;;  %vm24665_vm12 = vmmov %vm24643_vm0 }
 0x1db   : > { %16508 = vmatprep.mubr.msk.f32.mxu0 %vm24661_vm13, %v2712_v39  ;;  %vm24666_vm13 = vmmov %vm24643_vm0  ;;  %v710_v39 = vadd.s32 208, %v20645_v2 }
 0x1de   : > { %16509 = vmatmul.mubr.msk.f32.gmra.mrb[6].mxu0 %vm24662_vm15, %v20799_v1  ;;  %vm24667_vm15 = vmmov %vm24643_vm0 }
 0x1df   : > { %16511 = vmatprep.mubr.msk.f32.mxu0 %vm24663_vm14, %v2714_v46  ;;  %vm24668_vm14 = vmmov %vm24643_vm0 }
 0x1e2   : > { %16512 = vmatmul.mubr.msk.f32.gmra.mrb[8].mxu0 %vm24664_vm3, %v20814_v12  ;;  %vm24669_vm3 = vmmov %vm24643_vm0 }
 0x1e3   : > { %16514 = vmatprep.mubr.msk.f32.mxu0 %vm24643_vm0, %v2716_v52  ;;  %v21256_v52 = vld [vmem:[#allocation2 + $0xd7] sm:$0xff] }
 0x1e4   : > { %24676 = vst [vmem:[#allocation95_spill] sm:$0xff] %v21256_v52 }
 0x1e6   : > { %16515 = vmatmul.mubr.msk.f32.gmra.mrb[10].mxu0 %vm24665_vm12, %v20834_v23  ;;  %vm24670_vm12 = vmmov %vm24643_vm0 }
 0x1e7   : > { %16517 = vmatprep.mubr.msk.f32.mxu0 %vm24666_vm13, %v2718_v49  ;;  %vm24671_vm13 = vmmov %vm24643_vm0  ;;  %v902_v49 = vand.u32 15, %v710_v39  ;;  %v714_v39 = vadd.s32 240, %v20645_v2 }
 0x1ea   : > { %16518 = vmatmul.mubr.msk.f32.gmra.mrb[12].mxu0 %vm24667_vm15, %v20858_v33  ;;  %vm24672_vm15 = vnez %v24548_v44  ;;  %v21373_v44 = vld [vmem:[#allocation2 + $0x80] sm:$0xff]  ;;  %v21415_v33 = vld [vmem:[#allocation2 + $0xd8] sm:$0xff] }
 0x1eb   : > { %16520 = vmatprep.mubr.msk.f32.mxu0 %vm24668_vm14, %v2720_v20  ;;  %v2726_v38 = vsel %vm24672_vm15, %v20897_v57, 0.0  ;;  %vm24673_vm14 = vmmov %vm24643_vm0  ;;  %v712_v20 = vadd.s32 224, %v20645_v2  ;;  %vm24679_vm15 = vnez %v24559_v10  ;;  %v21284_v10 = vld [vmem:[#allocation2 + $0xf7] sm:$0xff]  ;;  %v21289_v2 = vld [vmem:[#allocation2 + $0xef] sm:$0xff]  ;;  %24727 = vst [vmem:[#allocation109_spill] sm:$0xff] %v21415_v33 }
 0x1ec   : > { %24689 = vst [vmem:[#allocation100_spill] sm:$0xff] %v21284_v10  ;;  %24692 = vst [vmem:[#allocation101_spill] sm:$0xff] %v21289_v2  ;;  %v21389_v57 = vld [vmem:[#allocation2 + $0xa0] sm:$0xff] }
 0x1ee   : > { %16521 = vmatmul.mubr.msk.f32.gmra.mrb[14].mxu0 %vm24669_vm3, %v20873_v42  ;;  %vm24674_vm3 = vmmov %vm24643_vm0  ;;  %v21405_v42 = vld [vmem:[#allocation2 + $0xc0] sm:$0xff] }
 0x1ef   : > { %16523 = vmatprep.mubr.msk.f32.mxu0 %vm24643_vm0, %v2722_v41  ;;  %vm24675_vm0 = vnez %v24553_v56  ;;  %v2730_v41 = vsel %vm24679_vm15, %v21256_v52, 0.0  ;;  %v916_v56 = vand.u32 15, %v712_v20  ;;  %v930_v20 = vand.u32 15, %v714_v39  ;;  %v21303_v39 = vld [vmem:[#allocation2 + $0xff] sm:$0xff]  ;;  %24723 = vst [vmem:[#allocation106_spill] sm:$0xff] %v21405_v42 }
 0x1f0   : > { %v2728_v46 = vsel %vm24675_vm0, %v20914_v11, 0.0  ;;  %vm24684_vm0 = vmmov %vm24674_vm3  ;;  %24698 = vst [vmem:[#allocation104_spill] sm:$0xff] %v21303_v39  ;;  %v21367_v52 = vld [vmem:[#allocation2 + $0x78] sm:$0xff]  ;;  %v21375_v11 = vld [vmem:[#allocation2 + $0x88] sm:$0xff] }
 0x1f1   : > { %vm24691_vm15 = vmmov %vm24684_vm0 }
 0x1f2   : > { %16524 = vmatmul.mubr.msk.f32.gmra.mrb[16].mxu0 %vm24670_vm12, %v20888_v51  ;;  %vm24677_vm12 = vmmov %vm24674_vm3  ;;  %v21391_v51 = vld [vmem:[#allocation2 + $0xa8] sm:$0xff] }
 0x1f3   : > { %16526 = vmatprep.mubr.msk.f32.mxu0 %vm24671_vm13, %v2724_v17  ;;  %vm24678_vm13 = vmmov %vm24674_vm3  ;;  %v24680_v17 = vmov 0 }
 0x1f6   : > { %16527 = vmatmul.mubr.msk.f32.gmra.mrb[18].mxu0 %vm24673_vm14, %v20902_v62  ;;  %vm21265_vm14 = vcmp.ne.s32.totalorder %v902_v49, 0  ;;  %v24686_v49 = vmov 0  ;;  %v21381_v62 = vld [vmem:[#allocation2 + $0x90] sm:$0xff] }
 0x1f7   : > { %16529 = vmatprep.mubr.msk.f32.mxu0 %vm24674_vm3, %v2726_v38  ;;  %v24681_v17 = vsel %vm21265_vm14, 4294967295, %v24680_v17  ;;  %v21269_v38 = vld [vmem:[#allocation2 + $0xe7] sm:$0xff] }
 0x1f8   : > { %24682 = vst [vmem:[#allocation96_spill] sm:$0xff] %v24681_v17  ;;  %24683 = vst [vmem:[#allocation97_spill] sm:$0xff] %v21269_v38  ;;  %v21365_v17 = vld [vmem:[#allocation2 + $0x70] sm:$0xff] }
 0x1fa   : > { %16530 = vmatmul.mubr.msk.f32.gmra.mrb[20].mxu0 %vm24677_vm12, %v20921_v16  ;;  %v21275_v16 = vld [vmem:[#allocation2 + $0xdf] sm:$0xff]  ;;  %vm21280_vm12 = vcmp.ne.s32.totalorder %v916_v56, 0  ;;  %v21298_v56 = vld [vmem:[#allocation2 + $0x107] sm:$0xff] }
 0x1fb   : > { %16532 = vmatprep.mubr.msk.f32.mxu0 %vm24678_vm13, %v2728_v46  ;;  %24685 = vst [vmem:[#allocation98_spill] sm:$0xff] %v21275_v16  ;;  %v2732_v46 = vsel %vm21265_vm14, %v21269_v38, 0.0  ;;  %v24687_v49 = vsel %vm21280_vm12, 4294967295, %v24686_v49  ;;  %vm24690_vm13 = vmmov %vm24684_vm0  ;;  %v24693_v38 = vmov 0 }
 0x1fc   : > { %24688 = vst [vmem:[#allocation99_spill] sm:$0xff] %v24687_v49  ;;  %24696 = vst [vmem:[#allocation103_spill] sm:$0xff] %v21298_v56  ;;  %v21351_v49 = vld [vmem:[#allocation2 + $0x58] sm:$0xff] }
 0x1fd   : > { %vm24697_vm14 = vmmov %vm24674_vm3 }
 0x1fe   : > { %16533 = vmatmul.mubr.msk.f32.gmra.mrb[22].mxu0 %vm24674_vm3, %v20933_v21  ;;  %v21357_v21 = vld [vmem:[#allocation2 + $0x60] sm:$0xff] }
 0x1ff   : > { %16535 = vmatprep.mubr.msk.f32.mxu0 %vm24684_vm0, %v2730_v41  ;;  %v2734_v41 = vsel %vm21280_vm12, %v21284_v10, 0.0  ;;  %vm21294_vm0 = vcmp.ne.s32.totalorder %v930_v20, 0  ;;  %v21311_v20 = vld [vmem:[#allocation2 + $0x10f] sm:$0xff]  ;;  %v21313_v10 = vld [vmem:[#allocation2 + $0x18] sm:$0xff]  ;;  %vm24702_vm12 = vmmov %vm24674_vm3 }
 0x200   : > { %v24694_v38 = vsel %vm21294_vm0, 4294967295, %v24693_v38  ;;  %24701 = vst [vmem:[#allocation105_spill] sm:$0xff] %v21311_v20 }
 0x201   : > { %24695 = vst [vmem:[#allocation102_spill] sm:$0xff] %v24694_v38  ;;  %v21343_v38 = vld [vmem:[#allocation2 + $0x48] sm:$0xff] }
 0x202   : > { %16536 = vmatmul.mubr.msk.f32.gmra.mrb[24].mxu0 %vm24690_vm13, %v21275_v16  ;;  %vm24700_vm13 = vmmov %vm24674_vm3  ;;  %v21359_v16 = vld [vmem:[#allocation2 + $0x68] sm:$0xff] }
 0x203   : > { %16538 = vmatprep.mubr.msk.f32.mxu0 %vm24691_vm15, %v2732_v46  ;;  %v2736_v46 = vsel %vm21294_vm0, %v21298_v56, 0.0  ;;  %vm24699_vm15 = vmmov %vm24674_vm3  ;;  %v21323_v56 = vld [vmem:[#allocation11 + $0x18] sm:$0xf] }
 0x204   : > { %vm24708_vm0 = vmmov %vm24674_vm3 }
 0x206   : > { %16539 = vmatmul.mubr.msk.f32.gmra.mrb[26].mxu0 %vm24674_vm3, %v21289_v2  ;;  %v21321_v2 = vld [vmem:[#allocation2 + $0x28] sm:$0xff] }
 0x207   : > { %16541 = vmatprep.mubr.msk.f32.mxu0 %vm24697_vm14, %v2734_v41  ;;  %vm24703_vm14 = vmmov %vm24674_vm3  ;;  %v21319_v41 = vld [vmem:[#allocation2 + $0x20] sm:$0xff] }
 0x20a   : > { %16542 = vmatmul.mubr.msk.f32.gmra.mrb[28].mxu0 %vm24699_vm15, %v21303_v39  ;;  %vm24704_vm15 = vmmov %vm24674_vm3  ;;  %v21341_v39 = vld [vmem:[#allocation2 + $0x40] sm:$0xff] }
 0x20b   : > { %16544 = vmatprep.mubr.msk.f32.mxu0 %vm24700_vm13, %v2736_v46  ;;  %v21329_v46 = vld [vmem:[#allocation2 + $0x30] sm:$0xff]  ;;  %vm24705_vm13 = vcmask 1043456  }
 0x20e   : > { %16545 = vmatmul.mubr.msk.f32.gmra.mrb[30].mxu0 %vm24702_vm12, %v21311_v20  ;;  %v21333_v20 = vld [vmem:[#allocation2 + $0x38] sm:$0xff]  ;;  %vm24706_vm12 = vmmov %vm24705_vm13 }
 0x20f   : > { %16549 = vmatprep.mubr.msk.f32.mxu0 %vm24703_vm14, %v21313_v10  ;;  %vm24707_vm14 = vmmov %vm24674_vm3 }
 0x212   : > { %16550 = vmatmul.mubr.msk.f32.vlgmr.msra.gmra.mrb[0].mxu0 %vm24674_vm3, %v21319_v41  ;;  %vm24709_vm3 = vmmov %vm24708_vm0 }
 0x213   : > { %16552 = vmatprep.mubr.msk.f32.mxu0 %vm24704_vm15, %v21321_v2  ;;  %16598 = vmatpush3.msk.msra.mxu0 %vm24705_vm13, %v21189_v0  ;;  %vm24710_vm15 = vmmov %vm24708_vm0  ;;  %v21349_v0 = vld [vmem:[#allocation2 + $0x50] sm:$0xff] }
 0x214   : > { %16647 = vmatprep.subr.msk.mxu0 %vm24706_vm12, %v21323_v56  ;;  %vm24711_vm13 = vmmov %vm24708_vm0 }
 0x215   : > { %vm24712_vm12 = vmmov %vm24708_vm0 }
 0x216   : > { %16553 = vmatmul.mubr.msk.f32.gmra.mrb[2].mxu0 %vm24707_vm14, %v21329_v46  ;;  %vm24713_vm14 = vmmov %vm24708_vm0 }
 0x217   : > { %16555 = vmatprep.mubr.msk.f32.mxu0 %vm24708_vm0, %v21333_v20 }
 0x21a   : > { %16556 = vmatmul.mubr.msk.f32.gmra.mrb[4].mxu0 %vm24709_vm3, %v21341_v39  ;;  %vm24714_vm3 = vmmov %vm24708_vm0 }
 0x21b   : > { %16558 = vmatprep.mubr.msk.f32.mxu0 %vm24710_vm15, %v21343_v38  ;;  %vm24715_vm15 = vmmov %vm24708_vm0 }
 0x21e   : > { %16559 = vmatmul.mubr.msk.f32.gmra.mrb[6].mxu0 %vm24711_vm13, %v21349_v0  ;;  %vm24716_vm13 = vmmov %vm24708_vm0 }
 0x21f   : > { %16561 = vmatprep.mubr.msk.f32.mxu0 %vm24712_vm12, %v21351_v49  ;;  %vm24717_vm12 = vmmov %vm24708_vm0 }
 0x222   : > { %16562 = vmatmul.mubr.msk.f32.gmra.mrb[8].mxu0 %vm24708_vm0, %v21357_v21 }
 0x223   : > { %16564 = vmatprep.mubr.msk.f32.mxu0 %vm24713_vm14, %v21359_v16  ;;  %vm24718_vm14 = vmmov %vm24708_vm0 }
 0x226   : > { %16565 = vmatmul.mubr.msk.f32.gmra.mrb[10].mxu0 %vm24714_vm3, %v21365_v17  ;;  %vm24719_vm3 = vmmov %vm24708_vm0 }
 0x227   : > { %16567 = vmatprep.mubr.msk.f32.mxu0 %vm24715_vm15, %v21367_v52  ;;  %vm24720_vm15 = vmmov %vm24708_vm0 }
 0x22a   : > { %16568 = vmatmul.mubr.msk.f32.gmra.mrb[12].mxu0 %vm24716_vm13, %v21373_v44  ;;  %vm24721_vm13 = vmmov %vm24708_vm0 }
 0x22b   : > { %16570 = vmatprep.mubr.msk.f32.mxu0 %vm24717_vm12, %v21375_v11  ;;  %vm24722_vm12 = vmmov %vm24708_vm0 }
 0x22e   : > { %16571 = vmatmul.mubr.msk.f32.gmra.mrb[14].mxu0 %vm24708_vm0, %v21381_v62 }
 0x22f   : > { %16573 = vmatprep.mubr.msk.f32.mxu0 %vm24718_vm14, %v21383_v35  ;;  %vm24725_vm14 = vmmov %vm24708_vm0 }
 0x232   : > { %16574 = vmatmul.mubr.msk.f32.gmra.mrb[16].mxu0 %vm24719_vm3, %v21389_v57  ;;  %vm24728_vm3 = vmmov %vm24708_vm0 }
 0x233   : > { %16576 = vmatprep.mubr.msk.f32.mxu0 %vm24720_vm15, %v21391_v51  ;;  %vm24729_vm15 = vmmov %vm24708_vm0 }
 0x236   : > { %16577 = vmatmul.mubr.msk.f32.gmra.mrb[18].mxu0 %vm24721_vm13, %v21397_v28  ;;  %vm24731_vm13 = vmmov %vm24708_vm0 }
 0x237   : > { %16579 = vmatprep.mubr.msk.f32.mxu0 %vm24722_vm12, %v21399_v45  ;;  %vm24732_vm12 = vmmov %vm24708_vm0 }
 0x23a   : > { %16580 = vmatmul.mubr.msk.f32.gmra.mrb[20].mxu0 %vm24708_vm0, %v21405_v42  ;;  %v21431_v42 = vld [vmem:[#allocation2 + $0xf8] sm:$0xff] }
 0x23b   : > { %16582 = vmatprep.mubr.msk.f32.mxu0 %vm24725_vm14, %v21407_v14  ;;  %v21429_v14 = vld [vmem:[#allocation2 + $0xf0] sm:$0xff]  ;;  %24734 = vst [vmem:[#allocation112_spill] sm:$0xff] %v21431_v42  ;;  %vm24735_vm14 = vmmov %vm24708_vm0 }
 0x23c   : > { %24733 = vst [vmem:[#allocation111_spill] sm:$0xff] %v21429_v14 }
 0x23e   : > { %16583 = vmatmul.mubr.msk.f32.gmra.mrb[22].mxu0 %vm24728_vm3, %v21413_v36  ;;  %v21439_v36 = vld [vmem:[#allocation2 + $0x108] sm:$0xff]  ;;  %vm24737_vm3 = vmmov %vm24708_vm0 }
 0x23f   : > { %16585 = vmatprep.mubr.msk.f32.mxu0 %vm24729_vm15, %v21415_v33  ;;  %v21437_v33 = vld [vmem:[#allocation2 + $0x100] sm:$0xff]  ;;  %24736 = vst [vmem:[#allocation113_spill] sm:$0xff] %v21439_v36  ;;  %vm24738_vm15 = vmmov %vm24708_vm0 }
 0x240   : > { %vm24746_vm11 = vmmov %vm24737_vm3 }
 0x242   : > { %16586 = vmatmul.mubr.msk.f32.gmra.mrb[24].mxu0 %vm24731_vm13, %v21421_v7  ;;  %vm24739_vm13 = vmmov %vm24708_vm0 }
 0x243   : > { %16588 = vmatprep.mubr.msk.f32.mxu0 %vm24732_vm12, %v21423_v30  ;;  %v21445_v30 = vld [vmem:[#allocation2 + $0x110] sm:$0xff]  ;;  %vm24740_vm12 = vmmov %vm24708_vm0 }
 0x246   : > { %16589 = vmatmul.mubr.msk.f32.gmra.mrb[26].mxu0 %vm24708_vm0, %v21429_v14  ;;  %vm24741_vm0 = vnez %v24566_v24  ;;  %v21454_v14 = vld [vmem:[#allocation11 + $0x1c] sm:$0xf] }
 0x247   : > { %16591 = vmatprep.mubr.msk.f32.mxu0 %vm24735_vm14, %v21431_v42  ;;  %v3519_v42 = vsel %vm24741_vm0, %v20954_v37, 0.0  ;;  %vm24742_vm14 = vmmov %vm24737_vm3  ;;  %v24755_v37 = vld [vmem:[#allocation68_spill] sm:$0xff] }
 0x248   : > { %vm24747_vm0 = vmmov %vm24737_vm3 }
 0x249   : > { %vm24750_vm10 = vmmov %vm24747_vm0 }
 0x24a   : > { %16592 = vmatmul.mubr.msk.f32.gmra.mrb[28].mxu0 %vm24737_vm3, %v21437_v33 }
 0x24b   : > { %16594 = vmatprep.mubr.msk.f32.mxu0 %vm24738_vm15, %v21439_v36  ;;  %vm24743_vm15 = vnez %v24569_v34 }
 0x24c   : > { %v3521_v36 = vsel %vm24743_vm15, %v20976_v63, 0.0  ;;  %vm24752_vm15 = vmmov %vm24747_vm0  ;;  %v24758_v63 = vld [vmem:[#allocation71_spill] sm:$0xff] }
 0x24e   : > { %16595 = vmatmul.mubr.msk.f32.gmra.mrb[30].mxu0 %vm24739_vm13, %v21445_v30  ;;  %vm24744_vm13 = vcmask 1043456  }
 0x24f   : > { %16599 = vmatprep.mubr.msk.f32.mxu0 %vm24740_vm12, %v20948_v32  ;;  %vm24745_vm12 = vmmov %vm24744_vm13 }
 0x252   : > { %16600 = vmatmul.mubr.msk.f32.vlgmr.msra.gmra.mrb[0].mxu0 %vm24742_vm14, %v3519_v42  ;;  %vm24748_vm14 = vnez %v24574_v59 }
 0x253   : > { %16602 = vmatprep.mubr.msk.f32.mxu0 %vm24737_vm3, %v20970_v53  ;;  %16648 = vmatpush3.msk.msra.mxu0 %vm24744_vm13, %v21323_v56  ;;  %v3523_v42 = vsel %vm24748_vm14, %v20994_v25, 0.0  ;;  %vm24749_vm3 = vmmov %vm24747_vm0  ;;  %vm24751_vm13 = vnez %v24580_v22  ;;  %v24760_v25 = vld [vmem:[#allocation69_spill] sm:$0xff]  ;;  %v24765_v56 = vld [vmem:[#allocation76_spill] sm:$0xff] }
 0x254   : > { %16697 = vmatprep.subr.msk.mxu0 %vm24745_vm12, %v21454_v14  ;;  %v3525_v32 = vsel %vm24751_vm13, %v21009_v43, 0.0  ;;  %vm24757_vm12 = vmmov %vm24749_vm3  ;;  %v24763_v43 = vld [vmem:[#allocation74_spill] sm:$0xff] }
 0x255   : > { %vm24762_vm14 = vmmov %vm24749_vm3 }
 0x256   : > { %16603 = vmatmul.mubr.msk.f32.gmra.mrb[2].mxu0 %vm24746_vm11, %v3521_v36  ;;  %vm24753_vm11 = vmmov %vm24747_vm0  ;;  %v24754_v36 = vld [vmem:[#allocation70_spill] sm:$0xff] }
 0x257   : > { %16605 = vmatprep.mubr.msk.f32.mxu0 %vm24747_vm0, %v20988_v19  ;;  %vm24756_vm0 = vnez %v24755_v37  ;;  %v24759_v19 = vld [vmem:[#allocation73_spill] sm:$0xff]  ;;  %vm24768_vm13 = vmmov %vm24749_vm3  ;;  %v24787_v37 = vld [vmem:[#allocation86_spill] sm:$0xff] }
 0x258   : > { %v3527_v53 = vsel %vm24756_vm0, %v24754_v36, 0.0  ;;  %v24771_v36 = vld [vmem:[#allocation79_spill] sm:$0xff] }
 0x25a   : > { %16606 = vmatmul.mubr.msk.f32.gmra.mrb[4].mxu0 %vm24749_vm3, %v3523_v42 }
 0x25b   : > { %16608 = vmatprep.mubr.msk.f32.mxu0 %vm24750_vm10, %v21003_v50  ;;  %vm24761_vm10 = vnez %v24760_v25 }
 0x25c   : > { %v3529_v50 = vsel %vm24761_vm10, %v24759_v19, 0.0  ;;  %v24775_v19 = vld [vmem:[#allocation80_spill] sm:$0xff] }
 0x25e   : > { %16609 = vmatmul.mubr.msk.f32.gmra.mrb[6].mxu0 %vm24752_vm15, %v3525_v32  ;;  %vm24764_vm15 = vmmov %vm24749_vm3  ;;  %v24769_v32 = vld [vmem:[#allocation77_spill] sm:$0xff] }
 0x25f   : > { %16611 = vmatprep.mubr.msk.f32.mxu0 %vm24753_vm11, %v21018_v27  ;;  %v24766_v27 = vld [vmem:[#allocation72_spill] sm:$0xff] }
 0x260   : > { %vm24767_vm11 = vnez %v24766_v27 }
 0x261   : > { %v3531_v42 = vsel %vm24767_vm11, %v24765_v56, 0.0  ;;  %v24781_v56 = vld [vmem:[#allocation83_spill] sm:$0xff] }
 0x262   : > { %16612 = vmatmul.mubr.msk.f32.gmra.mrb[8].mxu0 %vm24757_vm12, %v3527_v53  ;;  %vm24770_vm12 = vmmov %vm24749_vm3  ;;  %v24772_v53 = vld [vmem:[#allocation75_spill] sm:$0xff] }
 0x263   : > { %16614 = vmatprep.mubr.msk.f32.mxu0 %vm24749_vm3, %v24758_v63  ;;  %vm24773_vm3 = vnez %v24772_v53  ;;  %vm24774_vm0 = vmmov %vm24770_vm12  ;;  %v1506_v53 = vld [vmem:[#allocation2 + $0x10] sm:$0xff] }
 0x264   : > { %v3533_v63 = vsel %vm24773_vm3, %v24771_v36, 0.0  ;;  %vm24780_vm10 = vmmov %vm24774_vm0  ;;  %v1538_v36 = vld [vmem:[#allocation11 + $0x4] sm:$0xf] }
 0x265   : > { %vm24786_vm11 = vmmov %vm24774_vm0 }
 0x266   : > { %16615 = vmatmul.mubr.msk.f32.gmra.mrb[10].mxu0 %vm24762_vm14, %v3529_v50  ;;  %vm24776_vm14 = vmmov %vm24774_vm0  ;;  %v24777_v50 = vld [vmem:[#allocation82_spill] sm:$0xff] }
 0x267   : > { %16617 = vmatprep.mubr.msk.f32.mxu0 %vm24764_vm15, %v24763_v43  ;;  %v24778_v43 = vld [vmem:[#allocation78_spill] sm:$0xff]  ;;  %vm24794_vm3 = vmmov %vm24774_vm0 }
 0x268   : > { %vm24779_vm15 = vnez %v24778_v43  ;;  %v24789_v43 = vld [vmem:[#allocation84_spill] sm:$0xff]  ;;  %vm24798_vm9 = vmmov %vm24774_vm0 }
 0x269   : > { %v3535_v25 = vsel %vm24779_vm15, %v24777_v50, 0.0 }
 0x26a   : > { %16618 = vmatmul.mubr.msk.f32.gmra.mrb[12].mxu0 %vm24768_vm13, %v3531_v42  ;;  %vm24782_vm13 = vmmov %vm24774_vm0  ;;  %v24783_v42 = vld [vmem:[#allocation85_spill] sm:$0xff] }
 0x26b   : > { %16620 = vmatprep.mubr.msk.f32.mxu0 %vm24770_vm12, %v24769_v32  ;;  %v24784_v32 = vld [vmem:[#allocation81_spill] sm:$0xff] }
 0x26c   : > { %vm24785_vm12 = vnez %v24784_v32 }
 0x26d   : > { %v3537_v27 = vsel %vm24785_vm12, %v24783_v42, 0.0  ;;  %vm24797_vm12 = vmmov %vm24774_vm0 }
 0x26e   : > { %16621 = vmatmul.mubr.msk.f32.gmra.mrb[14].mxu0 %vm24774_vm0, %v3533_v63  ;;  %v1505_v63 = vld [vmem:[#allocation2 + $0x8] sm:$0xff] }
 0x26f   : > { %16623 = vmatprep.mubr.msk.f32.mxu0 %vm24776_vm14, %v24775_v19  ;;  %v24788_v19 = vld [vmem:[#allocation88_spill] sm:$0xff]  ;;  %vm24790_vm14 = vnez %v24789_v43 }
 0x270   : > { %v3539_v50 = vsel %vm24790_vm14, %v24788_v19, 0.0 }
 0x272   : > { %16624 = vmatmul.mubr.msk.f32.gmra.mrb[16].mxu0 %vm24780_vm10, %v3535_v25  ;;  %vm24791_vm10 = vcmask 1043456   ;;  %v24795_v25 = vld [vmem:[#allocation40_spill] sm:$0xff] }
 0x273   : > { %16626 = vmatprep.mubr.msk.f32.mxu0 %vm24782_vm13, %v24781_v56  ;;  %16347 = vmatprep.subr.msk.mxu1 %vm24791_vm10, %v1538_v36  ;;  %vm24792_vm15 = vmmov %vm24791_vm10 }
 0x274   : > { %16348 = vmatpush3.msk.msra.mxu1 %vm24792_vm15, %v1538_v36  ;;  %vm24793_vm13 = vmmov %vm24774_vm0  ;;  %v21568_v36 = vld [vmem:[#allocation2 + $0x111] sm:$0xff] }
 0x275   : > { %16349 = vmatprep.mubr.msk.f32.mxu1 %vm24793_vm13, %v1505_v63  ;;  %vm24804_vm13 = vmmov %vm24774_vm0  ;;  %v3909_v63 = vld [vmem:[#allocation2 + $0x2f] sm:$0xff] }
 0x276   : > { %16627 = vmatmul.mubr.msk.f32.gmra.mrb[18].mxu0 %vm24786_vm11, %v3537_v27  ;;  %16350 = vmatmul.mubr.msk.f32.vlgmr.msra.gmra.mrb[0].mxu1 %vm24794_vm3, %v1506_v53  ;;  %vm24796_vm11 = vmmov %vm24791_vm10  ;;  %v24800_v27 = vld [vmem:[#allocation87_spill] sm:$0xff] }
 0x277   : > { %16629 = vmatprep.mubr.msk.f32.mxu0 %vm24774_vm0, %v24787_v37  ;;  %19025 = vmatprep.subr.msk.mxu1 %vm24796_vm11, %v24795_v25  ;;  %v24799_v37 = vld [vmem:[#allocation90_spill] sm:$0xff]  ;;  %vm24801_vm10 = vnez %v24800_v27  ;;  %vm24802_vm15 = vmmov %vm24796_vm11 }
 0x278   : > { %16352 = vmatprep.mubr.msk.f32.mxu1 %vm24798_vm9, %v21313_v10  ;;  %v3541_v56 = vsel %vm24801_vm10, %v24799_v37, 0.0  ;;  %19026 = vmatpush3.msk.msra.mxu1 %vm24802_vm15, %v24795_v25  ;;  %vm24803_vm3 = vmmov %vm24774_vm0  ;;  %v24807_v10 = vld [vmem:[#allocation92_spill] sm:$0xff]  ;;  %v3944_v25 = vsel %vm20731_vm4, %v20774_v55, 0.0  ;;  %v3948_v55 = vsel %vm20770_vm6, %v20808_v8, 0.0 }
 0x279   : > { %vm24806_vm9 = vmmov %vm24774_vm0  ;;  %v24856_v37 = vld [vmem:[#allocation44_spill] sm:$0xff] }
 0x27a   : > { %16630 = vmatmul.mubr.msk.f32.gmra.mrb[20].mxu0 %vm24797_vm12, %v3539_v50  ;;  %16353 = vmatmul.mubr.msk.f32.gmra.mrb[2].mxu1 %vm24803_vm3, %v21319_v41  ;;  %vm24805_vm12 = vmmov %vm24774_vm0  ;;  %v24813_v41 = vld [vmem:[#allocation91_spill] sm:$0xff]  ;;  %v21591_v50 = vld [vmem:[#allocation11 + $0x20] sm:$0xf] }
 0x27b   : > { %16632 = vmatprep.mubr.msk.f32.mxu0 %vm24774_vm0, %v21123_v6  ;;  %16355 = vmatprep.mubr.msk.f32.mxu1 %vm24805_vm12, %v21321_v2  ;;  %v24808_v6 = vld [vmem:[#allocation89_spill] sm:$0xff]  ;;  %vm24810_vm10 = vmmov %vm24774_vm0 }
 0x27c   : > { %vm24809_vm11 = vnez %v24808_v6  ;;  %vm24811_vm15 = vmmov %vm24774_vm0 }
 0x27d   : > { %v3543_v53 = vsel %vm24809_vm11, %v24807_v10, 0.0  ;;  %vm24812_vm3 = vmmov %vm24774_vm0  ;;  %v24858_v10 = vld [vmem:[#allocation108_spill] sm:$0xff] }
 0x27e   : > { %16633 = vmatmul.mubr.msk.f32.gmra.mrb[22].mxu0 %vm24804_vm13, %v3541_v56  ;;  %16356 = vmatmul.mubr.msk.f32.gmra.mrb[4].mxu1 %vm24774_vm0, %v21329_v46  ;;  %vm24814_vm13 = vnez %v24813_v41  ;;  %vm24815_vm12 = vmmov %vm24774_vm0 }
 0x27f   : > { %16635 = vmatprep.mubr.msk.f32.mxu0 %vm24806_vm9, %v21138_v9  ;;  %16358 = vmatprep.mubr.msk.f32.mxu1 %vm24811_vm15, %v21333_v20  ;;  %v3545_v42 = vsel %vm24814_vm13, %v21159_v3, 0.0  ;;  %vm24816_vm9 = vmmov %vm24774_vm0  ;;  %v3547_v9 = vsel %vm21155_vm1, %v21173_v31, 0.0  ;;  %v3908_v3 = vld [vmem:[#allocation2 + $0x27] sm:$0xff] }
 0x280   : > { %vm24817_vm11 = vmmov %vm24774_vm0  ;;  %v3940_v31 = vsel %vm20660_vm2, %v3908_v3, 0.0  ;;  %v24866_v3 = vld [vmem:[#allocation45_spill] sm:$0xff] }
 0x281   : > { %vm24819_vm15 = vmmov %vm24774_vm0 }
 0x282   : > { %16636 = vmatmul.mubr.msk.f32.gmra.mrb[24].mxu0 %vm24810_vm10, %v3543_v53  ;;  %16359 = vmatmul.mubr.msk.f32.gmra.mrb[6].mxu1 %vm24815_vm12, %v21341_v39  ;;  %vm24818_vm10 = vmmov %vm24774_vm0  ;;  %vm24822_vm12 = vnez %v24650_v13  ;;  %v24860_v53 = vld [vmem:[#allocation50_spill] sm:$0xff]  ;;  %v6066_v13 = vld [vmem:[#allocation15 + $0x48] sm:$0xff] }
 0x283   : > { %16638 = vmatprep.mubr.msk.f32.mxu0 %vm24812_vm3, %v21153_v4  ;;  %16361 = vmatprep.mubr.msk.f32.mxu1 %vm24817_vm11, %v21343_v38  ;;  %v21566_v4 = vld [vmem:[#allocation2 + $0x109] sm:$0xff]  ;;  %vm24820_vm3 = vmmov %vm24774_vm0 }
 0x284   : > { %vm24821_vm11 = vmmov %vm24774_vm0 }
 0x285   : > { %vm24828_vm2 = vmmov %vm24774_vm0 }
 0x286   : > { %16639 = vmatmul.mubr.msk.f32.gmra.mrb[26].mxu0 %vm24816_vm9, %v3545_v42  ;;  %16362 = vmatmul.mubr.msk.f32.gmra.mrb[8].mxu1 %vm24774_vm0, %v21349_v0  ;;  %vm24823_vm9 = vmmov %vm24774_vm0  ;;  %v24862_v42 = vld [vmem:[#allocation109_spill] sm:$0xff] }
 0x287   : > { %16641 = vmatprep.mubr.msk.f32.mxu0 %vm24818_vm10, %v21167_v26  ;;  %16364 = vmatprep.mubr.msk.f32.mxu1 %vm24820_vm3, %v21351_v49  ;;  %v3549_v26 = vsel %vm24822_vm12, %v21568_v36, 0.0  ;;  %vm24824_vm10 = vmmov %vm24774_vm0  ;;  %vm24826_vm3 = vnez %v24522_v29 }
 0x288   : > { %v3942_v19 = vsel %vm24826_vm3, %v20753_v48, 0.0  ;;  %vm24833_vm3 = vmmov %vm24828_vm2  ;;  %v3946_v48 = vsel %vm20749_vm5, %v20789_v61, 0.0  ;;  %v24847_v61 = vld [vmem:[#allocation46_spill] sm:$0xff] }
 0x289   : > { %v3952_v8 = vsel %vm20804_vm8, %v24847_v61, 0.0  ;;  %v24880_v61 = vld [vmem:[#allocation112_spill] sm:$0xff] }
 0x28a   : > { %16642 = vmatmul.mubr.msk.f32.gmra.mrb[28].mxu0 %vm24819_vm15, %v3547_v9  ;;  %16365 = vmatmul.mubr.msk.f32.gmra.mrb[10].mxu1 %vm24823_vm9, %v21357_v21  ;;  %vm24825_vm15 = vmmov %vm24774_vm0  ;;  %v24865_v9 = vld [vmem:[#allocation52_spill] sm:$0xff] }
 0x28b   : > { %16644 = vmatprep.mubr.msk.f32.mxu0 %vm24821_vm11, %v21566_v4  ;;  %16367 = vmatprep.mubr.msk.f32.mxu1 %vm24774_vm0, %v21359_v16  ;;  %vm24827_vm11 = vmmov %vm24774_vm0 }
 0x28c   : > { %vm24829_vm9 = vmmov %vm24774_vm0 }
 0x28e   : > { %16645 = vmatmul.mubr.msk.f32.gmra.mrb[30].mxu0 %vm24824_vm10, %v3549_v26  ;;  %16368 = vmatmul.mubr.msk.f32.gmra.mrb[12].mxu1 %vm24827_vm11, %v21365_v17  ;;  %vm24830_vm10 = vmmov %vm24774_vm0  ;;  %vm24831_vm0 = vcmask 1043456  }
 0x28f   : > { %16649 = vmatprep.mubr.msk.f32.mxu0 %vm24825_vm15, %v3940_v31  ;;  %16370 = vmatprep.mubr.msk.f32.mxu1 %vm24829_vm9, %v21367_v52  ;;  %vm24832_vm15 = vmmov %vm24831_vm0  ;;  %v24869_v31 = vld [vmem:[#allocation53_spill] sm:$0xff] }
 0x290   : > { %vm24834_vm11 = vmmov %vm24828_vm2 }
 0x291   : > { %vm24835_vm9 = vmmov %vm24828_vm2 }
 0x292   : > { %16650 = vmatmul.mubr.msk.f32.vlgmr.msra.gmra.mrb[0].mxu0 %vm24828_vm2, %v3909_v63  ;;  %16371 = vmatmul.mubr.msk.f32.gmra.mrb[14].mxu1 %vm24833_vm3, %v21373_v44  ;;  %v24870_v63 = vld [vmem:[#allocation110_spill] sm:$0xff] }
 0x293   : > { %16652 = vmatprep.mubr.msk.f32.mxu0 %vm24830_vm10, %v3942_v19  ;;  %16698 = vmatpush3.msk.msra.mxu0 %vm24831_vm0, %v21454_v14  ;;  %vm24836_vm10 = vmmov %vm24828_vm2  ;;  %v24851_v14 = vld [vmem:[#allocation47_spill] sm:$0xff] }
 0x294   : > { %16747 = vmatprep.subr.msk.mxu0 %vm24832_vm15, %v21591_v50  ;;  %16373 = vmatprep.mubr.msk.f32.mxu1 %vm24834_vm11, %v21375_v11  ;;  %vm24837_vm0 = vmmov %vm24828_vm2  ;;  %v24873_v19 = vld [vmem:[#allocation55_spill] sm:$0xff] }
 0x295   : > { %vm24838_vm3 = vmmov %vm24837_vm0 }
 0x296   : > { %16653 = vmatmul.mubr.msk.f32.gmra.mrb[2].mxu0 %vm24828_vm2, %v20780_v58  ;;  %16374 = vmatmul.mubr.msk.f32.gmra.mrb[16].mxu1 %vm24836_vm10, %v21381_v62  ;;  %vm24839_vm15 = vmmov %vm24837_vm0  ;;  %v3950_v58 = vsel %vm20785_vm7, %v20823_v15, 0.0  ;;  %v24853_v15 = vld [vmem:[#allocation107_spill] sm:$0xff] }
 0x297   : > { %16655 = vmatprep.mubr.msk.f32.mxu0 %vm24835_vm9, %v3944_v25  ;;  %16376 = vmatprep.mubr.msk.f32.mxu1 %vm24838_vm3, %v21383_v35  ;;  %vm24840_vm2 = vmmov %vm24837_vm0  ;;  %v24874_v25 = vld [vmem:[#allocation48_spill] sm:$0xff] }
 0x298   : > { %vm24841_vm11 = vmmov %vm24837_vm0 }
 0x299   : > { %vm24842_vm9 = vmmov %vm24837_vm0 }
 0x29a   : > { %16656 = vmatmul.mubr.msk.f32.gmra.mrb[4].mxu0 %vm24837_vm0, %v20799_v1  ;;  %16377 = vmatmul.mubr.msk.f32.gmra.mrb[18].mxu1 %vm24840_vm2, %v21389_v57  ;;  %vm24843_vm10 = vmmov %vm24837_vm0  ;;  %v24848_v1 = vld [vmem:[#allocation43_spill] sm:$0xff] }
 0x29b   : > { %16658 = vmatprep.mubr.msk.f32.mxu0 %vm24839_vm15, %v3946_v48  ;;  %16379 = vmatprep.mubr.msk.f32.mxu1 %vm24842_vm9, %v21391_v51  ;;  %vm24844_vm3 = vmmov %vm24837_vm0 }
 0x29c   : > { %vm24845_vm15 = vmmov %vm24837_vm0 }
 0x29d   : > { %vm24846_vm2 = vmmov %vm24837_vm0 }
 0x29e   : > { %16659 = vmatmul.mubr.msk.f32.gmra.mrb[6].mxu0 %vm24841_vm11, %v20814_v12  ;;  %16380 = vmatmul.mubr.msk.f32.gmra.mrb[20].mxu1 %vm24837_vm0, %v21397_v28  ;;  %v24849_v12 = vld [vmem:[#allocation106_spill] sm:$0xff]  ;;  %vm24850_vm11 = vmmov %vm24837_vm0 }
 0x29f   : > { %16661 = vmatprep.mubr.msk.f32.mxu0 %vm24843_vm10, %v3948_v55  ;;  %16382 = vmatprep.mubr.msk.f32.mxu1 %vm24845_vm15, %v21399_v45  ;;  %vm24852_vm9 = vmmov %vm24837_vm0  ;;  %v24876_v55 = vld [vmem:[#allocation111_spill] sm:$0xff] }
 0x2a0   : > { %vm24854_vm10 = vmmov %vm24837_vm0 }
 0x2a1   : > { %vm24859_vm15 = vmmov %vm24837_vm0 }
 0x2a2   : > { %16662 = vmatmul.mubr.msk.f32.gmra.mrb[8].mxu0 %vm24844_vm3, %v20834_v23  ;;  %16383 = vmatmul.mubr.msk.f32.gmra.mrb[22].mxu1 %vm24850_vm11, %v24849_v12  ;;  %v24855_v23 = vld [vmem:[#allocation49_spill] sm:$0xff]  ;;  %vm24857_vm3 = vnez %v24856_v37  ;;  %vm24863_vm11 = vmmov %vm24837_vm0 }
 0x2a3   : > { %16664 = vmatprep.mubr.msk.f32.mxu0 %vm24846_vm2, %v3950_v58  ;;  %16385 = vmatprep.mubr.msk.f32.mxu1 %vm24854_vm10, %v24853_v15  ;;  %v3954_v56 = vsel %vm24857_vm3, %v24855_v23, 0.0  ;;  %vm24861_vm2 = vmmov %vm24837_vm0  ;;  %v24878_v58 = vld [vmem:[#allocation56_spill] sm:$0xff] }
 0x2a4   : > { %vm24864_vm8 = vmmov %vm24837_vm0 }
 0x2a5   : > { %vm24868_vm10 = vmmov %vm24837_vm0 }
 0x2a6   : > { %16665 = vmatmul.mubr.msk.f32.gmra.mrb[10].mxu0 %vm24852_vm9, %v24851_v14  ;;  %16386 = vmatmul.mubr.msk.f32.gmra.mrb[24].mxu1 %vm24859_vm15, %v24858_v10  ;;  %vm24867_vm9 = vnez %v24866_v3  ;;  %vm24871_vm15 = vmmov %vm24837_vm0  ;;  %v24884_v14 = vld [vmem:[#allocation51_spill] sm:$0xff] }
 0x2a7   : > { %16667 = vmatprep.mubr.msk.f32.mxu0 %vm24837_vm0, %v3952_v8  ;;  %16388 = vmatprep.mubr.msk.f32.mxu1 %vm24863_vm11, %v24862_v42  ;;  %v3956_v26 = vsel %vm24867_vm9, %v24865_v9, 0.0  ;;  %vm24872_vm3 = vmmov %vm24837_vm0  ;;  %v24883_v8 = vld [vmem:[#allocation59_spill] sm:$0xff]  ;;  %v24889_v9 = vld [vmem:[#allocation96_spill] sm:$0xff] }
 0x2a8   : > { %vm24879_vm11 = vmmov %vm24837_vm0 }
 0x2a9   : > { %vm24882_vm9 = vmmov %vm24837_vm0 }
 0x2aa   : > { %16668 = vmatmul.mubr.msk.f32.gmra.mrb[12].mxu0 %vm24861_vm2, %v24860_v53  ;;  %16389 = vmatmul.mubr.msk.f32.gmra.mrb[26].mxu1 %vm24868_vm10, %v21421_v7  ;;  %vm24875_vm2 = vnez %v24874_v25  ;;  %vm24881_vm10 = vmmov %vm24837_vm0  ;;  %v24888_v53 = vld [vmem:[#allocation95_spill] sm:$0xff] }
 0x2ab   : > { %16670 = vmatprep.mubr.msk.f32.mxu0 %vm24864_vm8, %v3954_v56  ;;  %16391 = vmatprep.mubr.msk.f32.mxu1 %vm24871_vm15, %v24870_v63  ;;  %v3958_v48 = vsel %vm24875_vm2, %v24873_v19, 0.0  ;;  %vm24877_vm8 = vmmov %vm24837_vm0  ;;  %v24886_v56 = vld [vmem:[#allocation60_spill] sm:$0xff] }
 0x2ac   : > { %vm24887_vm15 = vmmov %vm24872_vm3 }
 0x2ad   : > { %vm24892_vm2 = vmmov %vm24872_vm3 }
 0x2ae   : > { %16671 = vmatmul.mubr.msk.f32.gmra.mrb[14].mxu0 %vm24837_vm0, %v24869_v31  ;;  %16392 = vmatmul.mubr.msk.f32.gmra.mrb[28].mxu1 %vm24877_vm8, %v24876_v55  ;;  %vm24885_vm0 = vnez %v24884_v14  ;;  %vm24890_vm8 = vnez %v24889_v9  ;;  %v24893_v31 = vld [vmem:[#allocation54_spill] sm:$0xff] }
 0x2af   : > { %16673 = vmatprep.mubr.msk.f32.mxu0 %vm24872_vm3, %v3956_v26  ;;  %16394 = vmatprep.mubr.msk.f32.mxu1 %vm24881_vm10, %v24880_v61  ;;  %v3960_v23 = vsel %vm24885_vm0, %v24883_v8, 0.0  ;;  %v1498_v26 = vsel %vm24890_vm8, %v24888_v53, 0.0  ;;  %vm24896_vm10 = vmmov %vm24892_vm2  ;;  %v24899_v8 = vld [vmem:[#allocation97_spill] sm:$0xff] }
 0x2b0   : > { %vm24902_vm0 = vmmov %vm24892_vm2 }
 0x2b1   : > { %vm24903_vm7 = vmmov %vm24902_vm0 }
 0x2b2   : > { %16674 = vmatmul.mubr.msk.f32.gmra.mrb[16].mxu0 %vm24879_vm11, %v24878_v58  ;;  %16395 = vmatmul.mubr.msk.f32.gmra.mrb[30].mxu1 %vm24872_vm3, %v21437_v33  ;;  %vm24891_vm11 = vmmov %vm24872_vm3  ;;  %v24897_v58 = vld [vmem:[#allocation62_spill] sm:$0xff] }
 0x2b3   : > { %16676 = vmatprep.mubr.msk.f32.mxu0 %vm24882_vm9, %v3958_v48  ;;  %16438 = vmatprep.mubr.msk.f32.mxu1 %vm24892_vm2, %v1498_v26  ;;  %vm24894_vm9 = vnez %v24893_v31  ;;  %v24895_v48 = vld [vmem:[#allocation98_spill] sm:$0xff]  ;;  %vm24898_vm3 = vmmov %vm24892_vm2  ;;  %v24906_v31 = vld [vmem:[#allocation101_spill] sm:$0xff] }
 0x2b4   : > { %v3962_v19 = vsel %vm24894_vm9, %v24888_v53, 0.0  ;;  %v24909_v53 = vld [vmem:[#allocation100_spill] sm:$0xff]  ;;  %vm24912_vm9 = vmmov %vm24902_vm0 }
 0x2b5   : > { %vm24913_vm6 = vmmov %vm24902_vm0 }
 0x2b6   : > { %16677 = vmatmul.mubr.msk.f32.gmra.mrb[18].mxu0 %vm24887_vm15, %v24886_v56  ;;  %16439 = vmatmul.mubr.msk.f32.vlgmr.msra.gmra.mrb[26].mxu1 %vm24896_vm10, %v24895_v48  ;;  %v24900_v56 = vld [vmem:[#allocation99_spill] sm:$0xff]  ;;  %vm24908_vm10 = vmmov %vm24902_vm0 }
 0x2b7   : > { %16679 = vmatprep.mubr.msk.f32.mxu0 %vm24891_vm11, %v3960_v23  ;;  %vm24901_vm15 = vnez %v24900_v56  ;;  %v24904_v23 = vld [vmem:[#allocation58_spill] sm:$0xff]  ;;  %vm24907_vm11 = vmmov %vm24902_vm0 }
 0x2b8   : > { %v1500_v14 = vsel %vm24901_vm15, %v24899_v8, 0.0  ;;  %vm24905_vm2 = vnez %v24904_v23  ;;  %v21730_v23 = vld [vmem:[#allocation9] sm:$0xff] }
 0x2b9   : > { %16441 = vmatprep.mubr.msk.f32.mxu1 %vm24903_vm7, %v1500_v14  ;;  %v3964_v26 = vsel %vm24905_vm2, %v24899_v8, 0.0  ;;  %v3966_v14 = vsel %vm24890_vm8, %v24909_v53, 0.0  ;;  %vm24915_vm7 = vmmov %vm24902_vm0 }
 0x2ba   : > { %16680 = vmatmul.mubr.msk.f32.gmra.mrb[20].mxu0 %vm24898_vm3, %v24897_v58  ;;  %16442 = vmatmul.mubr.msk.f32.gmra.mrb[28].mxu1 %vm24907_vm11, %v24906_v31  ;;  %v24910_v58 = vld [vmem:[#allocation102_spill] sm:$0xff]  ;;  %vm24916_vm11 = vmmov %vm24902_vm0 }
 0x2bb   : > { %16682 = vmatprep.mubr.msk.f32.mxu0 %vm24902_vm0, %v3962_v19  ;;  %vm24911_vm3 = vnez %v24910_v58  ;;  %v24914_v19 = vld [vmem:[#allocation104_spill] sm:$0xff] }
 0x2bc   : > { %v1502_v25 = vsel %vm24911_vm3, %v24909_v53, 0.0  ;;  %v3939_v53 = vld [vmem:[#allocation2 + $0x11f] sm:$0xff] }
 0x2bd   : > { %16444 = vmatprep.mubr.msk.f32.mxu1 %vm24913_vm6, %v1502_v25  ;;  %vm24918_vm6 = vmmov %vm24902_vm0 }
 0x2be   : > { %16683 = vmatmul.mubr.msk.f32.gmra.mrb[22].mxu0 %vm24908_vm10, %v24895_v48  ;;  %16445 = vmatmul.mubr.msk.f32.gmra.mrb[30].mxu1 %vm24915_vm7, %v24914_v19  ;;  %v24917_v48 = vld [vmem:[#allocation103_spill] sm:$0xff]  ;;  %vm1374_vm10 = vcmask 24576   ;;  %vm24921_vm7 = vmmov %vm24902_vm0 }
 0x2bf   : > { %16685 = vmatprep.mubr.msk.f32.mxu0 %vm24912_vm9, %v3964_v26  ;;  %v3968_v8 = vsel %vm24901_vm15, %v24917_v48, 0.0  ;;  %v3938_v26 = vld [vmem:[#allocation2 + $0x117] sm:$0xff]  ;;  %1375 = vst.msk [vmem:[#allocation2 + $0x128] sm:$0x1] %vm1374_vm10, %v21730_v23  ;;  %vm24919_vm9 = vmmov %vm24902_vm0 }
 0x2c0   : > { %v3970_v25 = vsel %vm24911_vm3, %v3938_v26, 0.0  ;;  %vm24923_vm15 = vmmov %vm24902_vm0  ;;  %v4737_v48 = vld [vmem:[#allocation2 + $0xb1] sm:$0xff] }
 0x2c1   : > { %vm24924_vm10 = vmmov %vm24902_vm0 }
 0x2c2   : > { %16686 = vmatmul.mubr.msk.f32.gmra.mrb[24].mxu0 %vm24902_vm0, %v24906_v31  ;;  %v24920_v31 = vld [vmem:[#allocation105_spill] sm:$0xff]  ;;  %vm24927_vm3 = vmmov %vm24902_vm0 }
 0x2c3   : > { %16688 = vmatprep.mubr.msk.f32.mxu0 %vm24916_vm11, %v3966_v14  ;;  %vm24922_vm11 = vmmov %vm24902_vm0 }
 0x2c6   : > { %16689 = vmatmul.mubr.msk.f32.gmra.mrb[26].mxu0 %vm24918_vm6, %v24914_v19  ;;  %vm24925_vm6 = vmmov %vm24902_vm0  ;;  %v4736_v19 = vld [vmem:[#allocation2 + $0xa9] sm:$0xff] }
 0x2c7   : > { %16691 = vmatprep.mubr.msk.f32.mxu0 %vm24919_vm9, %v3968_v8  ;;  %vm24926_vm9 = vcmask 1043456   ;;  %v24981_v8 = vld [vmem:[#allocation78_spill] sm:$0xff] }
 0x2ca   : > { %16692 = vmatmul.mubr.msk.f32.gmra.mrb[28].mxu0 %vm24921_vm7, %v24920_v31  ;;  %vm24928_vm7 = vmmov %vm24902_vm0  ;;  %v4739_v31 = vld [vmem:[#allocation2 + $0xc1] sm:$0xff] }
 0x2cb   : > { %16694 = vmatprep.mubr.msk.f32.mxu0 %vm24902_vm0, %v3970_v25  ;;  %v4738_v25 = vld [vmem:[#allocation2 + $0xb9] sm:$0xff] }
 0x2ce   : > { %16695 = vmatmul.mubr.msk.f32.gmra.mrb[30].mxu0 %vm24922_vm11, %v3939_v53  ;;  %vm24930_vm11 = vmmov %vm24902_vm0 }
 0x2cf   : > { %16699 = vmatprep.mubr.msk.f32.mxu0 %vm24923_vm15, %v21321_v2  ;;  %vm24929_vm15 = vmmov %vm24902_vm0  ;;  %v24949_v2 = vld [vmem:[#allocation113_spill] sm:$0xff] }
 0x2d2   : > { %16700 = vmatmul.mubr.msk.f32.vlgmr.msra.gmra.mrb[0].mxu0 %vm24924_vm10, %v21329_v46  ;;  %vm24931_vm10 = vmmov %vm24902_vm0  ;;  %v4731_v46 = vld [vmem:[#allocation2 + $0x81] sm:$0xff] }
 0x2d3   : > { %16702 = vmatprep.mubr.msk.f32.mxu0 %vm24925_vm6, %v21333_v20  ;;  %16748 = vmatpush3.msk.msra.mxu0 %vm24926_vm9, %v21591_v50  ;;  %vm24932_vm6 = vmmov %vm24902_vm0  ;;  %v4730_v20 = vld [vmem:[#allocation2 + $0x79] sm:$0xff] }
 0x2d4   : > { %vm24934_vm9 = vmmov %vm24902_vm0 }
 0x2d6   : > { %16703 = vmatmul.mubr.msk.f32.gmra.mrb[2].mxu0 %vm24927_vm3, %v21341_v39  ;;  %vm24933_vm3 = vmmov %vm24902_vm0 }
 0x2d7   : > { %16705 = vmatprep.mubr.msk.f32.mxu0 %vm24928_vm7, %v21343_v38  ;;  %vm24935_vm7 = vmmov %vm24902_vm0  ;;  %v4729_v38 = vld [vmem:[#allocation2 + $0x71] sm:$0xff] }
 0x2da   : > { %16706 = vmatmul.mubr.msk.f32.gmra.mrb[4].mxu0 %vm24902_vm0, %v21349_v0  ;;  %v24969_v0 = vld [vmem:[#allocation69_spill] sm:$0xff] }
 0x2db   : > { %16708 = vmatprep.mubr.msk.f32.mxu0 %vm24929_vm15, %v21351_v49  ;;  %vm24936_vm15 = vmmov %vm24902_vm0  ;;  %v24965_v49 = vld [vmem:[#allocation68_spill] sm:$0xff] }
 0x2de   : > { %16709 = vmatmul.mubr.msk.f32.gmra.mrb[6].mxu0 %vm24930_vm11, %v21357_v21  ;;  %vm24937_vm11 = vmmov %vm24902_vm0  ;;  %v4727_v21 = vld [vmem:[#allocation2 + $0x61] sm:$0xff] }
 0x2df   : > { %16711 = vmatprep.mubr.msk.f32.mxu0 %vm24931_vm10, %v21359_v16  ;;  %vm24938_vm10 = vmmov %vm24902_vm0  ;;  %v4726_v16 = vld [vmem:[#allocation2 + $0x59] sm:$0xff] }
 0x2e2   : > { %16712 = vmatmul.mubr.msk.f32.gmra.mrb[8].mxu0 %vm24932_vm6, %v21365_v17  ;;  %vm24939_vm6 = vmmov %vm24902_vm0  ;;  %v4728_v17 = vld [vmem:[#allocation2 + $0x69] sm:$0xff] }
 0x2e3   : > { %16714 = vmatprep.mubr.msk.f32.mxu0 %vm24933_vm3, %v21367_v52  ;;  %vm24940_vm3 = vmmov %vm24902_vm0 }
 0x2e6   : > { %16715 = vmatmul.mubr.msk.f32.gmra.mrb[10].mxu0 %vm24934_vm9, %v21373_v44  ;;  %vm24941_vm9 = vmmov %vm24902_vm0  ;;  %v4721_v44 = vld [vmem:[#allocation2 + $0x31] sm:$0xff] }
 0x2e7   : > { %16717 = vmatprep.mubr.msk.f32.mxu0 %vm24935_vm7, %v21375_v11  ;;  %vm24942_vm7 = vmmov %vm24902_vm0 }
 0x2ea   : > { %16718 = vmatmul.mubr.msk.f32.gmra.mrb[12].mxu0 %vm24902_vm0, %v21381_v62  ;;  %v4725_v62 = vld [vmem:[#allocation2 + $0x51] sm:$0xff] }
 0x2eb   : > { %16720 = vmatprep.mubr.msk.f32.mxu0 %vm24936_vm15, %v21383_v35  ;;  %vm24943_vm15 = vmmov %vm24902_vm0  ;;  %v4720_v35 = vld [vmem:[#allocation2 + $0x29] sm:$0xff] }
 0x2ee   : > { %16721 = vmatmul.mubr.msk.f32.gmra.mrb[14].mxu0 %vm24937_vm11, %v21389_v57  ;;  %vm24944_vm11 = vmmov %vm24902_vm0  ;;  %v4724_v57 = vld [vmem:[#allocation2 + $0x49] sm:$0xff] }
 0x2ef   : > { %16723 = vmatprep.mubr.msk.f32.mxu0 %vm24938_vm10, %v21391_v51  ;;  %vm24945_vm10 = vmmov %vm24902_vm0  ;;  %v4723_v51 = vld [vmem:[#allocation2 + $0x41] sm:$0xff] }
 0x2f2   : > { %16724 = vmatmul.mubr.msk.f32.gmra.mrb[16].mxu0 %vm24939_vm6, %v21397_v28  ;;  %vm24946_vm6 = vmmov %vm24902_vm0  ;;  %v4360_v28 = vld [vmem:[#allocation2 + $0x118] sm:$0xff] }
 0x2f3   : > { %16726 = vmatprep.mubr.msk.f32.mxu0 %vm24940_vm3, %v21399_v45  ;;  %vm24947_vm3 = vmmov %vm24902_vm0 }
 0x2f6   : > { %16727 = vmatmul.mubr.msk.f32.gmra.mrb[18].mxu0 %vm24941_vm9, %v24849_v12  ;;  %vm24948_vm9 = vmmov %vm24902_vm0  ;;  %v4732_v12 = vld [vmem:[#allocation2 + $0x89] sm:$0xff] }
 0x2f7   : > { %16729 = vmatprep.mubr.msk.f32.mxu0 %vm24942_vm7, %v24853_v15  ;;  %vm24950_vm7 = vmmov %vm24902_vm0  ;;  %v4733_v15 = vld [vmem:[#allocation2 + $0x91] sm:$0xff] }
 0x2fa   : > { %16730 = vmatmul.mubr.msk.f32.gmra.mrb[20].mxu0 %vm24902_vm0, %v24858_v10  ;;  %v24973_v10 = vld [vmem:[#allocation72_spill] sm:$0xff] }
 0x2fb   : > { %16732 = vmatprep.mubr.msk.f32.mxu0 %vm24943_vm15, %v24862_v42  ;;  %vm24951_vm15 = vmmov %vm24902_vm0 }
 0x2fe   : > { %16733 = vmatmul.mubr.msk.f32.gmra.mrb[22].mxu0 %vm24944_vm11, %v21421_v7  ;;  %v4361_v7 = vld [vmem:[#allocation2 + $0x120] sm:$0xff]  ;;  %vm24952_vm11 = vmmov %vm24902_vm0 }
 0x2ff   : > { %16735 = vmatprep.mubr.msk.f32.mxu0 %vm24945_vm10, %v24870_v63  ;;  %vm24953_vm10 = vmmov %vm24902_vm0  ;;  %v4734_v63 = vld [vmem:[#allocation2 + $0x99] sm:$0xff] }
 0x302   : > { %16736 = vmatmul.mubr.msk.f32.gmra.mrb[24].mxu0 %vm24946_vm6, %v24876_v55  ;;  %vm24954_vm6 = vnez %v24566_v24  ;;  %v4735_v55 = vld [vmem:[#allocation2 + $0xa1] sm:$0xff] }
 0x303   : > { %16738 = vmatprep.mubr.msk.f32.mxu0 %vm24947_vm3, %v24880_v61  ;;  %v4753_v45 = vsel %vm24954_vm6, %v4721_v44, 0.0  ;;  %vm24955_vm3 = vmmov %vm24902_vm0  ;;  %v24977_v61 = vld [vmem:[#allocation75_spill] sm:$0xff]  ;;  %v4743_v44 = vld [vmem:[#allocation2 + $0xe1] sm:$0xff] }
 0x304   : > { %vm24961_vm6 = vmmov %vm24902_vm0 }
 0x306   : > { %16739 = vmatmul.mubr.msk.f32.gmra.mrb[26].mxu0 %vm24948_vm9, %v21437_v33  ;;  %v4722_v33 = vld [vmem:[#allocation2 + $0x39] sm:$0xff]  ;;  %vm24956_vm9 = vmmov %vm24902_vm0 }
 0x307   : > { %16741 = vmatprep.mubr.msk.f32.mxu0 %vm24950_vm7, %v24949_v2  ;;  %vm24957_vm7 = vnez %v24569_v34  ;;  %v4740_v2 = vld [vmem:[#allocation2 + $0xc9] sm:$0xff] }
 0x30a   : > { %16742 = vmatmul.mubr.msk.f32.gmra.mrb[28].mxu0 %vm24902_vm0, %v21445_v30  ;;  %v4755_v30 = vsel %vm24957_vm7, %v4723_v51, 0.0  ;;  %vm24964_vm7 = vmmov %vm24902_vm0  ;;  %v4745_v51 = vld [vmem:[#allocation2 + $0xf1] sm:$0xff] }
 0x30b   : > { %16744 = vmatprep.mubr.msk.f32.mxu0 %vm24951_vm15, %v4360_v28  ;;  %vm24958_vm15 = vmmov %vm24902_vm0  ;;  %v4741_v28 = vld [vmem:[#allocation2 + $0xd1] sm:$0xff] }
 0x30e   : > { %16745 = vmatmul.mubr.msk.f32.gmra.mrb[30].mxu0 %vm24952_vm11, %v4361_v7  ;;  %vm24959_vm11 = vnez %v24574_v59  ;;  %v4773_v7 = vsel %vm24790_vm14, %v4741_v28, 0.0 }
 0x30f   : > { %16749 = vmatprep.mubr.msk.f32.mxu0 %vm24953_vm10, %v4720_v35  ;;  %v4757_v11 = vsel %vm24959_vm11, %v4725_v62, 0.0  ;;  %vm24960_vm10 = vmmov %vm24902_vm0  ;;  %v4742_v35 = vld [vmem:[#allocation2 + $0xd9] sm:$0xff]  ;;  %v4747_v62 = vld [vmem:[#allocation2 + $0x101] sm:$0xff] }
 0x310   : > { %vm24968_vm11 = vmmov %vm24961_vm6 }
 0x312   : > { %16750 = vmatmul.mubr.msk.f32.vlgmr.msra.gmra.mrb[0].mxu0 %vm24955_vm3, %v4753_v45  ;;  %vm24962_vm3 = vnez %v24580_v22 }
 0x313   : > { %16752 = vmatprep.mubr.msk.f32.mxu0 %vm24956_vm9, %v4722_v33  ;;  %v4759_v52 = vsel %vm24962_vm3, %v4727_v21, 0.0  ;;  %vm24963_vm9 = vmmov %vm24902_vm0  ;;  %v4744_v33 = vld [vmem:[#allocation2 + $0xe9] sm:$0xff]  ;;  %v4750_v21 = vld [vmem:[#allocation2 + $0x119] sm:$0xff] }
 0x314   : > { %vm24972_vm3 = vmmov %vm24964_vm7 }
 0x316   : > { %16753 = vmatmul.mubr.msk.f32.gmra.mrb[2].mxu0 %vm24902_vm0, %v4755_v30  ;;  %vm24966_vm0 = vnez %v24965_v49 }
 0x317   : > { %16755 = vmatprep.mubr.msk.f32.mxu0 %vm24958_vm15, %v4724_v57  ;;  %v4761_v39 = vsel %vm24966_vm0, %v4729_v38, 0.0  ;;  %vm24967_vm15 = vmmov %vm24961_vm6  ;;  %v4746_v57 = vld [vmem:[#allocation2 + $0xf9] sm:$0xff] }
 0x318   : > { %vm24976_vm0 = vmmov %vm24972_vm3 }
 0x31a   : > { %16756 = vmatmul.mubr.msk.f32.gmra.mrb[4].mxu0 %vm24960_vm10, %v4757_v11  ;;  %vm24971_vm10 = vmmov %vm24964_vm7  ;;  %v4779_v11 = vsel %vm24814_vm13, %v4747_v62, 0.0 }
 0x31b   : > { %16758 = vmatprep.mubr.msk.f32.mxu0 %vm24961_vm6, %v4726_v16  ;;  %vm24970_vm6 = vnez %v24969_v0  ;;  %v4781_v16 = vsel %vm21155_vm1, %v21568_v36, 0.0 }
 0x31c   : > { %v4763_v50 = vsel %vm24970_vm6, %v4731_v46, 0.0  ;;  %vm24980_vm6 = vmmov %vm24976_vm0 }
 0x31e   : > { %16759 = vmatmul.mubr.msk.f32.gmra.mrb[6].mxu0 %vm24963_vm9, %v4759_v52  ;;  %vm24975_vm9 = vmmov %vm24972_vm3  ;;  %v4751_v52 = vld [vmem:[#allocation2 + $0x121] sm:$0xff] }
 0x31f   : > { %16761 = vmatprep.mubr.msk.f32.mxu0 %vm24964_vm7, %v4728_v17  ;;  %vm24974_vm7 = vnez %v24973_v10  ;;  %v4783_v17 = vsel %vm24822_vm12, %v4751_v52, 0.0 }
 0x320   : > { %v4765_v42 = vsel %vm24974_vm7, %v4733_v15, 0.0  ;;  %vm24984_vm7 = vmmov %vm24976_vm0  ;;  %v5354_v15 = vld [vmem:[#allocation15 + $0x20] sm:$0xff] }
 0x322   : > { %16762 = vmatmul.mubr.msk.f32.gmra.mrb[8].mxu0 %vm24967_vm15, %v4761_v39  ;;  %vm24979_vm15 = vmmov %vm24976_vm0 }
 0x323   : > { %16764 = vmatprep.mubr.msk.f32.mxu0 %vm24968_vm11, %v4730_v20  ;;  %vm24978_vm11 = vnez %v24977_v61 }
 0x324   : > { %v4767_v14 = vsel %vm24978_vm11, %v4735_v55, 0.0  ;;  %vm24987_vm11 = vmmov %vm24980_vm6 }
 0x326   : > { %16765 = vmatmul.mubr.msk.f32.gmra.mrb[10].mxu0 %vm24971_vm10, %v4763_v50  ;;  %vm24983_vm10 = vmmov %vm24976_vm0 }
 0x327   : > { %16767 = vmatprep.mubr.msk.f32.mxu0 %vm24972_vm3, %v4732_v12  ;;  %vm24982_vm3 = vnez %v24981_v8 }
 0x328   : > { %v4769_v26 = vsel %vm24982_vm3, %v4737_v48, 0.0  ;;  %v5357_v48 = vld [vmem:[#allocation15 + $0x38] sm:$0xff] }
 0x32a   : > { %16768 = vmatmul.mubr.msk.f32.gmra.mrb[12].mxu0 %vm24975_vm9, %v4765_v42  ;;  %vm24986_vm9 = vmmov %vm24980_vm6  ;;  %v5355_v42 = vld [vmem:[#allocation15 + $0x28] sm:$0xff] }
 0x32b   : > { %16770 = vmatprep.mubr.msk.f32.mxu0 %vm24976_vm0, %v4734_v63  ;;  %vm24985_vm0 = vnez %v24784_v32  ;;  %v18243_v55 = vpack.c.bf16 %v5355_v42, %v5354_v15 }
 0x32c   : > { %v4771_v53 = vsel %vm24985_vm0, %v4739_v31, 0.0  ;;  %vm24991_vm0 = vmmov %vm24980_vm6 }
 0x32d   : > { %vm24994_vm14 = vmmov %vm24991_vm0  ;;  %18244 = vmatprep.subr.bf16.mxu1 %v18243_v55 }
 0x32e   : > { %16771 = vmatmul.mubr.msk.f32.gmra.mrb[14].mxu0 %vm24979_vm15, %v4767_v14  ;;  %vm24988_vm15 = vmmov %vm24980_vm6  ;;  %18246 = vmatpush3.bf16.msra.mxu1 %v18243_v55 }
 0x32f   : > { %16773 = vmatprep.mubr.msk.f32.mxu0 %vm24980_vm6, %v4736_v19  ;;  %v5356_v19 = vld [vmem:[#allocation15 + $0x30] sm:$0xff] }
 0x332   : > { %16774 = vmatmul.mubr.msk.f32.gmra.mrb[16].mxu0 %vm24983_vm10, %v4769_v26  ;;  %vm24990_vm10 = vmmov %vm24980_vm6 }
 0x333   : > { %16776 = vmatprep.mubr.msk.f32.mxu0 %vm24984_vm7, %v4738_v25  ;;  %vm24989_vm7 = vnez %v24800_v27  ;;  %v18247_v25 = vpack.c.bf16 %v5357_v48, %v5356_v19 }
 0x334   : > { %v4775_v45 = vsel %vm24989_vm7, %v4743_v44, 0.0 }
 0x335   : > { %18248 = vmatprep.subr.bf16.mxu1 %v18247_v25 }
 0x336   : > { %16777 = vmatmul.mubr.msk.f32.gmra.mrb[18].mxu0 %vm24986_vm9, %v4771_v53  ;;  %vm24993_vm9 = vmmov %vm24991_vm0  ;;  %18250 = vmatpush3.bf16.msra.mxu1 %v18247_v25 }
 0x337   : > { %16779 = vmatprep.mubr.msk.f32.mxu0 %vm24987_vm11, %v4740_v2  ;;  %vm24992_vm11 = vnez %v24808_v6  ;;  %v21957_v6 = vld [vmem:[#allocation13] ss:$0 sm:$0xff] }
 0x338   : > { %v4777_v30 = vsel %vm24992_vm11, %v4745_v51, 0.0  ;;  %v5317_v51 = vld [vmem:[#allocation15] sm:$0xff] }
 0x33a   : > { %16780 = vmatmul.mubr.msk.f32.gmra.mrb[20].mxu0 %vm24980_vm6, %v4773_v7  ;;  %vm24995_vm6 = vmmov %vm24991_vm0 }
 0x33b   : > { %16782 = vmatprep.mubr.msk.f32.mxu0 %vm24988_vm15, %v4742_v35  ;;  %vm24996_vm15 = vmmov %vm24991_vm0 }
 0x33e   : > { %16783 = vmatmul.mubr.msk.f32.gmra.mrb[22].mxu0 %vm24990_vm10, %v4775_v45  ;;  %vm24997_vm10 = vmmov %vm24991_vm0 }
 0x33f   : > { %16785 = vmatprep.mubr.msk.f32.mxu0 %vm24991_vm0, %v4744_v33 }
 0x342   : > { %16786 = vmatmul.mubr.msk.f32.gmra.mrb[24].mxu0 %vm24993_vm9, %v4777_v30  ;;  %vm5213_vm9 = vcmask 261120   ;;  %v5318_v30 = vld [vmem:[#allocation15 + $0x8] sm:$0xff] }
 0x343   : > { %16788 = vmatprep.mubr.msk.f32.mxu0 %vm24994_vm14, %v4746_v57  ;;  %vm24998_vm14 = vmmov %vm24991_vm0  ;;  %5214 = vst.msk [vmem:[#allocation3] sm:$0xff] %vm5213_vm9, %v21730_v23  ;;  %v18251_v62 = vpack.c.bf16 %v5318_v30, %v5317_v51  ;;  %v5320_v51 = vld [vmem:[#allocation15 + $0x18] sm:$0xff] }
 0x344   : > { %5215 = vst.msk [vmem:[#allocation3 + $0x8] sm:$0xff] %vm5213_vm9, %v21730_v23  ;;  %5216 = vst.msk [vmem:[#allocation3 + $0x10] sm:$0xff] %vm5213_vm9, %v21730_v23 }
 0x345   : > { %5249 = vst.msk [vmem:[#allocation3 + $0x118] sm:$0xff] %vm5213_vm9, %v21730_v23  ;;  %5250 = vst.msk [vmem:[#allocation3 + $0x120] sm:$0xff] %vm5213_vm9, %v21730_v23  ;;  %18252 = vmatprep.subr.bf16.mxu1 %v18251_v62 }
 0x346   : > { %16789 = vmatmul.mubr.msk.f32.gmra.mrb[26].mxu0 %vm24995_vm6, %v4779_v11  ;;  %9272 = vst.msk [vmem:[#allocation5] sm:$0xff] %vm5213_vm9, %v21730_v23  ;;  %9273 = vst.msk [vmem:[#allocation5 + $0x8] sm:$0xff] %vm5213_vm9, %v21730_v23  ;;  %vm25027_vm6 = vnez %v24517_v5 }
 0x347   : > { %16791 = vmatprep.mubr.msk.f32.mxu0 %vm24996_vm15, %v21566_v4  ;;  %9282 = vst.msk [vmem:[#allocation5 + $0x50] sm:$0xff] %vm5213_vm9, %v21730_v23  ;;  %vm25029_vm15 = vnez %v24522_v29 }
 0x349   : > { %v21871_v38 = vpop.f32.mrb[0].mxu1 }
 0x34a   : > { %16792 = vmatmul.mubr.msk.f32.gmra.mrb[28].mxu0 %vm24991_vm0, %v4781_v16  ;;  %v21873_v39 = vpop.f32.mrb[1].mxu1  ;;  %vm25030_vm0 = vnez %v24528_v54 }
 0x34b   : > { %16794 = vmatprep.mubr.msk.f32.mxu0 %vm24997_vm10, %v4750_v21  ;;  %v5321_v2 = vld [vmem:[#allocation3 + $0x8] sm:$0xff]  ;;  %v5322_v23 = vld [vmem:[#allocation3 + $0x10] sm:$0xff]  ;;  %vm25031_vm10 = vnez %v24530_v60 }
 0x34c   : > { %16805 = vmatprep.mubr.msk.f32.mxu1 %vm5213_vm9, %v5321_v2 }
 0x34d   : > { %v21876_v4 = vpop.f32.mrb[2].mxu1  ;;  %16806 = vmatmul.mubr.msk.f32.vlgmr.msra.gmra.mrb[32].mxu1 %vm5213_vm9, %v5322_v23  ;;  %v5319_v23 = vld [vmem:[#allocation15 + $0x10] sm:$0xff] }
 0x34e   : > { %16795 = vmatmul.mubr.msk.f32.gmra.mrb[30].mxu0 %vm24998_vm14, %v4783_v17  ;;  %v21878_v20 = vpop.f32.mrb[3].mxu1  ;;  %18254 = vmatpush3.bf16.msra.mxu1 %v18251_v62  ;;  %v18255_v30 = vpack.c.bf16 %v5320_v51, %v5319_v23  ;;  %v6065_v62 = vld [vmem:[#allocation15 + $0x40] sm:$0xff]  ;;  %vm25032_vm14 = vnez %v24848_v1 }
 0x34f   : > { %v21954_v18 = vpack.c.bf16 %v6066_v13, %v6065_v62 }
 0x350   : > { %18256 = vmatprep.subr.bf16.mxu1 %v18255_v30 }
 0x351   : > { %v21880_v36 = vpop.f32.mrb[4].mxu1 }
 0x352   : > { %v21882_v46 = vpop.f32.mrb[5].mxu1  ;;  %18258 = vmatpush3.bf16.msra.mxu1 %v18255_v30 }
 0x353   : > { %18260 = vmatprep.subr.bf16.mxu1 %v21954_v18 }
 0x355   : > { %v21884_v50 = vpop.f32.mrb[6].mxu1 }
 0x356   : > { %v21886_v12 = vpop.f32.mrb[7].mxu1 }
 0x359   : > { %v21888_v63 = vpop.f32.mrb[8].mxu1 }
 0x35a   : > { %v21906_v14 = vpop.f32.mrb[9].mxu1 }
 0x35d   : > { %v21908_v26 = vpop.f32.mrb[10].mxu1 }
 0x35e   : > { %v21910_v31 = vpop.f32.mrb[11].mxu1 }
 0x361   : > { %v21912_v53 = vpop.f32.mrb[12].mxu1 }
 0x362   : > { %v21914_v28 = vpop.f32.mrb[13].mxu1 }
 0x365   : > { %v21918_v7 = vpop.f32.mrb[14].mxu1 }
 0x366   : > { %v21920_v35 = vpop.f32.mrb[15].mxu1 }
 0x369   : > { %v21922_v44 = vpop.f32.mrb[16].mxu1 }
 0x36a   : > { %v21924_v45 = vpop.f32.mrb[17].mxu1 }
 0x36d   : > { %v21926_v33 = vpop.f32.mrb[18].mxu1 }
 0x36e   : > { %v21928_v57 = vpop.f32.mrb[19].mxu1 }
 0x371   : > { %v21930_v11 = vpop.f32.mrb[20].mxu1 }
 0x372   : > { %v21932_v16 = vpop.f32.mrb[21].mxu1 }
 0x375   : > { %v21934_v21 = vpop.f32.mrb[22].mxu1 }
 0x376   : > { %v21936_v52 = vpop.f32.mrb[23].mxu1 }
 0x379   : > { %v21938_v17 = vpop.f32.mrb[24].mxu1 }
 0x37a   : > { %v21940_v15 = vpop.f32.mrb[25].mxu1 }
 0x389   : > { %v21942_v42 = vpop.f32.mrb[26].mxu1 }
 0x38a   : > { %v21944_v55 = vpop.f32.mrb[27].mxu1 }
 0x38d   : > { %v21946_v19 = vpop.f32.mrb[28].mxu1 }
 0x38e   : > { %v21948_v48 = vpop.f32.mrb[29].mxu1 }
 0x391   : > { %v21950_v25 = vpop.f32.mrb[30].mxu1 }
 0x392   : > { %v21952_v2 = vpop.f32.mrb[31].mxu1 }
 0x3e5   : > { %v16751_v41 = vpop.f32.mrb[0].mxu0 }
 0x3e6   : > { %v19027_v27 = vadd.f32 %v16751_v41, %v21871_v38  ;;  %v4951_v43 = vpop.f32.mrb[1].mxu0 }
 0x3e7   : > { %v19028_v32 = vadd.f32 %v4951_v43, %v21873_v39 }
 0x3e8   : > { %v5150_v8 = vadd.f32 %v19027_v27, %v21957_v6 }
 0x3e9   : > { %v5149_v23 = vadd.f32 %v19028_v32, %v21957_v6  ;;  %v16754_v51 = vpop.f32.mrb[2].mxu0 }
 0x3ea   : > { %v5182_v30 = vmax.f32 %v5150_v8, 0.0  ;;  %v19029_v61 = vadd.f32 %v16754_v51, %v21876_v4  ;;  %v4961_v13 = vpop.f32.mrb[3].mxu0 }
 0x3eb   : > { %v5181_v62 = vmax.f32 %v5149_v23, 0.0  ;;  %v19030_v10 = vadd.f32 %v4961_v13, %v21878_v20 }
 0x3ec   : > { %5218 = vst.msk [vmem:[#allocation3 + $0x20] sm:$0xff] %vm5213_vm9, %v5182_v30  ;;  %v5152_v0 = vadd.f32 %v19029_v61, %v21957_v6 }
 0x3ed   : > { %5217 = vst.msk [vmem:[#allocation3 + $0x18] sm:$0xff] %vm5213_vm9, %v5181_v62  ;;  %v5151_v43 = vadd.f32 %v19030_v10, %v21957_v6  ;;  %v16757_v41 = vpop.f32.mrb[4].mxu0 }
 0x3ee   : > { %v5184_v27 = vmax.f32 %v5152_v0, 0.0  ;;  %v19031_v32 = vadd.f32 %v16757_v41, %v21880_v36  ;;  %v4971_v38 = vpop.f32.mrb[5].mxu0 }
 0x3ef   : > { %v5183_v8 = vmax.f32 %v5151_v43, 0.0  ;;  %v19032_v39 = vadd.f32 %v4971_v38, %v21882_v46 }
 0x3f0   : > { %5220 = vst.msk [vmem:[#allocation3 + $0x30] sm:$0xff] %vm5213_vm9, %v5184_v27  ;;  %v5154_v4 = vadd.f32 %v19031_v32, %v21957_v6 }
 0x3f1   : > { %5219 = vst.msk [vmem:[#allocation3 + $0x28] sm:$0xff] %vm5213_vm9, %v5183_v8  ;;  %v5153_v61 = vadd.f32 %v19032_v39, %v21957_v6  ;;  %v16760_v20 = vpop.f32.mrb[6].mxu0 }
 0x3f2   : > { %v5186_v23 = vmax.f32 %v5154_v4, 0.0  ;;  %v19033_v10 = vadd.f32 %v16760_v20, %v21884_v50  ;;  %v4981_v51 = vpop.f32.mrb[7].mxu0 }
 0x3f3   : > { %v5185_v0 = vmax.f32 %v5153_v61, 0.0  ;;  %v19034_v36 = vadd.f32 %v4981_v51, %v21886_v12  ;;  %v21985_v43 = vld [vmem:[#allocation3 + $0x20] sm:$0xff] }
 0x3f4   : > { %5222 = vst.msk [vmem:[#allocation3 + $0x40] sm:$0xff] %vm5213_vm9, %v5186_v23  ;;  %v5156_v46 = vadd.f32 %v19033_v10, %v21957_v6  ;;  %v21979_v30 = vld [vmem:[#allocation3 + $0x18] sm:$0xff]  ;;  %24999 = vst [vmem:[#allocation70_spill] sm:$0xff] %v21985_v43 }
 0x3f5   : > { %5221 = vst.msk [vmem:[#allocation3 + $0x38] sm:$0xff] %vm5213_vm9, %v5185_v0  ;;  %v5155_v13 = vadd.f32 %v19034_v36, %v21957_v6  ;;  %v16763_v62 = vpop.f32.mrb[8].mxu0  ;;  %16808 = vmatprep.mubr.msk.f32.mxu1 %vm5213_vm9, %v21979_v30 }
 0x3f6   : > { %v5188_v50 = vmax.f32 %v5156_v46, 0.0  ;;  %v19035_v41 = vadd.f32 %v16763_v62, %v21888_v63  ;;  %v4991_v12 = vpop.f32.mrb[9].mxu0  ;;  %16809 = vmatmul.mubr.msk.f32.gmra.mrb[34].mxu1 %vm5213_vm9, %v21985_v43 }
 0x3f7   : > { %v5187_v27 = vmax.f32 %v5155_v13, 0.0  ;;  %v19036_v32 = vadd.f32 %v4991_v12, %v21906_v14  ;;  %v21999_v63 = vld [vmem:[#allocation3 + $0x30] sm:$0xff] }
 0x3f8   : > { %5224 = vst.msk [vmem:[#allocation3 + $0x50] sm:$0xff] %vm5213_vm9, %v5188_v50  ;;  %v5158_v38 = vadd.f32 %v19035_v41, %v21957_v6  ;;  %v21993_v8 = vld [vmem:[#allocation3 + $0x28] sm:$0xff]  ;;  %25001 = vst [vmem:[#allocation73_spill] sm:$0xff] %v21999_v63 }
 0x3f9   : > { %25000 = vst [vmem:[#allocation71_spill] sm:$0xff] %v21993_v8  ;;  %5223 = vst.msk [vmem:[#allocation3 + $0x48] sm:$0xff] %vm5213_vm9, %v5187_v27  ;;  %v5157_v39 = vadd.f32 %v19036_v32, %v21957_v6  ;;  %v16766_v4 = vpop.f32.mrb[10].mxu0  ;;  %16811 = vmatprep.mubr.msk.f32.mxu1 %vm5213_vm9, %v21993_v8  ;;  %v22339_v8 = vld [vmem:[#allocation3 + $0x21] sm:$0xff] }
 0x3fa   : > { %v5190_v61 = vmax.f32 %v5158_v38, 0.0  ;;  %v19037_v20 = vadd.f32 %v16766_v4, %v21908_v26  ;;  %v5001_v14 = vpop.f32.mrb[11].mxu0  ;;  %16812 = vmatmul.mubr.msk.f32.gmra.mrb[36].mxu1 %vm5213_vm9, %v21999_v63  ;;  %v6878_v63 = vld [vmem:[#allocation15 + $0x88] sm:$0xff] }
 0x3fb   : > { %v5189_v23 = vmax.f32 %v5157_v39, 0.0  ;;  %v19038_v10 = vadd.f32 %v5001_v14, %v21910_v31  ;;  %v22013_v26 = vld [vmem:[#allocation3 + $0x40] sm:$0xff] }
 0x3fc   : > { %5226 = vst.msk [vmem:[#allocation3 + $0x60] sm:$0xff] %vm5213_vm9, %v5190_v61  ;;  %v5160_v51 = vadd.f32 %v19037_v20, %v21957_v6  ;;  %v22007_v0 = vld [vmem:[#allocation3 + $0x38] sm:$0xff]  ;;  %25003 = vst [vmem:[#allocation76_spill] sm:$0xff] %v22013_v26 }
 0x3fd   : > { %25002 = vst [vmem:[#allocation74_spill] sm:$0xff] %v22007_v0  ;;  %5225 = vst.msk [vmem:[#allocation3 + $0x58] sm:$0xff] %vm5213_vm9, %v5189_v23  ;;  %v5159_v36 = vadd.f32 %v19038_v10, %v21957_v6  ;;  %v16769_v46 = vpop.f32.mrb[12].mxu0  ;;  %16814 = vmatprep.mubr.msk.f32.mxu1 %vm5213_vm9, %v22007_v0  ;;  %v6877_v0 = vld [vmem:[#allocation15 + $0x80] sm:$0xff] }
 0x3fe   : > { %v5192_v13 = vmax.f32 %v5160_v51, 0.0  ;;  %v19039_v62 = vadd.f32 %v16769_v46, %v21912_v53  ;;  %v5011_v31 = vpop.f32.mrb[13].mxu0  ;;  %16815 = vmatmul.mubr.msk.f32.gmra.mrb[38].mxu1 %vm5213_vm9, %v22013_v26  ;;  %v22344_v43 = vpack.c.bf16 %v6878_v63, %v6877_v0  ;;  %v22361_v0 = vld [vmem:[#allocation3 + $0x39] sm:$0xff] }
 0x3ff   : > { %v5191_v50 = vmax.f32 %v5159_v36, 0.0  ;;  %v19040_v41 = vadd.f32 %v5011_v31, %v21914_v28  ;;  %v22027_v53 = vld [vmem:[#allocation3 + $0x50] sm:$0xff]  ;;  %25047 = vst [vmem:[#allocation110_spill] sm:$0xff] %v22361_v0 }
 0x400   : > { %5228 = vst.msk [vmem:[#allocation3 + $0x70] sm:$0xff] %vm5213_vm9, %v5192_v13  ;;  %v5162_v12 = vadd.f32 %v19039_v62, %v21957_v6  ;;  %v22021_v27 = vld [vmem:[#allocation3 + $0x48] sm:$0xff]  ;;  %25005 = vst [vmem:[#allocation79_spill] sm:$0xff] %v22027_v53 }
 0x401   : > { %25004 = vst [vmem:[#allocation77_spill] sm:$0xff] %v22021_v27  ;;  %5227 = vst.msk [vmem:[#allocation3 + $0x68] sm:$0xff] %vm5213_vm9, %v5191_v50  ;;  %v5161_v32 = vadd.f32 %v19040_v41, %v21957_v6  ;;  %v16772_v38 = vpop.f32.mrb[14].mxu0  ;;  %16817 = vmatprep.mubr.msk.f32.mxu1 %vm5213_vm9, %v22021_v27 }
 0x402   : > { %v5194_v39 = vmax.f32 %v5162_v12, 0.0  ;;  %v19041_v4 = vadd.f32 %v16772_v38, %v21918_v7  ;;  %v5021_v28 = vpop.f32.mrb[15].mxu0  ;;  %16818 = vmatmul.mubr.msk.f32.gmra.mrb[40].mxu1 %vm5213_vm9, %v22027_v53  ;;  %v6490_v53 = vld [vmem:[#allocation15 + $0x78] sm:$0xff] }
 0x403   : > { %v5193_v61 = vmax.f32 %v5161_v32, 0.0  ;;  %v19042_v20 = vadd.f32 %v5021_v28, %v21920_v35  ;;  %v22041_v7 = vld [vmem:[#allocation3 + $0x60] sm:$0xff] }
 0x404   : > { %5230 = vst.msk [vmem:[#allocation3 + $0x80] sm:$0xff] %vm5213_vm9, %v5194_v39  ;;  %v5164_v14 = vadd.f32 %v19041_v4, %v21957_v6  ;;  %v22035_v23 = vld [vmem:[#allocation3 + $0x58] sm:$0xff]  ;;  %25007 = vst [vmem:[#allocation82_spill] sm:$0xff] %v22041_v7 }
 0x405   : > { %25006 = vst [vmem:[#allocation80_spill] sm:$0xff] %v22035_v23  ;;  %5229 = vst.msk [vmem:[#allocation3 + $0x78] sm:$0xff] %vm5213_vm9, %v5193_v61  ;;  %v5163_v10 = vadd.f32 %v19042_v20, %v21957_v6  ;;  %v16775_v51 = vpop.f32.mrb[16].mxu0  ;;  %16820 = vmatprep.mubr.msk.f32.mxu1 %vm5213_vm9, %v22035_v23  ;;  %v6489_v23 = vld [vmem:[#allocation15 + $0x70] sm:$0xff] }
 0x406   : > { %v5196_v36 = vmax.f32 %v5164_v14, 0.0  ;;  %v19043_v46 = vadd.f32 %v16775_v51, %v21922_v44  ;;  %v5031_v35 = vpop.f32.mrb[17].mxu0  ;;  %16821 = vmatmul.mubr.msk.f32.gmra.mrb[42].mxu1 %vm5213_vm9, %v22041_v7  ;;  %v18271_v27 = vpack.c.bf16 %v6490_v53, %v6489_v23  ;;  %v22350_v23 = vld [vmem:[#allocation3 + $0x29] sm:$0xff] }
 0x407   : > { %v5195_v13 = vmax.f32 %v5163_v10, 0.0  ;;  %v19044_v62 = vadd.f32 %v5031_v35, %v21924_v45  ;;  %v22055_v44 = vld [vmem:[#allocation3 + $0x70] sm:$0xff] }
 0x408   : > { %5232 = vst.msk [vmem:[#allocation3 + $0x90] sm:$0xff] %vm5213_vm9, %v5196_v36  ;;  %v5166_v31 = vadd.f32 %v19043_v46, %v21957_v6  ;;  %v22049_v50 = vld [vmem:[#allocation3 + $0x68] sm:$0xff]  ;;  %25009 = vst [vmem:[#allocation85_spill] sm:$0xff] %v22055_v44 }
 0x409   : > { %25008 = vst [vmem:[#allocation83_spill] sm:$0xff] %v22049_v50  ;;  %5231 = vst.msk [vmem:[#allocation3 + $0x88] sm:$0xff] %vm5213_vm9, %v5195_v13  ;;  %v5165_v41 = vadd.f32 %v19044_v62, %v21957_v6  ;;  %v16778_v12 = vpop.f32.mrb[18].mxu0  ;;  %16823 = vmatprep.mubr.msk.f32.mxu1 %vm5213_vm9, %v22049_v50  ;;  %v6000_v50 = vld [vmem:[#allocation3 + $0x9] sm:$0xff] }
 0x40a   : > { %v5198_v32 = vmax.f32 %v5166_v31, 0.0  ;;  %v19045_v38 = vadd.f32 %v16778_v12, %v21926_v33  ;;  %v5041_v45 = vpop.f32.mrb[19].mxu0  ;;  %16824 = vmatmul.mubr.msk.f32.gmra.mrb[44].mxu1 %vm5213_vm9, %v22055_v44 }
 0x40b   : > { %v5197_v39 = vmax.f32 %v5165_v41, 0.0  ;;  %v19046_v4 = vadd.f32 %v5041_v45, %v21928_v57  ;;  %v22069_v33 = vld [vmem:[#allocation3 + $0x80] sm:$0xff] }
 0x40c   : > { %5234 = vst.msk [vmem:[#allocation3 + $0xa0] sm:$0xff] %vm5213_vm9, %v5198_v32  ;;  %v5168_v28 = vadd.f32 %v19045_v38, %v21957_v6  ;;  %v22063_v61 = vld [vmem:[#allocation3 + $0x78] sm:$0xff]  ;;  %25011 = vst [vmem:[#allocation88_spill] sm:$0xff] %v22069_v33 }
 0x40d   : > { %25010 = vst [vmem:[#allocation86_spill] sm:$0xff] %v22063_v61  ;;  %5233 = vst.msk [vmem:[#allocation3 + $0x98] sm:$0xff] %vm5213_vm9, %v5197_v39  ;;  %v5167_v20 = vadd.f32 %v19046_v4, %v21957_v6  ;;  %v16781_v14 = vpop.f32.mrb[20].mxu0  ;;  %16826 = vmatprep.mubr.msk.f32.mxu1 %vm5213_vm9, %v22063_v61 }
 0x40e   : > { %v5200_v10 = vmax.f32 %v5168_v28, 0.0  ;;  %v19047_v51 = vadd.f32 %v16781_v14, %v21930_v11  ;;  %v5051_v57 = vpop.f32.mrb[21].mxu0  ;;  %16827 = vmatmul.mubr.msk.f32.gmra.mrb[46].mxu1 %vm5213_vm9, %v22069_v33 }
 0x40f   : > { %v5199_v36 = vmax.f32 %v5167_v20, 0.0  ;;  %v19048_v46 = vadd.f32 %v5051_v57, %v21932_v16  ;;  %v22083_v11 = vld [vmem:[#allocation3 + $0x90] sm:$0xff] }
 0x410   : > { %5236 = vst.msk [vmem:[#allocation3 + $0xb0] sm:$0xff] %vm5213_vm9, %v5200_v10  ;;  %v5170_v35 = vadd.f32 %v19047_v51, %v21957_v6  ;;  %v22077_v13 = vld [vmem:[#allocation3 + $0x88] sm:$0xff]  ;;  %25013 = vst [vmem:[#allocation90_spill] sm:$0xff] %v22083_v11 }
 0x411   : > { %25012 = vst [vmem:[#allocation40_spill] sm:$0xff] %v22077_v13  ;;  %5235 = vst.msk [vmem:[#allocation3 + $0xa8] sm:$0xff] %vm5213_vm9, %v5199_v36  ;;  %v5169_v62 = vadd.f32 %v19048_v46, %v21957_v6  ;;  %v16784_v31 = vpop.f32.mrb[22].mxu0  ;;  %16829 = vmatprep.mubr.msk.f32.mxu1 %vm5213_vm9, %v22077_v13 }
 0x412   : > { %v5202_v41 = vmax.f32 %v5170_v35, 0.0  ;;  %v19049_v12 = vadd.f32 %v16784_v31, %v21934_v21  ;;  %v5061_v16 = vpop.f32.mrb[23].mxu0  ;;  %16830 = vmatmul.mubr.msk.f32.gmra.mrb[48].mxu1 %vm5213_vm9, %v22083_v11 }
 0x413   : > { %v5201_v32 = vmax.f32 %v5169_v62, 0.0  ;;  %v19050_v38 = vadd.f32 %v5061_v16, %v21936_v52  ;;  %v22097_v21 = vld [vmem:[#allocation3 + $0xa0] sm:$0xff] }
 0x414   : > { %5238 = vst.msk [vmem:[#allocation3 + $0xc0] sm:$0xff] %vm5213_vm9, %v5202_v41  ;;  %v5172_v45 = vadd.f32 %v19049_v12, %v21957_v6  ;;  %v22091_v39 = vld [vmem:[#allocation3 + $0x98] sm:$0xff]  ;;  %25015 = vst [vmem:[#allocation46_spill] sm:$0xff] %v22097_v21 }
 0x415   : > { %25014 = vst [vmem:[#allocation92_spill] sm:$0xff] %v22091_v39  ;;  %5237 = vst.msk [vmem:[#allocation3 + $0xb8] sm:$0xff] %vm5213_vm9, %v5201_v32  ;;  %v5171_v4 = vadd.f32 %v19050_v38, %v21957_v6  ;;  %v16787_v28 = vpop.f32.mrb[24].mxu0  ;;  %16832 = vmatprep.mubr.msk.f32.mxu1 %vm5213_vm9, %v22091_v39 }
 0x416   : > { %v5204_v20 = vmax.f32 %v5172_v45, 0.0  ;;  %v19051_v14 = vadd.f32 %v16787_v28, %v21938_v17  ;;  %v5071_v52 = vpop.f32.mrb[25].mxu0  ;;  %16833 = vmatmul.mubr.msk.f32.gmra.mrb[50].mxu1 %vm5213_vm9, %v22097_v21 }
 0x417   : > { %v5203_v10 = vmax.f32 %v5171_v4, 0.0  ;;  %v19052_v51 = vadd.f32 %v5071_v52, %v21940_v15  ;;  %v22111_v17 = vld [vmem:[#allocation3 + $0xb0] sm:$0xff] }
 0x418   : > { %5240 = vst.msk [vmem:[#allocation3 + $0xd0] sm:$0xff] %vm5213_vm9, %v5204_v20  ;;  %v5174_v57 = vadd.f32 %v19051_v14, %v21957_v6  ;;  %v22105_v36 = vld [vmem:[#allocation3 + $0xa8] sm:$0xff]  ;;  %25017 = vst [vmem:[#allocation106_spill] sm:$0xff] %v22111_v17 }
 0x419   : > { %25016 = vst [vmem:[#allocation43_spill] sm:$0xff] %v22105_v36  ;;  %5239 = vst.msk [vmem:[#allocation3 + $0xc8] sm:$0xff] %vm5213_vm9, %v5203_v10  ;;  %v5173_v46 = vadd.f32 %v19052_v51, %v21957_v6  ;;  %v16790_v35 = vpop.f32.mrb[26].mxu0  ;;  %16835 = vmatprep.mubr.msk.f32.mxu1 %vm5213_vm9, %v22105_v36 }
 0x41a   : > { %v5206_v62 = vmax.f32 %v5174_v57, 0.0  ;;  %v19053_v31 = vadd.f32 %v16790_v35, %v21942_v42  ;;  %v5081_v15 = vpop.f32.mrb[27].mxu0  ;;  %16836 = vmatmul.mubr.msk.f32.gmra.mrb[52].mxu1 %vm5213_vm9, %v22111_v17 }
 0x41b   : > { %v5205_v41 = vmax.f32 %v5173_v46, 0.0  ;;  %v19054_v12 = vadd.f32 %v5081_v15, %v21944_v55  ;;  %v22125_v42 = vld [vmem:[#allocation3 + $0xc0] sm:$0xff] }
 0x41c   : > { %5242 = vst.msk [vmem:[#allocation3 + $0xe0] sm:$0xff] %vm5213_vm9, %v5206_v62  ;;  %v5176_v16 = vadd.f32 %v19053_v31, %v21957_v6  ;;  %v22119_v32 = vld [vmem:[#allocation3 + $0xb8] sm:$0xff]  ;;  %25019 = vst [vmem:[#allocation107_spill] sm:$0xff] %v22125_v42 }
 0x41d   : > { %25018 = vst [vmem:[#allocation47_spill] sm:$0xff] %v22119_v32  ;;  %5241 = vst.msk [vmem:[#allocation3 + $0xd8] sm:$0xff] %vm5213_vm9, %v5205_v41  ;;  %v5175_v38 = vadd.f32 %v19054_v12, %v21957_v6  ;;  %v16793_v45 = vpop.f32.mrb[28].mxu0  ;;  %16838 = vmatprep.mubr.msk.f32.mxu1 %vm5213_vm9, %v22119_v32  ;;  %v22291_v36 = vld [vmem:[#allocation3 + $0xbf] sm:$0xff] }
 0x41e   : > { %v5208_v4 = vmax.f32 %v5176_v16, 0.0  ;;  %v19055_v28 = vadd.f32 %v16793_v45, %v21946_v19  ;;  %v5091_v55 = vpop.f32.mrb[29].mxu0  ;;  %16839 = vmatmul.mubr.msk.f32.gmra.mrb[54].mxu1 %vm5213_vm9, %v22125_v42  ;;  %v5253_v45 = vld [vmem:[#allocation3 + $0x7] sm:$0xff]  ;;  %v22281_v42 = vld [vmem:[#allocation3 + $0xaf] sm:$0xff] }
 0x41f   : > { %v5207_v20 = vmax.f32 %v5175_v38, 0.0  ;;  %v19056_v14 = vadd.f32 %v5091_v55, %v21948_v48  ;;  %v22139_v19 = vld [vmem:[#allocation3 + $0xd0] sm:$0xff] }
 0x420   : > { %5244 = vst.msk [vmem:[#allocation3 + $0xf0] sm:$0xff] %vm5213_vm9, %v5208_v4  ;;  %v5178_v52 = vadd.f32 %v19055_v28, %v21957_v6  ;;  %v22133_v10 = vld [vmem:[#allocation3 + $0xc8] sm:$0xff]  ;;  %25021 = vst [vmem:[#allocation44_spill] sm:$0xff] %v22139_v19  ;;  %v5285_v28 = vsel %vm25027_vm6, %v5253_v45, 0.0 }
 0x421   : > { %25020 = vst [vmem:[#allocation49_spill] sm:$0xff] %v22133_v10  ;;  %5243 = vst.msk [vmem:[#allocation3 + $0xe8] sm:$0xff] %vm5213_vm9, %v5207_v20  ;;  %v5177_v51 = vadd.f32 %v19056_v14, %v21957_v6  ;;  %v16796_v57 = vpop.f32.mrb[30].mxu0  ;;  %16841 = vmatprep.mubr.msk.f32.mxu1 %vm5213_vm9, %v22133_v10  ;;  %v6067_v20 = vld [vmem:[#allocation15 + $0x50] sm:$0xff]  ;;  %v6068_v14 = vld [vmem:[#allocation15 + $0x58] sm:$0xff] }
 0x422   : > { %v5210_v46 = vmax.f32 %v5178_v52, 0.0  ;;  %v19057_v35 = vadd.f32 %v16796_v57, %v21950_v25  ;;  %v5101_v48 = vpop.f32.mrb[31].mxu0  ;;  %16842 = vmatmul.mubr.msk.f32.gmra.mrb[56].mxu1 %vm5213_vm9, %v22139_v19  ;;  %v5254_v52 = vld [vmem:[#allocation3 + $0xf] sm:$0xff]  ;;  %v18263_v57 = vpack.c.bf16 %v6068_v14, %v6067_v20  ;;  %v22209_v45 = vld [vmem:[#allocation3 + $0x47] sm:$0xff]  ;;  %v22219_v14 = vld [vmem:[#allocation3 + $0x57] sm:$0xff] }
 0x423   : > { %v5209_v62 = vmax.f32 %v5177_v51, 0.0  ;;  %v19058_v31 = vadd.f32 %v5101_v48, %v21952_v2  ;;  %v22153_v25 = vld [vmem:[#allocation3 + $0xe0] sm:$0xff]  ;;  %v22178_v51 = vld [vmem:[#allocation3 + $0x17] sm:$0xff]  ;;  %v5293_v20 = vsel %vm25030_vm0, %v22209_v45, 0.0  ;;  %v22301_v11 = vld [vmem:[#allocation3 + $0xcf] sm:$0xff] }
 0x424   : > { %5246 = vst.msk [vmem:[#allocation3 + $0x100] sm:$0xff] %vm5213_vm9, %v5210_v46  ;;  %v5180_v15 = vadd.f32 %v19057_v35, %v21957_v6  ;;  %v22147_v41 = vld [vmem:[#allocation3 + $0xd8] sm:$0xff]  ;;  %25023 = vst [vmem:[#allocation50_spill] sm:$0xff] %v22153_v25  ;;  %v6487_v46 = vld [vmem:[#allocation15 + $0x60] sm:$0xff]  ;;  %v5287_v48 = vsel %vm25029_vm15, %v22178_v51, 0.0 }
 0x425   : > { %25022 = vst [vmem:[#allocation108_spill] sm:$0xff] %v22147_v41  ;;  %5245 = vst.msk [vmem:[#allocation3 + $0xf8] sm:$0xff] %vm5213_vm9, %v5209_v62  ;;  %v5179_v12 = vadd.f32 %v19058_v31, %v21957_v6  ;;  %16844 = vmatprep.mubr.msk.f32.mxu1 %vm5213_vm9, %v22147_v41  ;;  %v6488_v35 = vld [vmem:[#allocation15 + $0x68] sm:$0xff]  ;;  %v22271_v41 = vld [vmem:[#allocation3 + $0x9f] sm:$0xff] }
 0x426   : > { %v5212_v16 = vmax.f32 %v5180_v15, 0.0  ;;  %16845 = vmatmul.mubr.msk.f32.gmra.mrb[58].mxu1 %vm5213_vm9, %v22153_v25  ;;  %v22185_v62 = vld [vmem:[#allocation3 + $0x27] sm:$0xff]  ;;  %v22188_v31 = vpack.c.bf16 %v6488_v35, %v6487_v46  ;;  %v22190_v15 = vld [vmem:[#allocation3 + $0x1f] sm:$0xff]  ;;  %v22279_v10 = vld [vmem:[#allocation3 + $0xb7] sm:$0xff] }
 0x427   : > { %v5211_v2 = vmax.f32 %v5179_v12, 0.0  ;;  %v22163_v6 = vld [vmem:[#allocation3 + $0xf0] sm:$0xff]  ;;  %v5289_v12 = vsel %vm20731_vm4, %v22185_v62, 0.0  ;;  %v22229_v46 = vld [vmem:[#allocation3 + $0x67] sm:$0xff]  ;;  %v22231_v35 = vld [vmem:[#allocation3 + $0x5f] sm:$0xff] }
 0x428   : > { %5248 = vst.msk [vmem:[#allocation3 + $0x110] sm:$0xff] %vm5213_vm9, %v5212_v16  ;;  %v22158_v38 = vld [vmem:[#allocation3 + $0xe8] sm:$0xff]  ;;  %25025 = vst [vmem:[#allocation52_spill] sm:$0xff] %v22163_v6  ;;  %v22198_v16 = vld [vmem:[#allocation3 + $0x37] sm:$0xff] }
 0x429   : > { %25024 = vst [vmem:[#allocation109_spill] sm:$0xff] %v22158_v38  ;;  %5247 = vst.msk [vmem:[#allocation3 + $0x108] sm:$0xff] %vm5213_vm9, %v5211_v2  ;;  %16847 = vmatprep.mubr.msk.f32.mxu1 %vm5213_vm9, %v22158_v38  ;;  %v5291_v2 = vsel %vm20749_vm5, %v22198_v16, 0.0  ;;  %v22269_v25 = vld [vmem:[#allocation3 + $0xa7] sm:$0xff]  ;;  %v22299_v39 = vld [vmem:[#allocation3 + $0xd7] sm:$0xff] }
 0x42a   : > { %16848 = vmatmul.mubr.msk.f32.gmra.mrb[60].mxu1 %vm5213_vm9, %v22163_v6  ;;  %v22261_v6 = vld [vmem:[#allocation3 + $0x8f] sm:$0xff]  ;;  %v22289_v17 = vld [vmem:[#allocation3 + $0xc7] sm:$0xff]  ;;  %v22311_v33 = vld [vmem:[#allocation3 + $0xdf] sm:$0xff] }
 0x42b   : > { %v22173_v55 = vld [vmem:[#allocation3 + $0x100] sm:$0xff]  ;;  %v5309_v21 = vsel %vm24905_vm2, %v22289_v17, 0.0  ;;  %vm25042_vm2 = vnez %v24900_v56  ;;  %v22321_v44 = vld [vmem:[#allocation3 + $0xef] sm:$0xff] }
 0x42c   : > { %v22167_v4 = vld [vmem:[#allocation3 + $0xf8] sm:$0xff]  ;;  %25028 = vst [vmem:[#allocation53_spill] sm:$0xff] %v22173_v55  ;;  %v22309_v13 = vld [vmem:[#allocation3 + $0xe7] sm:$0xff] }
 0x42d   : > { %25026 = vst [vmem:[#allocation45_spill] sm:$0xff] %v22167_v4  ;;  %16850 = vmatprep.mubr.msk.f32.mxu1 %vm5213_vm9, %v22167_v4  ;;  %v22259_v4 = vld [vmem:[#allocation3 + $0x97] sm:$0xff]  ;;  %v22329_v7 = vld [vmem:[#allocation3 + $0xff] sm:$0xff] }
 0x42e   : > { %16851 = vmatmul.mubr.msk.f32.gmra.mrb[62].mxu1 %vm5213_vm9, %v22173_v55  ;;  %v22251_v55 = vld [vmem:[#allocation3 + $0x7f] sm:$0xff]  ;;  %v22319_v61 = vld [vmem:[#allocation3 + $0xf7] sm:$0xff] }
 0x42f   : > { %16861 = vmatprep.mubr.msk.f32.mxu1 %vm5213_vm9, %v5285_v28  ;;  %v22211_v28 = vld [vmem:[#allocation3 + $0x3f] sm:$0xff] }
 0x432   : > { %16862 = vmatmul.mubr.msk.f32.vlgmr.msra.gmra.mrb[32].mxu1 %vm5213_vm9, %v5254_v52  ;;  %v22221_v52 = vld [vmem:[#allocation3 + $0x4f] sm:$0xff] }
 0x433   : > { %16864 = vmatprep.mubr.msk.f32.mxu1 %vm5213_vm9, %v5287_v48  ;;  %18262 = vmatpush3.bf16.msra.mxu1 %v21954_v18  ;;  %v22201_v18 = vld [vmem:[#allocation3 + $0x2f] sm:$0xff]  ;;  %v5297_v48 = vsel %vm25032_vm14, %v22229_v46, 0.0  ;;  %vm25034_vm14 = vnez %v24866_v3 }
 0x434   : > { %18264 = vmatprep.subr.bf16.mxu1 %v18263_v57 }
 0x436   : > { %16865 = vmatmul.mubr.msk.f32.gmra.mrb[34].mxu1 %vm5213_vm9, %v22190_v15 }
 0x437   : > { %16867 = vmatprep.mubr.msk.f32.mxu1 %vm5213_vm9, %v5289_v12  ;;  %18266 = vmatpush3.bf16.msra.mxu1 %v18263_v57  ;;  %v5295_v57 = vsel %vm25031_vm10, %v22219_v14, 0.0  ;;  %v22239_v12 = vld [vmem:[#allocation3 + $0x77] sm:$0xff]  ;;  %vm25033_vm10 = vnez %v24856_v37 }
 0x438   : > { %18268 = vmatprep.subr.bf16.mxu1 %v22188_v31 }
 0x43a   : > { %16868 = vmatmul.mubr.msk.f32.gmra.mrb[36].mxu1 %vm5213_vm9, %v22201_v18 }
 0x43b   : > { %16870 = vmatprep.mubr.msk.f32.mxu1 %vm5213_vm9, %v5291_v2  ;;  %v22241_v2 = vld [vmem:[#allocation3 + $0x6f] sm:$0xff] }
 0x43e   : > { %16871 = vmatmul.mubr.msk.f32.gmra.mrb[38].mxu1 %vm5213_vm9, %v22211_v28 }
 0x43f   : > { %16873 = vmatprep.mubr.msk.f32.mxu1 %vm5213_vm9, %v5293_v20  ;;  %v5299_v20 = vsel %vm25033_vm10, %v22239_v12, 0.0 }
 0x442   : > { %16874 = vmatmul.mubr.msk.f32.gmra.mrb[40].mxu1 %vm5213_vm9, %v22221_v52 }
 0x443   : > { %16876 = vmatprep.mubr.msk.f32.mxu1 %vm5213_vm9, %v5295_v57  ;;  %v22249_v57 = vld [vmem:[#allocation3 + $0x87] sm:$0xff] }
 0x446   : > { %16877 = vmatmul.mubr.msk.f32.gmra.mrb[42].mxu1 %vm5213_vm9, %v22231_v35 }
 0x447   : > { %16879 = vmatprep.mubr.msk.f32.mxu1 %vm5213_vm9, %v5297_v48  ;;  %v5301_v48 = vsel %vm25034_vm14, %v22249_v57, 0.0 }
 0x44a   : > { %16880 = vmatmul.mubr.msk.f32.gmra.mrb[44].mxu1 %vm5213_vm9, %v22241_v2 }
 0x44b   : > { %16882 = vmatprep.mubr.msk.f32.mxu1 %vm5213_vm9, %v5299_v20  ;;  %v25035_v20 = vld [vmem:[#allocation48_spill] sm:$0xff] }
 0x44c   : > { %vm25036_vm10 = vnez %v25035_v20 }
 0x44d   : > { %v5303_v38 = vsel %vm25036_vm10, %v22259_v4, 0.0 }
 0x44e   : > { %16883 = vmatmul.mubr.msk.f32.gmra.mrb[46].mxu1 %vm5213_vm9, %v22251_v55 }
 0x44f   : > { %16885 = vmatprep.mubr.msk.f32.mxu1 %vm5213_vm9, %v5301_v48  ;;  %v25037_v48 = vld [vmem:[#allocation51_spill] sm:$0xff] }
 0x450   : > { %vm25038_vm14 = vnez %v25037_v48 }
 0x451   : > { %v5305_v19 = vsel %vm25038_vm14, %v22269_v25, 0.0 }
 0x452   : > { %16886 = vmatmul.mubr.msk.f32.gmra.mrb[48].mxu1 %vm5213_vm9, %v22261_v6 }
 0x453   : > { %16888 = vmatprep.mubr.msk.f32.mxu1 %vm5213_vm9, %v5303_v38  ;;  %v25039_v38 = vld [vmem:[#allocation54_spill] sm:$0xff] }
 0x454   : > { %vm25040_vm10 = vnez %v25039_v38 }
 0x455   : > { %v5307_v32 = vsel %vm25040_vm10, %v22279_v10, 0.0 }
 0x456   : > { %16889 = vmatmul.mubr.msk.f32.gmra.mrb[50].mxu1 %vm5213_vm9, %v22271_v41 }
 0x457   : > { %16891 = vmatprep.mubr.msk.f32.mxu1 %vm5213_vm9, %v5305_v19  ;;  %v25041_v19 = vld [vmem:[#allocation58_spill] sm:$0xff] }
 0x45a   : > { %16892 = vmatmul.mubr.msk.f32.gmra.mrb[52].mxu1 %vm5213_vm9, %v22281_v42 }
 0x45b   : > { %16894 = vmatprep.mubr.msk.f32.mxu1 %vm5213_vm9, %v5307_v32  ;;  %v5311_v32 = vsel %vm24890_vm8, %v22299_v39, 0.0  ;;  %vm25043_vm8 = vnez %v24910_v58 }
 0x45e   : > { %16895 = vmatmul.mubr.msk.f32.gmra.mrb[54].mxu1 %vm5213_vm9, %v22291_v36 }
 0x45f   : > { %16897 = vmatprep.mubr.msk.f32.mxu1 %vm5213_vm9, %v5309_v21  ;;  %v5313_v21 = vsel %vm25042_vm2, %v22309_v13, 0.0  ;;  %vm25044_vm2 = vnez %v24566_v24 }
 0x462   : > { %16898 = vmatmul.mubr.msk.f32.gmra.mrb[56].mxu1 %vm5213_vm9, %v22301_v11 }
 0x463   : > { %16900 = vmatprep.mubr.msk.f32.mxu1 %vm5213_vm9, %v5311_v32  ;;  %v5315_v32 = vsel %vm25043_vm8, %v22319_v61, 0.0  ;;  %vm25045_vm8 = vnez %v24569_v34 }
 0x464   : > { %v6035_v53 = vsel %vm25045_vm8, %v22339_v8, 0.0  ;;  %vm25049_vm8 = vnez %v24580_v22 }
 0x466   : > { %16901 = vmatmul.mubr.msk.f32.gmra.mrb[58].mxu1 %vm5213_vm9, %v22311_v33 }
 0x467   : > { %16903 = vmatprep.mubr.msk.f32.mxu1 %vm5213_vm9, %v5313_v21  ;;  %v6001_v21 = vld [vmem:[#allocation3 + $0x11] sm:$0xff] }
 0x468   : > { %v6033_v26 = vsel %vm25044_vm2, %v6001_v21, 0.0  ;;  %vm25046_vm2 = vnez %v24574_v59  ;;  %v22373_v21 = vld [vmem:[#allocation3 + $0x51] sm:$0xff]  ;;  %v22383_v59 = vld [vmem:[#allocation3 + $0x61] sm:$0xff] }
 0x469   : > { %25051 = vst [vmem:[#allocation56_spill] sm:$0xff] %v22373_v21  ;;  %25054 = vst [vmem:[#allocation59_spill] sm:$0xff] %v22383_v59 }
 0x46a   : > { %16904 = vmatmul.mubr.msk.f32.gmra.mrb[60].mxu1 %vm5213_vm9, %v22321_v44 }
 0x46b   : > { %16906 = vmatprep.mubr.msk.f32.mxu1 %vm5213_vm9, %v5315_v32  ;;  %v22337_v32 = vld [vmem:[#allocation3 + $0x19] sm:$0xff] }
 0x46e   : > { %16907 = vmatmul.mubr.msk.f32.gmra.mrb[62].mxu1 %vm5213_vm9, %v22329_v7 }
 0x46f   : > { %16917 = vmatprep.mubr.msk.f32.mxu1 %vm5213_vm9, %v6000_v50  ;;  %v22363_v50 = vld [vmem:[#allocation3 + $0x41] sm:$0xff] }
 0x470   : > { %25048 = vst [vmem:[#allocation55_spill] sm:$0xff] %v22363_v50 }
 0x472   : > { %16918 = vmatmul.mubr.msk.f32.vlgmr.msra.gmra.mrb[32].mxu1 %vm5213_vm9, %v6033_v26  ;;  %v22352_v26 = vld [vmem:[#allocation3 + $0x31] sm:$0xff] }
 0x473   : > { %16920 = vmatprep.mubr.msk.f32.mxu1 %vm5213_vm9, %v22337_v32  ;;  %18270 = vmatpush3.bf16.msra.mxu1 %v22188_v31  ;;  %v6037_v63 = vsel %vm25046_vm2, %v22352_v26, 0.0  ;;  %v6039_v31 = vsel %vm25049_vm8, %v22363_v50, 0.0  ;;  %vm25052_vm2 = vnez %v24965_v49  ;;  %v22393_v50 = vld [vmem:[#allocation3 + $0x71] sm:$0xff] }
 0x474   : > { %18272 = vmatprep.subr.bf16.mxu1 %v18271_v27  ;;  %25058 = vst [vmem:[#allocation95_spill] sm:$0xff] %v22393_v50 }
 0x476   : > { %16921 = vmatmul.mubr.msk.f32.gmra.mrb[34].mxu1 %vm5213_vm9, %v6035_v53  ;;  %v6041_v53 = vsel %vm25052_vm2, %v22373_v21, 0.0  ;;  %v22403_v21 = vld [vmem:[#allocation3 + $0x81] sm:$0xff] }
 0x477   : > { %16923 = vmatprep.mubr.msk.f32.mxu1 %vm5213_vm9, %v22350_v23  ;;  %18274 = vmatpush3.bf16.msra.mxu1 %v18271_v27  ;;  %v22371_v27 = vld [vmem:[#allocation3 + $0x49] sm:$0xff]  ;;  %25062 = vst [vmem:[#allocation98_spill] sm:$0xff] %v22403_v21 }
 0x478   : > { %18276 = vmatprep.subr.bf16.mxu1 %v22344_v43  ;;  %25050 = vst [vmem:[#allocation111_spill] sm:$0xff] %v22371_v27 }
 0x47a   : > { %16924 = vmatmul.mubr.msk.f32.gmra.mrb[36].mxu1 %vm5213_vm9, %v6037_v63  ;;  %v22381_v63 = vld [vmem:[#allocation3 + $0x59] sm:$0xff] }
 0x47b   : > { %16926 = vmatprep.mubr.msk.f32.mxu1 %vm5213_vm9, %v22361_v0  ;;  %25053 = vst [vmem:[#allocation112_spill] sm:$0xff] %v22381_v63  ;;  %v6880_v0 = vld [vmem:[#allocation15 + $0x98] sm:$0xff] }
 0x47e   : > { %16927 = vmatmul.mubr.msk.f32.gmra.mrb[38].mxu1 %vm5213_vm9, %v6039_v31  ;;  %v25055_v31 = vld [vmem:[#allocation69_spill] sm:$0xff] }
 0x47f   : > { %16929 = vmatprep.mubr.msk.f32.mxu1 %vm5213_vm9, %v22371_v27  ;;  %vm25056_vm8 = vnez %v25055_v31  ;;  %v22391_v27 = vld [vmem:[#allocation3 + $0x69] sm:$0xff] }
 0x480   : > { %v6043_v22 = vsel %vm25056_vm8, %v22383_v59, 0.0  ;;  %25057 = vst [vmem:[#allocation60_spill] sm:$0xff] %v22391_v27  ;;  %v22413_v59 = vld [vmem:[#allocation3 + $0x91] sm:$0xff] }
 0x481   : > { %25066 = vst [vmem:[#allocation97_spill] sm:$0xff] %v22413_v59 }
 0x482   : > { %16930 = vmatmul.mubr.msk.f32.gmra.mrb[40].mxu1 %vm5213_vm9, %v6041_v53  ;;  %v25059_v53 = vld [vmem:[#allocation72_spill] sm:$0xff] }
 0x483   : > { %16932 = vmatprep.mubr.msk.f32.mxu1 %vm5213_vm9, %v22381_v63  ;;  %vm25060_vm2 = vnez %v25059_v53  ;;  %v22401_v63 = vld [vmem:[#allocation3 + $0x79] sm:$0xff]  ;;  %v6049_v53 = vsel %vm24982_vm3, %v22413_v59, 0.0  ;;  %v22443_v59 = vld [vmem:[#allocation3 + $0xc1] sm:$0xff] }
 0x484   : > { %v6045_v49 = vsel %vm25060_vm2, %v22393_v50, 0.0  ;;  %25061 = vst [vmem:[#allocation96_spill] sm:$0xff] %v22401_v63  ;;  %v22423_v50 = vld [vmem:[#allocation3 + $0xa1] sm:$0xff]  ;;  %25077 = vst [vmem:[#allocation113_spill] sm:$0xff] %v22443_v59 }
 0x485   : > { %25069 = vst [vmem:[#allocation100_spill] sm:$0xff] %v22423_v50 }
 0x486   : > { %16933 = vmatmul.mubr.msk.f32.gmra.mrb[42].mxu1 %vm5213_vm9, %v6043_v22  ;;  %v25063_v22 = vld [vmem:[#allocation75_spill] sm:$0xff] }
 0x487   : > { %16935 = vmatprep.mubr.msk.f32.mxu1 %vm5213_vm9, %v22391_v27  ;;  %vm25064_vm8 = vnez %v25063_v22  ;;  %v22411_v27 = vld [vmem:[#allocation3 + $0x89] sm:$0xff] }
 0x488   : > { %v6047_v31 = vsel %vm25064_vm8, %v22403_v21, 0.0  ;;  %25065 = vst [vmem:[#allocation62_spill] sm:$0xff] %v22411_v27  ;;  %v22433_v21 = vld [vmem:[#allocation3 + $0xb1] sm:$0xff] }
 0x489   : > { %25073 = vst [vmem:[#allocation103_spill] sm:$0xff] %v22433_v21 }
 0x48a   : > { %16936 = vmatmul.mubr.msk.f32.gmra.mrb[44].mxu1 %vm5213_vm9, %v6045_v49 }
 0x48b   : > { %16938 = vmatprep.mubr.msk.f32.mxu1 %vm5213_vm9, %v22401_v63  ;;  %v22421_v63 = vld [vmem:[#allocation3 + $0x99] sm:$0xff] }
 0x48c   : > { %25068 = vst [vmem:[#allocation101_spill] sm:$0xff] %v22421_v63 }
 0x48e   : > { %16939 = vmatmul.mubr.msk.f32.gmra.mrb[46].mxu1 %vm5213_vm9, %v6047_v31  ;;  %v25070_v31 = vld [vmem:[#allocation81_spill] sm:$0xff] }
 0x48f   : > { %16941 = vmatprep.mubr.msk.f32.mxu1 %vm5213_vm9, %v22411_v27  ;;  %vm25071_vm8 = vnez %v25070_v31  ;;  %v22431_v27 = vld [vmem:[#allocation3 + $0xa9] sm:$0xff]  ;;  %v6055_v31 = vsel %vm24989_vm7, %v22443_v59, 0.0  ;;  %v22473_v59 = vld [vmem:[#allocation3 + $0xf1] sm:$0xff] }
 0x490   : > { %v6051_v22 = vsel %vm25071_vm8, %v22423_v50, 0.0  ;;  %25072 = vst [vmem:[#allocation104_spill] sm:$0xff] %v22431_v27  ;;  %v22453_v50 = vld [vmem:[#allocation3 + $0xd1] sm:$0xff]  ;;  %25086 = vst [vmem:[#allocation115_spill] sm:$0xff] %v22473_v59 }
 0x491   : > { %25080 = vst [vmem:[#allocation51_spill] sm:$0xff] %v22453_v50 }
 0x492   : > { %16942 = vmatmul.mubr.msk.f32.gmra.mrb[48].mxu1 %vm5213_vm9, %v6049_v53  ;;  %v25074_v53 = vld [vmem:[#allocation84_spill] sm:$0xff] }
 0x493   : > { %16944 = vmatprep.mubr.msk.f32.mxu1 %vm5213_vm9, %v22421_v63  ;;  %vm25075_vm3 = vnez %v25074_v53  ;;  %v22441_v63 = vld [vmem:[#allocation3 + $0xb9] sm:$0xff]  ;;  %v6057_v53 = vsel %vm24992_vm11, %v22453_v50, 0.0  ;;  %v22483_v50 = vld [vmem:[#allocation3 + $0x101] sm:$0xff] }
 0x494   : > { %v6053_v49 = vsel %vm25075_vm3, %v22433_v21, 0.0  ;;  %25076 = vst [vmem:[#allocation105_spill] sm:$0xff] %v22441_v63  ;;  %v22463_v21 = vld [vmem:[#allocation3 + $0xe1] sm:$0xff]  ;;  %25089 = vst [vmem:[#allocation117_spill] sm:$0xff] %v22483_v50 }
 0x495   : > { %25083 = vst [vmem:[#allocation58_spill] sm:$0xff] %v22463_v21 }
 0x496   : > { %16945 = vmatmul.mubr.msk.f32.gmra.mrb[50].mxu1 %vm5213_vm9, %v6051_v22  ;;  %v6059_v22 = vsel %vm24814_vm13, %v22463_v21, 0.0  ;;  %v6879_v21 = vld [vmem:[#allocation15 + $0x90] sm:$0xff] }
 0x497   : > { %16947 = vmatprep.mubr.msk.f32.mxu1 %vm5213_vm9, %v22431_v27  ;;  %v22451_v27 = vld [vmem:[#allocation3 + $0xc9] sm:$0xff] }
 0x498   : > { %25079 = vst [vmem:[#allocation48_spill] sm:$0xff] %v22451_v27 }
 0x49a   : > { %16948 = vmatmul.mubr.msk.f32.gmra.mrb[52].mxu1 %vm5213_vm9, %v6053_v49  ;;  %v6061_v49 = vsel %vm21155_vm1, %v22473_v59, 0.0  ;;  %v7299_v59 = vld [vmem:[#allocation15 + $0xa0] sm:$0xff] }
 0x49b   : > { %16950 = vmatprep.mubr.msk.f32.mxu1 %vm5213_vm9, %v22441_v63  ;;  %v22461_v63 = vld [vmem:[#allocation3 + $0xd9] sm:$0xff] }
 0x49c   : > { %25082 = vst [vmem:[#allocation54_spill] sm:$0xff] %v22461_v63 }
 0x49e   : > { %16951 = vmatmul.mubr.msk.f32.gmra.mrb[54].mxu1 %vm5213_vm9, %v6055_v31  ;;  %v6063_v31 = vsel %vm24822_vm12, %v22483_v50, 0.0 }
 0x49f   : > { %16953 = vmatprep.mubr.msk.f32.mxu1 %vm5213_vm9, %v22451_v27  ;;  %v22471_v27 = vld [vmem:[#allocation3 + $0xe9] sm:$0xff] }
 0x4a0   : > { %25085 = vst [vmem:[#allocation114_spill] sm:$0xff] %v22471_v27 }
 0x4a2   : > { %16954 = vmatmul.mubr.msk.f32.gmra.mrb[56].mxu1 %vm5213_vm9, %v6057_v53  ;;  %v6454_v53 = vsel %vm25027_vm6, %v22178_v51, 0.0  ;;  %v6458_v51 = vsel %vm20731_vm4, %v22198_v16, 0.0  ;;  %vm25091_vm4 = vnez %v24530_v60 }
 0x4a3   : > { %16956 = vmatprep.mubr.msk.f32.mxu1 %vm5213_vm9, %v22461_v63  ;;  %v22481_v63 = vld [vmem:[#allocation3 + $0xf9] sm:$0xff] }
 0x4a4   : > { %25088 = vst [vmem:[#allocation116_spill] sm:$0xff] %v22481_v63 }
 0x4a6   : > { %16957 = vmatmul.mubr.msk.f32.gmra.mrb[58].mxu1 %vm5213_vm9, %v6059_v22  ;;  %v6456_v22 = vsel %vm25029_vm15, %v22185_v62, 0.0 }
 0x4a7   : > { %16959 = vmatprep.mubr.msk.f32.mxu1 %vm5213_vm9, %v22471_v27  ;;  %v7300_v27 = vld [vmem:[#allocation15 + $0xa8] sm:$0xff] }
 0x4aa   : > { %16960 = vmatmul.mubr.msk.f32.gmra.mrb[60].mxu1 %vm5213_vm9, %v6061_v49  ;;  %v18279_v49 = vpack.c.bf16 %v6880_v0, %v6879_v21 }
 0x4ab   : > { %16962 = vmatprep.mubr.msk.f32.mxu1 %vm5213_vm9, %v22481_v63 }
 0x4ae   : > { %16963 = vmatmul.mubr.msk.f32.gmra.mrb[62].mxu1 %vm5213_vm9, %v6063_v31  ;;  %v18283_v31 = vpack.c.bf16 %v7300_v27, %v7299_v59  ;;  %v6462_v59 = vsel %vm25030_vm0, %v22219_v14, 0.0  ;;  %vm25093_vm0 = vnez %v24856_v37 }
 0x4af   : > { %16973 = vmatprep.mubr.msk.f32.mxu1 %vm5213_vm9, %v6454_v53  ;;  %v6468_v27 = vsel %vm25093_vm0, %v22249_v57, 0.0 }
 0x4b2   : > { %16974 = vmatmul.mubr.msk.f32.vlgmr.msra.gmra.mrb[32].mxu1 %vm5213_vm9, %v22190_v15  ;;  %v6464_v15 = vsel %vm25091_vm4, %v22229_v46, 0.0  ;;  %vm25094_vm4 = vnez %v24866_v3 }
 0x4b3   : > { %16976 = vmatprep.mubr.msk.f32.mxu1 %vm5213_vm9, %v6456_v22  ;;  %18278 = vmatpush3.bf16.msra.mxu1 %v22344_v43  ;;  %v6460_v43 = vsel %vm20749_vm5, %v22209_v45, 0.0  ;;  %vm25092_vm5 = vnez %v24848_v1  ;;  %v6470_v21 = vsel %vm25094_vm4, %v22259_v4, 0.0  ;;  %v6474_v22 = vsel %vm25038_vm14, %v22279_v10, 0.0 }
 0x4b4   : > { %18280 = vmatprep.subr.bf16.mxu1 %v18279_v49  ;;  %v6466_v0 = vsel %vm25092_vm5, %v22239_v12, 0.0  ;;  %vm25095_vm5 = vnez %v25035_v20  ;;  %vm25097_vm14 = vnez %v24889_v9 }
 0x4b5   : > { %v6472_v53 = vsel %vm25095_vm5, %v22269_v25, 0.0  ;;  %vm25096_vm5 = vnez %v25041_v19 }
 0x4b6   : > { %16977 = vmatmul.mubr.msk.f32.gmra.mrb[34].mxu1 %vm5213_vm9, %v22201_v18 }
 0x4b7   : > { %16979 = vmatprep.mubr.msk.f32.mxu1 %vm5213_vm9, %v6458_v51  ;;  %18282 = vmatpush3.bf16.msra.mxu1 %v18279_v49  ;;  %v6476_v49 = vsel %vm25040_vm10, %v22289_v17, 0.0  ;;  %v6478_v51 = vsel %vm25096_vm5, %v22299_v39, 0.0  ;;  %vm25098_vm10 = vnez %v24900_v56  ;;  %vm25099_vm5 = vnez %v24910_v58  ;;  %v25102_v58 = vld [vmem:[#allocation73_spill] sm:$0xff]  ;;  %v25103_v56 = vld [vmem:[#allocation74_spill] sm:$0xff] }
 0x4b8   : > { %18284 = vmatprep.subr.bf16.mxu1 %v18283_v31 }
 0x4ba   : > { %16980 = vmatmul.mubr.msk.f32.gmra.mrb[36].mxu1 %vm5213_vm9, %v22211_v28 }
 0x4bb   : > { %16982 = vmatprep.mubr.msk.f32.mxu1 %vm5213_vm9, %v6460_v43  ;;  %v6480_v43 = vsel %vm25097_vm14, %v22309_v13, 0.0 }
 0x4be   : > { %16983 = vmatmul.mubr.msk.f32.gmra.mrb[38].mxu1 %vm5213_vm9, %v22221_v52 }
 0x4bf   : > { %16985 = vmatprep.mubr.msk.f32.mxu1 %vm5213_vm9, %v6462_v59  ;;  %v6482_v59 = vsel %vm25098_vm10, %v22319_v61, 0.0  ;;  %vm25130_vm10 = vnez %v24569_v34 }
 0x4c2   : > { %16986 = vmatmul.mubr.msk.f32.gmra.mrb[40].mxu1 %vm5213_vm9, %v22231_v35 }
 0x4c3   : > { %16988 = vmatprep.mubr.msk.f32.mxu1 %vm5213_vm9, %v6464_v15  ;;  %v22580_v15 = vld [vmem:[#allocation3 + $0x107] sm:$0xff] }
 0x4c6   : > { %16989 = vmatmul.mubr.msk.f32.gmra.mrb[42].mxu1 %vm5213_vm9, %v22241_v2 }
 0x4c7   : > { %16991 = vmatprep.mubr.msk.f32.mxu1 %vm5213_vm9, %v6466_v0  ;;  %v6484_v0 = vsel %vm25099_vm5, %v22580_v15, 0.0  ;;  %vm25129_vm5 = vnez %v24566_v24 }
 0x4ca   : > { %16992 = vmatmul.mubr.msk.f32.gmra.mrb[44].mxu1 %vm5213_vm9, %v22251_v55 }
 0x4cb   : > { %16994 = vmatprep.mubr.msk.f32.mxu1 %vm5213_vm9, %v6468_v27  ;;  %v22588_v27 = vld [vmem:[#allocation3 + $0x10f] sm:$0xff] }
 0x4ce   : > { %16995 = vmatmul.mubr.msk.f32.gmra.mrb[46].mxu1 %vm5213_vm9, %v22261_v6 }
 0x4cf   : > { %16997 = vmatprep.mubr.msk.f32.mxu1 %vm5213_vm9, %v6470_v21  ;;  %v7301_v21 = vld [vmem:[#allocation15 + $0xb0] sm:$0xff] }
 0x4d2   : > { %16998 = vmatmul.mubr.msk.f32.gmra.mrb[48].mxu1 %vm5213_vm9, %v22271_v41 }
 0x4d3   : > { %17000 = vmatprep.mubr.msk.f32.mxu1 %vm5213_vm9, %v6472_v53  ;;  %v7302_v53 = vld [vmem:[#allocation15 + $0xb8] sm:$0xff] }
 0x4d6   : > { %17001 = vmatmul.mubr.msk.f32.gmra.mrb[50].mxu1 %vm5213_vm9, %v22281_v42 }
 0x4d7   : > { %17003 = vmatprep.mubr.msk.f32.mxu1 %vm5213_vm9, %v6474_v22  ;;  %v18287_v22 = vpack.c.bf16 %v7302_v53, %v7301_v21  ;;  %v25105_v21 = vld [vmem:[#allocation77_spill] sm:$0xff]  ;;  %v25106_v53 = vld [vmem:[#allocation79_spill] sm:$0xff] }
 0x4da   : > { %17004 = vmatmul.mubr.msk.f32.gmra.mrb[52].mxu1 %vm5213_vm9, %v22291_v36 }
 0x4db   : > { %17006 = vmatprep.mubr.msk.f32.mxu1 %vm5213_vm9, %v6476_v49  ;;  %v7721_v49 = vld [vmem:[#allocation15 + $0xc0] sm:$0xff] }
 0x4de   : > { %17007 = vmatmul.mubr.msk.f32.gmra.mrb[54].mxu1 %vm5213_vm9, %v22301_v11 }
 0x4df   : > { %17009 = vmatprep.mubr.msk.f32.mxu1 %vm5213_vm9, %v6478_v51  ;;  %v7722_v51 = vld [vmem:[#allocation15 + $0xc8] sm:$0xff] }
 0x4e2   : > { %17010 = vmatmul.mubr.msk.f32.gmra.mrb[56].mxu1 %vm5213_vm9, %v22311_v33 }
 0x4e3   : > { %17012 = vmatprep.mubr.msk.f32.mxu1 %vm5213_vm9, %v6480_v43  ;;  %v25100_v43 = vld [vmem:[#allocation70_spill] sm:$0xff] }
 0x4e6   : > { %17013 = vmatmul.mubr.msk.f32.gmra.mrb[58].mxu1 %vm5213_vm9, %v22321_v44 }
 0x4e7   : > { %17015 = vmatprep.mubr.msk.f32.mxu1 %vm5213_vm9, %v6482_v59  ;;  %v25101_v59 = vld [vmem:[#allocation71_spill] sm:$0xff] }
 0x4ea   : > { %17016 = vmatmul.mubr.msk.f32.gmra.mrb[60].mxu1 %vm5213_vm9, %v22329_v7 }
 0x4eb   : > { %17018 = vmatprep.mubr.msk.f32.mxu1 %vm5213_vm9, %v6484_v0  ;;  %v18291_v0 = vpack.c.bf16 %v7722_v51, %v7721_v49  ;;  %v25108_v49 = vld [vmem:[#allocation82_spill] sm:$0xff]  ;;  %v25112_v51 = vld [vmem:[#allocation88_spill] sm:$0xff] }
 0x4ee   : > { %17019 = vmatmul.mubr.msk.f32.gmra.mrb[62].mxu1 %vm5213_vm9, %v22588_v27 }
 0x4ef   : > { %17029 = vmatprep.mubr.msk.f32.mxu1 %vm5213_vm9, %v21979_v30  ;;  %v25104_v30 = vld [vmem:[#allocation76_spill] sm:$0xff] }
 0x4f2   : > { %17030 = vmatmul.mubr.msk.f32.vlgmr.msra.gmra.mrb[32].mxu1 %vm5213_vm9, %v25100_v43  ;;  %v25113_v43 = vld [vmem:[#allocation40_spill] sm:$0xff] }
 0x4f3   : > { %17032 = vmatprep.mubr.msk.f32.mxu1 %vm5213_vm9, %v25101_v59  ;;  %18286 = vmatpush3.bf16.msra.mxu1 %v18283_v31  ;;  %v25107_v31 = vld [vmem:[#allocation80_spill] sm:$0xff]  ;;  %v25114_v59 = vld [vmem:[#allocation90_spill] sm:$0xff] }
 0x4f4   : > { %18288 = vmatprep.subr.bf16.mxu1 %v18287_v22 }
 0x4f6   : > { %17033 = vmatmul.mubr.msk.f32.gmra.mrb[34].mxu1 %vm5213_vm9, %v25102_v58  ;;  %v25109_v58 = vld [vmem:[#allocation83_spill] sm:$0xff] }
 0x4f7   : > { %17035 = vmatprep.mubr.msk.f32.mxu1 %vm5213_vm9, %v25103_v56  ;;  %18290 = vmatpush3.bf16.msra.mxu1 %v18287_v22  ;;  %v25110_v56 = vld [vmem:[#allocation85_spill] sm:$0xff]  ;;  %v25111_v22 = vld [vmem:[#allocation86_spill] sm:$0xff] }
 0x4f8   : > { %18292 = vmatprep.subr.bf16.mxu1 %v18291_v0 }
 0x4fa   : > { %17036 = vmatmul.mubr.msk.f32.gmra.mrb[36].mxu1 %vm5213_vm9, %v25104_v30  ;;  %v25115_v30 = vld [vmem:[#allocation92_spill] sm:$0xff] }
 0x4fb   : > { %17038 = vmatprep.mubr.msk.f32.mxu1 %vm5213_vm9, %v25105_v21  ;;  %v25116_v21 = vld [vmem:[#allocation46_spill] sm:$0xff] }
 0x4fe   : > { %17039 = vmatmul.mubr.msk.f32.gmra.mrb[38].mxu1 %vm5213_vm9, %v25106_v53  ;;  %v25117_v53 = vld [vmem:[#allocation43_spill] sm:$0xff] }
 0x4ff   : > { %17041 = vmatprep.mubr.msk.f32.mxu1 %vm5213_vm9, %v25107_v31  ;;  %v25118_v31 = vld [vmem:[#allocation106_spill] sm:$0xff] }
 0x502   : > { %17042 = vmatmul.mubr.msk.f32.gmra.mrb[40].mxu1 %vm5213_vm9, %v25108_v49  ;;  %v25119_v49 = vld [vmem:[#allocation47_spill] sm:$0xff] }
 0x503   : > { %17044 = vmatprep.mubr.msk.f32.mxu1 %vm5213_vm9, %v25109_v58  ;;  %v25120_v58 = vld [vmem:[#allocation107_spill] sm:$0xff] }
 0x506   : > { %17045 = vmatmul.mubr.msk.f32.gmra.mrb[42].mxu1 %vm5213_vm9, %v25110_v56  ;;  %v25121_v56 = vld [vmem:[#allocation49_spill] sm:$0xff] }
 0x507   : > { %17047 = vmatprep.mubr.msk.f32.mxu1 %vm5213_vm9, %v25111_v22  ;;  %v25122_v22 = vld [vmem:[#allocation44_spill] sm:$0xff] }
 0x50a   : > { %17048 = vmatmul.mubr.msk.f32.gmra.mrb[44].mxu1 %vm5213_vm9, %v25112_v51  ;;  %v25123_v51 = vld [vmem:[#allocation108_spill] sm:$0xff] }
 0x50b   : > { %17050 = vmatprep.mubr.msk.f32.mxu1 %vm5213_vm9, %v25113_v43  ;;  %v25124_v43 = vld [vmem:[#allocation50_spill] sm:$0xff] }
 0x50e   : > { %17051 = vmatmul.mubr.msk.f32.gmra.mrb[46].mxu1 %vm5213_vm9, %v25114_v59  ;;  %v25125_v59 = vld [vmem:[#allocation109_spill] sm:$0xff] }
 0x50f   : > { %17053 = vmatprep.mubr.msk.f32.mxu1 %vm5213_vm9, %v25115_v30  ;;  %v25126_v30 = vld [vmem:[#allocation52_spill] sm:$0xff] }
 0x512   : > { %17054 = vmatmul.mubr.msk.f32.gmra.mrb[48].mxu1 %vm5213_vm9, %v25116_v21  ;;  %v25127_v21 = vld [vmem:[#allocation45_spill] sm:$0xff] }
 0x513   : > { %17056 = vmatprep.mubr.msk.f32.mxu1 %vm5213_vm9, %v25117_v53  ;;  %v25128_v53 = vld [vmem:[#allocation53_spill] sm:$0xff] }
 0x516   : > { %17057 = vmatmul.mubr.msk.f32.gmra.mrb[50].mxu1 %vm5213_vm9, %v25118_v31  ;;  %v22652_v31 = vld [vmem:[#allocation3 + $0x108] sm:$0xff] }
 0x517   : > { %17059 = vmatprep.mubr.msk.f32.mxu1 %vm5213_vm9, %v25119_v49  ;;  %v22656_v49 = vld [vmem:[#allocation3 + $0x110] sm:$0xff] }
 0x51a   : > { %17060 = vmatmul.mubr.msk.f32.gmra.mrb[52].mxu1 %vm5213_vm9, %v25120_v58  ;;  %v7723_v58 = vld [vmem:[#allocation15 + $0xd0] sm:$0xff] }
 0x51b   : > { %17062 = vmatprep.mubr.msk.f32.mxu1 %vm5213_vm9, %v25121_v56  ;;  %v7724_v56 = vld [vmem:[#allocation15 + $0xd8] sm:$0xff] }
 0x51e   : > { %17063 = vmatmul.mubr.msk.f32.gmra.mrb[54].mxu1 %vm5213_vm9, %v25122_v22  ;;  %v18295_v22 = vpack.c.bf16 %v7724_v56, %v7723_v58  ;;  %v25136_v56 = vld [vmem:[#allocation56_spill] sm:$0xff] }
 0x51f   : > { %17065 = vmatprep.mubr.msk.f32.mxu1 %vm5213_vm9, %v25123_v51  ;;  %v7267_v51 = vsel %vm25129_vm5, %v22339_v8, 0.0  ;;  %v25132_v8 = vld [vmem:[#allocation55_spill] sm:$0xff] }
 0x522   : > { %17066 = vmatmul.mubr.msk.f32.gmra.mrb[56].mxu1 %vm5213_vm9, %v25124_v43  ;;  %v8111_v43 = vld [vmem:[#allocation15 + $0xe0] sm:$0xff] }
 0x523   : > { %17068 = vmatprep.mubr.msk.f32.mxu1 %vm5213_vm9, %v25125_v59  ;;  %v8112_v59 = vld [vmem:[#allocation15 + $0xe8] sm:$0xff] }
 0x526   : > { %17069 = vmatmul.mubr.msk.f32.gmra.mrb[58].mxu1 %vm5213_vm9, %v25126_v30  ;;  %v18299_v30 = vpack.c.bf16 %v8112_v59, %v8111_v43  ;;  %v25139_v59 = vld [vmem:[#allocation112_spill] sm:$0xff] }
 0x527   : > { %17071 = vmatprep.mubr.msk.f32.mxu1 %vm5213_vm9, %v25127_v21  ;;  %v7269_v21 = vsel %vm25130_vm10, %v22352_v26, 0.0 }
 0x52a   : > { %17072 = vmatmul.mubr.msk.f32.gmra.mrb[60].mxu1 %vm5213_vm9, %v25128_v53  ;;  %v25133_v53 = vld [vmem:[#allocation66_spill] sm:$0xff] }
 0x52b   : > { %17074 = vmatprep.mubr.msk.f32.mxu1 %vm5213_vm9, %v22652_v31  ;;  %vm25134_vm5 = vnez %v25133_v53  ;;  %v25143_v53 = vld [vmem:[#allocation60_spill] sm:$0xff] }
 0x52c   : > { %v7271_v58 = vsel %vm25134_vm5, %v25132_v8, 0.0 }
 0x52e   : > { %17075 = vmatmul.mubr.msk.f32.gmra.mrb[62].mxu1 %vm5213_vm9, %v22656_v49 }
 0x52f   : > { %17085 = vmatprep.mubr.msk.f32.mxu1 %vm5213_vm9, %v22337_v32  ;;  %v25131_v32 = vld [vmem:[#allocation110_spill] sm:$0xff] }
 0x532   : > { %17086 = vmatmul.mubr.msk.f32.vlgmr.msra.gmra.mrb[32].mxu1 %vm5213_vm9, %v7267_v51  ;;  %v25137_v51 = vld [vmem:[#allocation67_spill] sm:$0xff] }
 0x533   : > { %17088 = vmatprep.mubr.msk.f32.mxu1 %vm5213_vm9, %v22350_v23  ;;  %18294 = vmatpush3.bf16.msra.mxu1 %v18291_v0  ;;  %v25135_v0 = vld [vmem:[#allocation111_spill] sm:$0xff]  ;;  %vm25138_vm14 = vnez %v25137_v51  ;;  %v25147_v51 = vld [vmem:[#allocation96_spill] sm:$0xff] }
 0x534   : > { %18296 = vmatprep.subr.bf16.mxu1 %v18295_v22  ;;  %v7273_v43 = vsel %vm25138_vm14, %v25136_v56, 0.0 }
 0x536   : > { %17089 = vmatmul.mubr.msk.f32.gmra.mrb[34].mxu1 %vm5213_vm9, %v7269_v21  ;;  %v25141_v21 = vld [vmem:[#allocation68_spill] sm:$0xff] }
 0x537   : > { %17091 = vmatprep.mubr.msk.f32.mxu1 %vm5213_vm9, %v25131_v32  ;;  %18298 = vmatpush3.bf16.msra.mxu1 %v18295_v22  ;;  %v25140_v22 = vld [vmem:[#allocation59_spill] sm:$0xff]  ;;  %vm25142_vm10 = vnez %v25141_v21  ;;  %v25150_v21 = vld [vmem:[#allocation62_spill] sm:$0xff] }
 0x538   : > { %18300 = vmatprep.subr.bf16.mxu1 %v18299_v30  ;;  %v7275_v34 = vsel %vm25142_vm10, %v25140_v22, 0.0 }
 0x53a   : > { %17092 = vmatmul.mubr.msk.f32.gmra.mrb[36].mxu1 %vm5213_vm9, %v7271_v58  ;;  %v25144_v58 = vld [vmem:[#allocation95_spill] sm:$0xff] }
 0x53b   : > { %17094 = vmatprep.mubr.msk.f32.mxu1 %vm5213_vm9, %v25135_v0  ;;  %v25145_v0 = vld [vmem:[#allocation69_spill] sm:$0xff] }
 0x53c   : > { %vm25146_vm5 = vnez %v25145_v0  ;;  %v25154_v0 = vld [vmem:[#allocation101_spill] sm:$0xff] }
 0x53d   : > { %v7277_v8 = vsel %vm25146_vm5, %v25144_v58, 0.0 }
 0x53e   : > { %17095 = vmatmul.mubr.msk.f32.gmra.mrb[38].mxu1 %vm5213_vm9, %v7273_v43  ;;  %v25148_v43 = vld [vmem:[#allocation98_spill] sm:$0xff] }
 0x53f   : > { %17097 = vmatprep.mubr.msk.f32.mxu1 %vm5213_vm9, %v25139_v59  ;;  %v7279_v56 = vsel %vm25060_vm2, %v25148_v43, 0.0  ;;  %v25158_v59 = vld [vmem:[#allocation104_spill] sm:$0xff] }
 0x542   : > { %17098 = vmatmul.mubr.msk.f32.gmra.mrb[40].mxu1 %vm5213_vm9, %v7275_v34  ;;  %v25151_v34 = vld [vmem:[#allocation97_spill] sm:$0xff] }
 0x543   : > { %17100 = vmatprep.mubr.msk.f32.mxu1 %vm5213_vm9, %v25143_v53  ;;  %v25152_v53 = vld [vmem:[#allocation75_spill] sm:$0xff] }
 0x544   : > { %vm25153_vm10 = vnez %v25152_v53  ;;  %v25161_v53 = vld [vmem:[#allocation105_spill] sm:$0xff] }
 0x545   : > { %v7281_v22 = vsel %vm25153_vm10, %v25151_v34, 0.0 }
 0x546   : > { %17101 = vmatmul.mubr.msk.f32.gmra.mrb[42].mxu1 %vm5213_vm9, %v7277_v8  ;;  %v25155_v8 = vld [vmem:[#allocation100_spill] sm:$0xff] }
 0x547   : > { %17103 = vmatprep.mubr.msk.f32.mxu1 %vm5213_vm9, %v25147_v51  ;;  %v25156_v51 = vld [vmem:[#allocation78_spill] sm:$0xff] }
 0x548   : > { %vm25157_vm5 = vnez %v25156_v51  ;;  %v25164_v51 = vld [vmem:[#allocation48_spill] sm:$0xff] }
 0x549   : > { %v7283_v58 = vsel %vm25157_vm5, %v25155_v8, 0.0 }
 0x54a   : > { %17104 = vmatmul.mubr.msk.f32.gmra.mrb[44].mxu1 %vm5213_vm9, %v7279_v56  ;;  %v25159_v56 = vld [vmem:[#allocation103_spill] sm:$0xff] }
 0x54b   : > { %17106 = vmatprep.mubr.msk.f32.mxu1 %vm5213_vm9, %v25150_v21  ;;  %v7285_v43 = vsel %vm25071_vm8, %v25159_v56, 0.0  ;;  %v25167_v21 = vld [vmem:[#allocation54_spill] sm:$0xff] }
 0x54e   : > { %17107 = vmatmul.mubr.msk.f32.gmra.mrb[46].mxu1 %vm5213_vm9, %v7281_v22  ;;  %v25162_v22 = vld [vmem:[#allocation113_spill] sm:$0xff] }
 0x54f   : > { %17109 = vmatprep.mubr.msk.f32.mxu1 %vm5213_vm9, %v25154_v0  ;;  %v7287_v34 = vsel %vm25075_vm3, %v25162_v22, 0.0  ;;  %v25170_v0 = vld [vmem:[#allocation114_spill] sm:$0xff] }
 0x552   : > { %17110 = vmatmul.mubr.msk.f32.gmra.mrb[48].mxu1 %vm5213_vm9, %v7283_v58  ;;  %v25165_v58 = vld [vmem:[#allocation51_spill] sm:$0xff] }
 0x553   : > { %17112 = vmatprep.mubr.msk.f32.mxu1 %vm5213_vm9, %v25158_v59  ;;  %v7289_v8 = vsel %vm24989_vm7, %v25165_v58, 0.0  ;;  %v7295_v59 = vsel %vm21155_vm1, %v22483_v50, 0.0  ;;  %v8533_v50 = vld [vmem:[#allocation15 + $0x100] sm:$0xff] }
 0x556   : > { %17113 = vmatmul.mubr.msk.f32.gmra.mrb[50].mxu1 %vm5213_vm9, %v7285_v43  ;;  %v25168_v43 = vld [vmem:[#allocation58_spill] sm:$0xff] }
 0x557   : > { %17115 = vmatprep.mubr.msk.f32.mxu1 %vm5213_vm9, %v25161_v53  ;;  %v7291_v56 = vsel %vm24992_vm11, %v25168_v43, 0.0  ;;  %v22750_v53 = vld [vmem:[#allocation3 + $0x109] sm:$0xff] }
 0x55a   : > { %17116 = vmatmul.mubr.msk.f32.gmra.mrb[52].mxu1 %vm5213_vm9, %v7287_v34  ;;  %v25171_v34 = vld [vmem:[#allocation115_spill] sm:$0xff] }
 0x55b   : > { %17118 = vmatprep.mubr.msk.f32.mxu1 %vm5213_vm9, %v25164_v51  ;;  %v7293_v22 = vsel %vm24814_vm13, %v25171_v34, 0.0  ;;  %v8113_v34 = vld [vmem:[#allocation15 + $0xf0] sm:$0xff]  ;;  %v7690_v51 = vsel %vm25029_vm15, %v22198_v16, 0.0  ;;  %vm25176_vm15 = vnez %v24526_v47 }
 0x55c   : > { %v7694_v29 = vsel %vm25176_vm15, %v22219_v14, 0.0  ;;  %vm25179_vm15 = vnez %v24848_v1  ;;  %v8083_v16 = vld [vmem:[#allocation3 + $0x50] sm:$0xff] }
 0x55d   : > { %v7700_v47 = vsel %vm25179_vm15, %v22249_v57, 0.0  ;;  %vm25184_vm15 = vnez %v24889_v9  ;;  %v25187_v9 = vld [vmem:[#allocation102_spill] sm:$0xff]  ;;  %v8087_v14 = vld [vmem:[#allocation3 + $0x70] sm:$0xff] }
 0x55e   : > { %17119 = vmatmul.mubr.msk.f32.gmra.mrb[54].mxu1 %vm5213_vm9, %v7289_v8  ;;  %v7688_v8 = vsel %vm25027_vm6, %v22185_v62, 0.0  ;;  %vm25175_vm6 = vnez %v24524_v40  ;;  %v8093_v57 = vld [vmem:[#allocation3 + $0xa0] sm:$0xff] }
 0x55f   : > { %17121 = vmatprep.mubr.msk.f32.mxu1 %vm5213_vm9, %v25167_v21  ;;  %v7692_v5 = vsel %vm25175_vm6, %v22209_v45, 0.0  ;;  %vm25178_vm6 = vnez %v24530_v60  ;;  %v7704_v60 = vsel %vm25094_vm4, %v22269_v25, 0.0  ;;  %vm25182_vm4 = vnez %v25039_v38  ;;  %v8079_v25 = vld [vmem:[#allocation3 + $0x30] sm:$0xff]  ;;  %v8085_v45 = vld [vmem:[#allocation3 + $0x60] sm:$0xff]  ;;  %v8096_v38 = vld [vmem:[#allocation3 + $0xb8] sm:$0xff] }
 0x560   : > { %v7698_v62 = vsel %vm25178_vm6, %v22239_v12, 0.0  ;;  %v7710_v3 = vsel %vm25182_vm4, %v22299_v39, 0.0  ;;  %vm25183_vm6 = vnez %v25041_v19  ;;  %vm25188_vm4 = vnez %v25187_v9  ;;  %v8091_v12 = vld [vmem:[#allocation3 + $0x90] sm:$0xff]  ;;  %v8097_v19 = vld [vmem:[#allocation3 + $0xc0] sm:$0xff] }
 0x562   : > { %17122 = vmatmul.mubr.msk.f32.gmra.mrb[56].mxu1 %vm5213_vm9, %v7291_v56  ;;  %v22752_v56 = vld [vmem:[#allocation3 + $0x111] sm:$0xff] }
 0x563   : > { %17124 = vmatprep.mubr.msk.f32.mxu1 %vm5213_vm9, %v25170_v0  ;;  %v8114_v0 = vld [vmem:[#allocation15 + $0xf8] sm:$0xff] }
 0x566   : > { %17125 = vmatmul.mubr.msk.f32.gmra.mrb[58].mxu1 %vm5213_vm9, %v7293_v22  ;;  %v7297_v22 = vsel %vm24822_vm12, %v22752_v56, 0.0  ;;  %vm25177_vm12 = vnez %v24528_v54  ;;  %v7702_v54 = vsel %vm25093_vm0, %v22259_v4, 0.0  ;;  %vm25181_vm0 = vnez %v25037_v48  ;;  %v8081_v4 = vld [vmem:[#allocation3 + $0x40] sm:$0xff]  ;;  %v8095_v48 = vld [vmem:[#allocation3 + $0xb0] sm:$0xff] }
 0x567   : > { %17127 = vmatprep.mubr.msk.f32.mxu1 %vm5213_vm9, %v22481_v63  ;;  %v8534_v63 = vld [vmem:[#allocation15 + $0x108] sm:$0xff]  ;;  %v7696_v40 = vsel %vm25177_vm12, %v22229_v46, 0.0  ;;  %vm25180_vm12 = vnez %v25035_v20  ;;  %v7708_v37 = vsel %vm25181_vm0, %v22289_v17, 0.0  ;;  %vm5251_vm0 = vcmask 253952   ;;  %v8089_v46 = vld [vmem:[#allocation3 + $0x80] sm:$0xff] }
 0x568   : > { %v7706_v1 = vsel %vm25180_vm12, %v22279_v10, 0.0  ;;  %v19837_v17 = vld [vmem:[#allocation9] sm:$0xff]  ;;  %v8078_v10 = vld [vmem:[#allocation3 + $0x28] sm:$0xff] }
 0x569   : > { %5252 = vst.msk [vmem:[#allocation3 + $0x128] sm:$0x1] %vm5251_vm0, %v19837_v17  ;;  %9283 = vst.msk [vmem:[#allocation5 + $0x58] sm:$0x1] %vm5251_vm0, %v19837_v17  ;;  %v8094_v20 = vld [vmem:[#allocation3 + $0xa8] sm:$0xff] }
 0x56a   : > { %17128 = vmatmul.mubr.msk.f32.gmra.mrb[60].mxu1 %vm5213_vm9, %v7295_v59  ;;  %v18303_v59 = vpack.c.bf16 %v8114_v0, %v8113_v34  ;;  %v8103_v0 = vld [vmem:[#allocation3 + $0xf0] sm:$0xff]  ;;  %v8105_v34 = vld [vmem:[#allocation3 + $0x100] sm:$0xff] }
 0x56b   : > { %17130 = vmatprep.mubr.msk.f32.mxu1 %vm5213_vm9, %v22750_v53 }
 0x56e   : > { %17131 = vmatmul.mubr.msk.f32.gmra.mrb[62].mxu1 %vm5213_vm9, %v7297_v22  ;;  %v18307_v22 = vpack.c.bf16 %v8534_v63, %v8533_v50  ;;  %v8098_v50 = vld [vmem:[#allocation3 + $0xc8] sm:$0xff]  ;;  %v8099_v63 = vld [vmem:[#allocation3 + $0xd0] sm:$0xff] }
 0x56f   : > { %17141 = vmatprep.mubr.msk.f32.mxu1 %vm5213_vm9, %v7688_v8  ;;  %v8108_v8 = vld [vmem:[#allocation3 + $0x118] sm:$0xff] }
 0x572   : > { %17142 = vmatmul.mubr.msk.f32.vlgmr.msra.gmra.mrb[32].mxu1 %vm5213_vm9, %v22201_v18  ;;  %v8084_v18 = vld [vmem:[#allocation3 + $0x58] sm:$0xff] }
 0x573   : > { %17144 = vmatprep.mubr.msk.f32.mxu1 %vm5213_vm9, %v7690_v51  ;;  %18302 = vmatpush3.bf16.msra.mxu1 %v18299_v30  ;;  %v8102_v30 = vld [vmem:[#allocation3 + $0xe8] sm:$0xff]  ;;  %v8104_v51 = vld [vmem:[#allocation3 + $0xf8] sm:$0xff] }
 0x574   : > { %18304 = vmatprep.subr.bf16.mxu1 %v18303_v59 }
 0x576   : > { %17145 = vmatmul.mubr.msk.f32.gmra.mrb[34].mxu1 %vm5213_vm9, %v22211_v28  ;;  %v8086_v28 = vld [vmem:[#allocation3 + $0x68] sm:$0xff] }
 0x577   : > { %17147 = vmatprep.mubr.msk.f32.mxu1 %vm5213_vm9, %v7692_v5  ;;  %18306 = vmatpush3.bf16.msra.mxu1 %v18303_v59  ;;  %v8109_v59 = vld [vmem:[#allocation3 + $0x120] sm:$0xff]  ;;  %v25191_v5 = vld [vmem:[#allocation64_spill] sm:$0xff] }
 0x578   : > { %18308 = vmatprep.subr.bf16.mxu1 %v18307_v22 }
 0x57a   : > { %17148 = vmatmul.mubr.msk.f32.gmra.mrb[36].mxu1 %vm5213_vm9, %v22221_v52  ;;  %v8088_v52 = vld [vmem:[#allocation3 + $0x78] sm:$0xff] }
 0x57b   : > { %17150 = vmatprep.mubr.msk.f32.mxu1 %vm5213_vm9, %v7694_v29  ;;  %v25193_v29 = vld [vmem:[#allocation111_spill] sm:$0xff] }
 0x57e   : > { %17151 = vmatmul.mubr.msk.f32.gmra.mrb[38].mxu1 %vm5213_vm9, %v22231_v35  ;;  %v8090_v35 = vld [vmem:[#allocation3 + $0x88] sm:$0xff] }
 0x57f   : > { %17153 = vmatprep.mubr.msk.f32.mxu1 %vm5213_vm9, %v7696_v40  ;;  %v25194_v40 = vld [vmem:[#allocation56_spill] sm:$0xff] }
 0x582   : > { %17154 = vmatmul.mubr.msk.f32.gmra.mrb[40].mxu1 %vm5213_vm9, %v22241_v2  ;;  %v8092_v2 = vld [vmem:[#allocation3 + $0x98] sm:$0xff] }
 0x583   : > { %17156 = vmatprep.mubr.msk.f32.mxu1 %vm5213_vm9, %v7698_v62 }
 0x586   : > { %17157 = vmatmul.mubr.msk.f32.gmra.mrb[42].mxu1 %vm5213_vm9, %v22251_v55  ;;  %v8082_v55 = vld [vmem:[#allocation3 + $0x48] sm:$0xff] }
 0x587   : > { %17159 = vmatprep.mubr.msk.f32.mxu1 %vm5213_vm9, %v7700_v47 }
 0x58a   : > { %17160 = vmatmul.mubr.msk.f32.gmra.mrb[44].mxu1 %vm5213_vm9, %v22261_v6  ;;  %v8080_v6 = vld [vmem:[#allocation3 + $0x38] sm:$0xff] }
 0x58b   : > { %17162 = vmatprep.mubr.msk.f32.mxu1 %vm5213_vm9, %v7702_v54  ;;  %v25200_v54 = vld [vmem:[#allocation60_spill] sm:$0xff] }
 0x58e   : > { %17163 = vmatmul.mubr.msk.f32.gmra.mrb[46].mxu1 %vm5213_vm9, %v22271_v41 }
 0x58f   : > { %17165 = vmatprep.mubr.msk.f32.mxu1 %vm5213_vm9, %v7704_v60  ;;  %v25201_v60 = vld [vmem:[#allocation95_spill] sm:$0xff] }
 0x592   : > { %17166 = vmatmul.mubr.msk.f32.gmra.mrb[48].mxu1 %vm5213_vm9, %v22281_v42  ;;  %v8536_v42 = vld [vmem:[#allocation15 + $0x118] sm:$0xff] }
 0x593   : > { %17168 = vmatprep.mubr.msk.f32.mxu1 %vm5213_vm9, %v7706_v1  ;;  %v25202_v1 = vld [vmem:[#allocation68_spill] sm:$0xff] }
 0x594   : > { %vm25203_vm0 = vnez %v25202_v1 }
 0x596   : > { %17169 = vmatmul.mubr.msk.f32.gmra.mrb[50].mxu1 %vm5213_vm9, %v22291_v36  ;;  %v7712_v36 = vsel %vm25183_vm6, %v22309_v13, 0.0  ;;  %v7686_v13 = vld [vmem:[#allocation3 + $0x117] sm:$0xff]  ;;  %vm25189_vm6 = vnez %v24566_v24 }
 0x597   : > { %17171 = vmatprep.mubr.msk.f32.mxu1 %vm5213_vm9, %v7708_v37  ;;  %v25197_v24 = vld [vmem:[#allocation112_spill] sm:$0xff]  ;;  %v8509_v37 = vsel %vm25203_vm0, %v25201_v60, 0.0 }
 0x59a   : > { %17172 = vmatmul.mubr.msk.f32.gmra.mrb[52].mxu1 %vm5213_vm9, %v22301_v11  ;;  %v7714_v11 = vsel %vm25184_vm15, %v22319_v61, 0.0  ;;  %v8535_v61 = vld [vmem:[#allocation15 + $0x110] sm:$0xff]  ;;  %vm25192_vm15 = vnez %v25191_v5 }
 0x59b   : > { %17174 = vmatprep.mubr.msk.f32.mxu1 %vm5213_vm9, %v7710_v3  ;;  %v18311_v41 = vpack.c.bf16 %v8536_v42, %v8535_v61  ;;  %v25204_v3 = vld [vmem:[#allocation96_spill] sm:$0xff] }
 0x59e   : > { %17175 = vmatmul.mubr.msk.f32.gmra.mrb[54].mxu1 %vm5213_vm9, %v22311_v33  ;;  %v25185_v33 = vld [vmem:[#allocation99_spill] sm:$0xff] }
 0x59f   : > { %17177 = vmatprep.mubr.msk.f32.mxu1 %vm5213_vm9, %v7712_v36  ;;  %vm25186_vm12 = vnez %v25185_v33  ;;  %v25205_v36 = vld [vmem:[#allocation98_spill] sm:$0xff] }
 0x5a0   : > { %v7716_v39 = vsel %vm25186_vm12, %v22580_v15, 0.0  ;;  %v8100_v15 = vld [vmem:[#allocation3 + $0xd8] sm:$0xff] }
 0x5a2   : > { %17178 = vmatmul.mubr.msk.f32.gmra.mrb[56].mxu1 %vm5213_vm9, %v22321_v44  ;;  %v7718_v44 = vsel %vm25188_vm4, %v7686_v13, 0.0  ;;  %v25209_v13 = vld [vmem:[#allocation97_spill] sm:$0xff] }
 0x5a3   : > { %17180 = vmatprep.mubr.msk.f32.mxu1 %vm5213_vm9, %v7714_v11  ;;  %v25206_v11 = vld [vmem:[#allocation69_spill] sm:$0xff]  ;;  %v8513_v9 = vsel %vm25060_vm2, %v25209_v13, 0.0 }
 0x5a4   : > { %vm25207_vm4 = vnez %v25206_v11 }
 0x5a5   : > { %v8511_v33 = vsel %vm25207_vm4, %v25205_v36, 0.0 }
 0x5a6   : > { %17181 = vmatmul.mubr.msk.f32.gmra.mrb[58].mxu1 %vm5213_vm9, %v22329_v7  ;;  %v7687_v7 = vld [vmem:[#allocation3 + $0x11f] sm:$0xff] }
 0x5a7   : > { %17183 = vmatprep.mubr.msk.f32.mxu1 %vm5213_vm9, %v7716_v39  ;;  %v25208_v39 = vld [vmem:[#allocation62_spill] sm:$0xff] }
 0x5aa   : > { %17184 = vmatmul.mubr.msk.f32.gmra.mrb[60].mxu1 %vm5213_vm9, %v22588_v27  ;;  %v8101_v27 = vld [vmem:[#allocation3 + $0xe0] sm:$0xff] }
 0x5ab   : > { %17186 = vmatprep.mubr.msk.f32.mxu1 %vm5213_vm9, %v7718_v44  ;;  %v25211_v44 = vld [vmem:[#allocation101_spill] sm:$0xff] }
 0x5ae   : > { %17187 = vmatmul.mubr.msk.f32.gmra.mrb[62].mxu1 %vm5213_vm9, %v7687_v7  ;;  %v25212_v7 = vld [vmem:[#allocation100_spill] sm:$0xff] }
 0x5af   : > { %17197 = vmatprep.mubr.msk.f32.mxu1 %vm5213_vm9, %v8078_v10  ;;  %v8515_v42 = vsel %vm25153_vm10, %v25212_v7, 0.0  ;;  %v25214_v10 = vld [vmem:[#allocation104_spill] sm:$0xff] }
 0x5b2   : > { %17198 = vmatmul.mubr.msk.f32.vlgmr.msra.gmra.mrb[32].mxu1 %vm5213_vm9, %v8079_v25 }
 0x5b3   : > { %17200 = vmatprep.mubr.msk.f32.mxu1 %vm5213_vm9, %v8080_v6  ;;  %18310 = vmatpush3.bf16.msra.mxu1 %v18307_v22  ;;  %v8501_v22 = vsel %vm25189_vm6, %v22352_v26, 0.0  ;;  %v25198_v26 = vld [vmem:[#allocation59_spill] sm:$0xff] }
 0x5b4   : > { %18312 = vmatprep.subr.bf16.mxu1 %v18311_v41  ;;  %v8507_v47 = vsel %vm25138_vm14, %v25198_v26, 0.0 }
 0x5b6   : > { %17201 = vmatmul.mubr.msk.f32.gmra.mrb[34].mxu1 %vm5213_vm9, %v8081_v4  ;;  %v25217_v4 = vld [vmem:[#allocation105_spill] sm:$0xff] }
 0x5b7   : > { %17203 = vmatprep.mubr.msk.f32.mxu1 %vm5213_vm9, %v8082_v55  ;;  %18314 = vmatpush3.bf16.msra.mxu1 %v18311_v41  ;;  %v25215_v41 = vld [vmem:[#allocation103_spill] sm:$0xff]  ;;  %v25218_v55 = vld [vmem:[#allocation113_spill] sm:$0xff] }
 0x5b8   : > { %v8517_v6 = vsel %vm25157_vm5, %v25215_v41, 0.0 }
 0x5ba   : > { %17204 = vmatmul.mubr.msk.f32.gmra.mrb[36].mxu1 %vm5213_vm9, %v8083_v16 }
 0x5bb   : > { %17206 = vmatprep.mubr.msk.f32.mxu1 %vm5213_vm9, %v8084_v18  ;;  %v8519_v18 = vsel %vm25071_vm8, %v25218_v55, 0.0  ;;  %vm24471_vm8 = vmmov 1  }
 0x5be   : > { %17207 = vmatmul.mubr.msk.f32.gmra.mrb[38].mxu1 %vm5213_vm9, %v8085_v45  ;;  %v25220_v45 = vld [vmem:[#allocation48_spill] sm:$0xff] }
 0x5bf   : > { %17209 = vmatprep.mubr.msk.f32.mxu1 %vm5213_vm9, %v8086_v28 }
 0x5c2   : > { %17210 = vmatmul.mubr.msk.f32.gmra.mrb[40].mxu1 %vm5213_vm9, %v8087_v14  ;;  %v8521_v14 = vsel %vm25075_vm3, %v25165_v58, 0.0  ;;  %v25226_v58 = vld [vmem:[#allocation116_spill] sm:$0xff] }
 0x5c3   : > { %17212 = vmatprep.mubr.msk.f32.mxu1 %vm5213_vm9, %v8088_v52 }
 0x5c6   : > { %17213 = vmatmul.mubr.msk.f32.gmra.mrb[42].mxu1 %vm5213_vm9, %v8089_v46  ;;  %v8523_v46 = vsel %vm24989_vm7, %v25168_v43, 0.0  ;;  %v8498_v43 = vld [vmem:[#allocation3 + $0x119] sm:$0xff] }
 0x5c7   : > { %17215 = vmatprep.mubr.msk.f32.mxu1 %vm5213_vm9, %v8090_v35  ;;  %v25223_v35 = vld [vmem:[#allocation114_spill] sm:$0xff] }
 0x5ca   : > { %17216 = vmatmul.mubr.msk.f32.gmra.mrb[44].mxu1 %vm5213_vm9, %v8091_v12  ;;  %v25224_v12 = vld [vmem:[#allocation115_spill] sm:$0xff] }
 0x5cb   : > { %17218 = vmatprep.mubr.msk.f32.mxu1 %vm5213_vm9, %v8092_v2 }
 0x5ce   : > { %17219 = vmatmul.mubr.msk.f32.gmra.mrb[46].mxu1 %vm5213_vm9, %v8093_v57  ;;  %v8525_v57 = vsel %vm24992_vm11, %v25224_v12, 0.0 }
 0x5cf   : > { %17221 = vmatprep.mubr.msk.f32.mxu1 %vm5213_vm9, %v8094_v20  ;;  %v25227_v20 = vld [vmem:[#allocation117_spill] sm:$0xff] }
 0x5d2   : > { %17222 = vmatmul.mubr.msk.f32.gmra.mrb[48].mxu1 %vm5213_vm9, %v8095_v48  ;;  %v8527_v48 = vsel %vm24814_vm13, %v25227_v20, 0.0  ;;  %vm9138_vm13 = vcmask 908288  }
 0x5d3   : > { %17224 = vmatprep.mubr.msk.f32.mxu1 %vm5213_vm9, %v8096_v38  ;;  %v8499_v38 = vld [vmem:[#allocation3 + $0x121] sm:$0xff] }
 0x5d6   : > { %17225 = vmatmul.mubr.msk.f32.gmra.mrb[50].mxu1 %vm5213_vm9, %v8097_v19 }
 0x5d7   : > { %17227 = vmatprep.mubr.msk.f32.mxu1 %vm5213_vm9, %v8098_v50  ;;  %v8529_v50 = vsel %vm21155_vm1, %v22752_v56, 0.0  ;;  %v9329_v56 = vld [vmem:[#allocation18 + $0x20] sm:$0xff]  ;;  %vm24472_vm1 = vcmask 1046528  }
 0x5d8   : > { %vm18359_vm2 = vmpackc.low %vm24472_vm1, %vm24471_vm8 }
 0x5da   : > { %17228 = vmatmul.mubr.msk.f32.gmra.mrb[52].mxu1 %vm5213_vm9, %v8099_v63  ;;  %v25230_v63 = vld [vmem:[#allocation94_spill] sm:$0xff] }
 0x5db   : > { %17230 = vmatprep.mubr.msk.f32.mxu1 %vm5213_vm9, %v8100_v15  ;;  %vm25231_vm5 = vnez %v25230_v63 }
 0x5dc   : > { %v8531_v15 = vsel %vm25231_vm5, %v8499_v38, 0.0 }
 0x5de   : > { %17231 = vmatmul.mubr.msk.f32.gmra.mrb[54].mxu1 %vm5213_vm9, %v8101_v27  ;;  %v20229_v27 = vmov 0.0|0.0  }
 0x5df   : > { %17233 = vmatprep.mubr.msk.f32.mxu1 %vm5213_vm9, %v8102_v30  ;;  %18315 = vmatprep.subr.bf16.mxu0 %v20229_v27  ;;  %v9330_v30 = vld [vmem:[#allocation18 + $0x28] sm:$0xff] }
 0x5e2   : > { %17234 = vmatmul.mubr.msk.f32.gmra.mrb[56].mxu1 %vm5213_vm9, %v8103_v0  ;;  %v9331_v0 = vld [vmem:[#allocation18 + $0x30] sm:$0xff] }
 0x5e3   : > { %17236 = vmatprep.mubr.msk.f32.mxu1 %vm5213_vm9, %v8104_v51  ;;  %v18361_v51 = vpack.c.bf16 %v9330_v30, %v9329_v56 }
 0x5e5   : > { %18362 = vmatprep.subr.bf16.mxu1 %v18361_v51 }
 0x5e6   : > { %17237 = vmatmul.mubr.msk.f32.gmra.mrb[58].mxu1 %vm5213_vm9, %v8105_v34  ;;  %v9332_v34 = vld [vmem:[#allocation18 + $0x38] sm:$0xff] }
 0x5e7   : > { %17239 = vmatprep.mubr.msk.f32.mxu1 %vm5213_vm9, %v22652_v31  ;;  %v25190_v31 = vld [vmem:[#allocation55_spill] sm:$0xff] }
 0x5ea   : > { %17240 = vmatmul.mubr.msk.f32.gmra.mrb[60].mxu1 %vm5213_vm9, %v22656_v49  ;;  %v8503_v49 = vsel %vm25192_vm15, %v25190_v31, 0.0 }
 0x5eb   : > { %17242 = vmatprep.mubr.msk.f32.mxu1 %vm5213_vm9, %v8108_v8  ;;  %v18365_v8 = vpack.c.bf16 %v9332_v34, %v9331_v0 }
 0x5ee   : > { %17243 = vmatmul.mubr.msk.f32.gmra.mrb[62].mxu1 %vm5213_vm9, %v8109_v59  ;;  %v22987_v59 = vld [vmem:[#allocation16] ss:$0 sm:$0xff] }
 0x5ef   : > { %17253 = vmatprep.mubr.msk.f32.mxu1 %vm5213_vm9, %v22350_v23  ;;  %v25195_v23 = vld [vmem:[#allocation66_spill] sm:$0xff] }
 0x5f0   : > { %vm25196_vm12 = vnez %v25195_v23 }
 0x5f1   : > { %v8505_v62 = vsel %vm25196_vm12, %v25194_v40, 0.0 }
 0x5f2   : > { %17254 = vmatmul.mubr.msk.f32.vlgmr.msra.gmra.mrb[32].mxu1 %vm5213_vm9, %v8501_v22 }
 0x5f3   : > { %17256 = vmatprep.mubr.msk.f32.mxu1 %vm5213_vm9, %v25131_v32  ;;  %18364 = vmatpush3.bf16.msra.mxu1 %v18361_v51 }
 0x5f4   : > { %18366 = vmatprep.subr.bf16.mxu1 %v18365_v8 }
 0x5f6   : > { %17257 = vmatmul.mubr.msk.f32.gmra.mrb[34].mxu1 %vm5213_vm9, %v8503_v49 }
 0x5f7   : > { %17259 = vmatprep.mubr.msk.f32.mxu1 %vm5213_vm9, %v25193_v29  ;;  %18368 = vmatpush3.bf16.msra.mxu1 %v18365_v8 }
 0x5fa   : > { %17260 = vmatmul.mubr.msk.f32.gmra.mrb[36].mxu1 %vm5213_vm9, %v8505_v62 }
 0x5fb   : > { %17262 = vmatprep.mubr.msk.f32.mxu1 %vm5213_vm9, %v25197_v24 }
 0x5fe   : > { %17263 = vmatmul.mubr.msk.f32.gmra.mrb[38].mxu1 %vm5213_vm9, %v8507_v47 }
 0x5ff   : > { %17265 = vmatprep.mubr.msk.f32.mxu1 %vm5213_vm9, %v25200_v54 }
 0x602   : > { %17266 = vmatmul.mubr.msk.f32.gmra.mrb[40].mxu1 %vm5213_vm9, %v8509_v37 }
 0x603   : > { %17268 = vmatprep.mubr.msk.f32.mxu1 %vm5213_vm9, %v25204_v3 }
 0x606   : > { %17269 = vmatmul.mubr.msk.f32.gmra.mrb[42].mxu1 %vm5213_vm9, %v8511_v33 }
 0x607   : > { %17271 = vmatprep.mubr.msk.f32.mxu1 %vm5213_vm9, %v25208_v39 }
 0x60a   : > { %17272 = vmatmul.mubr.msk.f32.gmra.mrb[44].mxu1 %vm5213_vm9, %v8513_v9 }
 0x60b   : > { %17274 = vmatprep.mubr.msk.f32.mxu1 %vm5213_vm9, %v25211_v44 }
 0x60e   : > { %17275 = vmatmul.mubr.msk.f32.gmra.mrb[46].mxu1 %vm5213_vm9, %v8515_v42 }
 0x60f   : > { %17277 = vmatprep.mubr.msk.f32.mxu1 %vm5213_vm9, %v25214_v10 }
 0x612   : > { %17278 = vmatmul.mubr.msk.f32.gmra.mrb[48].mxu1 %vm5213_vm9, %v8517_v6 }
 0x613   : > { %17280 = vmatprep.mubr.msk.f32.mxu1 %vm5213_vm9, %v25217_v4 }
 0x616   : > { %17281 = vmatmul.mubr.msk.f32.gmra.mrb[50].mxu1 %vm5213_vm9, %v8519_v18 }
 0x617   : > { %17283 = vmatprep.mubr.msk.f32.mxu1 %vm5213_vm9, %v25220_v45 }
 0x61a   : > { %17284 = vmatmul.mubr.msk.f32.gmra.mrb[52].mxu1 %vm5213_vm9, %v8521_v14 }
 0x61b   : > { %17286 = vmatprep.mubr.msk.f32.mxu1 %vm5213_vm9, %v25167_v21 }
 0x61e   : > { %17287 = vmatmul.mubr.msk.f32.gmra.mrb[54].mxu1 %vm5213_vm9, %v8523_v46 }
 0x61f   : > { %17289 = vmatprep.mubr.msk.f32.mxu1 %vm5213_vm9, %v25223_v35 }
 0x622   : > { %17290 = vmatmul.mubr.msk.f32.gmra.mrb[56].mxu1 %vm5213_vm9, %v8525_v57 }
 0x623   : > { %17292 = vmatprep.mubr.msk.f32.mxu1 %vm5213_vm9, %v25226_v58 }
 0x626   : > { %17293 = vmatmul.mubr.msk.f32.gmra.mrb[58].mxu1 %vm5213_vm9, %v8527_v48 }
 0x627   : > { %17295 = vmatprep.mubr.msk.f32.mxu1 %vm5213_vm9, %v22750_v53  ;;  %v9123_v53 = vld [vmem:[%s24182_s13 + $0x8] sm:$0xff] }
 0x628   : > { %14952 = vmatprep.mubr.msk.f32.mxu0 %vm9138_vm13, %v9123_v53 }
 0x62a   : > { %17296 = vmatmul.mubr.msk.f32.gmra.mrb[60].mxu1 %vm5213_vm9, %v8529_v50 }
 0x62b   : > { %17298 = vmatprep.mubr.msk.f32.mxu1 %vm5213_vm9, %v8498_v43 }
 0x62e   : > { %17299 = vmatmul.mubr.msk.f32.gmra.mrb[62].mxu1 %vm5213_vm9, %v8531_v15 }
 0x6c5   : > { %v17255_v22 = vpop.f32.mrb[32].mxu1 }
 0x6c6   : > { %v8898_v31 = vadd.f32 %v17255_v22, %v22987_v59  ;;  %v8699_v5 = vpop.f32.mrb[33].mxu1 }
 0x6c7   : > { %v8897_v49 = vadd.f32 %v22987_v59, %v8699_v5 }
 0x6c8   : > { %v8930_v29 = vmax.f32 %v8898_v31, 0.0 }
 0x6c9   : > { %v8929_v40 = vmax.f32 %v8897_v49, 0.0  ;;  %v17258_v23 = vpop.f32.mrb[34].mxu1 }
 0x6ca   : > { %8962 = vst.msk [vmem:[#allocation4 + $0x8] sm:$0xff] %vm5213_vm9, %v8930_v29  ;;  %v8900_v62 = vadd.f32 %v17258_v23, %v22987_v59  ;;  %v8709_v24 = vpop.f32.mrb[35].mxu1 }
 0x6cb   : > { %8961 = vst.msk [vmem:[#allocation4] sm:$0xff] %vm5213_vm9, %v8929_v40  ;;  %v8899_v26 = vadd.f32 %v22987_v59, %v8709_v24 }
 0x6cc   : > { %v8932_v32 = vmax.f32 %v8900_v62, 0.0 }
 0x6cd   : > { %v8931_v47 = vmax.f32 %v8899_v26, 0.0  ;;  %v17261_v54 = vpop.f32.mrb[36].mxu1 }
 0x6ce   : > { %8964 = vst.msk [vmem:[#allocation4 + $0x18] sm:$0xff] %vm5213_vm9, %v8932_v32  ;;  %v8902_v60 = vadd.f32 %v17261_v54, %v22987_v59  ;;  %v8719_v1 = vpop.f32.mrb[37].mxu1 }
 0x6cf   : > { %8963 = vst.msk [vmem:[#allocation4 + $0x10] sm:$0xff] %vm5213_vm9, %v8931_v47  ;;  %v8901_v37 = vadd.f32 %v22987_v59, %v8719_v1 }
 0x6d0   : > { %v8934_v3 = vmax.f32 %v8902_v60, 0.0 }
 0x6d1   : > { %v8933_v36 = vmax.f32 %v8901_v37, 0.0  ;;  %v17264_v11 = vpop.f32.mrb[38].mxu1  ;;  %v8994_v45 = vld [vmem:[#allocation4 + $0x8] sm:$0xff] }
 0x6d2   : > { %8966 = vst.msk [vmem:[#allocation4 + $0x28] sm:$0xff] %vm5213_vm9, %v8934_v3  ;;  %v8904_v33 = vadd.f32 %v17264_v11, %v22987_v59  ;;  %v8729_v39 = vpop.f32.mrb[39].mxu1  ;;  %v8993_v6 = vld [vmem:[#allocation4] sm:$0xff] }
 0x6d3   : > { %8965 = vst.msk [vmem:[#allocation4 + $0x20] sm:$0xff] %vm5213_vm9, %v8933_v36  ;;  %v8903_v13 = vadd.f32 %v22987_v59, %v8729_v39  ;;  %v9023_v4 = vld [vmem:[#allocation4 + $0x1] sm:$0xff] }
 0x6d4   : > { %v8936_v17 = vmax.f32 %v8904_v33, 0.0  ;;  %v9053_v58 = vmax.f32 %v8993_v6, %v9023_v4 }
 0x6d5   : > { %v8935_v9 = vmax.f32 %v8903_v13, 0.0  ;;  %v17267_v44 = vpop.f32.mrb[40].mxu1  ;;  %v8996_v28 = vld [vmem:[#allocation4 + $0x18] sm:$0xff] }
 0x6d6   : > { %8968 = vst.msk [vmem:[#allocation4 + $0x38] sm:$0xff] %vm5213_vm9, %v8936_v17  ;;  %v8906_v7 = vadd.f32 %v17267_v44, %v22987_v59  ;;  %v8739_v61 = vpop.f32.mrb[41].mxu1  ;;  %v8995_v42 = vld [vmem:[#allocation4 + $0x10] sm:$0xff] }
 0x6d7   : > { %v9025_v10 = vld [vmem:[#allocation4 + $0x11] sm:$0xff]  ;;  %8967 = vst.msk [vmem:[#allocation4 + $0x30] sm:$0xff] %vm5213_vm9, %v8935_v9  ;;  %v8905_v41 = vadd.f32 %v22987_v59, %v8739_v61  ;;  %v9024_v55 = vld [vmem:[#allocation4 + $0x9] sm:$0xff] }
 0x6d8   : > { %v8938_v25 = vmax.f32 %v8906_v7, 0.0  ;;  %v9055_v14 = vmax.f32 %v8995_v42, %v9025_v10  ;;  %v9054_v20 = vmax.f32 %v8994_v45, %v9024_v55 }
 0x6d9   : > { %v8937_v16 = vmax.f32 %v8905_v41, 0.0  ;;  %v17270_v18 = vpop.f32.mrb[42].mxu1  ;;  %v8998_v63 = vld [vmem:[#allocation4 + $0x28] sm:$0xff] }
 0x6da   : > { %8970 = vst.msk [vmem:[#allocation4 + $0x48] sm:$0xff] %vm5213_vm9, %v8938_v25  ;;  %v8908_v52 = vadd.f32 %v17270_v18, %v22987_v59  ;;  %v8749_v46 = vpop.f32.mrb[43].mxu1  ;;  %v9026_v35 = vld [vmem:[#allocation4 + $0x19] sm:$0xff]  ;;  %v9027_v2 = vld [vmem:[#allocation4 + $0x21] sm:$0xff]  ;;  %v9092_v19 = vmax.f32 %v9053_v58, %v9055_v14 }
 0x6db   : > { %v8997_v12 = vld [vmem:[#allocation4 + $0x20] sm:$0xff]  ;;  %8969 = vst.msk [vmem:[#allocation4 + $0x40] sm:$0xff] %vm5213_vm9, %v8937_v16  ;;  %v8907_v57 = vadd.f32 %v22987_v59, %v8749_v46  ;;  %v9056_v21 = vmax.f32 %v8996_v28, %v9026_v35 }
 0x6dc   : > { %v8940_v48 = vmax.f32 %v8908_v52, 0.0  ;;  %v9057_v15 = vmax.f32 %v8997_v12, %v9027_v2 }
 0x6dd   : > { %v8939_v43 = vmax.f32 %v8907_v57, 0.0  ;;  %v17273_v38 = vpop.f32.mrb[44].mxu1  ;;  %v9093_v50 = vmax.f32 %v9054_v20, %v9056_v21  ;;  %v9000_v23 = vld [vmem:[#allocation4 + $0x38] sm:$0xff] }
 0x6de   : > { %8972 = vst.msk [vmem:[#allocation4 + $0x58] sm:$0xff] %vm5213_vm9, %v8940_v48  ;;  %v8910_v53 = vadd.f32 %v17273_v38, %v22987_v59  ;;  %v8759_v56 = vpop.f32.mrb[45].mxu1  ;;  %v9028_v30 = vld [vmem:[#allocation4 + $0x29] sm:$0xff]  ;;  %v9029_v51 = vld [vmem:[#allocation4 + $0x31] sm:$0xff]  ;;  %v9094_v29 = vmax.f32 %v9055_v14, %v9057_v15 }
 0x6df   : > { %v8999_v0 = vld [vmem:[#allocation4 + $0x30] sm:$0xff]  ;;  %8971 = vst.msk [vmem:[#allocation4 + $0x50] sm:$0xff] %vm5213_vm9, %v8939_v43  ;;  %v8909_v34 = vadd.f32 %v22987_v59, %v8759_v56  ;;  %v18316_v8 = vpack.c.bf16 %v9093_v50, %v9092_v19  ;;  %v9058_v22 = vmax.f32 %v8998_v63, %v9028_v30 }
 0x6e0   : > { %v8942_v31 = vmax.f32 %v8910_v53, 0.0  ;;  %v9059_v62 = vmax.f32 %v8999_v0, %v9029_v51 }
 0x6e1   : > { %v8941_v5 = vmax.f32 %v8909_v34, 0.0  ;;  %v17276_v49 = vpop.f32.mrb[46].mxu1  ;;  %18317 = vmatpush1.bf16.msra.mxu0 %v18316_v8  ;;  %v9095_v40 = vmax.f32 %v9056_v21, %v9058_v22  ;;  %v9002_v13 = vld [vmem:[#allocation4 + $0x48] sm:$0xff] }
 0x6e2   : > { %8974 = vst.msk [vmem:[#allocation4 + $0x68] sm:$0xff] %vm5213_vm9, %v8942_v31  ;;  %v8912_v24 = vadd.f32 %v17276_v49, %v22987_v59  ;;  %v8769_v26 = vpop.f32.mrb[47].mxu1  ;;  %18318 = vmatprep.subr.bf16.mxu0 %v20229_v27  ;;  %v9030_v32 = vld [vmem:[#allocation4 + $0x39] sm:$0xff]  ;;  %v9031_v54 = vld [vmem:[#allocation4 + $0x41] sm:$0xff]  ;;  %v9096_v33 = vmax.f32 %v9057_v15, %v9059_v62 }
 0x6e3   : > { %v9001_v47 = vld [vmem:[#allocation4 + $0x40] sm:$0xff]  ;;  %8973 = vst.msk [vmem:[#allocation4 + $0x60] sm:$0xff] %vm5213_vm9, %v8941_v5  ;;  %v8911_v60 = vadd.f32 %v22987_v59, %v8769_v26  ;;  %v18319_v1 = vpack.c.bf16 %v9095_v40, %v9094_v29  ;;  %v9060_v37 = vmax.f32 %v9000_v23, %v9030_v32 }
 0x6e4   : > { %v8944_v3 = vmax.f32 %v8912_v24, 0.0  ;;  %v9061_v17 = vmax.f32 %v9001_v47, %v9031_v54 }
 0x6e5   : > { %v8943_v36 = vmax.f32 %v8911_v60, 0.0  ;;  %v17279_v11 = vpop.f32.mrb[48].mxu1  ;;  %18320 = vmatpush1.bf16.msra.mxu0 %v18319_v1  ;;  %v9097_v39 = vmax.f32 %v9058_v22, %v9060_v37  ;;  %v9004_v45 = vld [vmem:[#allocation4 + $0x58] sm:$0xff] }
 0x6e6   : > { %8976 = vst.msk [vmem:[#allocation4 + $0x78] sm:$0xff] %vm5213_vm9, %v8944_v3  ;;  %v8914_v9 = vadd.f32 %v17279_v11, %v22987_v59  ;;  %v8779_v44 = vpop.f32.mrb[49].mxu1  ;;  %18321 = vmatprep.subr.bf16.mxu0 %v20229_v27  ;;  %v9032_v7 = vld [vmem:[#allocation4 + $0x49] sm:$0xff]  ;;  %v9033_v42 = vld [vmem:[#allocation4 + $0x51] sm:$0xff]  ;;  %v9098_v16 = vmax.f32 %v9059_v62, %v9061_v17 }
 0x6e7   : > { %v9003_v61 = vld [vmem:[#allocation4 + $0x50] sm:$0xff]  ;;  %8975 = vst.msk [vmem:[#allocation4 + $0x70] sm:$0xff] %vm5213_vm9, %v8943_v36  ;;  %v8913_v10 = vadd.f32 %v22987_v59, %v8779_v44  ;;  %v18322_v41 = vpack.c.bf16 %v9097_v39, %v9096_v33  ;;  %v9062_v25 = vmax.f32 %v9002_v13, %v9032_v7 }
 0x6e8   : > { %v8946_v6 = vmax.f32 %v8914_v9, 0.0  ;;  %v9063_v28 = vmax.f32 %v9003_v61, %v9033_v42 }
 0x6e9   : > { %v8945_v4 = vmax.f32 %v8913_v10, 0.0  ;;  %v17282_v55 = vpop.f32.mrb[50].mxu1  ;;  %18323 = vmatpush1.bf16.msra.mxu0 %v18322_v41  ;;  %v9099_v18 = vmax.f32 %v9060_v37, %v9062_v25  ;;  %v9006_v19 = vld [vmem:[#allocation4 + $0x68] sm:$0xff] }
 0x6ea   : > { %8978 = vst.msk [vmem:[#allocation4 + $0x88] sm:$0xff] %vm5213_vm9, %v8946_v6  ;;  %v8916_v14 = vadd.f32 %v17282_v55, %v22987_v59  ;;  %v8789_v52 = vpop.f32.mrb[51].mxu1  ;;  %18324 = vmatprep.subr.bf16.mxu0 %v20229_v27  ;;  %v9034_v46 = vld [vmem:[#allocation4 + $0x59] sm:$0xff]  ;;  %v9035_v12 = vld [vmem:[#allocation4 + $0x61] sm:$0xff]  ;;  %v9100_v43 = vmax.f32 %v9061_v17, %v9063_v28 }
 0x6eb   : > { %v9005_v35 = vld [vmem:[#allocation4 + $0x60] sm:$0xff]  ;;  %8977 = vst.msk [vmem:[#allocation4 + $0x80] sm:$0xff] %vm5213_vm9, %v8945_v4  ;;  %v8915_v2 = vadd.f32 %v22987_v59, %v8789_v52  ;;  %v18325_v57 = vpack.c.bf16 %v9099_v18, %v9098_v16  ;;  %v9064_v58 = vmax.f32 %v9004_v45, %v9034_v46 }
 0x6ec   : > { %v8948_v20 = vmax.f32 %v8916_v14, 0.0  ;;  %v9065_v50 = vmax.f32 %v9005_v35, %v9035_v12 }
 0x6ed   : > { %v8947_v21 = vmax.f32 %v8915_v2, 0.0  ;;  %v17285_v48 = vpop.f32.mrb[52].mxu1  ;;  %18326 = vmatpush1.bf16.msra.mxu0 %v18325_v57  ;;  %v9101_v38 = vmax.f32 %v9062_v25, %v9064_v58  ;;  %v9008_v29 = vld [vmem:[#allocation4 + $0x78] sm:$0xff] }
 0x6ee   : > { %8980 = vst.msk [vmem:[#allocation4 + $0x98] sm:$0xff] %vm5213_vm9, %v8948_v20  ;;  %v8918_v63 = vadd.f32 %v17285_v48, %v22987_v59  ;;  %v8799_v15 = vpop.f32.mrb[53].mxu1  ;;  %18327 = vmatprep.subr.bf16.mxu0 %v20229_v27  ;;  %v9036_v53 = vld [vmem:[#allocation4 + $0x69] sm:$0xff]  ;;  %v9037_v30 = vld [vmem:[#allocation4 + $0x71] sm:$0xff]  ;;  %v9102_v5 = vmax.f32 %v9063_v28, %v9065_v50 }
 0x6ef   : > { %v9007_v56 = vld [vmem:[#allocation4 + $0x70] sm:$0xff]  ;;  %8979 = vst.msk [vmem:[#allocation4 + $0x90] sm:$0xff] %vm5213_vm9, %v8947_v21  ;;  %v8917_v0 = vadd.f32 %v22987_v59, %v8799_v15  ;;  %v18328_v51 = vpack.c.bf16 %v9101_v38, %v9100_v43  ;;  %v9066_v34 = vmax.f32 %v9006_v19, %v9036_v53 }
 0x6f0   : > { %v8950_v8 = vmax.f32 %v8918_v63, 0.0  ;;  %v9067_v40 = vmax.f32 %v9007_v56, %v9037_v30 }
 0x6f1   : > { %v8949_v22 = vmax.f32 %v8917_v0, 0.0  ;;  %v17288_v31 = vpop.f32.mrb[54].mxu1  ;;  %18329 = vmatpush1.bf16.msra.mxu0 %v18328_v51  ;;  %v9103_v49 = vmax.f32 %v9064_v58, %v9066_v34  ;;  %v9010_v33 = vld [vmem:[#allocation4 + $0x88] sm:$0xff] }
 0x6f2   : > { %8982 = vst.msk [vmem:[#allocation4 + $0xa8] sm:$0xff] %vm5213_vm9, %v8950_v8  ;;  %v8920_v23 = vadd.f32 %v17288_v31, %v22987_v59  ;;  %v8809_v62 = vpop.f32.mrb[55].mxu1  ;;  %18330 = vmatprep.subr.bf16.mxu0 %v20229_v27  ;;  %v9038_v24 = vld [vmem:[#allocation4 + $0x79] sm:$0xff]  ;;  %v9039_v32 = vld [vmem:[#allocation4 + $0x81] sm:$0xff]  ;;  %v9104_v36 = vmax.f32 %v9065_v50, %v9067_v40 }
 0x6f3   : > { %v9009_v26 = vld [vmem:[#allocation4 + $0x80] sm:$0xff]  ;;  %8981 = vst.msk [vmem:[#allocation4 + $0xa0] sm:$0xff] %vm5213_vm9, %v8949_v22  ;;  %v8919_v47 = vadd.f32 %v22987_v59, %v8809_v62  ;;  %v18331_v54 = vpack.c.bf16 %v9103_v49, %v9102_v5  ;;  %v9068_v60 = vmax.f32 %v9008_v29, %v9038_v24 }
 0x6f4   : > { %v8952_v1 = vmax.f32 %v8920_v23, 0.0  ;;  %v9069_v39 = vmax.f32 %v9009_v26, %v9039_v32 }
 0x6f5   : > { %v8951_v37 = vmax.f32 %v8919_v47, 0.0  ;;  %v17291_v3 = vpop.f32.mrb[56].mxu1  ;;  %18332 = vmatpush1.bf16.msra.mxu0 %v18331_v54  ;;  %v9105_v11 = vmax.f32 %v9066_v34, %v9068_v60  ;;  %v9012_v16 = vld [vmem:[#allocation4 + $0x98] sm:$0xff] }
 0x6f6   : > { %8984 = vst.msk [vmem:[#allocation4 + $0xb8] sm:$0xff] %vm5213_vm9, %v8952_v1  ;;  %v8922_v13 = vadd.f32 %v17291_v3, %v22987_v59  ;;  %v8819_v17 = vpop.f32.mrb[57].mxu1  ;;  %18333 = vmatprep.subr.bf16.mxu0 %v20229_v27  ;;  %v9040_v9 = vld [vmem:[#allocation4 + $0x89] sm:$0xff]  ;;  %v9041_v7 = vld [vmem:[#allocation4 + $0x91] sm:$0xff]  ;;  %v9106_v4 = vmax.f32 %v9067_v40, %v9069_v39 }
 0x6f7   : > { %v9011_v44 = vld [vmem:[#allocation4 + $0x90] sm:$0xff]  ;;  %8983 = vst.msk [vmem:[#allocation4 + $0xb0] sm:$0xff] %vm5213_vm9, %v8951_v37  ;;  %v8921_v61 = vadd.f32 %v22987_v59, %v8819_v17  ;;  %v18334_v42 = vpack.c.bf16 %v9105_v11, %v9104_v36  ;;  %v9070_v10 = vmax.f32 %v9010_v33, %v9040_v9 }
 0x6f8   : > { %v8954_v41 = vmax.f32 %v8922_v13, 0.0  ;;  %v9071_v18 = vmax.f32 %v9011_v44, %v9041_v7 }
 0x6f9   : > { %v8953_v25 = vmax.f32 %v8921_v61, 0.0  ;;  %v17294_v6 = vpop.f32.mrb[58].mxu1  ;;  %18335 = vmatpush1.bf16.msra.mxu0 %v18334_v42  ;;  %v9107_v55 = vmax.f32 %v9068_v60, %v9070_v10  ;;  %v9014_v43 = vld [vmem:[#allocation4 + $0xa8] sm:$0xff] }
 0x6fa   : > { %8986 = vst.msk [vmem:[#allocation4 + $0xc8] sm:$0xff] %vm5213_vm9, %v8954_v41  ;;  %v8924_v45 = vadd.f32 %v17294_v6, %v22987_v59  ;;  %v8829_v28 = vpop.f32.mrb[59].mxu1  ;;  %18336 = vmatprep.subr.bf16.mxu0 %v20229_v27  ;;  %v9042_v14 = vld [vmem:[#allocation4 + $0x99] sm:$0xff]  ;;  %v9043_v46 = vld [vmem:[#allocation4 + $0xa1] sm:$0xff]  ;;  %v9108_v21 = vmax.f32 %v9069_v39, %v9071_v18 }
 0x6fb   : > { %v9013_v52 = vld [vmem:[#allocation4 + $0xa0] sm:$0xff]  ;;  %8985 = vst.msk [vmem:[#allocation4 + $0xc0] sm:$0xff] %vm5213_vm9, %v8953_v25  ;;  %v8923_v35 = vadd.f32 %v22987_v59, %v8829_v28  ;;  %v18337_v12 = vpack.c.bf16 %v9107_v55, %v9106_v4  ;;  %v9072_v2 = vmax.f32 %v9012_v16, %v9042_v14 }
 0x6fc   : > { %v8956_v57 = vmax.f32 %v8924_v45, 0.0  ;;  %v9073_v38 = vmax.f32 %v9013_v52, %v9043_v46 }
 0x6fd   : > { %v8955_v58 = vmax.f32 %v8923_v35, 0.0  ;;  %v17297_v20 = vpop.f32.mrb[60].mxu1  ;;  %18338 = vmatpush1.bf16.msra.mxu0 %v18337_v12  ;;  %v9109_v48 = vmax.f32 %v9070_v10, %v9072_v2  ;;  %v9016_v5 = vld [vmem:[#allocation4 + $0xb8] sm:$0xff] }
 0x6fe   : > { %8988 = vst.msk [vmem:[#allocation4 + $0xd8] sm:$0xff] %vm5213_vm9, %v8956_v57  ;;  %v8926_v19 = vadd.f32 %v17297_v20, %v22987_v59  ;;  %v8839_v50 = vpop.f32.mrb[61].mxu1  ;;  %18339 = vmatprep.subr.bf16.mxu0 %v20229_v27  ;;  %v9044_v63 = vld [vmem:[#allocation4 + $0xa9] sm:$0xff]  ;;  %v9045_v53 = vld [vmem:[#allocation4 + $0xb1] sm:$0xff]  ;;  %v9110_v22 = vmax.f32 %v9071_v18, %v9073_v38 }
 0x6ff   : > { %v9015_v15 = vld [vmem:[#allocation4 + $0xb0] sm:$0xff]  ;;  %8987 = vst.msk [vmem:[#allocation4 + $0xd0] sm:$0xff] %vm5213_vm9, %v8955_v58  ;;  %v8925_v56 = vadd.f32 %v22987_v59, %v8839_v50  ;;  %v18340_v30 = vpack.c.bf16 %v9109_v48, %v9108_v21  ;;  %v9074_v0 = vmax.f32 %v9014_v43, %v9044_v63  ;;  %v9122_v63 = vld [vmem:[%s24182_s13] sm:$0xff] }
 0x700   : > { %v8958_v51 = vmax.f32 %v8926_v19, 0.0  ;;  %v9075_v49 = vmax.f32 %v9015_v15, %v9045_v53  ;;  %v9125_v15 = vld [vmem:[%s24182_s13 + $0x18] sm:$0xff]  ;;  %v9124_v53 = vld [vmem:[%s24182_s13 + $0x10] sm:$0xff] }
 0x701   : > { %v8957_v34 = vmax.f32 %v8925_v56, 0.0  ;;  %v17300_v8 = vpop.f32.mrb[62].mxu1  ;;  %18341 = vmatpush1.bf16.msra.mxu0 %v18340_v30  ;;  %v9111_v31 = vmax.f32 %v9072_v2, %v9074_v0  ;;  %v9018_v3 = vld [vmem:[#allocation4 + $0xc8] sm:$0xff]  ;;  %v9126_v30 = vld [vmem:[%s24182_s13 + $0x20] sm:$0xff] }
 0x702   : > { %8990 = vst.msk [vmem:[#allocation4 + $0xe8] sm:$0xff] %vm5213_vm9, %v8958_v51  ;;  %v8928_v29 = vadd.f32 %v17300_v8, %v22987_v59  ;;  %v8849_v40 = vpop.f32.mrb[63].mxu1  ;;  %18342 = vmatprep.subr.bf16.mxu0 %v20229_v27  ;;  %v9046_v23 = vld [vmem:[#allocation4 + $0xb9] sm:$0xff]  ;;  %v9047_v24 = vld [vmem:[#allocation4 + $0xc1] sm:$0xff]  ;;  %v9112_v1 = vmax.f32 %v9073_v38, %v9075_v49  ;;  %v9128_v51 = vld [vmem:[%s24182_s13 + $0x30] sm:$0xff] }
 0x703   : > { %v9017_v62 = vld [vmem:[#allocation4 + $0xc0] sm:$0xff]  ;;  %8989 = vst.msk [vmem:[#allocation4 + $0xe0] sm:$0xff] %vm5213_vm9, %v8957_v34  ;;  %v8927_v26 = vadd.f32 %v22987_v59, %v8849_v40  ;;  %v18343_v32 = vpack.c.bf16 %v9111_v31, %v9110_v22  ;;  %v9076_v47 = vmax.f32 %v9016_v5, %v9046_v23  ;;  %v9127_v56 = vld [vmem:[%s24182_s13 + $0x28] sm:$0xff]  ;;  %v9133_v22 = vld [vmem:[%s24182_s13 + $0x58] sm:$0xff] }
 0x704   : > { %v8960_v54 = vmax.f32 %v8928_v29, 0.0  ;;  %v9077_v36 = vmax.f32 %v9017_v62, %v9047_v24  ;;  %v9131_v34 = vld [vmem:[%s24182_s13 + $0x48] sm:$0xff]  ;;  %v9130_v8 = vld [vmem:[%s24182_s13 + $0x40] sm:$0xff]  ;;  %v9132_v31 = vld [vmem:[%s24182_s13 + $0x50] sm:$0xff] }
 0x705   : > { %v8959_v60 = vmax.f32 %v8927_v26, 0.0  ;;  %18344 = vmatpush1.bf16.msra.mxu0 %v18343_v32  ;;  %v9113_v37 = vmax.f32 %v9074_v0, %v9076_v47  ;;  %v9020_v44 = vld [vmem:[#allocation4 + $0xd8] sm:$0xff]  ;;  %v9135_v5 = vld [vmem:[%s24182_s13 + $0x68] sm:$0xff]  ;;  %v9136_v40 = vld [vmem:[%s24182_s13 + $0x70] sm:$0xff] }
 0x706   : > { %8992 = vst.msk [vmem:[#allocation4 + $0xf8] sm:$0xff] %vm5213_vm9, %v8960_v54  ;;  %18345 = vmatprep.subr.bf16.mxu0 %v20229_v27  ;;  %v9048_v11 = vld [vmem:[#allocation4 + $0xc9] sm:$0xff]  ;;  %v9049_v39 = vld [vmem:[#allocation4 + $0xd1] sm:$0xff]  ;;  %v9114_v17 = vmax.f32 %v9075_v49, %v9077_v36  ;;  %v9134_v49 = vld [vmem:[%s24182_s13 + $0x60] sm:$0xff] }
 0x707   : > { %v9019_v33 = vld [vmem:[#allocation4 + $0xd0] sm:$0xff]  ;;  %8991 = vst.msk [vmem:[#allocation4 + $0xf0] sm:$0xff] %vm5213_vm9, %v8959_v60  ;;  %v18346_v13 = vpack.c.bf16 %v9113_v37, %v9112_v1  ;;  %v9078_v59 = vmax.f32 %v9018_v3, %v9048_v11  ;;  %v9129_v0 = vld [vmem:[%s24182_s13 + $0x38] sm:$0xff]  ;;  %v9320_v23 = vld [vmem:[#allocation5 + $0x8] sm:$0xff] }
 0x708   : > { %v9079_v7 = vmax.f32 %v9019_v33, %v9049_v39  ;;  %v9137_v29 = vld [vmem:[%s24182_s13 + $0x78] sm:$0xff]  ;;  %17309 = vmatprep.mubr.msk.f32.mxu1 %vm5213_vm9, %v9320_v23  ;;  %v9317_v24 = vld [vmem:[#allocation18 + $0x8] sm:$0xff]  ;;  %v9318_v60 = vld [vmem:[#allocation18 + $0x10] sm:$0xff] }
 0x709   : > { %18347 = vmatpush1.bf16.msra.mxu0 %v18346_v13  ;;  %v9115_v9 = vmax.f32 %v9076_v47, %v9078_v59  ;;  %v9083_v6 = vld [vmem:[#allocation4 + $0xe8] sm:$0xff]  ;;  %v9316_v62 = vld [vmem:[#allocation18] sm:$0xff]  ;;  %v9319_v1 = vld [vmem:[#allocation18 + $0x18] sm:$0xff] }
 0x70a   : > { %18348 = vmatprep.subr.bf16.mxu0 %v20229_v27  ;;  %v9050_v61 = vld [vmem:[#allocation4 + $0xd9] sm:$0xff]  ;;  %v9051_v10 = vld [vmem:[#allocation4 + $0xe1] sm:$0xff]  ;;  %v9116_v55 = vmax.f32 %v9077_v36, %v9079_v7  ;;  %v9052_v45 = vld [vmem:[#allocation4 + $0xe9] sm:$0x7f]  ;;  %v18369_v26 = vpack.c.bf16 %v9317_v24, %v9316_v62  ;;  %v18373_v3 = vpack.c.bf16 %v9319_v1, %v9318_v60 }
 0x70b   : > { %v9021_v42 = vld [vmem:[#allocation4 + $0xe0] sm:$0xff]  ;;  %v18349_v41 = vpack.c.bf16 %v9115_v9, %v9114_v17  ;;  %v9080_v25 = vmax.f32 %v9020_v44, %v9050_v61  ;;  %v9022_v4 = vld [vmem:[#allocation4 + $0xe8] sm:$0x7f]  ;;  %v9624_v33 = vld [vmem:[#allocation18 + $0x40] sm:$0xff] }
 0x70c   : > { %v9081_v18 = vmax.f32 %v9021_v42, %v9051_v10  ;;  %v9082_v48 = vmax.f32 %v9022_v4, %v9052_v45  ;;  %18370 = vmatprep.subr.bf16.mxu1 %v18369_v26  ;;  %v9625_v39 = vld [vmem:[#allocation18 + $0x48] sm:$0xff]  ;;  %v25245_v24 = vld [vmem:[#allocation63_spill] sm:$0xff] }
 0x70d   : > { %18350 = vmatpush1.bf16.msra.mxu0 %v18349_v41  ;;  %v9117_v16 = vmax.f32 %v9078_v59, %v9080_v25  ;;  %v9085_v28 = vld [vmem:[#allocation4 + $0xf8] sm:$0x7f]  ;;  %v23129_v59 = vpack.c.bf16 %v9625_v39, %v9624_v33  ;;  %v25251_v39 = vld [vmem:[#allocation65_spill] sm:$0xff] }
 0x70e   : > { %v9088_v14 = vld [vmem:[#allocation4 + $0xf9] sm:$0x7f]  ;;  %18351 = vmatprep.subr.bf16.mxu0 %v20229_v27  ;;  %v9084_v52 = vld [vmem:[#allocation4 + $0xf0] sm:$0xff]  ;;  %v9118_v20 = vmax.f32 %v9079_v7, %v9081_v18  ;;  %v12007_v23 = vld [vmem:[#allocation21 + $0x208] sm:$0xff] }
 0x70f   : > { %v9086_v46 = vld [vmem:[#allocation4 + $0xe9] sm:$0xff]  ;;  %v9087_v35 = vld [vmem:[#allocation4 + $0xf1] sm:$0xff]  ;;  %v18352_v12 = vpack.c.bf16 %v9117_v16, %v9116_v55  ;;  %v9091_v58 = vmax.f32 %v9085_v28, %v9088_v14 }
 0x710   : > { %v9089_v2 = vmax.f32 %v9083_v6, %v9086_v46  ;;  %v9090_v57 = vmax.f32 %v9084_v52, %v9087_v35  ;;  %v25232_v16 = vld [vmem:[#allocation38_spill] sm:$0xff]  ;;  %v9284_v14 = vld [vmem:[#allocation5 + $0x7] sm:$0xff] }
 0x711   : > { %18353 = vmatpush1.bf16.msra.mxu0 %v18352_v12  ;;  %v9121_v19 = vmax.f32 %v9082_v48, %v9091_v58  ;;  %v25233_v52 = vld [vmem:[#allocation57_spill] sm:$0xff]  ;;  %v9627_v48 = vld [vmem:[#allocation18 + $0x58] sm:$0xff] }
 0x712   : > { %v9119_v21 = vmax.f32 %v9080_v25, %v9089_v2  ;;  %18354 = vmatprep.subr.bf16.mxu0 %v20229_v27  ;;  %v9120_v43 = vmax.f32 %v9081_v18, %v9090_v57  ;;  %v1168_v18 = vand.u32 7, %v25232_v16  ;;  %v1175_v46 = vand.u32 7, %v25233_v52  ;;  %v25236_v2 = vld [vmem:[#allocation39_spill] sm:$0xff] }
 0x713   : > { %v1182_v57 = vand.u32 7, %v25236_v2 }
 0x714   : > { %v18355_v38 = vpack.c.bf16 %v9119_v21, %v9118_v20  ;;  %v18358_v50 = vpack.c.bf16 %v9121_v19, %v9120_v43  ;;  %vm23161_vm3 = vcmp.ne.s32.totalorder %v1168_v18, 0  ;;  %v9626_v21 = vld [vmem:[#allocation18 + $0x50] sm:$0xff]  ;;  %vm23174_vm7 = vcmp.ne.s32.totalorder %v1175_v46, 0  ;;  %v11851_v43 = vld [vmem:[#allocation21 + $0x1f8] sm:$0xff] }
 0x715   : > { %v9308_v58 = vsel %vm23161_vm3, %v9284_v14, 0.0  ;;  %v25239_v19 = vld [vmem:[#allocation61_spill] sm:$0xff]  ;;  %vm23184_vm11 = vcmp.ne.s32.totalorder %v1182_v57, 0  ;;  %vm23255_vm0 = vcmp.ne.s32.totalorder %v1168_v18, 7  ;;  %v9785_v14 = vld [vmem:[#allocation18 + $0x78] sm:$0xff]  ;;  %vm23267_vm4 = vcmp.ne.s32.totalorder %v1175_v46, 7 }
 0x716   : > { %18356 = vmatpush1.bf16.msra.mxu0 %v18355_v38  ;;  %vm23276_vm5 = vcmp.ne.s32.totalorder %v1182_v57, 7 }
 0x717   : > { %18357 = vmatprep.subr.bf16.mxu0 %v20229_v27 }
 0x71a   : > { %18360 = vmatpush1.bf16.msk.msra.mxu0 %vm18359_vm2, %v18358_v50  ;;  %v1189_v50 = vand.u32 7, %v25239_v19 }
 0x71c   : > { %vm23200_vm10 = vcmp.ne.s32.totalorder %v1189_v50, 0 }
 0x71d   : > { %9232 = vmatmul.mubr.f32.vlgmr.msra.gmra.mrb[32].mxu0 %v9122_v63  ;;  %v10767_v63 = vld [vmem:[#allocation21 + $0x40] sm:$0xff] }
 0x71e   : > { %14953 = vmatprep.mubr.msk.f32.mxu0 %vm9138_vm13, %v9125_v15  ;;  %v10768_v15 = vld [vmem:[#allocation21 + $0x48] sm:$0xff] }
 0x721   : > { %9237 = vmatmul.mubr.f32.gmra.mrb[34].mxu0 %v9124_v53 }
 0x722   : > { %14954 = vmatprep.mubr.msk.f32.mxu0 %vm9138_vm13, %v9127_v56 }
 0x725   : > { %9242 = vmatmul.mubr.f32.gmra.mrb[36].mxu0 %v9126_v30  ;;  %v25242_v30 = vld [vmem:[#allocation41_spill] sm:$0xff] }
 0x726   : > { %14955 = vmatprep.mubr.msk.f32.mxu0 %vm9138_vm13, %v9129_v0  ;;  %v1196_v0 = vand.u32 7, %v25242_v30 }
 0x728   : > { %vm23210_vm14 = vcmp.ne.s32.totalorder %v1196_v0, 0  ;;  %vm23300_vm2 = vcmp.ne.s32.totalorder %v1196_v0, 7 }
 0x729   : > { %9247 = vmatmul.mubr.f32.gmra.mrb[38].mxu0 %v9128_v51  ;;  %v18433_v51 = vpack.c.bf16 %v10768_v15, %v10767_v63  ;;  %v9932_v15 = vld [vmem:[#allocation18 + $0x80] sm:$0xff] }
 0x72a   : > { %14956 = vmatprep.mubr.msk.f32.mxu0 %vm9138_vm13, %v9131_v34  ;;  %v10769_v34 = vld [vmem:[#allocation21 + $0x50] sm:$0xff] }
 0x72b   : > { %18434 = vmatprep.subr.bf16.mxu0 %v18433_v51 }
 0x72c   : > { %18436 = vmatpush3.bf16.msra.mxu0 %v18433_v51  ;;  %v9933_v51 = vld [vmem:[#allocation18 + $0x88] sm:$0xff] }
 0x72d   : > { %9252 = vmatmul.mubr.f32.gmra.mrb[40].mxu0 %v9130_v8  ;;  %v10770_v8 = vld [vmem:[#allocation21 + $0x58] sm:$0xff] }
 0x72e   : > { %14957 = vmatprep.mubr.msk.f32.mxu0 %vm9138_vm13, %v9133_v22  ;;  %v18381_v22 = vpack.c.bf16 %v9627_v48, %v9626_v21  ;;  %v25260_v21 = vmov 0 }
 0x72f   : > { %v25261_v21 = vsel %vm23276_vm5, 4294967295, %v25260_v21 }
 0x731   : > { %9257 = vmatmul.mubr.f32.gmra.mrb[42].mxu0 %v9132_v31  ;;  %v18437_v31 = vpack.c.bf16 %v10770_v8, %v10769_v34  ;;  %v25264_v8 = vmov 0 }
 0x732   : > { %14958 = vmatprep.mubr.msk.f32.mxu0 %vm9138_vm13, %v9135_v5  ;;  %v25265_v8 = vsel %vm23300_vm2, 4294967295, %v25264_v8 }
 0x733   : > { %18438 = vmatprep.subr.bf16.mxu0 %v18437_v31 }
 0x734   : > { %18440 = vmatpush3.bf16.msra.mxu0 %v18437_v31  ;;  %v18393_v31 = vpack.c.bf16 %v9933_v51, %v9932_v15  ;;  %v10093_v15 = vld [vmem:[#allocation18 + $0xb8] sm:$0xff] }
 0x735   : > { %9262 = vmatmul.mubr.f32.gmra.mrb[44].mxu0 %v9134_v49  ;;  %v9782_v49 = vld [vmem:[#allocation18 + $0x60] sm:$0xff] }
 0x736   : > { %14959 = vmatprep.mubr.msk.f32.mxu0 %vm9138_vm13, %v9137_v29  ;;  %v9783_v29 = vld [vmem:[#allocation18 + $0x68] sm:$0xff]  ;;  %vm23291_vm13 = vcmp.ne.s32.totalorder %v1189_v50, 7 }
 0x737   : > { %v18385_v1 = vpack.c.bf16 %v9783_v29, %v9782_v49 }
 0x739   : > { %9267 = vmatmul.mubr.f32.gmra.mrb[46].mxu0 %v9136_v40 }
 0x7f0   : > { %v9233_v32 = vpop.f32.mrb[32].mxu0 }
 0x7f1   : > { %9274 = vst.msk [vmem:[#allocation5 + $0x10] sm:$0xff] %vm5213_vm9, %v9233_v32  ;;  %v9235_v47 = vpop.f32.mrb[33].mxu0 }
 0x7f4   : > { %v9238_v54 = vpop.f32.mrb[34].mxu0 }
 0x7f5   : > { %9275 = vst.msk [vmem:[#allocation5 + $0x18] sm:$0xff] %vm5213_vm9, %v9238_v54  ;;  %v9240_v37 = vpop.f32.mrb[35].mxu0  ;;  %v25248_v54 = vld [vmem:[#allocation42_spill] sm:$0xff] }
 0x7f6   : > { %v1210_v60 = vand.u32 7, %v25248_v54 }
 0x7f8   : > { %v9243_v36 = vpop.f32.mrb[36].mxu0  ;;  %v23124_v11 = vld [vmem:[#allocation5 + $0x10] sm:$0xff]  ;;  %vm23233_vm15 = vcmp.ne.s32.totalorder %v1210_v60, 0  ;;  %vm23320_vm1 = vcmp.ne.s32.totalorder %v1210_v60, 7  ;;  %v9934_v60 = vld [vmem:[#allocation18 + $0x90] sm:$0xff] }
 0x7f9   : > { %9276 = vst.msk [vmem:[#allocation5 + $0x20] sm:$0xff] %vm5213_vm9, %v9243_v36  ;;  %v9245_v13 = vpop.f32.mrb[37].mxu0  ;;  %17310 = vmatmul.mubr.msk.f32.vlgmr.msra.gmra.mrb[64].mxu1 %vm5213_vm9, %v23124_v11  ;;  %v23178_v38 = vld [vmem:[#allocation5 + $0xf] sm:$0xff] }
 0x7fa   : > { %18372 = vmatpush3.bf16.msra.mxu1 %v18369_v26  ;;  %v9309_v5 = vsel %vm23174_vm7, %v23178_v38, 0.0  ;;  %v1203_v26 = vand.u32 7, %v25245_v24  ;;  %v1217_v13 = vand.u32 7, %v25251_v39  ;;  %v12009_v36 = vld [vmem:[#allocation21 + $0x218] sm:$0xff] }
 0x7fb   : > { %18374 = vmatprep.subr.bf16.mxu1 %v18373_v3 }
 0x7fc   : > { %v9248_v17 = vpop.f32.mrb[38].mxu0  ;;  %v23131_v9 = vld [vmem:[#allocation5 + $0x18] sm:$0xff]  ;;  %vm23225_vm6 = vcmp.ne.s32.totalorder %v1203_v26, 0  ;;  %vm23246_vm12 = vcmp.ne.s32.totalorder %v1217_v13, 0  ;;  %vm23313_vm8 = vcmp.ne.s32.totalorder %v1203_v26, 7 }
 0x7fd   : > { %9277 = vst.msk [vmem:[#allocation5 + $0x28] sm:$0xff] %vm5213_vm9, %v9248_v17  ;;  %v9250_v44 = vpop.f32.mrb[39].mxu0  ;;  %17312 = vmatprep.mubr.msk.f32.mxu1 %vm5213_vm9, %v23131_v9  ;;  %v23188_v56 = vld [vmem:[#allocation5 + $0x17] sm:$0xff] }
 0x7fe   : > { %18376 = vmatpush3.bf16.msra.mxu1 %v18373_v3  ;;  %v9310_v40 = vsel %vm23184_vm11, %v23188_v56, 0.0  ;;  %v23271_v18 = vld [vmem:[#allocation5 + $0x11] sm:$0xff]  ;;  %v9774_v39 = vsel %vm23174_vm7, %v23188_v56, 0.0 }
 0x7ff   : > { %18378 = vmatprep.subr.bf16.mxu1 %v23129_v59  ;;  %v9616_v46 = vsel %vm23267_vm4, %v23271_v18, 0.0 }
 0x800   : > { %v9253_v7 = vpop.f32.mrb[40].mxu0  ;;  %v23137_v61 = vld [vmem:[#allocation5 + $0x20] sm:$0xff] }
 0x801   : > { %9278 = vst.msk [vmem:[#allocation5 + $0x30] sm:$0xff] %vm5213_vm9, %v9253_v7  ;;  %v9255_v42 = vpop.f32.mrb[41].mxu0  ;;  %17313 = vmatmul.mubr.msk.f32.gmra.mrb[66].mxu1 %vm5213_vm9, %v23137_v61  ;;  %v23204_v62 = vld [vmem:[#allocation5 + $0x1f] sm:$0xff] }
 0x802   : > { %v9311_v37 = vsel %vm23200_vm10, %v23204_v62, 0.0  ;;  %v25254_v42 = vmov 0  ;;  %v23280_v48 = vld [vmem:[#allocation5 + $0x19] sm:$0xff] }
 0x803   : > { %v25255_v42 = vsel %vm23246_vm12, 4294967295, %v25254_v42  ;;  %v9617_v34 = vsel %vm23276_vm5, %v23280_v48, 0.0 }
 0x804   : > { %v9258_v10 = vpop.f32.mrb[42].mxu0  ;;  %v23142_v41 = vld [vmem:[#allocation5 + $0x28] sm:$0xff] }
 0x805   : > { %9279 = vst.msk [vmem:[#allocation5 + $0x38] sm:$0xff] %vm5213_vm9, %v9258_v10  ;;  %v9260_v25 = vpop.f32.mrb[43].mxu0  ;;  %17315 = vmatprep.mubr.msk.f32.mxu1 %vm5213_vm9, %v23142_v41  ;;  %v23214_v47 = vld [vmem:[#allocation5 + $0x27] sm:$0xff] }
 0x806   : > { %v9312_v3 = vsel %vm23210_vm14, %v23214_v47, 0.0  ;;  %v23295_v57 = vld [vmem:[#allocation5 + $0x21] sm:$0xff] }
 0x807   : > { %v9618_v19 = vsel %vm23291_vm13, %v23295_v57, 0.0 }
 0x808   : > { %v9263_v6 = vpop.f32.mrb[44].mxu0  ;;  %v23147_v4 = vld [vmem:[#allocation5 + $0x30] sm:$0xff] }
 0x809   : > { %9280 = vst.msk [vmem:[#allocation5 + $0x40] sm:$0xff] %vm5213_vm9, %v9263_v6  ;;  %v9265_v55 = vpop.f32.mrb[45].mxu0  ;;  %17316 = vmatmul.mubr.msk.f32.gmra.mrb[68].mxu1 %vm5213_vm9, %v23147_v4  ;;  %v23229_v33 = vld [vmem:[#allocation5 + $0x2f] sm:$0xff] }
 0x80a   : > { %v9313_v44 = vsel %vm23225_vm6, %v23229_v33, 0.0  ;;  %v9591_v6 = vld [vmem:[#allocation5 + $0x9] sm:$0xff] }
 0x80c   : > { %v9268_v45 = vpop.f32.mrb[46].mxu0  ;;  %v23153_v28 = vld [vmem:[#allocation5 + $0x38] sm:$0xff] }
 0x80d   : > { %9281 = vst.msk [vmem:[#allocation5 + $0x48] sm:$0xff] %vm5213_vm9, %v9268_v45  ;;  %17318 = vmatprep.mubr.msk.f32.mxu1 %vm5213_vm9, %v23153_v28  ;;  %v9270_v35 = vpop.f32.mrb[47].mxu0  ;;  %v23237_v17 = vld [vmem:[#allocation5 + $0x37] sm:$0xff]  ;;  %v9784_v45 = vld [vmem:[#allocation18 + $0x70] sm:$0xff] }
 0x80e   : > { %v9314_v7 = vsel %vm23233_vm15, %v23237_v17, 0.0  ;;  %v9615_v35 = vsel %vm23255_vm0, %v9591_v6, 0.0  ;;  %v18389_v63 = vpack.c.bf16 %v9785_v14, %v9784_v45  ;;  %v23317_v0 = vld [vmem:[#allocation5 + $0x31] sm:$0xff]  ;;  %v9776_v6 = vsel %vm23200_vm10, %v23214_v47, 0.0 }
 0x80f   : > { %v9620_v29 = vsel %vm23313_vm8, %v23317_v0, 0.0  ;;  %v9778_v45 = vsel %vm23225_vm6, %v23237_v17, 0.0 }
 0x810   : > { %v23168_v20 = vld [vmem:[#allocation5 + $0x40] sm:$0xff] }
 0x811   : > { %17319 = vmatmul.mubr.msk.f32.gmra.mrb[70].mxu1 %vm5213_vm9, %v23168_v20  ;;  %v23250_v10 = vld [vmem:[#allocation5 + $0x3f] sm:$0xff] }
 0x812   : > { %17329 = vmatprep.mubr.msk.f32.mxu1 %vm5213_vm9, %v9308_v58  ;;  %v9315_v55 = vsel %vm23246_vm12, %v23250_v10, 0.0  ;;  %v25258_v58 = vmov 0  ;;  %v23324_v49 = vld [vmem:[#allocation5 + $0x39] sm:$0xff]  ;;  %v9779_v14 = vsel %vm23233_vm15, %v23250_v10, 0.0 }
 0x813   : > { %v25259_v58 = vsel %vm23267_vm4, 4294967295, %v25258_v58 }
 0x814   : > { %v23337_v26 = vld [vmem:[#allocation5 + $0x41] sm:$0xff] }
 0x815   : > { %17330 = vmatmul.mubr.msk.f32.vlgmr.msra.gmra.mrb[64].mxu1 %vm5213_vm9, %v9309_v5 }
 0x816   : > { %17332 = vmatprep.mubr.msk.f32.mxu1 %vm5213_vm9, %v9310_v40  ;;  %18380 = vmatpush3.bf16.msra.mxu1 %v23129_v59  ;;  %v9621_v40 = vsel %vm23320_vm1, %v23324_v49, 0.0 }
 0x817   : > { %18382 = vmatprep.subr.bf16.mxu1 %v18381_v22 }
 0x819   : > { %17333 = vmatmul.mubr.msk.f32.gmra.mrb[66].mxu1 %vm5213_vm9, %v9311_v37  ;;  %v9773_v37 = vsel %vm23161_vm3, %v23178_v38, 0.0 }
 0x81a   : > { %17335 = vmatprep.mubr.msk.f32.mxu1 %vm5213_vm9, %v9312_v3  ;;  %18384 = vmatpush3.bf16.msra.mxu1 %v18381_v22  ;;  %v23304_v22 = vld [vmem:[#allocation5 + $0x29] sm:$0xff] }
 0x81b   : > { %18386 = vmatprep.subr.bf16.mxu1 %v18385_v1  ;;  %v9619_v50 = vsel %vm23300_vm2, %v23304_v22, 0.0  ;;  %vm23333_vm2 = vcmp.ne.s32.totalorder %v1217_v13, 7  ;;  %v10090_v13 = vld [vmem:[#allocation18 + $0xa0] sm:$0xff] }
 0x81c   : > { %v9622_v54 = vsel %vm23333_vm2, %v23337_v26, 0.0 }
 0x81d   : > { %17336 = vmatmul.mubr.msk.f32.gmra.mrb[68].mxu1 %vm5213_vm9, %v9313_v44  ;;  %v10091_v44 = vld [vmem:[#allocation18 + $0xa8] sm:$0xff] }
 0x81e   : > { %17338 = vmatprep.mubr.msk.f32.mxu1 %vm5213_vm9, %v9314_v7  ;;  %v9775_v7 = vsel %vm23184_vm11, %v23204_v62, 0.0  ;;  %v18401_v38 = vpack.c.bf16 %v10091_v44, %v10090_v13  ;;  %v10086_v44 = vsel %vm23313_vm8, %v23324_v49, 0.0 }
 0x821   : > { %17339 = vmatmul.mubr.msk.f32.gmra.mrb[70].mxu1 %vm5213_vm9, %v9315_v55  ;;  %v9777_v55 = vsel %vm23210_vm14, %v23229_v33, 0.0 }
 0x822   : > { %17349 = vmatprep.mubr.msk.f32.mxu1 %vm5213_vm9, %v9615_v35  ;;  %v23371_v35 = vld [vmem:[#allocation5 + $0x47] sm:$0xff] }
 0x825   : > { %17350 = vmatmul.mubr.msk.f32.vlgmr.msra.gmra.mrb[64].mxu1 %vm5213_vm9, %v9616_v46  ;;  %v10092_v46 = vld [vmem:[#allocation18 + $0xb0] sm:$0xff] }
 0x826   : > { %17352 = vmatprep.mubr.msk.f32.mxu1 %vm5213_vm9, %v9617_v34  ;;  %18388 = vmatpush3.bf16.msra.mxu1 %v18385_v1  ;;  %v9935_v1 = vld [vmem:[#allocation18 + $0x98] sm:$0xff]  ;;  %v18405_v51 = vpack.c.bf16 %v10093_v15, %v10092_v46  ;;  %v10248_v34 = vld [vmem:[#allocation18 + $0xc0] sm:$0xff]  ;;  %v10240_v46 = vsel %vm23174_vm7, %v23204_v62, 0.0  ;;  %v10243_v62 = vsel %vm23210_vm14, %v23237_v17, 0.0 }
 0x827   : > { %18390 = vmatprep.subr.bf16.mxu1 %v18389_v63  ;;  %v18397_v3 = vpack.c.bf16 %v9935_v1, %v9934_v60  ;;  %v10082_v60 = vsel %vm23267_vm4, %v23280_v48, 0.0  ;;  %v10398_v1 = vld [vmem:[#allocation18 + $0xe0] sm:$0xff]  ;;  %vm25272_vm4 = vnez %v25265_v8 }
 0x828   : > { %v10085_v13 = vsel %vm25272_vm4, %v23317_v0, 0.0  ;;  %v10556_v15 = vld [vmem:[#allocation18 + $0x100] sm:$0xff] }
 0x829   : > { %17353 = vmatmul.mubr.msk.f32.gmra.mrb[66].mxu1 %vm5213_vm9, %v9618_v19 }
 0x82a   : > { %17355 = vmatprep.mubr.msk.f32.mxu1 %vm5213_vm9, %v9619_v50  ;;  %18392 = vmatpush3.bf16.msra.mxu1 %v18389_v63  ;;  %v9780_v63 = vsel %vm23246_vm12, %v23371_v35, 0.0  ;;  %v10250_v50 = vld [vmem:[#allocation18 + $0xd0] sm:$0xff] }
 0x82b   : > { %18394 = vmatprep.subr.bf16.mxu1 %v18393_v31 }
 0x82d   : > { %17356 = vmatmul.mubr.msk.f32.gmra.mrb[68].mxu1 %vm5213_vm9, %v9620_v29  ;;  %v10251_v29 = vld [vmem:[#allocation18 + $0xd8] sm:$0xff] }
 0x82e   : > { %17358 = vmatprep.mubr.msk.f32.mxu1 %vm5213_vm9, %v9621_v40  ;;  %v10081_v40 = vsel %vm23255_vm0, %v23271_v18, 0.0 }
 0x831   : > { %17359 = vmatmul.mubr.msk.f32.gmra.mrb[70].mxu1 %vm5213_vm9, %v9622_v54  ;;  %v18413_v54 = vpack.c.bf16 %v10251_v29, %v10250_v50  ;;  %v10558_v50 = vld [vmem:[#allocation18 + $0x110] sm:$0xff]  ;;  %v10559_v29 = vld [vmem:[#allocation18 + $0x118] sm:$0xff] }
 0x832   : > { %17369 = vmatprep.mubr.msk.f32.mxu1 %vm5213_vm9, %v9773_v37  ;;  %v10399_v37 = vld [vmem:[#allocation18 + $0xe8] sm:$0xff] }
 0x833   : > { %v18417_v18 = vpack.c.bf16 %v10399_v37, %v10398_v1  ;;  %v10750_v1 = vld [vmem:[#allocation21] sm:$0xff]  ;;  %v10751_v37 = vld [vmem:[#allocation21 + $0x8] sm:$0xff] }
 0x835   : > { %17370 = vmatmul.mubr.msk.f32.vlgmr.msra.gmra.mrb[64].mxu1 %vm5213_vm9, %v9774_v39  ;;  %v10084_v39 = vsel %vm23291_vm13, %v23304_v22, 0.0 }
 0x836   : > { %17372 = vmatprep.mubr.msk.f32.mxu1 %vm5213_vm9, %v9775_v7  ;;  %18396 = vmatpush3.bf16.msra.mxu1 %v18393_v31  ;;  %v10249_v31 = vld [vmem:[#allocation18 + $0xc8] sm:$0xff]  ;;  %v10087_v7 = vsel %vm23320_vm1, %v23337_v26, 0.0 }
 0x837   : > { %18398 = vmatprep.subr.bf16.mxu1 %v18397_v3  ;;  %v18409_v19 = vpack.c.bf16 %v10249_v31, %v10248_v34  ;;  %v10241_v34 = vsel %vm23184_vm11, %v23214_v47, 0.0  ;;  %v10242_v31 = vsel %vm23200_vm10, %v23229_v33, 0.0  ;;  %v10244_v47 = vsel %vm23225_vm6, %v23250_v10, 0.0 }
 0x838   : > { %v10245_v33 = vsel %vm23233_vm15, %v23371_v35, 0.0  ;;  %v18429_v10 = vpack.c.bf16 %v10559_v29, %v10558_v50  ;;  %v10772_v35 = vld [vmem:[#allocation21 + $0x68] sm:$0xff] }
 0x839   : > { %17373 = vmatmul.mubr.msk.f32.gmra.mrb[66].mxu1 %vm5213_vm9, %v9776_v6 }
 0x83a   : > { %17375 = vmatprep.mubr.msk.f32.mxu1 %vm5213_vm9, %v9777_v55  ;;  %18400 = vmatpush3.bf16.msra.mxu1 %v18397_v3  ;;  %v10083_v3 = vsel %vm23276_vm5, %v23295_v57, 0.0  ;;  %v10400_v55 = vld [vmem:[#allocation18 + $0xf0] sm:$0xff] }
 0x83b   : > { %18402 = vmatprep.subr.bf16.mxu1 %v18401_v38 }
 0x83d   : > { %17376 = vmatmul.mubr.msk.f32.gmra.mrb[68].mxu1 %vm5213_vm9, %v9778_v45  ;;  %v10401_v45 = vld [vmem:[#allocation18 + $0xf8] sm:$0xff] }
 0x83e   : > { %17378 = vmatprep.mubr.msk.f32.mxu1 %vm5213_vm9, %v9779_v14  ;;  %v10239_v14 = vsel %vm23161_vm3, %v23188_v56, 0.0 }
 0x841   : > { %17379 = vmatmul.mubr.msk.f32.gmra.mrb[70].mxu1 %vm5213_vm9, %v9780_v63  ;;  %v18421_v63 = vpack.c.bf16 %v10401_v45, %v10400_v55 }
 0x842   : > { %17389 = vmatprep.mubr.msk.f32.mxu1 %vm5213_vm9, %v23124_v11  ;;  %v23392_v11 = vld [vmem:[#allocation5 + $0x48] sm:$0xff] }
 0x845   : > { %17390 = vmatmul.mubr.msk.f32.vlgmr.msra.gmra.mrb[64].mxu1 %vm5213_vm9, %v23131_v9 }
 0x846   : > { %17392 = vmatprep.mubr.msk.f32.mxu1 %vm5213_vm9, %v23137_v61  ;;  %18404 = vmatpush3.bf16.msra.mxu1 %v18401_v38  ;;  %v10080_v38 = vld [vmem:[#allocation5 + $0x49] sm:$0xff] }
 0x847   : > { %18406 = vmatprep.subr.bf16.mxu1 %v18405_v51  ;;  %v10088_v6 = vsel %vm23333_vm2, %v10080_v38, 0.0 }
 0x849   : > { %17393 = vmatmul.mubr.msk.f32.gmra.mrb[66].mxu1 %vm5213_vm9, %v23142_v41 }
 0x84a   : > { %17395 = vmatprep.mubr.msk.f32.mxu1 %vm5213_vm9, %v23147_v4  ;;  %18408 = vmatpush3.bf16.msra.mxu1 %v18405_v51  ;;  %v10557_v51 = vld [vmem:[#allocation18 + $0x108] sm:$0xff] }
 0x84b   : > { %18410 = vmatprep.subr.bf16.mxu1 %v18409_v19  ;;  %v18425_v56 = vpack.c.bf16 %v10557_v51, %v10556_v15 }
 0x84d   : > { %17396 = vmatmul.mubr.msk.f32.gmra.mrb[68].mxu1 %vm5213_vm9, %v23153_v28 }
 0x84e   : > { %17398 = vmatprep.mubr.msk.f32.mxu1 %vm5213_vm9, %v23168_v20 }
 0x851   : > { %17399 = vmatmul.mubr.msk.f32.gmra.mrb[70].mxu1 %vm5213_vm9, %v23392_v11 }
 0x852   : > { %17409 = vmatprep.mubr.msk.f32.mxu1 %vm5213_vm9, %v10081_v40  ;;  %v10773_v40 = vld [vmem:[#allocation21 + $0x70] sm:$0xff] }
 0x855   : > { %17410 = vmatmul.mubr.msk.f32.vlgmr.msra.gmra.mrb[64].mxu1 %vm5213_vm9, %v10082_v60 }
 0x856   : > { %17412 = vmatprep.mubr.msk.f32.mxu1 %vm5213_vm9, %v10083_v3  ;;  %18412 = vmatpush3.bf16.msra.mxu1 %v18409_v19  ;;  %v10238_v19 = vld [vmem:[#allocation5 + $0x4f] sm:$0xff] }
 0x857   : > { %18414 = vmatprep.subr.bf16.mxu1 %v18413_v54  ;;  %v10246_v17 = vsel %vm23246_vm12, %v10238_v19, 0.0  ;;  %vm25273_vm12 = vnez %v25259_v58 }
 0x859   : > { %17413 = vmatmul.mubr.msk.f32.gmra.mrb[66].mxu1 %vm5213_vm9, %v10084_v39  ;;  %v15032_v39 = vld [vmem:[#allocation19] ss:$0 sm:$0xff] }
 0x85a   : > { %17415 = vmatprep.mubr.msk.f32.mxu1 %vm5213_vm9, %v10085_v13  ;;  %18416 = vmatpush3.bf16.msra.mxu1 %v18413_v54  ;;  %v10774_v54 = vld [vmem:[#allocation21 + $0x78] sm:$0xff] }
 0x85b   : > { %18418 = vmatprep.subr.bf16.mxu1 %v18417_v18  ;;  %v18445_v60 = vpack.c.bf16 %v10774_v54, %v10773_v40 }
 0x85d   : > { %17416 = vmatmul.mubr.msk.f32.gmra.mrb[68].mxu1 %vm5213_vm9, %v10086_v44 }
 0x85e   : > { %17418 = vmatprep.mubr.msk.f32.mxu1 %vm5213_vm9, %v10087_v7 }
 0x861   : > { %17419 = vmatmul.mubr.msk.f32.gmra.mrb[70].mxu1 %vm5213_vm9, %v10088_v6 }
 0x862   : > { %17429 = vmatprep.mubr.msk.f32.mxu1 %vm5213_vm9, %v10239_v14 }
 0x865   : > { %17430 = vmatmul.mubr.msk.f32.vlgmr.msra.gmra.mrb[64].mxu1 %vm5213_vm9, %v10240_v46 }
 0x866   : > { %17432 = vmatprep.mubr.msk.f32.mxu1 %vm5213_vm9, %v10241_v34  ;;  %18420 = vmatpush3.bf16.msra.mxu1 %v18417_v18  ;;  %v18449_v18 = vpack.c.bf16 %v10751_v37, %v10750_v1  ;;  %v11050_v1 = vld [vmem:[#allocation21 + $0x80] sm:$0xff]  ;;  %v11051_v37 = vld [vmem:[#allocation21 + $0x88] sm:$0xff] }
 0x867   : > { %18422 = vmatprep.subr.bf16.mxu1 %v18421_v63 }
 0x869   : > { %17433 = vmatmul.mubr.msk.f32.gmra.mrb[66].mxu1 %vm5213_vm9, %v10242_v31 }
 0x86a   : > { %17435 = vmatprep.mubr.msk.f32.mxu1 %vm5213_vm9, %v10243_v62  ;;  %18424 = vmatpush3.bf16.msra.mxu1 %v18421_v63  ;;  %v10752_v62 = vld [vmem:[#allocation21 + $0x10] sm:$0xff] }
 0x86b   : > { %18426 = vmatprep.subr.bf16.mxu1 %v18425_v56 }
 0x86d   : > { %17436 = vmatmul.mubr.msk.f32.gmra.mrb[68].mxu1 %vm5213_vm9, %v10244_v47  ;;  %v10753_v47 = vld [vmem:[#allocation21 + $0x18] sm:$0xff] }
 0x86e   : > { %17438 = vmatprep.mubr.msk.f32.mxu1 %vm5213_vm9, %v10245_v33  ;;  %v18453_v29 = vpack.c.bf16 %v10753_v47, %v10752_v62  ;;  %v11057_v62 = vld [vmem:[#allocation21 + $0xb8] sm:$0xff] }
 0x871   : > { %17439 = vmatmul.mubr.msk.f32.gmra.mrb[70].mxu1 %vm5213_vm9, %v10246_v17 }
 0x872   : > { %17449 = vmatprep.mubr.msk.f32.mxu1 %vm5213_vm9, %v23131_v9  ;;  %v10396_v9 = vld [vmem:[#allocation5 + $0x50] sm:$0xff] }
 0x875   : > { %17450 = vmatmul.mubr.msk.f32.vlgmr.msra.gmra.mrb[64].mxu1 %vm5213_vm9, %v23137_v61  ;;  %v10547_v61 = vsel %vm23255_vm0, %v23280_v48, 0.0  ;;  %v10546_v48 = vld [vmem:[#allocation5 + $0x51] sm:$0xff] }
 0x876   : > { %17452 = vmatprep.mubr.msk.f32.mxu1 %vm5213_vm9, %v23142_v41  ;;  %18428 = vmatpush3.bf16.msra.mxu1 %v18425_v56  ;;  %v10548_v41 = vsel %vm25273_vm12, %v23295_v57, 0.0  ;;  %v10552_v57 = vsel %vm23313_vm8, %v23337_v26, 0.0  ;;  %v10771_v26 = vld [vmem:[#allocation21 + $0x60] sm:$0xff] }
 0x877   : > { %18430 = vmatprep.subr.bf16.mxu1 %v18429_v10 }
 0x879   : > { %17453 = vmatmul.mubr.msk.f32.gmra.mrb[66].mxu1 %vm5213_vm9, %v23147_v4  ;;  %v10549_v4 = vsel %vm23276_vm5, %v23304_v22, 0.0  ;;  %v10553_v22 = vsel %vm23320_vm1, %v10080_v38, 0.0 }
 0x87a   : > { %17455 = vmatprep.mubr.msk.f32.mxu1 %vm5213_vm9, %v23153_v28  ;;  %18432 = vmatpush3.bf16.msra.mxu1 %v18429_v10  ;;  %v10550_v28 = vsel %vm23291_vm13, %v23317_v0, 0.0  ;;  %v10554_v0 = vsel %vm23333_vm2, %v10546_v48, 0.0 }
 0x87d   : > { %17456 = vmatmul.mubr.msk.f32.gmra.mrb[68].mxu1 %vm5213_vm9, %v23168_v20  ;;  %v10551_v20 = vsel %vm25272_vm4, %v23324_v49, 0.0  ;;  %vm10720_vm4 = vcmask 523264   ;;  %v23503_v49 = vld [vmem:[#allocation9] sm:$0xff] }
 0x87e   : > { %17458 = vmatprep.mubr.msk.f32.mxu1 %vm5213_vm9, %v23392_v11  ;;  %10721 = vst.msk [vmem:[#allocation6] sm:$0xff] %vm10720_vm4, %v23503_v49  ;;  %10722 = vst.msk [vmem:[#allocation6 + $0x8] sm:$0xff] %vm10720_vm4, %v23503_v49  ;;  %v18441_v11 = vpack.c.bf16 %v10772_v35, %v10771_v26  ;;  %v10756_v26 = vld [vmem:[#allocation21 + $0x30] sm:$0xff]  ;;  %v10757_v35 = vld [vmem:[#allocation21 + $0x38] sm:$0xff] }
 0x87f   : > { %10731 = vst.msk [vmem:[#allocation6 + $0x50] sm:$0xff] %vm10720_vm4, %v23503_v49  ;;  %12303 = vst.msk [vmem:[#allocation8] sm:$0xff] %vm10720_vm4, %v23503_v49  ;;  %v18461_v40 = vpack.c.bf16 %v10757_v35, %v10756_v26 }
 0x880   : > { %18442 = vmatprep.subr.bf16.mxu0 %v18441_v11 }
 0x881   : > { %17459 = vmatmul.mubr.msk.f32.gmra.mrb[70].mxu1 %vm5213_vm9, %v10396_v9  ;;  %18444 = vmatpush3.bf16.msra.mxu0 %v18441_v11 }
 0x882   : > { %17469 = vmatprep.mubr.msk.f32.mxu1 %vm5213_vm9, %v10547_v61  ;;  %18446 = vmatprep.subr.bf16.mxu0 %v18445_v60 }
 0x885   : > { %17470 = vmatmul.mubr.msk.f32.vlgmr.msra.gmra.mrb[64].mxu1 %vm5213_vm9, %v10548_v41  ;;  %18448 = vmatpush3.bf16.msra.mxu0 %v18445_v60  ;;  %v10758_v3 = vld [vmem:[#allocation6 + $0x8] sm:$0xff]  ;;  %v10754_v41 = vld [vmem:[#allocation21 + $0x20] sm:$0xff] }
 0x886   : > { %17472 = vmatprep.mubr.msk.f32.mxu1 %vm5213_vm9, %v10549_v4  ;;  %17497 = vmatprep.mubr.msk.f32.mxu0 %vm10720_vm4, %v10758_v3  ;;  %v10755_v4 = vld [vmem:[#allocation21 + $0x28] sm:$0xff] }
 0x887   : > { %18450 = vmatprep.subr.bf16.mxu0 %v18449_v18  ;;  %v10734_v54 = vld [vmem:[#allocation6 + $0x7] sm:$0xff] }
 0x889   : > { %17473 = vmatmul.mubr.msk.f32.gmra.mrb[66].mxu1 %vm5213_vm9, %v10550_v28 }
 0x88a   : > { %17475 = vmatprep.mubr.msk.f32.mxu1 %vm5213_vm9, %v10551_v20 }
 0x88d   : > { %17476 = vmatmul.mubr.msk.f32.gmra.mrb[68].mxu1 %vm5213_vm9, %v10552_v57 }
 0x88e   : > { %17478 = vmatprep.mubr.msk.f32.mxu1 %vm5213_vm9, %v10553_v22  ;;  %v18457_v22 = vpack.c.bf16 %v10755_v4, %v10754_v41 }
 0x891   : > { %17479 = vmatmul.mubr.msk.f32.gmra.mrb[70].mxu1 %vm5213_vm9, %v10554_v0  ;;  %vm10732_vm9 = vcmask 516096  }
 0x892   : > { %10733 = vst.msk [vmem:[#allocation6 + $0x58] sm:$0x1] %vm10732_vm9, %v23503_v49  ;;  %vm25274_vm9 = vnez %v25255_v42 }
 0x899   : > { %v11996_v58 = vld [vmem:[#allocation6 + $0x51] sm:$0xff] }
 0x958   : > { %v17471_v13 = vpop.f32.mrb[64].mxu1 }
 0x959   : > { %v10705_v44 = vadd.f32 %v17471_v13, %v15032_v39  ;;  %v10650_v7 = vpop.f32.mrb[65].mxu1 }
 0x95a   : > { %v10704_v38 = vadd.f32 %v15032_v39, %v10650_v7  ;;  %v11053_v7 = vld [vmem:[#allocation21 + $0x98] sm:$0xff] }
 0x95b   : > { %v10713_v6 = vmax.f32 %v10705_v44, 0.0  ;;  %v11052_v44 = vld [vmem:[#allocation21 + $0x90] sm:$0xff] }
 0x95c   : > { %v10712_v55 = vmax.f32 %v10704_v38, 0.0  ;;  %v17474_v45 = vpop.f32.mrb[66].mxu1 }
 0x95d   : > { %10724 = vst.msk [vmem:[#allocation6 + $0x18] sm:$0xff] %vm10720_vm4, %v10713_v6  ;;  %v10707_v14 = vadd.f32 %v17474_v45, %v15032_v39  ;;  %v10660_v63 = vpop.f32.mrb[67].mxu1 }
 0x95e   : > { %10723 = vst.msk [vmem:[#allocation6 + $0x10] sm:$0xff] %vm10720_vm4, %v10712_v55  ;;  %v10706_v46 = vadd.f32 %v15032_v39, %v10660_v63  ;;  %v18469_v55 = vpack.c.bf16 %v11053_v7, %v11052_v44  ;;  %v11055_v63 = vld [vmem:[#allocation21 + $0xa8] sm:$0xff] }
 0x95f   : > { %v10715_v15 = vmax.f32 %v10707_v14, 0.0  ;;  %v11054_v14 = vld [vmem:[#allocation21 + $0xa0] sm:$0xff] }
 0x960   : > { %v10714_v51 = vmax.f32 %v10706_v46, 0.0  ;;  %v17477_v34 = vpop.f32.mrb[68].mxu1 }
 0x961   : > { %10726 = vst.msk [vmem:[#allocation6 + $0x28] sm:$0xff] %vm10720_vm4, %v10715_v15  ;;  %v10709_v56 = vadd.f32 %v17477_v34, %v15032_v39  ;;  %v10670_v31 = vpop.f32.mrb[69].mxu1  ;;  %v18473_v34 = vpack.c.bf16 %v11055_v63, %v11054_v14  ;;  %v11218_v14 = vld [vmem:[#allocation21 + $0xf0] sm:$0xff]  ;;  %v11219_v63 = vld [vmem:[#allocation21 + $0xf8] sm:$0xff] }
 0x962   : > { %10725 = vst.msk [vmem:[#allocation6 + $0x20] sm:$0xff] %vm10720_vm4, %v10714_v51  ;;  %v10708_v33 = vadd.f32 %v15032_v39, %v10670_v31  ;;  %v11056_v31 = vld [vmem:[#allocation21 + $0xb0] sm:$0xff] }
 0x963   : > { %v10717_v19 = vmax.f32 %v10709_v56, 0.0 }
 0x964   : > { %v10716_v17 = vmax.f32 %v10708_v33, 0.0  ;;  %v17480_v50 = vpop.f32.mrb[70].mxu1  ;;  %v23524_v20 = vld [vmem:[#allocation6 + $0x18] sm:$0xff] }
 0x965   : > { %10728 = vst.msk [vmem:[#allocation6 + $0x38] sm:$0xff] %vm10720_vm4, %v10717_v19  ;;  %v10711_v10 = vadd.f32 %v17480_v50, %v15032_v39  ;;  %v10680_v9 = vpop.f32.mrb[71].mxu1  ;;  %v23519_v61 = vld [vmem:[#allocation6 + $0x10] sm:$0xff] }
 0x966   : > { %10727 = vst.msk [vmem:[#allocation6 + $0x30] sm:$0xff] %vm10720_vm4, %v10716_v17  ;;  %v10710_v28 = vadd.f32 %v15032_v39, %v10680_v9  ;;  %17498 = vmatmul.mubr.msk.f32.vlgmr.msra.gmra.mrb[48].mxu0 %vm10720_vm4, %v23519_v61  ;;  %v18465_v39 = vpack.c.bf16 %v11051_v37, %v11050_v1  ;;  %v23553_v38 = vld [vmem:[#allocation6 + $0xf] sm:$0xff]  ;;  %v23556_v6 = vld [vmem:[#allocation6 + $0x17] sm:$0xff]  ;;  %v18477_v17 = vpack.c.bf16 %v11057_v62, %v11056_v31 }
 0x967   : > { %v10719_v48 = vmax.f32 %v10711_v10, 0.0  ;;  %17500 = vmatprep.mubr.msk.f32.mxu0 %vm10720_vm4, %v23524_v20  ;;  %18452 = vmatpush3.bf16.msra.mxu0 %v18449_v18  ;;  %v10742_v18 = vsel %vm23161_vm3, %v10734_v54, 0.0  ;;  %v10743_v45 = vsel %vm23174_vm7, %v23553_v38, 0.0  ;;  %v10744_v46 = vsel %vm23184_vm11, %v23556_v6, 0.0  ;;  %v11213_v10 = vld [vmem:[#allocation21 + $0xc8] sm:$0xff]  ;;  %v23598_v35 = vld [vmem:[#allocation6 + $0x11] sm:$0xff] }
 0x968   : > { %v10718_v57 = vmax.f32 %v10710_v28, 0.0  ;;  %18454 = vmatprep.subr.bf16.mxu0 %v18453_v29  ;;  %v23534_v11 = vld [vmem:[#allocation6 + $0x28] sm:$0xff]  ;;  %v11042_v1 = vsel %vm25273_vm12, %v23598_v35, 0.0  ;;  %v11216_v37 = vld [vmem:[#allocation21 + $0xe0] sm:$0xff]  ;;  %v18493_v31 = vpack.c.bf16 %v11219_v63, %v11218_v14 }
 0x969   : > { %10730 = vst.msk [vmem:[#allocation6 + $0x48] sm:$0xff] %vm10720_vm4, %v10719_v48  ;;  %v23529_v0 = vld [vmem:[#allocation6 + $0x20] sm:$0xff]  ;;  %v11033_v4 = vld [vmem:[#allocation6 + $0x9] sm:$0xff] }
 0x96a   : > { %10729 = vst.msk [vmem:[#allocation6 + $0x40] sm:$0xff] %vm10720_vm4, %v10718_v57  ;;  %17501 = vmatmul.mubr.msk.f32.gmra.mrb[50].mxu0 %vm10720_vm4, %v23529_v0  ;;  %v23565_v15 = vld [vmem:[#allocation6 + $0x1f] sm:$0xff]  ;;  %v23568_v51 = vld [vmem:[#allocation6 + $0x27] sm:$0xff]  ;;  %v11041_v26 = vsel %vm23255_vm0, %v11033_v4, 0.0 }
 0x96b   : > { %17503 = vmatprep.mubr.msk.f32.mxu0 %vm10720_vm4, %v23534_v11  ;;  %18456 = vmatpush3.bf16.msra.mxu0 %v18453_v29  ;;  %v10745_v56 = vsel %vm23200_vm10, %v23565_v15, 0.0  ;;  %v10746_v47 = vsel %vm23210_vm14, %v23568_v51, 0.0  ;;  %v11212_v29 = vld [vmem:[#allocation21 + $0xc0] sm:$0xff]  ;;  %v11214_v57 = vld [vmem:[#allocation21 + $0xd0] sm:$0xff] }
 0x96c   : > { %18458 = vmatprep.subr.bf16.mxu0 %v18457_v22  ;;  %v23542_v3 = vld [vmem:[#allocation6 + $0x38] sm:$0xff]  ;;  %v18481_v28 = vpack.c.bf16 %v11213_v10, %v11212_v29  ;;  %v23610_v44 = vld [vmem:[#allocation6 + $0x21] sm:$0xff]  ;;  %v11368_v4 = vld [vmem:[#allocation21 + $0x110] sm:$0xff] }
 0x96d   : > { %v23538_v60 = vld [vmem:[#allocation6 + $0x30] sm:$0xff]  ;;  %v11528_v63 = vld [vmem:[#allocation21 + $0x140] sm:$0xff] }
 0x96e   : > { %17504 = vmatmul.mubr.msk.f32.gmra.mrb[52].mxu0 %vm10720_vm4, %v23538_v60  ;;  %v23577_v33 = vld [vmem:[#allocation6 + $0x2f] sm:$0xff]  ;;  %v23580_v19 = vld [vmem:[#allocation6 + $0x37] sm:$0xff] }
 0x96f   : > { %17506 = vmatprep.mubr.msk.f32.mxu0 %vm10720_vm4, %v23542_v3  ;;  %18460 = vmatpush3.bf16.msra.mxu0 %v18457_v22  ;;  %v10747_v50 = vsel %vm23225_vm6, %v23577_v33, 0.0  ;;  %v10748_v9 = vsel %vm23233_vm15, %v23580_v19, 0.0  ;;  %v11215_v22 = vld [vmem:[#allocation21 + $0xd8] sm:$0xff]  ;;  %v23613_v7 = vld [vmem:[#allocation6 + $0x29] sm:$0xff]  ;;  %v11208_v14 = vsel %vm23225_vm6, %v23580_v19, 0.0 }
 0x970   : > { %18462 = vmatprep.subr.bf16.mxu0 %v18461_v40  ;;  %v18485_v54 = vpack.c.bf16 %v11215_v22, %v11214_v57  ;;  %v11204_v22 = vsel %vm23174_vm7, %v23556_v6, 0.0 }
 0x971   : > { %v23549_v13 = vld [vmem:[#allocation6 + $0x40] sm:$0xff] }
 0x972   : > { %17507 = vmatmul.mubr.msk.f32.gmra.mrb[54].mxu0 %vm10720_vm4, %v23549_v13  ;;  %v23589_v41 = vld [vmem:[#allocation6 + $0x3f] sm:$0xff] }
 0x973   : > { %18464 = vmatpush3.bf16.msra.mxu0 %v18461_v40  ;;  %17525 = vmatprep.mubr.msk.f32.mxu0 %vm10720_vm4, %v10742_v18  ;;  %v10749_v48 = vsel %vm25274_vm9, %v23589_v41, 0.0  ;;  %v23601_v40 = vld [vmem:[#allocation6 + $0x19] sm:$0xff]  ;;  %v11217_v18 = vld [vmem:[#allocation21 + $0xe8] sm:$0xff] }
 0x974   : > { %18466 = vmatprep.subr.bf16.mxu0 %v18465_v39  ;;  %v23634_v29 = vld [vmem:[#allocation6 + $0x41] sm:$0xff] }
 0x976   : > { %17526 = vmatmul.mubr.msk.f32.vlgmr.msra.gmra.mrb[48].mxu0 %vm10720_vm4, %v10743_v45  ;;  %v11044_v45 = vsel %vm23291_vm13, %v23610_v44, 0.0 }
 0x977   : > { %17528 = vmatprep.mubr.msk.f32.mxu0 %vm10720_vm4, %v10744_v46  ;;  %18468 = vmatpush3.bf16.msra.mxu0 %v18465_v39  ;;  %v11043_v39 = vsel %vm23276_vm5, %v23601_v40, 0.0  ;;  %vm25275_vm5 = vnez %v25265_v8  ;;  %v12216_v8 = vld [vmem:[#allocation28] sm:$0xff] }
 0x978   : > { %18470 = vmatprep.subr.bf16.mxu0 %v18469_v55  ;;  %v11045_v46 = vsel %vm25275_vm5, %v23613_v7, 0.0 }
 0x97a   : > { %17529 = vmatmul.mubr.msk.f32.gmra.mrb[50].mxu0 %vm10720_vm4, %v10745_v56  ;;  %v23625_v56 = vld [vmem:[#allocation6 + $0x39] sm:$0xff] }
 0x97b   : > { %17531 = vmatprep.mubr.msk.f32.mxu0 %vm10720_vm4, %v10746_v47  ;;  %18472 = vmatpush3.bf16.msra.mxu0 %v18469_v55  ;;  %v18489_v55 = vpack.c.bf16 %v11217_v18, %v11216_v37  ;;  %v11366_v47 = vld [vmem:[#allocation21 + $0x100] sm:$0xff]  ;;  %v11206_v37 = vsel %vm23200_vm10, %v23568_v51, 0.0  ;;  %v11372_v18 = vld [vmem:[#allocation21 + $0x130] sm:$0xff] }
 0x97c   : > { %18474 = vmatprep.subr.bf16.mxu0 %v18473_v34 }
 0x97e   : > { %17532 = vmatmul.mubr.msk.f32.gmra.mrb[52].mxu0 %vm10720_vm4, %v10747_v50  ;;  %v11047_v50 = vsel %vm23320_vm1, %v23625_v56, 0.0 }
 0x97f   : > { %17534 = vmatprep.mubr.msk.f32.mxu0 %vm10720_vm4, %v10748_v9  ;;  %18476 = vmatpush3.bf16.msra.mxu0 %v18473_v34  ;;  %v23622_v34 = vld [vmem:[#allocation6 + $0x31] sm:$0xff]  ;;  %v11048_v9 = vsel %vm23333_vm2, %v23634_v29, 0.0 }
 0x980   : > { %18478 = vmatprep.subr.bf16.mxu0 %v18477_v17  ;;  %v11046_v62 = vsel %vm23313_vm8, %v23622_v34, 0.0  ;;  %v12000_v25 = vsel %vm23291_vm13, %v23622_v34, 0.0 }
 0x982   : > { %17535 = vmatmul.mubr.msk.f32.gmra.mrb[54].mxu0 %vm10720_vm4, %v10749_v48  ;;  %v11203_v48 = vsel %vm23161_vm3, %v23553_v38, 0.0 }
 0x983   : > { %18480 = vmatpush3.bf16.msra.mxu0 %v18477_v17  ;;  %17553 = vmatprep.mubr.msk.f32.mxu0 %vm10720_vm4, %v11041_v26  ;;  %v11367_v17 = vld [vmem:[#allocation21 + $0x108] sm:$0xff]  ;;  %v11370_v26 = vld [vmem:[#allocation21 + $0x120] sm:$0xff] }
 0x984   : > { %18482 = vmatprep.subr.bf16.mxu0 %v18481_v28  ;;  %v18497_v10 = vpack.c.bf16 %v11367_v17, %v11366_v47 }
 0x986   : > { %17554 = vmatmul.mubr.msk.f32.vlgmr.msra.gmra.mrb[48].mxu0 %vm10720_vm4, %v11042_v1  ;;  %v11205_v1 = vsel %vm23184_vm11, %v23565_v15, 0.0 }
 0x987   : > { %17556 = vmatprep.mubr.msk.f32.mxu0 %vm10720_vm4, %v11043_v39  ;;  %18484 = vmatpush3.bf16.msra.mxu0 %v18481_v28  ;;  %v11369_v28 = vld [vmem:[#allocation21 + $0x118] sm:$0xff] }
 0x988   : > { %18486 = vmatprep.subr.bf16.mxu0 %v18485_v54  ;;  %v18501_v57 = vpack.c.bf16 %v11369_v28, %v11368_v4  ;;  %v11373_v39 = vld [vmem:[#allocation21 + $0x138] sm:$0xff]  ;;  %v11532_v4 = vld [vmem:[#allocation21 + $0x160] sm:$0xff]  ;;  %v11533_v28 = vld [vmem:[#allocation21 + $0x168] sm:$0xff] }
 0x98a   : > { %17557 = vmatmul.mubr.msk.f32.gmra.mrb[50].mxu0 %vm10720_vm4, %v11044_v45  ;;  %v18509_v45 = vpack.c.bf16 %v11373_v39, %v11372_v18  ;;  %v11693_v18 = vld [vmem:[#allocation21 + $0x198] sm:$0xff]  ;;  %v11519_v39 = vsel %vm23255_vm0, %v23598_v35, 0.0 }
 0x98b   : > { %17559 = vmatprep.mubr.msk.f32.mxu0 %vm10720_vm4, %v11045_v46  ;;  %18488 = vmatpush3.bf16.msra.mxu0 %v18485_v54  ;;  %v11371_v54 = vld [vmem:[#allocation21 + $0x128] sm:$0xff] }
 0x98c   : > { %18490 = vmatprep.subr.bf16.mxu0 %v18489_v55  ;;  %v18505_v38 = vpack.c.bf16 %v11371_v54, %v11370_v26  ;;  %v11529_v46 = vld [vmem:[#allocation21 + $0x148] sm:$0xff]  ;;  %v11690_v26 = vld [vmem:[#allocation21 + $0x180] sm:$0xff] }
 0x98d   : > { %v18513_v47 = vpack.c.bf16 %v11529_v46, %v11528_v63  ;;  %v11691_v54 = vld [vmem:[#allocation21 + $0x188] sm:$0xff] }
 0x98e   : > { %17560 = vmatmul.mubr.msk.f32.gmra.mrb[52].mxu0 %vm10720_vm4, %v11046_v62  ;;  %v23668_v62 = vld [vmem:[#allocation6 + $0x47] sm:$0xff] }
 0x98f   : > { %17562 = vmatprep.mubr.msk.f32.mxu0 %vm10720_vm4, %v11047_v50  ;;  %18492 = vmatpush3.bf16.msra.mxu0 %v18489_v55  ;;  %v11207_v55 = vsel %vm23210_vm14, %v23577_v33, 0.0  ;;  %v11210_v17 = vsel %vm25274_vm9, %v23668_v62, 0.0  ;;  %v11530_v50 = vld [vmem:[#allocation21 + $0x150] sm:$0xff]  ;;  %v11695_v63 = vld [vmem:[#allocation21 + $0x1a8] sm:$0xff]  ;;  %vm25276_vm9 = vnez %v25261_v21  ;;  %v12002_v21 = vsel %vm23313_vm8, %v23634_v29, 0.0 }
 0x990   : > { %18494 = vmatprep.subr.bf16.mxu0 %v18493_v31  ;;  %v11521_v46 = vsel %vm25276_vm9, %v23610_v44, 0.0 }
 0x992   : > { %17563 = vmatmul.mubr.msk.f32.gmra.mrb[54].mxu0 %vm10720_vm4, %v11048_v9 }
 0x993   : > { %18496 = vmatpush3.bf16.msra.mxu0 %v18493_v31  ;;  %17581 = vmatprep.mubr.msk.f32.mxu0 %vm10720_vm4, %v11203_v48  ;;  %v11209_v31 = vsel %vm23233_vm15, %v23589_v41, 0.0  ;;  %v18521_v48 = vpack.c.bf16 %v11533_v28, %v11532_v4  ;;  %v11844_v4 = vld [vmem:[#allocation21 + $0x1c0] sm:$0xff]  ;;  %v11845_v28 = vld [vmem:[#allocation21 + $0x1c8] sm:$0xff] }
 0x994   : > { %18498 = vmatprep.subr.bf16.mxu0 %v18497_v10 }
 0x996   : > { %17582 = vmatmul.mubr.msk.f32.vlgmr.msra.gmra.mrb[48].mxu0 %vm10720_vm4, %v11204_v22  ;;  %v11535_v22 = vld [vmem:[#allocation21 + $0x178] sm:$0xff] }
 0x997   : > { %17584 = vmatprep.mubr.msk.f32.mxu0 %vm10720_vm4, %v11205_v1  ;;  %18500 = vmatpush3.bf16.msra.mxu0 %v18497_v10  ;;  %v11531_v10 = vld [vmem:[#allocation21 + $0x158] sm:$0xff]  ;;  %v18529_v1 = vpack.c.bf16 %v11691_v54, %v11690_v26  ;;  %v11846_v26 = vld [vmem:[#allocation21 + $0x1d0] sm:$0xff] }
 0x998   : > { %18502 = vmatprep.subr.bf16.mxu0 %v18501_v57  ;;  %v18517_v9 = vpack.c.bf16 %v11531_v10, %v11530_v50  ;;  %v11523_v50 = vsel %vm25275_vm5, %v23622_v34, 0.0  ;;  %v11847_v54 = vld [vmem:[#allocation21 + $0x1d8] sm:$0xff] }
 0x99a   : > { %17585 = vmatmul.mubr.msk.f32.gmra.mrb[50].mxu0 %vm10720_vm4, %v11206_v37  ;;  %v11692_v37 = vld [vmem:[#allocation21 + $0x190] sm:$0xff] }
 0x99b   : > { %17587 = vmatprep.mubr.msk.f32.mxu0 %vm10720_vm4, %v11207_v55  ;;  %18504 = vmatpush3.bf16.msra.mxu0 %v18501_v57  ;;  %v11534_v57 = vld [vmem:[#allocation21 + $0x170] sm:$0xff]  ;;  %v18533_v55 = vpack.c.bf16 %v11693_v18, %v11692_v37  ;;  %v18549_v37 = vpack.c.bf16 %v11847_v54, %v11846_v26  ;;  %v11682_v18 = vsel %vm23174_vm7, %v23565_v15, 0.0  ;;  %v11685_v15 = vsel %vm23210_vm14, %v23580_v19, 0.0 }
 0x99c   : > { %18506 = vmatprep.subr.bf16.mxu0 %v18505_v38  ;;  %vm12218_vm7 = vcmask 449536  }
 0x99d   : > { %17747 = vmatprep.mubr.msk.f32.mxu1 %vm12218_vm7, %v12216_v8 }
 0x99e   : > { %17588 = vmatmul.mubr.msk.f32.gmra.mrb[52].mxu0 %vm10720_vm4, %v11208_v14  ;;  %v11694_v14 = vld [vmem:[#allocation21 + $0x1a0] sm:$0xff] }
 0x99f   : > { %17590 = vmatprep.mubr.msk.f32.mxu0 %vm10720_vm4, %v11209_v31  ;;  %18508 = vmatpush3.bf16.msra.mxu0 %v18505_v38  ;;  %v23689_v38 = vld [vmem:[#allocation6 + $0x48] sm:$0xff]  ;;  %v18537_v35 = vpack.c.bf16 %v11695_v63, %v11694_v14  ;;  %v11522_v31 = vsel %vm23291_vm13, %v23613_v7, 0.0  ;;  %v12006_v63 = vld [vmem:[#allocation21 + $0x200] sm:$0xff]  ;;  %vm14083_vm13 = vcmask 89088  }
 0x9a0   : > { %18510 = vmatprep.subr.bf16.mxu0 %v18509_v45  ;;  %v11850_v14 = vld [vmem:[#allocation21 + $0x1f0] sm:$0xff]  ;;  %v18561_v32 = vpack.c.bf16 %v12007_v23, %v12006_v63 }
 0x9a1   : > { %v18557_v53 = vpack.c.bf16 %v11851_v43, %v11850_v14 }
 0x9a2   : > { %17591 = vmatmul.mubr.msk.f32.gmra.mrb[54].mxu0 %vm10720_vm4, %v11210_v17  ;;  %v11697_v17 = vld [vmem:[#allocation21 + $0x1b8] sm:$0xff] }
 0x9a3   : > { %18512 = vmatpush3.bf16.msra.mxu0 %v18509_v45  ;;  %17609 = vmatprep.mubr.msk.f32.mxu0 %vm10720_vm4, %v23519_v61  ;;  %v18525_v61 = vpack.c.bf16 %v11535_v22, %v11534_v57  ;;  %v11520_v45 = vsel %vm25273_vm12, %v23601_v40, 0.0  ;;  %v23720_v57 = vld [vmem:[#allocation6 + $0x49] sm:$0xff]  ;;  %v18545_v22 = vpack.c.bf16 %v11845_v28, %v11844_v4 }
 0x9a4   : > { %18514 = vmatprep.subr.bf16.mxu0 %v18513_v47  ;;  %v12003_v2 = vsel %vm23320_vm1, %v23720_v57, 0.0 }
 0x9a6   : > { %17610 = vmatmul.mubr.msk.f32.vlgmr.msra.gmra.mrb[48].mxu0 %vm10720_vm4, %v23524_v20 }
 0x9a7   : > { %17612 = vmatprep.mubr.msk.f32.mxu0 %vm10720_vm4, %v23529_v0  ;;  %18516 = vmatpush3.bf16.msra.mxu0 %v18513_v47  ;;  %v11696_v47 = vld [vmem:[#allocation21 + $0x1b0] sm:$0xff] }
 0x9a8   : > { %18518 = vmatprep.subr.bf16.mxu0 %v18517_v9  ;;  %v18541_v10 = vpack.c.bf16 %v11697_v17, %v11696_v47  ;;  %v12013_v47 = vld [vmem:[#allocation21 + $0x238] sm:$0xff] }
 0x9aa   : > { %17613 = vmatmul.mubr.msk.f32.gmra.mrb[50].mxu0 %vm10720_vm4, %v23534_v11 }
 0x9ab   : > { %17615 = vmatprep.mubr.msk.f32.mxu0 %vm10720_vm4, %v23538_v60  ;;  %18520 = vmatpush3.bf16.msra.mxu0 %v18517_v9  ;;  %v11524_v9 = vsel %vm23313_vm8, %v23625_v56, 0.0 }
 0x9ac   : > { %18522 = vmatprep.subr.bf16.mxu0 %v18521_v48 }
 0x9ae   : > { %17616 = vmatmul.mubr.msk.f32.gmra.mrb[52].mxu0 %vm10720_vm4, %v23542_v3 }
 0x9af   : > { %17618 = vmatprep.mubr.msk.f32.mxu0 %vm10720_vm4, %v23549_v13  ;;  %18524 = vmatpush3.bf16.msra.mxu0 %v18521_v48  ;;  %v11525_v48 = vsel %vm23320_vm1, %v23634_v29, 0.0  ;;  %vm25278_vm1 = vcmask 1046528  }
 0x9b0   : > { %18526 = vmatprep.subr.bf16.mxu0 %v18525_v61  ;;  %vm25279_vm8 = vmmov %vm25278_vm1 }
 0x9b2   : > { %17619 = vmatmul.mubr.msk.f32.gmra.mrb[54].mxu0 %vm10720_vm4, %v23689_v38 }
 0x9b3   : > { %18528 = vmatpush3.bf16.msra.mxu0 %v18525_v61  ;;  %17637 = vmatprep.mubr.msk.f32.mxu0 %vm10720_vm4, %v11519_v39  ;;  %v11526_v61 = vsel %vm23333_vm2, %v23720_v57, 0.0  ;;  %v11848_v39 = vld [vmem:[#allocation21 + $0x1e0] sm:$0xff] }
 0x9b4   : > { %18530 = vmatprep.subr.bf16.mxu0 %v18529_v1 }
 0x9b6   : > { %17638 = vmatmul.mubr.msk.f32.vlgmr.msra.gmra.mrb[48].mxu0 %vm10720_vm4, %v11520_v45  ;;  %v11683_v45 = vsel %vm23184_vm11, %v23568_v51, 0.0  ;;  %v11686_v51 = vsel %vm23225_vm6, %v23589_v41, 0.0  ;;  %v12010_v41 = vld [vmem:[#allocation21 + $0x220] sm:$0xff]  ;;  %vm12306_vm11 = vcmask 520192  }
 0x9b7   : > { %17640 = vmatprep.mubr.msk.f32.mxu0 %vm10720_vm4, %v11521_v46  ;;  %18532 = vmatpush3.bf16.msra.mxu0 %v18529_v1  ;;  %v11681_v1 = vsel %vm23161_vm3, %v23556_v6, 0.0  ;;  %v11684_v6 = vsel %vm23200_vm10, %v23577_v33, 0.0  ;;  %v11687_v33 = vsel %vm23233_vm15, %v23668_v62, 0.0  ;;  %v11680_v46 = vld [vmem:[#allocation6 + $0x4f] sm:$0xff]  ;;  %vm25277_vm3 = vnez %v25255_v42  ;;  %v12011_v62 = vld [vmem:[#allocation21 + $0x228] sm:$0xff] }
 0x9b8   : > { %18534 = vmatprep.subr.bf16.mxu0 %v18533_v55  ;;  %v11688_v19 = vsel %vm25277_vm3, %v11680_v46, 0.0  ;;  %v18569_v42 = vpack.c.bf16 %v12011_v62, %v12010_v41  ;;  %12307 = vst.msk [vmem:[#allocation8 + $0x18] sm:$0x1f] %vm12306_vm11, %v23503_v49  ;;  %v1280_v49 = vand.u32 3, %v25232_v16 }
 0x9ba   : > { %17641 = vmatmul.mubr.msk.f32.gmra.mrb[50].mxu0 %vm10720_vm4, %v11522_v31  ;;  %v12012_v31 = vld [vmem:[#allocation21 + $0x230] sm:$0xff]  ;;  %vm23856_vm10 = vcmp.ne.s32.totalorder %v1280_v49, 0  ;;  %vm23899_vm6 = vcmp.ne.s32.totalorder %v1280_v49, 3 }
 0x9bb   : > { %17643 = vmatprep.mubr.msk.f32.mxu0 %vm10720_vm4, %v11523_v50  ;;  %18536 = vmatpush3.bf16.msra.mxu0 %v18533_v55  ;;  %v11849_v55 = vld [vmem:[#allocation21 + $0x1e8] sm:$0xff]  ;;  %v15137_v49 = vld [vmem:[%s24178_s9 + $0xf0] sm:$0xff] }
 0x9bc   : > { %18538 = vmatprep.subr.bf16.mxu0 %v18537_v35  ;;  %v18553_v12 = vpack.c.bf16 %v11849_v55, %v11848_v39 }
 0x9be   : > { %17644 = vmatmul.mubr.msk.f32.gmra.mrb[52].mxu0 %vm10720_vm4, %v11524_v9 }
 0x9bf   : > { %17646 = vmatprep.mubr.msk.f32.mxu0 %vm10720_vm4, %v11525_v48  ;;  %18540 = vmatpush3.bf16.msra.mxu0 %v18537_v35  ;;  %v12008_v35 = vld [vmem:[#allocation21 + $0x210] sm:$0xff] }
 0x9c0   : > { %18542 = vmatprep.subr.bf16.mxu0 %v18541_v10  ;;  %v18565_v59 = vpack.c.bf16 %v12009_v36, %v12008_v35 }
 0x9c2   : > { %17647 = vmatmul.mubr.msk.f32.gmra.mrb[54].mxu0 %vm10720_vm4, %v11526_v61 }
 0x9c3   : > { %18544 = vmatpush3.bf16.msra.mxu0 %v18541_v10  ;;  %17665 = vmatprep.mubr.msk.f32.mxu0 %vm10720_vm4, %v11681_v1 }
 0x9c4   : > { %18546 = vmatprep.subr.bf16.mxu0 %v18545_v22 }
 0x9c6   : > { %17666 = vmatmul.mubr.msk.f32.vlgmr.msra.gmra.mrb[48].mxu0 %vm10720_vm4, %v11682_v18 }
 0x9c7   : > { %17668 = vmatprep.mubr.msk.f32.mxu0 %vm10720_vm4, %v11683_v45  ;;  %18548 = vmatpush3.bf16.msra.mxu0 %v18545_v22 }
 0x9c8   : > { %18550 = vmatprep.subr.bf16.mxu0 %v18549_v37 }
 0x9ca   : > { %17669 = vmatmul.mubr.msk.f32.gmra.mrb[50].mxu0 %vm10720_vm4, %v11684_v6 }
 0x9cb   : > { %17671 = vmatprep.mubr.msk.f32.mxu0 %vm10720_vm4, %v11685_v15  ;;  %18552 = vmatpush3.bf16.msra.mxu0 %v18549_v37 }
 0x9cc   : > { %18554 = vmatprep.subr.bf16.mxu0 %v18553_v12 }
 0x9ce   : > { %17672 = vmatmul.mubr.msk.f32.gmra.mrb[52].mxu0 %vm10720_vm4, %v11686_v51 }
 0x9cf   : > { %17674 = vmatprep.mubr.msk.f32.mxu0 %vm10720_vm4, %v11687_v33  ;;  %18556 = vmatpush3.bf16.msra.mxu0 %v18553_v12 }
 0x9d0   : > { %18558 = vmatprep.subr.bf16.mxu0 %v18557_v53 }
 0x9d2   : > { %17675 = vmatmul.mubr.msk.f32.gmra.mrb[54].mxu0 %vm10720_vm4, %v11688_v19 }
 0x9d3   : > { %18560 = vmatpush3.bf16.msra.mxu0 %v18557_v53  ;;  %17693 = vmatprep.mubr.msk.f32.mxu0 %vm10720_vm4, %v23524_v20  ;;  %v18573_v20 = vpack.c.bf16 %v12013_v47, %v12012_v31 }
 0x9d4   : > { %18562 = vmatprep.subr.bf16.mxu0 %v18561_v32 }
 0x9d6   : > { %17694 = vmatmul.mubr.msk.f32.vlgmr.msra.gmra.mrb[48].mxu0 %vm10720_vm4, %v23529_v0  ;;  %v11842_v0 = vld [vmem:[#allocation6 + $0x50] sm:$0xff] }
 0x9d7   : > { %17696 = vmatprep.mubr.msk.f32.mxu0 %vm10720_vm4, %v23534_v11  ;;  %18564 = vmatpush3.bf16.msra.mxu0 %v18561_v32  ;;  %v11997_v11 = vsel %vm23255_vm0, %v23601_v40, 0.0  ;;  %v12004_v40 = vsel %vm23333_vm2, %v11996_v58, 0.0  ;;  %vm14087_vm0 = vcmask 1042432  }
 0x9d8   : > { %18566 = vmatprep.subr.bf16.mxu0 %v18565_v59 }
 0x9da   : > { %17697 = vmatmul.mubr.msk.f32.gmra.mrb[50].mxu0 %vm10720_vm4, %v23538_v60  ;;  %v11998_v60 = vsel %vm25273_vm12, %v23610_v44, 0.0  ;;  %v15105_v44 = vld [vmem:[#allocation22] ss:$0 sm:$0xff]  ;;  %vm20231_vm12 = vmmov 0  }
 0x9db   : > { %17699 = vmatprep.mubr.msk.f32.mxu0 %vm10720_vm4, %v23542_v3  ;;  %18568 = vmatpush3.bf16.msra.mxu0 %v18565_v59  ;;  %v11999_v3 = vsel %vm25276_vm9, %v23613_v7, 0.0 }
 0x9dc   : > { %18570 = vmatprep.subr.bf16.mxu0 %v18569_v42 }
 0x9de   : > { %17700 = vmatmul.mubr.msk.f32.gmra.mrb[52].mxu0 %vm10720_vm4, %v23549_v13  ;;  %v12001_v13 = vsel %vm25275_vm5, %v23625_v56, 0.0 }
 0x9df   : > { %17702 = vmatprep.mubr.msk.f32.mxu0 %vm10720_vm4, %v23689_v38  ;;  %18572 = vmatpush3.bf16.msra.mxu0 %v18569_v42 }
 0x9e0   : > { %18574 = vmatprep.subr.bf16.mxu0 %v18573_v20 }
 0x9e2   : > { %17703 = vmatmul.mubr.msk.f32.gmra.mrb[54].mxu0 %vm10720_vm4, %v11842_v0 }
 0x9e3   : > { %18576 = vmatpush3.bf16.msra.mxu0 %v18573_v20  ;;  %17721 = vmatprep.mubr.msk.f32.mxu0 %vm10720_vm4, %v11997_v11 }
 0x9e6   : > { %17722 = vmatmul.mubr.msk.f32.vlgmr.msra.gmra.mrb[48].mxu0 %vm10720_vm4, %v11998_v60 }
 0x9e7   : > { %17724 = vmatprep.mubr.msk.f32.mxu0 %vm10720_vm4, %v11999_v3 }
 0x9ea   : > { %17725 = vmatmul.mubr.msk.f32.gmra.mrb[50].mxu0 %vm10720_vm4, %v12000_v25 }
 0x9eb   : > { %17727 = vmatprep.mubr.msk.f32.mxu0 %vm10720_vm4, %v12001_v13 }
 0x9ee   : > { %17728 = vmatmul.mubr.msk.f32.gmra.mrb[52].mxu0 %vm10720_vm4, %v12002_v21 }
 0x9ef   : > { %17730 = vmatprep.mubr.msk.f32.mxu0 %vm10720_vm4, %v12003_v2 }
 0x9f2   : > { %17731 = vmatmul.mubr.msk.f32.gmra.mrb[54].mxu0 %vm10720_vm4, %v12004_v40 }
 0xab9   : > { %v17723_v30 = vpop.f32.mrb[48].mxu0 }
 0xaba   : > { %v12159_v7 = vadd.f32 %v17723_v30, %v15105_v44  ;;  %v12104_v34 = vpop.f32.mrb[49].mxu0  ;;  %v15109_v30 = vld [vmem:[%s24178_s9 + $0x40] sm:$0xff] }
 0xabb   : > { %v12158_v56 = vadd.f32 %v15105_v44, %v12104_v34 }
 0xabc   : > { %v12167_v29 = vmax.f32 %v12159_v7, 0.0  ;;  %v15110_v7 = vld [vmem:[%s24178_s9 + $0x48] sm:$0xff] }
 0xabd   : > { %v12166_v38 = vmax.f32 %v12158_v56, 0.0  ;;  %v17726_v5 = vpop.f32.mrb[50].mxu0  ;;  %v15111_v56 = vld [vmem:[%s24178_s9 + $0x50] sm:$0xff] }
 0xabe   : > { %12175 = vst.msk [vmem:[#allocation7 + $0x8] sm:$0xff] %vm10720_vm4, %v12167_v29  ;;  %v12161_v17 = vadd.f32 %v17726_v5, %v15105_v44  ;;  %v12114_v50 = vpop.f32.mrb[51].mxu0  ;;  %v15112_v29 = vld [vmem:[%s24178_s9 + $0x58] sm:$0xff]  ;;  %v12217_v5 = vld [vmem:[#allocation28 + $0x8] sm:$0xff] }
 0xabf   : > { %12174 = vst.msk [vmem:[#allocation7] sm:$0xff] %vm10720_vm4, %v12166_v38  ;;  %v12160_v24 = vadd.f32 %v15105_v44, %v12114_v50  ;;  %v18589_v38 = vpack.c.bf16 %v15110_v7, %v15109_v30  ;;  %v15113_v50 = vld [vmem:[%s24178_s9 + $0x60] sm:$0xff] }
 0xac0   : > { %v12169_v10 = vmax.f32 %v12161_v17, 0.0  ;;  %v18593_v17 = vpack.c.bf16 %v15112_v29, %v15111_v56  ;;  %v15128_v56 = vld [vmem:[%s24178_s9 + $0xb8] sm:$0xff] }
 0xac1   : > { %v12168_v9 = vmax.f32 %v12160_v24, 0.0  ;;  %v17729_v4 = vpop.f32.mrb[52].mxu0  ;;  %v15114_v24 = vld [vmem:[%s24178_s9 + $0x68] sm:$0xff] }
 0xac2   : > { %12177 = vst.msk [vmem:[#allocation7 + $0x18] sm:$0xff] %vm10720_vm4, %v12169_v10  ;;  %v12163_v28 = vadd.f32 %v17729_v4, %v15105_v44  ;;  %v12124_v48 = vpop.f32.mrb[53].mxu0  ;;  %v15115_v10 = vld [vmem:[%s24178_s9 + $0x70] sm:$0xff]  ;;  %v15116_v4 = vld [vmem:[%s24178_s9 + $0x78] sm:$0xff] }
 0xac3   : > { %12176 = vst.msk [vmem:[#allocation7 + $0x10] sm:$0xff] %vm10720_vm4, %v12168_v9  ;;  %v12162_v57 = vadd.f32 %v15105_v44, %v12124_v48  ;;  %v18597_v9 = vpack.c.bf16 %v15114_v24, %v15113_v50  ;;  %v12316_v48 = vld [vmem:[%s24178_s9] sm:$0xff]  ;;  %v15133_v50 = vld [vmem:[%s24178_s9 + $0xd0] sm:$0xff]  ;;  %v15134_v24 = vld [vmem:[%s24178_s9 + $0xd8] sm:$0xff] }
 0xac4   : > { %v12171_v22 = vmax.f32 %v12163_v28, 0.0  ;;  %v18601_v28 = vpack.c.bf16 %v15116_v4, %v15115_v10 }
 0xac5   : > { %v12170_v61 = vmax.f32 %v12162_v57, 0.0  ;;  %v17732_v26 = vpop.f32.mrb[54].mxu0  ;;  %v12183_v12 = vld [vmem:[#allocation7 + $0x8] sm:$0xff] }
 0xac6   : > { %12179 = vst.msk [vmem:[#allocation7 + $0x28] sm:$0xff] %vm10720_vm4, %v12171_v22  ;;  %v12165_v54 = vadd.f32 %v17732_v26, %v15105_v44  ;;  %v12134_v1 = vpop.f32.mrb[55].mxu0  ;;  %v12182_v39 = vld [vmem:[#allocation7] sm:$0xff]  ;;  %v12317_v57 = vld [vmem:[%s24178_s9 + $0x8] sm:$0xff] }
 0xac7   : > { %12178 = vst.msk [vmem:[#allocation7 + $0x20] sm:$0xff] %vm10720_vm4, %v12170_v61  ;;  %v12164_v37 = vadd.f32 %v15105_v44, %v12134_v1  ;;  %v12189_v55 = vld [vmem:[#allocation7 + $0x1] sm:$0xff]  ;;  %v18605_v22 = vpack.c.bf16 %v12317_v57, %v12316_v48  ;;  %v12319_v1 = vld [vmem:[%s24178_s9 + $0x18] sm:$0xff] }
 0xac8   : > { %v12173_v18 = vmax.f32 %v12165_v54, 0.0  ;;  %v12196_v15 = vmax.f32 %v12182_v39, %v12189_v55  ;;  %v12318_v54 = vld [vmem:[%s24178_s9 + $0x10] sm:$0xff]  ;;  %v15135_v57 = vld [vmem:[%s24178_s9 + $0xe0] sm:$0xff] }
 0xac9   : > { %v12172_v45 = vmax.f32 %v12164_v37, 0.0  ;;  %v12185_v33 = vld [vmem:[#allocation7 + $0x18] sm:$0xff]  ;;  %v18609_v55 = vpack.c.bf16 %v12319_v1, %v12318_v54  ;;  %v13781_v37 = vld [vmem:[#allocation25 + $0x368] sm:$0xff] }
 0xaca   : > { %12181 = vst.msk [vmem:[#allocation7 + $0x38] sm:$0xff] %vm10720_vm4, %v12173_v18  ;;  %v12184_v6 = vld [vmem:[#allocation7 + $0x10] sm:$0xff]  ;;  %v15138_v54 = vld [vmem:[%s24178_s9 + $0xf8] sm:$0xff] }
 0xacb   : > { %v12190_v14 = vld [vmem:[#allocation7 + $0x9] sm:$0xff]  ;;  %v12191_v43 = vld [vmem:[#allocation7 + $0x11] sm:$0xff]  ;;  %12180 = vst.msk [vmem:[#allocation7 + $0x30] sm:$0xff] %vm10720_vm4, %v12172_v45  ;;  %v18649_v1 = vpack.c.bf16 %v15138_v54, %v15137_v49 }
 0xacc   : > { %v12197_v53 = vmax.f32 %v12183_v12, %v12190_v14  ;;  %v12198_v51 = vmax.f32 %v12184_v6, %v12191_v43  ;;  %v12320_v12 = vld [vmem:[%s24178_s9 + $0x20] sm:$0xff]  ;;  %v12321_v6 = vld [vmem:[%s24178_s9 + $0x28] sm:$0xff]  ;;  %v12322_v43 = vld [vmem:[%s24178_s9 + $0x30] sm:$0xff] }
 0xacd   : > { %v12187_v42 = vld [vmem:[#allocation7 + $0x28] sm:$0xff]  ;;  %v18613_v14 = vpack.c.bf16 %v12321_v6, %v12320_v12  ;;  %v15144_v12 = vld [vmem:[%s24178_s9 + $0x118] sm:$0xff] }
 0xace   : > { %v12209_v63 = vmax.f32 %v12196_v15, %v12197_v53  ;;  %v12210_v23 = vmax.f32 %v12197_v53, %v12198_v51  ;;  %v12186_v46 = vld [vmem:[#allocation7 + $0x20] sm:$0xff]  ;;  %v15176_v49 = vld [vmem:[%s24178_s9 + $0x1e8] sm:$0xff] }
 0xacf   : > { %v12192_v32 = vld [vmem:[#allocation7 + $0x19] sm:$0xff]  ;;  %v12193_v19 = vld [vmem:[#allocation7 + $0x21] sm:$0xff] }
 0xad0   : > { %v18577_v35 = vpack.c.bf16 %v12210_v23, %v12209_v63  ;;  %v12199_v36 = vmax.f32 %v12185_v33, %v12192_v32  ;;  %v12200_v59 = vmax.f32 %v12186_v46, %v12193_v19  ;;  %v13207_v15 = vld [vmem:[#allocation25 + $0x80] sm:$0xff]  ;;  %v13208_v53 = vld [vmem:[#allocation25 + $0x88] sm:$0xff]  ;;  %v13209_v23 = vld [vmem:[#allocation25 + $0x90] sm:$0xff] }
 0xad1   : > { %v12204_v31 = vld [vmem:[#allocation7 + $0x38] sm:$0x7f]  ;;  %v18733_v63 = vpack.c.bf16 %v13208_v53, %v13207_v15  ;;  %v13212_v19 = vld [vmem:[#allocation25 + $0xa8] sm:$0xff] }
 0xad2   : > { %18578 = vmatprep.subr.bf16.mxu1 %v18577_v35  ;;  %v12211_v41 = vmax.f32 %v12198_v51, %v12199_v36  ;;  %v12212_v62 = vmax.f32 %v12199_v36, %v12200_v59  ;;  %v12206_v47 = vld [vmem:[#allocation7 + $0x39] sm:$0x7f]  ;;  %v12194_v20 = vld [vmem:[#allocation7 + $0x29] sm:$0xff]  ;;  %v12205_v11 = vld [vmem:[#allocation7 + $0x31] sm:$0xff] }
 0xad3   : > { %18580 = vmatpush3.bf16.msra.mxu1 %v18577_v35  ;;  %v12203_v0 = vld [vmem:[#allocation7 + $0x30] sm:$0xff]  ;;  %v12201_v3 = vmax.f32 %v12187_v42, %v12194_v20  ;;  %v12208_v8 = vmax.f32 %v12204_v31, %v12206_v47  ;;  %v12323_v51 = vld [vmem:[%s24178_s9 + $0x38] sm:$0xff]  ;;  %18734 = vmatprep.subr.bf16.mxu0 %v18733_v63  ;;  %v15121_v36 = vld [vmem:[%s24178_s9 + $0x80] sm:$0xff] }
 0xad4   : > { %v18581_v60 = vpack.c.bf16 %v12212_v62, %v12211_v41  ;;  %v12207_v25 = vmax.f32 %v12203_v0, %v12205_v11  ;;  %v12188_v13 = vld [vmem:[#allocation7 + $0x30] sm:$0x7f]  ;;  %v13211_v32 = vld [vmem:[#allocation25 + $0xa0] sm:$0xff]  ;;  %v18617_v35 = vpack.c.bf16 %v12323_v51, %v12322_v43  ;;  %18736 = vmatpush3.bf16.msra.mxu0 %v18733_v63  ;;  %v1287_v62 = vand.u32 3, %v25233_v52  ;;  %v15146_v53 = vld [vmem:[%s24178_s9 + $0x128] sm:$0xff] }
 0xad5   : > { %v12195_v58 = vld [vmem:[#allocation7 + $0x31] sm:$0x7f]  ;;  %v12213_v21 = vmax.f32 %v12200_v59, %v12201_v3  ;;  %v15122_v59 = vld [vmem:[%s24178_s9 + $0x88] sm:$0xff]  ;;  %v18741_v41 = vpack.c.bf16 %v13212_v19, %v13211_v32  ;;  %v15124_v0 = vld [vmem:[%s24178_s9 + $0x98] sm:$0xff] }
 0xad6   : > { %18582 = vmatprep.subr.bf16.mxu1 %v18581_v60  ;;  %v12214_v2 = vmax.f32 %v12201_v3, %v12207_v25  ;;  %v12202_v40 = vmax.f32 %v12188_v13, %v12195_v58  ;;  %v13210_v33 = vld [vmem:[#allocation25 + $0x98] sm:$0xff]  ;;  %v13213_v42 = vld [vmem:[#allocation25 + $0xb0] sm:$0xff]  ;;  %v18621_v47 = vpack.c.bf16 %v15122_v59, %v15121_v36  ;;  %vm23893_vm14 = vcmp.ne.s32.totalorder %v1287_v62, 0  ;;  %v13215_v3 = vld [vmem:[#allocation25 + $0xc0] sm:$0xff] }
 0xad7   : > { %18584 = vmatpush3.bf16.msra.mxu1 %v18581_v60  ;;  %v18737_v46 = vpack.c.bf16 %v13210_v33, %v13209_v23  ;;  %v13214_v31 = vld [vmem:[#allocation25 + $0xb8] sm:$0xff]  ;;  %v13216_v25 = vld [vmem:[#allocation25 + $0xc8] sm:$0xff]  ;;  %vm23934_vm15 = vcmp.ne.s32.totalorder %v1287_v62, 3 }
 0xad8   : > { %v18585_v44 = vpack.c.bf16 %v12214_v2, %v12213_v21  ;;  %v12215_v34 = vmax.f32 %v12202_v40, %v12208_v8  ;;  %v15123_v20 = vld [vmem:[%s24178_s9 + $0x90] sm:$0xff]  ;;  %v18745_v11 = vpack.c.bf16 %v13214_v31, %v13213_v42  ;;  %v15125_v40 = vld [vmem:[%s24178_s9 + $0xa0] sm:$0xff]  ;;  %v15126_v8 = vld [vmem:[%s24178_s9 + $0xa8] sm:$0xff] }
 0xad9   : > { %18738 = vmatprep.subr.bf16.mxu0 %v18737_v46  ;;  %v18625_v21 = vpack.c.bf16 %v15124_v0, %v15123_v20  ;;  %v18629_v7 = vpack.c.bf16 %v15126_v8, %v15125_v40  ;;  %v15145_v15 = vld [vmem:[%s24178_s9 + $0x120] sm:$0xff]  ;;  %v15147_v23 = vld [vmem:[%s24178_s9 + $0x130] sm:$0xff]  ;;  %v15148_v33 = vld [vmem:[%s24178_s9 + $0x138] sm:$0xff] }
 0xada   : > { %18586 = vmatprep.subr.bf16.mxu1 %v18585_v44  ;;  %18740 = vmatpush3.bf16.msra.mxu0 %v18737_v46  ;;  %v18661_v63 = vpack.c.bf16 %v15146_v53, %v15145_v15  ;;  %v18665_v46 = vpack.c.bf16 %v15148_v33, %v15147_v23  ;;  %v15151_v32 = vld [vmem:[%s24178_s9 + $0x140] sm:$0xff]  ;;  %v15152_v19 = vld [vmem:[%s24178_s9 + $0x148] sm:$0xff]  ;;  %v15153_v36 = vld [vmem:[%s24178_s9 + $0x150] sm:$0xff] }
 0xadb   : > { %18588 = vmatpush3.bf16.msra.mxu1 %v18585_v44  ;;  %18742 = vmatprep.subr.bf16.mxu0 %v18741_v41  ;;  %v18749_v44 = vpack.c.bf16 %v13216_v25, %v13215_v3  ;;  %v15154_v59 = vld [vmem:[%s24178_s9 + $0x158] sm:$0xff]  ;;  %v15155_v31 = vld [vmem:[%s24178_s9 + $0x160] sm:$0xff]  ;;  %v15163_v40 = vld [vmem:[%s24178_s9 + $0x190] sm:$0xff] }
 0xadc   : > { %17745 = vmatprep.subr.msk.mxu1 %vm25278_vm1, %v12215_v34  ;;  %v18673_v62 = vpack.c.bf16 %v15154_v59, %v15153_v36  ;;  %v15158_v3 = vld [vmem:[%s24178_s9 + $0x178] sm:$0xff]  ;;  %v15185_v15 = vld [vmem:[%s24178_s9 + $0x220] sm:$0xff]  ;;  %v15186_v53 = vld [vmem:[%s24178_s9 + $0x228] sm:$0xff] }
 0xadd   : > { %v15164_v8 = vld [vmem:[%s24178_s9 + $0x198] sm:$0xff]  ;;  %v15187_v23 = vld [vmem:[%s24178_s9 + $0x230] sm:$0xff]  ;;  %v13975_v13 = vld [vmem:[#allocation25 + $0x468] sm:$0xff] }
 0xade   : > { %18744 = vmatpush3.bf16.msra.mxu0 %v18741_v41  ;;  %v15188_v33 = vld [vmem:[%s24178_s9 + $0x238] sm:$0xff] }
 0xadf   : > { %17746 = vmatpush3.msk.msra.mxu1 %vm25279_vm8, %v12215_v34  ;;  %18746 = vmatprep.subr.bf16.mxu0 %v18745_v11  ;;  %v15127_v34 = vld [vmem:[%s24178_s9 + $0xb0] sm:$0xff]  ;;  %v13219_v59 = vld [vmem:[#allocation25 + $0xe0] sm:$0xff] }
 0xae0   : > { %17748 = vmatmul.mubr.msk.f32.vlgmr.msra.gmra.mrb[72].mxu1 %vm12218_vm7, %v12217_v5  ;;  %18590 = vmatprep.subr.bf16.mxu1 %v18589_v38  ;;  %v18633_v29 = vpack.c.bf16 %v15128_v56, %v15127_v34  ;;  %v15132_v5 = vld [vmem:[%s24178_s9 + $0xc8] sm:$0xff]  ;;  %v15165_v34 = vld [vmem:[%s24178_s9 + $0x1a0] sm:$0xff] }
 0xae1   : > { %18592 = vmatpush3.bf16.msra.mxu1 %v18589_v38  ;;  %v15131_v38 = vld [vmem:[%s24178_s9 + $0xc0] sm:$0xff]  ;;  %v15166_v56 = vld [vmem:[%s24178_s9 + $0x1a8] sm:$0xff] }
 0xae2   : > { %18594 = vmatprep.subr.bf16.mxu1 %v18593_v17  ;;  %18748 = vmatpush3.bf16.msra.mxu0 %v18745_v11  ;;  %v15157_v11 = vld [vmem:[%s24178_s9 + $0x170] sm:$0xff] }
 0xae3   : > { %18750 = vmatprep.subr.bf16.mxu0 %v18749_v44  ;;  %v18681_v25 = vpack.c.bf16 %v15158_v3, %v15157_v11  ;;  %v15191_v11 = vld [vmem:[#allocation24] ss:$0 sm:$0xff] }
 0xae5   : > { %18596 = vmatpush3.bf16.msra.mxu1 %v18593_v17  ;;  %v18637_v17 = vpack.c.bf16 %v15132_v5, %v15131_v38  ;;  %v18693_v38 = vpack.c.bf16 %v15166_v56, %v15165_v34  ;;  %v15167_v5 = vld [vmem:[%s24178_s9 + $0x1b0] sm:$0xff]  ;;  %v13192_v56 = vld [vmem:[#allocation25 + $0x20] sm:$0xff] }
 0xae6   : > { %18598 = vmatprep.subr.bf16.mxu1 %v18597_v9  ;;  %18752 = vmatpush3.bf16.msra.mxu0 %v18749_v44 }
 0xae9   : > { %18600 = vmatpush3.bf16.msra.mxu1 %v18597_v9 }
 0xaea   : > { %18602 = vmatprep.subr.bf16.mxu1 %v18601_v28 }
 0xaed   : > { %18604 = vmatpush3.bf16.msra.mxu1 %v18601_v28  ;;  %v18641_v28 = vpack.c.bf16 %v15134_v24, %v15133_v50  ;;  %v15172_v24 = vld [vmem:[%s24178_s9 + $0x1c8] sm:$0xff] }
 0xaee   : > { %18606 = vmatprep.subr.bf16.mxu1 %v18605_v22 }
 0xbb3   : > { %v17749_v61 = vpop.f32.mrb[72].mxu1 }
 0xbb4   : > { %12305 = vst.msk [vmem:[#allocation8 + $0x10] sm:$0xff] %vm10720_vm4, %v17749_v61  ;;  %v12294_v26 = vpop.f32.mrb[73].mxu1 }
 0xbb5   : > { %12304 = vst.msk [vmem:[#allocation8 + $0x8] sm:$0xff] %vm10720_vm4, %v12294_v26 }
 0xbbb   : > { %v12694_v42 = vld [vmem:[#allocation8 + $0x10] sm:$0xff] }
 0xbbc   : > { %v12324_v18 = vld [vmem:[#allocation8 + $0x4] sm:$0xff]  ;;  %v23860_v39 = vld [vmem:[#allocation8 + $0xc] sm:$0xff] }
 0xbbd   : > { %v12308_v45 = vld [vmem:[#allocation8 + $0x3] sm:$0xff]  ;;  %17766 = vmatprep.mubr.msk.f32.mxu1 %vm10720_vm4, %v12324_v18  ;;  %v23897_v52 = vld [vmem:[#allocation8 + $0xb] sm:$0xff] }
 0xbbe   : > { %v12314_v16 = vsel %vm23856_vm10, %v12308_v45, 0.0  ;;  %17767 = vmatmul.mubr.msk.f32.vlgmr.msra.gmra.mrb[74].mxu1 %vm10720_vm4, %v23860_v39  ;;  %v12497_v58 = vld [vmem:[#allocation8 + $0x5] sm:$0xff]  ;;  %v12315_v2 = vsel %vm23893_vm14, %v23897_v52, 0.0  ;;  %v23938_v9 = vld [vmem:[#allocation8 + $0xd] sm:$0xff] }
 0xbbf   : > { %18608 = vmatpush3.bf16.msra.mxu1 %v18605_v22  ;;  %17785 = vmatprep.mubr.msk.f32.mxu1 %vm10720_vm4, %v12314_v16  ;;  %v12503_v30 = vsel %vm23899_vm6, %v12497_v58, 0.0  ;;  %v12597_v4 = vld [vmem:[#allocation8 + $0x7] sm:$0xff]  ;;  %v12504_v48 = vsel %vm23934_vm15, %v23938_v9, 0.0  ;;  %v15143_v16 = vld [vmem:[%s24178_s9 + $0x110] sm:$0xff] }
 0xbc0   : > { %18610 = vmatprep.subr.bf16.mxu1 %v18609_v55  ;;  %v15136_v22 = vld [vmem:[%s24178_s9 + $0xe8] sm:$0xff]  ;;  %v12599_v61 = vsel %vm23856_vm10, %v12597_v4, 0.0  ;;  %v15141_v18 = vld [vmem:[%s24178_s9 + $0x100] sm:$0xff]  ;;  %v12788_v44 = vld [vmem:[#allocation8 + $0x11] sm:$0xff] }
 0xbc1   : > { %v18645_v26 = vpack.c.bf16 %v15136_v22, %v15135_v57  ;;  %v12598_v6 = vld [vmem:[#allocation8 + $0xf] sm:$0xff]  ;;  %v15161_v58 = vld [vmem:[%s24178_s9 + $0x180] sm:$0xff] }
 0xbc2   : > { %v12600_v43 = vsel %vm23893_vm14, %v12598_v6, 0.0  ;;  %v12693_v51 = vld [vmem:[#allocation8 + $0x8] sm:$0xff]  ;;  %v12884_v57 = vld [vmem:[#allocation8 + $0x13] sm:$0xff] }
 0xbc3   : > { %18612 = vmatpush3.bf16.msra.mxu1 %v18609_v55  ;;  %v15142_v55 = vld [vmem:[%s24178_s9 + $0x108] sm:$0xff]  ;;  %v15184_v6 = vld [vmem:[%s24178_s9 + $0x218] sm:$0xff] }
 0xbc4   : > { %18614 = vmatprep.subr.bf16.mxu1 %v18613_v14  ;;  %v18653_v45 = vpack.c.bf16 %v15142_v55, %v15141_v18  ;;  %v12787_v41 = vld [vmem:[#allocation8 + $0x9] sm:$0xff]  ;;  %v15178_v18 = vld [vmem:[%s24178_s9 + $0x1f8] sm:$0xff] }
 0xbc5   : > { %v12789_v20 = vsel %vm23899_vm6, %v12787_v41, 0.0  ;;  %v13220_v41 = vld [vmem:[#allocation25 + $0xe8] sm:$0xff] }
 0xbc7   : > { %18616 = vmatpush3.bf16.msra.mxu1 %v18613_v14  ;;  %v18657_v14 = vpack.c.bf16 %v15144_v12, %v15143_v16  ;;  %v15183_v12 = vld [vmem:[%s24178_s9 + $0x210] sm:$0xff] }
 0xbc8   : > { %18618 = vmatprep.subr.bf16.mxu1 %v18617_v35 }
 0xbcb   : > { %18620 = vmatpush3.bf16.msra.mxu1 %v18617_v35  ;;  %v18669_v35 = vpack.c.bf16 %v15152_v19, %v15151_v32  ;;  %v13074_v32 = vld [vmem:[#allocation8 + $0x15] sm:$0xff] }
 0xbcc   : > { %18622 = vmatprep.subr.bf16.mxu1 %v18621_v47  ;;  %v13217_v19 = vld [vmem:[#allocation25 + $0xd0] sm:$0xff] }
 0xbce   : > { %17786 = vmatmul.mubr.msk.f32.vlgmr.msra.gmra.mrb[74].mxu1 %vm10720_vm4, %v12315_v2 }
 0xbcf   : > { %18624 = vmatpush3.bf16.msra.mxu1 %v18621_v47  ;;  %17804 = vmatprep.mubr.msk.f32.mxu1 %vm10720_vm4, %v12503_v30  ;;  %v15156_v47 = vld [vmem:[%s24178_s9 + $0x168] sm:$0xff]  ;;  %v18689_v30 = vpack.c.bf16 %v15164_v8, %v15163_v40 }
 0xbd0   : > { %18626 = vmatprep.subr.bf16.mxu1 %v18625_v21  ;;  %v18677_v0 = vpack.c.bf16 %v15156_v47, %v15155_v31  ;;  %v13222_v31 = vld [vmem:[#allocation25 + $0xf8] sm:$0xff]  ;;  %v13190_v8 = vld [vmem:[#allocation25 + $0x10] sm:$0xff] }
 0xbd3   : > { %18628 = vmatpush3.bf16.msra.mxu1 %v18625_v21  ;;  %v15162_v21 = vld [vmem:[%s24178_s9 + $0x188] sm:$0xff] }
 0xbd4   : > { %18630 = vmatprep.subr.bf16.mxu1 %v18629_v7  ;;  %v18685_v2 = vpack.c.bf16 %v15162_v21, %v15161_v58 }
 0xbd7   : > { %18632 = vmatpush3.bf16.msra.mxu1 %v18629_v7  ;;  %v12790_v7 = vsel %vm23934_vm15, %v12788_v44, 0.0  ;;  %v13191_v44 = vld [vmem:[#allocation25 + $0x18] sm:$0xff] }
 0xbd8   : > { %18634 = vmatprep.subr.bf16.mxu1 %v18633_v29  ;;  %v18769_v34 = vpack.c.bf16 %v13191_v44, %v13190_v8  ;;  %v13480_v44 = vld [vmem:[#allocation25 + $0x1a0] sm:$0xff] }
 0xbdb   : > { %18636 = vmatpush3.bf16.msra.mxu1 %v18633_v29  ;;  %v12885_v29 = vsel %vm23856_vm10, %v23897_v52, 0.0  ;;  %v15171_v52 = vld [vmem:[%s24178_s9 + $0x1c0] sm:$0xff] }
 0xbdc   : > { %18638 = vmatprep.subr.bf16.mxu1 %v18637_v17  ;;  %v18701_v4 = vpack.c.bf16 %v15172_v24, %v15171_v52  ;;  %v13196_v24 = vld [vmem:[#allocation25 + $0x40] sm:$0xff] }
 0xbde   : > { %17805 = vmatmul.mubr.msk.f32.vlgmr.msra.gmra.mrb[74].mxu1 %vm10720_vm4, %v12504_v48  ;;  %v15174_v48 = vld [vmem:[%s24178_s9 + $0x1d8] sm:$0xff] }
 0xbdf   : > { %18640 = vmatpush3.bf16.msra.mxu1 %v18637_v17  ;;  %17823 = vmatprep.mubr.msk.f32.mxu1 %vm10720_vm4, %v12599_v61  ;;  %v15168_v17 = vld [vmem:[%s24178_s9 + $0x1b8] sm:$0xff]  ;;  %v12886_v61 = vsel %vm23893_vm14, %v12884_v57, 0.0 }
 0xbe0   : > { %18642 = vmatprep.subr.bf16.mxu1 %v18641_v28  ;;  %v18697_v50 = vpack.c.bf16 %v15168_v17, %v15167_v5  ;;  %v13194_v17 = vld [vmem:[#allocation25 + $0x30] sm:$0xff]  ;;  %v13199_v57 = vld [vmem:[#allocation25 + $0x58] sm:$0xff] }
 0xbe3   : > { %18644 = vmatpush3.bf16.msra.mxu1 %v18641_v28  ;;  %v15173_v28 = vld [vmem:[%s24178_s9 + $0x1d0] sm:$0xff] }
 0xbe4   : > { %18646 = vmatprep.subr.bf16.mxu1 %v18645_v26  ;;  %v18705_v22 = vpack.c.bf16 %v15174_v48, %v15173_v28  ;;  %v13198_v48 = vld [vmem:[#allocation25 + $0x50] sm:$0xff] }
 0xbe7   : > { %18648 = vmatpush3.bf16.msra.mxu1 %v18645_v26  ;;  %v15175_v26 = vld [vmem:[%s24178_s9 + $0x1e0] sm:$0xff] }
 0xbe8   : > { %18650 = vmatprep.subr.bf16.mxu1 %v18649_v1  ;;  %v18709_v54 = vpack.c.bf16 %v15176_v49, %v15175_v26  ;;  %v13201_v26 = vld [vmem:[#allocation25 + $0x68] sm:$0xff] }
 0xbeb   : > { %18652 = vmatpush3.bf16.msra.mxu1 %v18649_v1  ;;  %v15177_v1 = vld [vmem:[%s24178_s9 + $0x1f0] sm:$0xff] }
 0xbec   : > { %18654 = vmatprep.subr.bf16.mxu1 %v18653_v45  ;;  %v18713_v55 = vpack.c.bf16 %v15178_v18, %v15177_v1  ;;  %v13203_v1 = vld [vmem:[#allocation25 + $0x78] sm:$0xff] }
 0xbee   : > { %17824 = vmatmul.mubr.msk.f32.vlgmr.msra.gmra.mrb[74].mxu1 %vm10720_vm4, %v12600_v43  ;;  %v12980_v43 = vld [vmem:[#allocation8 + $0x14] sm:$0xff] }
 0xbef   : > { %18656 = vmatpush3.bf16.msra.mxu1 %v18653_v45  ;;  %17842 = vmatprep.mubr.msk.f32.mxu1 %vm10720_vm4, %v12693_v51  ;;  %v15181_v45 = vld [vmem:[%s24178_s9 + $0x200] sm:$0xff]  ;;  %v13075_v51 = vsel %vm23899_vm6, %v23938_v9, 0.0  ;;  %v13076_v9 = vsel %vm23934_vm15, %v13074_v32, 0.0 }
 0xbf0   : > { %18658 = vmatprep.subr.bf16.mxu1 %v18657_v14  ;;  %v13387_v32 = vld [vmem:[#allocation25 + $0x148] sm:$0xff] }
 0xbf3   : > { %18660 = vmatpush3.bf16.msra.mxu1 %v18657_v14  ;;  %v18721_v14 = vpack.c.bf16 %v15184_v6, %v15183_v12  ;;  %v13381_v12 = vld [vmem:[#allocation25 + $0x118] sm:$0xff] }
 0xbf4   : > { %18662 = vmatprep.subr.bf16.mxu1 %v18661_v63 }
 0xbf7   : > { %18664 = vmatpush3.bf16.msra.mxu1 %v18661_v63  ;;  %v18725_v63 = vpack.c.bf16 %v15186_v53, %v15185_v15  ;;  %v13383_v15 = vld [vmem:[#allocation25 + $0x128] sm:$0xff] }
 0xbf8   : > { %18666 = vmatprep.subr.bf16.mxu1 %v18665_v46 }
 0xbfb   : > { %18668 = vmatpush3.bf16.msra.mxu1 %v18665_v46  ;;  %v18729_v46 = vpack.c.bf16 %v15188_v33, %v15187_v23  ;;  %v13385_v23 = vld [vmem:[#allocation25 + $0x138] sm:$0xff] }
 0xbfc   : > { %18670 = vmatprep.subr.bf16.mxu1 %v18669_v35 }
 0xbfe   : > { %17843 = vmatmul.mubr.msk.f32.vlgmr.msra.gmra.mrb[74].mxu1 %vm10720_vm4, %v12694_v42  ;;  %v18757_v42 = vpack.c.bf16 %v13220_v41, %v13219_v59  ;;  %v13390_v59 = vld [vmem:[#allocation25 + $0x160] sm:$0xff]  ;;  %v13391_v41 = vld [vmem:[#allocation25 + $0x168] sm:$0xff] }
 0xbff   : > { %18672 = vmatpush3.bf16.msra.mxu1 %v18669_v35  ;;  %17861 = vmatprep.mubr.msk.f32.mxu1 %vm10720_vm4, %v12789_v20  ;;  %v13218_v35 = vld [vmem:[#allocation25 + $0xd8] sm:$0xff]  ;;  %v13189_v20 = vld [vmem:[#allocation25 + $0x8] sm:$0xff] }
 0xc00   : > { %18674 = vmatprep.subr.bf16.mxu1 %v18673_v62  ;;  %v18753_v36 = vpack.c.bf16 %v13218_v35, %v13217_v19  ;;  %v13388_v19 = vld [vmem:[#allocation25 + $0x150] sm:$0xff]  ;;  %v13389_v35 = vld [vmem:[#allocation25 + $0x158] sm:$0xff] }
 0xc02   : > { %18754 = vmatprep.subr.bf16.mxu0 %v18753_v36 }
 0xc03   : > { %18676 = vmatpush3.bf16.msra.mxu1 %v18673_v62  ;;  %v13221_v62 = vld [vmem:[#allocation25 + $0xf0] sm:$0xff]  ;;  %18756 = vmatpush3.bf16.msra.mxu0 %v18753_v36  ;;  %v18817_v36 = vpack.c.bf16 %v13389_v35, %v13388_v19  ;;  %v13584_v19 = vld [vmem:[#allocation25 + $0x260] sm:$0xff] }
 0xc04   : > { %18678 = vmatprep.subr.bf16.mxu1 %v18677_v0  ;;  %v18761_v47 = vpack.c.bf16 %v13222_v31, %v13221_v62  ;;  %18758 = vmatprep.subr.bf16.mxu0 %v18757_v42  ;;  %v18821_v62 = vpack.c.bf16 %v13391_v41, %v13390_v59  ;;  %v13393_v31 = vld [vmem:[#allocation25 + $0x178] sm:$0xff]  ;;  %v13586_v35 = vld [vmem:[#allocation25 + $0x270] sm:$0xff]  ;;  %v13670_v41 = vld [vmem:[#allocation25 + $0x280] sm:$0xff] }
 0xc07   : > { %18680 = vmatpush3.bf16.msra.mxu1 %v18677_v0  ;;  %18760 = vmatpush3.bf16.msra.mxu0 %v18757_v42  ;;  %v13392_v42 = vld [vmem:[#allocation25 + $0x170] sm:$0xff] }
 0xc08   : > { %18682 = vmatprep.subr.bf16.mxu1 %v18681_v25  ;;  %18762 = vmatprep.subr.bf16.mxu0 %v18761_v47 }
 0xc0b   : > { %18684 = vmatpush3.bf16.msra.mxu1 %v18681_v25  ;;  %18764 = vmatpush3.bf16.msra.mxu0 %v18761_v47  ;;  %v18825_v47 = vpack.c.bf16 %v13393_v31, %v13392_v42  ;;  %v13672_v31 = vld [vmem:[#allocation25 + $0x290] sm:$0xff] }
 0xc0c   : > { %18686 = vmatprep.subr.bf16.mxu1 %v18685_v2 }
 0xc0e   : > { %17862 = vmatmul.mubr.msk.f32.vlgmr.msra.gmra.mrb[74].mxu1 %vm10720_vm4, %v12790_v7 }
 0xc0f   : > { %18688 = vmatpush3.bf16.msra.mxu1 %v18685_v2  ;;  %17880 = vmatprep.mubr.msk.f32.mxu1 %vm10720_vm4, %v12885_v29  ;;  %v13193_v29 = vld [vmem:[#allocation25 + $0x28] sm:$0xff] }
 0xc10   : > { %18690 = vmatprep.subr.bf16.mxu1 %v18689_v30  ;;  %v18773_v5 = vpack.c.bf16 %v13193_v29, %v13192_v56  ;;  %v13482_v29 = vld [vmem:[#allocation25 + $0x1b0] sm:$0xff] }
 0xc13   : > { %18692 = vmatpush3.bf16.msra.mxu1 %v18689_v30 }
 0xc14   : > { %18694 = vmatprep.subr.bf16.mxu1 %v18693_v38 }
 0xc17   : > { %18696 = vmatpush3.bf16.msra.mxu1 %v18693_v38 }
 0xc18   : > { %18698 = vmatprep.subr.bf16.mxu1 %v18697_v50 }
 0xc1b   : > { %18700 = vmatpush3.bf16.msra.mxu1 %v18697_v50  ;;  %v13195_v50 = vld [vmem:[#allocation25 + $0x38] sm:$0xff] }
 0xc1c   : > { %18702 = vmatprep.subr.bf16.mxu1 %v18701_v4  ;;  %v18777_v52 = vpack.c.bf16 %v13195_v50, %v13194_v17  ;;  %v13484_v17 = vld [vmem:[#allocation25 + $0x1c0] sm:$0xff]  ;;  %v13485_v50 = vld [vmem:[#allocation25 + $0x1c8] sm:$0xff] }
 0xc1e   : > { %17881 = vmatmul.mubr.msk.f32.vlgmr.msra.gmra.mrb[74].mxu1 %vm10720_vm4, %v12886_v61  ;;  %v13200_v61 = vld [vmem:[#allocation25 + $0x60] sm:$0xff] }
 0xc1f   : > { %18704 = vmatpush3.bf16.msra.mxu1 %v18701_v4  ;;  %17899 = vmatprep.mubr.msk.f32.mxu1 %vm10720_vm4, %v23860_v39  ;;  %v15182_v39 = vld [vmem:[%s24178_s9 + $0x208] sm:$0xff]  ;;  %v18789_v49 = vpack.c.bf16 %v13201_v26, %v13200_v61  ;;  %v13491_v26 = vld [vmem:[#allocation25 + $0x1f8] sm:$0xff] }
 0xc20   : > { %18706 = vmatprep.subr.bf16.mxu1 %v18705_v22  ;;  %v18717_v16 = vpack.c.bf16 %v15182_v39, %v15181_v45  ;;  %v13197_v4 = vld [vmem:[#allocation25 + $0x48] sm:$0xff]  ;;  %v13490_v61 = vld [vmem:[#allocation25 + $0x1f0] sm:$0xff] }
 0xc21   : > { %v18781_v28 = vpack.c.bf16 %v13197_v4, %v13196_v24  ;;  %v13379_v45 = vld [vmem:[#allocation25 + $0x108] sm:$0xff]  ;;  %v13486_v24 = vld [vmem:[#allocation25 + $0x1d0] sm:$0xff]  ;;  %v13487_v4 = vld [vmem:[#allocation25 + $0x1d8] sm:$0xff] }
 0xc23   : > { %18708 = vmatpush3.bf16.msra.mxu1 %v18705_v22  ;;  %v18785_v22 = vpack.c.bf16 %v13199_v57, %v13198_v48  ;;  %v13488_v48 = vld [vmem:[#allocation25 + $0x1e0] sm:$0xff]  ;;  %v13489_v57 = vld [vmem:[#allocation25 + $0x1e8] sm:$0xff] }
 0xc24   : > { %18710 = vmatprep.subr.bf16.mxu1 %v18709_v54 }
 0xc27   : > { %18712 = vmatpush3.bf16.msra.mxu1 %v18709_v54  ;;  %v13202_v54 = vld [vmem:[#allocation25 + $0x70] sm:$0xff] }
 0xc28   : > { %18714 = vmatprep.subr.bf16.mxu1 %v18713_v55  ;;  %v18793_v18 = vpack.c.bf16 %v13203_v1, %v13202_v54  ;;  %v13572_v54 = vld [vmem:[#allocation25 + $0x200] sm:$0xff]  ;;  %v13573_v1 = vld [vmem:[#allocation25 + $0x208] sm:$0xff] }
 0xc2b   : > { %18716 = vmatpush3.bf16.msra.mxu1 %v18713_v55  ;;  %v13378_v55 = vld [vmem:[#allocation25 + $0x100] sm:$0xff] }
 0xc2c   : > { %18718 = vmatprep.subr.bf16.mxu1 %v18717_v16  ;;  %v18797_v39 = vpack.c.bf16 %v13379_v45, %v13378_v55  ;;  %v13574_v55 = vld [vmem:[#allocation25 + $0x210] sm:$0xff]  ;;  %v13575_v45 = vld [vmem:[#allocation25 + $0x218] sm:$0xff] }
 0xc2e   : > { %17900 = vmatmul.mubr.msk.f32.vlgmr.msra.gmra.mrb[74].mxu1 %vm10720_vm4, %v12980_v43  ;;  %v13382_v43 = vld [vmem:[#allocation25 + $0x120] sm:$0xff] }
 0xc2f   : > { %18720 = vmatpush3.bf16.msra.mxu1 %v18717_v16  ;;  %17918 = vmatprep.mubr.msk.f32.mxu1 %vm10720_vm4, %v13075_v51  ;;  %v13380_v16 = vld [vmem:[#allocation25 + $0x110] sm:$0xff]  ;;  %v18805_v51 = vpack.c.bf16 %v13383_v15, %v13382_v43 }
 0xc30   : > { %18722 = vmatprep.subr.bf16.mxu1 %v18721_v14  ;;  %v18801_v6 = vpack.c.bf16 %v13381_v12, %v13380_v16  ;;  %v13576_v12 = vld [vmem:[#allocation25 + $0x220] sm:$0xff]  ;;  %v13578_v15 = vld [vmem:[#allocation25 + $0x230] sm:$0xff] }
 0xc33   : > { %18724 = vmatpush3.bf16.msra.mxu1 %v18721_v14 }
 0xc34   : > { %18726 = vmatprep.subr.bf16.mxu1 %v18725_v63 }
 0xc37   : > { %18728 = vmatpush3.bf16.msra.mxu1 %v18725_v63  ;;  %v13384_v63 = vld [vmem:[#allocation25 + $0x130] sm:$0xff] }
 0xc38   : > { %18730 = vmatprep.subr.bf16.mxu1 %v18729_v46  ;;  %v18809_v33 = vpack.c.bf16 %v13385_v23, %v13384_v63  ;;  %v13580_v63 = vld [vmem:[#allocation25 + $0x240] sm:$0xff]  ;;  %v13581_v23 = vld [vmem:[#allocation25 + $0x248] sm:$0xff] }
 0xc3b   : > { %18732 = vmatpush3.bf16.msra.mxu1 %v18729_v46  ;;  %v13386_v46 = vld [vmem:[#allocation25 + $0x140] sm:$0xff] }
 0xc3c   : > { %19021 = vmatprep.subr.bf16.mxu1 %v20229_v27  ;;  %v13188_v27 = vld [vmem:[#allocation25] sm:$0xff] }
 0xc3d   : > { %v18765_v0 = vpack.c.bf16 %v13189_v20, %v13188_v27  ;;  %v13476_v27 = vld [vmem:[#allocation25 + $0x180] sm:$0xff]  ;;  %v13477_v20 = vld [vmem:[#allocation25 + $0x188] sm:$0xff] }
 0xc3e   : > { %17919 = vmatmul.mubr.msk.f32.vlgmr.msra.gmra.mrb[74].mxu1 %vm10720_vm4, %v13076_v9  ;;  %v18813_v9 = vpack.c.bf16 %v13387_v32, %v13386_v46  ;;  %v13582_v46 = vld [vmem:[#allocation25 + $0x250] sm:$0xff]  ;;  %v13583_v32 = vld [vmem:[#allocation25 + $0x258] sm:$0xff]  ;;  %vm25288_vm4 = vmmov 1  }
 0xc3f   : > { %18766 = vmatprep.subr.bf16.mxu0 %v18765_v0  ;;  %vm19023_vm5 = vmpackc.low %vm14087_vm0, %vm25288_vm4 }
 0xd11   : > { %v17920_v3 = vpop.f32.mrb[74].mxu1 }
 0xd12   : > { %v24108_v25 = vadd.f32 %v17920_v3, %v15191_v11  ;;  %v13158_v58 = vpop.f32.mrb[75].mxu1  ;;  %v13479_v3 = vld [vmem:[#allocation25 + $0x198] sm:$0xff] }
 0xd13   : > { %v24110_v21 = vadd.f32 %v15191_v11, %v13158_v58  ;;  %v13478_v11 = vld [vmem:[#allocation25 + $0x190] sm:$0xff] }
 0xd14   : > { %v13179_v2 = vmax.f32 %v24108_v25, 0.0  ;;  %v18833_v58 = vpack.c.bf16 %v13479_v3, %v13478_v11  ;;  %v13681_v25 = vld [vmem:[#allocation25 + $0x2d8] sm:$0xff] }
 0xd15   : > { %v13178_v40 = vmax.f32 %v24110_v21, 0.0  ;;  %v13585_v21 = vld [vmem:[#allocation25 + $0x268] sm:$0xff] }
 0xd16   : > { %13182 = vst [vmem:[#allocation9 + $0x10] sm:$0xff] %v13179_v2 }
 0xd17   : > { %13181 = vst [vmem:[#allocation9 + $0x8] sm:$0xff] %v13178_v40 }
 0xd1e   : > { %v13204_v30 = vld [vmem:[#allocation9 + $0x4] sm:$0xff]  ;;  %v24118_v7 = vld [vmem:[#allocation9 + $0xc] sm:$0xff] }
 0xd1f   : > { %17953 = vmatprep.mubr.f32.mxu0 %v13204_v30  ;;  %v13184_v38 = vld [vmem:[#allocation9 + $0x3] sm:$0xff]  ;;  %v24123_v14 = vld [vmem:[#allocation9 + $0xb] sm:$0xff] }
 0xd20   : > { %17954 = vmatmul.mubr.f32.vlgmr.msra.gmra.mrb[56].mxu0 %v24118_v7  ;;  %v13373_v53 = vld [vmem:[#allocation9 + $0x5] sm:$0xff]  ;;  %v24130_v8 = vld [vmem:[#allocation9 + $0xd] sm:$0xff] }
 0xd21   : > { %18768 = vmatpush3.bf16.msra.mxu0 %v18765_v0  ;;  %17988 = vmatprep.mubr.msk.f32.mxu0 %vm23856_vm10, %v13184_v38  ;;  %v18829_v0 = vpack.c.bf16 %v13477_v20, %v13476_v27  ;;  %v13481_v30 = vld [vmem:[#allocation25 + $0x1a8] sm:$0xff]  ;;  %v13483_v38 = vld [vmem:[#allocation25 + $0x1b8] sm:$0xff]  ;;  %v13674_v20 = vld [vmem:[#allocation25 + $0x2a0] sm:$0xff] }
 0xd22   : > { %18770 = vmatprep.subr.bf16.mxu0 %v18769_v34  ;;  %v18837_v56 = vpack.c.bf16 %v13481_v30, %v13480_v44  ;;  %v13472_v16 = vld [vmem:[#allocation9 + $0xf] sm:$0xff] }
 0xd23   : > { %v13665_v11 = vld [vmem:[#allocation9 + $0x9] sm:$0xff]  ;;  %v13677_v44 = vld [vmem:[#allocation25 + $0x2b8] sm:$0xff] }
 0xd25   : > { %18772 = vmatpush3.bf16.msra.mxu0 %v18769_v34  ;;  %v13471_v34 = vld [vmem:[#allocation9 + $0x7] sm:$0xff] }
 0xd26   : > { %18774 = vmatprep.subr.bf16.mxu0 %v18773_v5 }
 0xd29   : > { %18776 = vmatpush3.bf16.msra.mxu0 %v18773_v5  ;;  %v18841_v5 = vpack.c.bf16 %v13483_v38, %v13482_v29  ;;  %v13680_v38 = vld [vmem:[#allocation25 + $0x2d0] sm:$0xff] }
 0xd2a   : > { %18778 = vmatprep.subr.bf16.mxu0 %v18777_v52 }
 0xd2d   : > { %18780 = vmatpush3.bf16.msra.mxu0 %v18777_v52  ;;  %v18845_v52 = vpack.c.bf16 %v13485_v50, %v13484_v17  ;;  %v13683_v17 = vld [vmem:[#allocation25 + $0x2e8] sm:$0xff] }
 0xd2e   : > { %18782 = vmatprep.subr.bf16.mxu0 %v18781_v28 }
 0xd31   : > { %18784 = vmatpush3.bf16.msra.mxu0 %v18781_v28  ;;  %v18849_v28 = vpack.c.bf16 %v13487_v4, %v13486_v24  ;;  %v13685_v24 = vld [vmem:[#allocation25 + $0x2f8] sm:$0xff] }
 0xd32   : > { %18786 = vmatprep.subr.bf16.mxu0 %v18785_v22 }
 0xd35   : > { %18788 = vmatpush3.bf16.msra.mxu0 %v18785_v22  ;;  %v18853_v22 = vpack.c.bf16 %v13489_v57, %v13488_v48  ;;  %v13769_v48 = vld [vmem:[#allocation25 + $0x308] sm:$0xff] }
 0xd36   : > { %18790 = vmatprep.subr.bf16.mxu0 %v18789_v49 }
 0xd39   : > { %18792 = vmatpush3.bf16.msra.mxu0 %v18789_v49  ;;  %v18857_v49 = vpack.c.bf16 %v13491_v26, %v13490_v61  ;;  %v13771_v61 = vld [vmem:[#allocation25 + $0x318] sm:$0xff] }
 0xd3a   : > { %18794 = vmatprep.subr.bf16.mxu0 %v18793_v18 }
 0xd3d   : > { %18796 = vmatpush3.bf16.msra.mxu0 %v18793_v18  ;;  %v18861_v18 = vpack.c.bf16 %v13573_v1, %v13572_v54  ;;  %v13772_v54 = vld [vmem:[#allocation25 + $0x320] sm:$0xff]  ;;  %v13773_v1 = vld [vmem:[#allocation25 + $0x328] sm:$0xff] }
 0xd3e   : > { %18798 = vmatprep.subr.bf16.mxu0 %v18797_v39 }
 0xd40   : > { %17989 = vmatmul.mubr.msk.f32.vlgmr.msra.gmra.mrb[56].mxu0 %vm23893_vm14, %v24123_v14 }
 0xd41   : > { %18800 = vmatpush3.bf16.msra.mxu0 %v18797_v39  ;;  %18023 = vmatprep.mubr.msk.f32.mxu0 %vm23899_vm6, %v13373_v53  ;;  %v18865_v39 = vpack.c.bf16 %v13575_v45, %v13574_v55  ;;  %v13579_v53 = vld [vmem:[#allocation25 + $0x238] sm:$0xff]  ;;  %v13774_v55 = vld [vmem:[#allocation25 + $0x330] sm:$0xff] }
 0xd42   : > { %18802 = vmatprep.subr.bf16.mxu0 %v18801_v6  ;;  %v13775_v45 = vld [vmem:[#allocation25 + $0x338] sm:$0xff] }
 0xd45   : > { %18804 = vmatpush3.bf16.msra.mxu0 %v18801_v6  ;;  %v13577_v6 = vld [vmem:[#allocation25 + $0x228] sm:$0xff] }
 0xd46   : > { %18806 = vmatprep.subr.bf16.mxu0 %v18805_v51  ;;  %v18869_v43 = vpack.c.bf16 %v13577_v6, %v13576_v12  ;;  %v13777_v12 = vld [vmem:[#allocation25 + $0x348] sm:$0xff] }
 0xd49   : > { %18808 = vmatpush3.bf16.msra.mxu0 %v18805_v51  ;;  %v18873_v51 = vpack.c.bf16 %v13579_v53, %v13578_v15  ;;  %v13779_v15 = vld [vmem:[#allocation25 + $0x358] sm:$0xff] }
 0xd4a   : > { %18810 = vmatprep.subr.bf16.mxu0 %v18809_v33 }
 0xd4d   : > { %18812 = vmatpush3.bf16.msra.mxu0 %v18809_v33  ;;  %v18877_v33 = vpack.c.bf16 %v13581_v23, %v13580_v63  ;;  %v13782_v63 = vld [vmem:[#allocation25 + $0x370] sm:$0xff]  ;;  %v13783_v23 = vld [vmem:[#allocation25 + $0x378] sm:$0xff] }
 0xd4e   : > { %18814 = vmatprep.subr.bf16.mxu0 %v18813_v9 }
 0xd51   : > { %18816 = vmatpush3.bf16.msra.mxu0 %v18813_v9  ;;  %v18881_v9 = vpack.c.bf16 %v13583_v32, %v13582_v46  ;;  %v13864_v46 = vld [vmem:[#allocation25 + $0x380] sm:$0xff]  ;;  %v13865_v32 = vld [vmem:[#allocation25 + $0x388] sm:$0xff] }
 0xd52   : > { %18818 = vmatprep.subr.bf16.mxu0 %v18817_v36 }
 0xd55   : > { %18820 = vmatpush3.bf16.msra.mxu0 %v18817_v36  ;;  %v13587_v36 = vld [vmem:[#allocation25 + $0x278] sm:$0xff] }
 0xd56   : > { %18822 = vmatprep.subr.bf16.mxu0 %v18821_v62  ;;  %v18889_v59 = vpack.c.bf16 %v13587_v36, %v13586_v35  ;;  %v13764_v35 = vld [vmem:[#allocation9 + $0x13] sm:$0xff]  ;;  %v13868_v36 = vld [vmem:[#allocation25 + $0x3a0] sm:$0xff] }
 0xd59   : > { %18824 = vmatpush3.bf16.msra.mxu0 %v18821_v62  ;;  %v13671_v62 = vld [vmem:[#allocation25 + $0x288] sm:$0xff] }
 0xd5a   : > { %18826 = vmatprep.subr.bf16.mxu0 %v18825_v47  ;;  %v18893_v42 = vpack.c.bf16 %v13671_v62, %v13670_v41  ;;  %v13870_v62 = vld [vmem:[#allocation25 + $0x3b0] sm:$0xff] }
 0xd5d   : > { %18828 = vmatpush3.bf16.msra.mxu0 %v18825_v47  ;;  %v13673_v47 = vld [vmem:[#allocation25 + $0x298] sm:$0xff] }
 0xd5e   : > { %18830 = vmatprep.subr.bf16.mxu0 %v18829_v0  ;;  %v18897_v27 = vpack.c.bf16 %v13673_v47, %v13672_v31  ;;  %v13872_v47 = vld [vmem:[#allocation25 + $0x3c0] sm:$0xff] }
 0xd60   : > { %18024 = vmatmul.mubr.msk.f32.vlgmr.msra.gmra.mrb[56].mxu0 %vm23934_vm15, %v24130_v8 }
 0xd61   : > { %18832 = vmatpush3.bf16.msra.mxu0 %v18829_v0  ;;  %18058 = vmatprep.mubr.msk.f32.mxu0 %vm23856_vm10, %v13471_v34  ;;  %v13675_v0 = vld [vmem:[#allocation25 + $0x2a8] sm:$0xff]  ;;  %v13678_v34 = vld [vmem:[#allocation25 + $0x2c0] sm:$0xff] }
 0xd62   : > { %18834 = vmatprep.subr.bf16.mxu0 %v18833_v58  ;;  %v18901_v3 = vpack.c.bf16 %v13675_v0, %v13674_v20  ;;  %v13874_v0 = vld [vmem:[#allocation25 + $0x3d0] sm:$0xff] }
 0xd65   : > { %18836 = vmatpush3.bf16.msra.mxu0 %v18833_v58  ;;  %v13676_v58 = vld [vmem:[#allocation25 + $0x2b0] sm:$0xff] }
 0xd66   : > { %18838 = vmatprep.subr.bf16.mxu0 %v18837_v56  ;;  %v18905_v30 = vpack.c.bf16 %v13677_v44, %v13676_v58  ;;  %v13877_v58 = vld [vmem:[#allocation25 + $0x3e8] sm:$0xff]  ;;  %v13878_v44 = vld [vmem:[#allocation25 + $0x3f0] sm:$0xff] }
 0xd69   : > { %18840 = vmatpush3.bf16.msra.mxu0 %v18837_v56  ;;  %v13679_v56 = vld [vmem:[#allocation25 + $0x2c8] sm:$0xff] }
 0xd6a   : > { %18842 = vmatprep.subr.bf16.mxu0 %v18841_v5  ;;  %v18909_v29 = vpack.c.bf16 %v13679_v56, %v13678_v34  ;;  %v13962_v56 = vld [vmem:[#allocation25 + $0x400] sm:$0xff] }
 0xd6d   : > { %18844 = vmatpush3.bf16.msra.mxu0 %v18841_v5  ;;  %v13682_v5 = vld [vmem:[#allocation25 + $0x2e0] sm:$0xff] }
 0xd6e   : > { %18846 = vmatprep.subr.bf16.mxu0 %v18845_v52  ;;  %v18917_v50 = vpack.c.bf16 %v13683_v17, %v13682_v5  ;;  %v13862_v17 = vld [vmem:[#allocation9 + $0x14] sm:$0xff] }
 0xd71   : > { %18848 = vmatpush3.bf16.msra.mxu0 %v18845_v52  ;;  %v13684_v52 = vld [vmem:[#allocation25 + $0x2f0] sm:$0xff] }
 0xd72   : > { %18850 = vmatprep.subr.bf16.mxu0 %v18849_v28  ;;  %v18921_v4 = vpack.c.bf16 %v13685_v24, %v13684_v52  ;;  %v13967_v52 = vld [vmem:[#allocation25 + $0x428] sm:$0xff] }
 0xd75   : > { %18852 = vmatpush3.bf16.msra.mxu0 %v18849_v28  ;;  %v13768_v28 = vld [vmem:[#allocation25 + $0x300] sm:$0xff] }
 0xd76   : > { %18854 = vmatprep.subr.bf16.mxu0 %v18853_v22  ;;  %v18925_v57 = vpack.c.bf16 %v13769_v48, %v13768_v28  ;;  %v13969_v28 = vld [vmem:[#allocation25 + $0x438] sm:$0xff] }
 0xd79   : > { %18856 = vmatpush3.bf16.msra.mxu0 %v18853_v22  ;;  %v13770_v22 = vld [vmem:[#allocation25 + $0x310] sm:$0xff] }
 0xd7a   : > { %18858 = vmatprep.subr.bf16.mxu0 %v18857_v49  ;;  %v18929_v26 = vpack.c.bf16 %v13771_v61, %v13770_v22  ;;  %v13971_v22 = vld [vmem:[#allocation25 + $0x448] sm:$0xff] }
 0xd7d   : > { %18860 = vmatpush3.bf16.msra.mxu0 %v18857_v49  ;;  %v13666_v49 = vld [vmem:[#allocation9 + $0x11] sm:$0xff] }
 0xd7e   : > { %18862 = vmatprep.subr.bf16.mxu0 %v18861_v18 }
 0xd80   : > { %18059 = vmatmul.mubr.msk.f32.vlgmr.msra.gmra.mrb[56].mxu0 %vm23893_vm14, %v13472_v16  ;;  %v13776_v16 = vld [vmem:[#allocation25 + $0x340] sm:$0xff] }
 0xd81   : > { %18864 = vmatpush3.bf16.msra.mxu0 %v18861_v18  ;;  %18093 = vmatprep.mubr.f32.mxu0 %v13178_v40  ;;  %v18885_v40 = vpack.c.bf16 %v13585_v21, %v13584_v19  ;;  %v18933_v18 = vpack.c.bf16 %v13773_v1, %v13772_v54  ;;  %v18941_v6 = vpack.c.bf16 %v13777_v12, %v13776_v16  ;;  %v13866_v19 = vld [vmem:[#allocation25 + $0x390] sm:$0xff]  ;;  %v13867_v21 = vld [vmem:[#allocation25 + $0x398] sm:$0xff]  ;;  %v13974_v1 = vld [vmem:[#allocation25 + $0x460] sm:$0xff] }
 0xd82   : > { %18866 = vmatprep.subr.bf16.mxu0 %v18865_v39  ;;  %v19839_v16 = vld [vmem:[#allocation9] sm:$0xff]  ;;  %v15204_v12 = vld [vmem:[#allocation27] ss:$0 sm:$0xff] }
 0xd83   : > { %18240 = vmatprep.mubr.msk.f32.mxu1 %vm20231_vm12, %v19839_v16 }
 0xd85   : > { %18868 = vmatpush3.bf16.msra.mxu0 %v18865_v39  ;;  %v18937_v39 = vpack.c.bf16 %v13775_v45, %v13774_v55  ;;  %v13977_v55 = vld [vmem:[#allocation25 + $0x478] sm:$0xff] }
 0xd86   : > { %18870 = vmatprep.subr.bf16.mxu0 %v18869_v43 }
 0xd89   : > { %18872 = vmatpush3.bf16.msra.mxu0 %v18869_v43  ;;  %v13778_v43 = vld [vmem:[#allocation25 + $0x350] sm:$0xff] }
 0xd8a   : > { %18874 = vmatprep.subr.bf16.mxu0 %v18873_v51  ;;  %v18945_v53 = vpack.c.bf16 %v13779_v15, %v13778_v43 }
 0xd8d   : > { %18876 = vmatpush3.bf16.msra.mxu0 %v18873_v51  ;;  %v13780_v51 = vld [vmem:[#allocation25 + $0x360] sm:$0xff] }
 0xd8e   : > { %18878 = vmatprep.subr.bf16.mxu0 %v18877_v33 }
 0xd91   : > { %18880 = vmatpush3.bf16.msra.mxu0 %v18877_v33  ;;  %v18953_v33 = vpack.c.bf16 %v13783_v23, %v13782_v63 }
 0xd92   : > { %18882 = vmatprep.subr.bf16.mxu0 %v18881_v9 }
 0xd95   : > { %18884 = vmatpush3.bf16.msra.mxu0 %v18881_v9  ;;  %v18957_v9 = vpack.c.bf16 %v13865_v32, %v13864_v46 }
 0xd96   : > { %18886 = vmatprep.subr.bf16.mxu0 %v18885_v40 }
 0xd99   : > { %18888 = vmatpush3.bf16.msra.mxu0 %v18885_v40  ;;  %v18961_v40 = vpack.c.bf16 %v13867_v21, %v13866_v19 }
 0xd9a   : > { %18890 = vmatprep.subr.bf16.mxu0 %v18889_v59 }
 0xd9d   : > { %18892 = vmatpush3.bf16.msra.mxu0 %v18889_v59  ;;  %v13869_v59 = vld [vmem:[#allocation25 + $0x3a8] sm:$0xff] }
 0xd9e   : > { %18894 = vmatprep.subr.bf16.mxu0 %v18893_v42  ;;  %v18965_v41 = vpack.c.bf16 %v13869_v59, %v13868_v36 }
 0xda0   : > { %18094 = vmatmul.mubr.f32.vlgmr.msra.gmra.mrb[56].mxu0 %v13179_v2  ;;  %v18913_v2 = vpack.c.bf16 %v13681_v25, %v13680_v38  ;;  %v13964_v25 = vld [vmem:[#allocation25 + $0x410] sm:$0xff] }
 0xda1   : > { %18896 = vmatpush3.bf16.msra.mxu0 %v18893_v42  ;;  %18128 = vmatprep.mubr.msk.f32.mxu0 %vm23899_vm6, %v13665_v11  ;;  %v13871_v42 = vld [vmem:[#allocation25 + $0x3b8] sm:$0xff] }
 0xda2   : > { %18898 = vmatprep.subr.bf16.mxu0 %v18897_v27  ;;  %v18969_v31 = vpack.c.bf16 %v13871_v42, %v13870_v62  ;;  %v13875_v11 = vld [vmem:[#allocation25 + $0x3d8] sm:$0xff] }
 0xda3   : > { %v18977_v60 = vpack.c.bf16 %v13875_v11, %v13874_v0 }
 0xda5   : > { %18900 = vmatpush3.bf16.msra.mxu0 %v18897_v27  ;;  %v13873_v27 = vld [vmem:[#allocation25 + $0x3c8] sm:$0xff] }
 0xda6   : > { %18902 = vmatprep.subr.bf16.mxu0 %v18901_v3  ;;  %v18973_v20 = vpack.c.bf16 %v13873_v27, %v13872_v47 }
 0xda9   : > { %18904 = vmatpush3.bf16.msra.mxu0 %v18901_v3  ;;  %v13876_v3 = vld [vmem:[#allocation25 + $0x3e0] sm:$0xff] }
 0xdaa   : > { %18906 = vmatprep.subr.bf16.mxu0 %v18905_v30 }
 0xdad   : > { %18908 = vmatpush3.bf16.msra.mxu0 %v18905_v30  ;;  %v13879_v30 = vld [vmem:[#allocation25 + $0x3f8] sm:$0xff] }
 0xdae   : > { %18910 = vmatprep.subr.bf16.mxu0 %v18909_v29  ;;  %v18985_v34 = vpack.c.bf16 %v13879_v30, %v13878_v44 }
 0xdb1   : > { %18912 = vmatpush3.bf16.msra.mxu0 %v18909_v29  ;;  %v13963_v29 = vld [vmem:[#allocation25 + $0x408] sm:$0xff] }
 0xdb2   : > { %18914 = vmatprep.subr.bf16.mxu0 %v18913_v2  ;;  %v18989_v38 = vpack.c.bf16 %v13963_v29, %v13962_v56 }
 0xdb5   : > { %18916 = vmatpush3.bf16.msra.mxu0 %v18913_v2  ;;  %v13965_v2 = vld [vmem:[#allocation25 + $0x418] sm:$0xff] }
 0xdb6   : > { %18918 = vmatprep.subr.bf16.mxu0 %v18917_v50  ;;  %v18993_v5 = vpack.c.bf16 %v13965_v2, %v13964_v25 }
 0xdb9   : > { %18920 = vmatpush3.bf16.msra.mxu0 %v18917_v50  ;;  %v13966_v50 = vld [vmem:[#allocation25 + $0x420] sm:$0xff] }
 0xdba   : > { %18922 = vmatprep.subr.bf16.mxu0 %v18921_v4  ;;  %v18997_v24 = vpack.c.bf16 %v13967_v52, %v13966_v50 }
 0xdbd   : > { %18924 = vmatpush3.bf16.msra.mxu0 %v18921_v4  ;;  %v13968_v4 = vld [vmem:[#allocation25 + $0x430] sm:$0xff] }
 0xdbe   : > { %18926 = vmatprep.subr.bf16.mxu0 %v18925_v57  ;;  %v19001_v48 = vpack.c.bf16 %v13969_v28, %v13968_v4 }
 0xdc0   : > { %18129 = vmatmul.mubr.msk.f32.vlgmr.msra.gmra.mrb[56].mxu0 %vm23934_vm15, %v13666_v49  ;;  %v13973_v49 = vld [vmem:[#allocation25 + $0x458] sm:$0xff] }
 0xdc1   : > { %18928 = vmatpush3.bf16.msra.mxu0 %v18925_v57  ;;  %18163 = vmatprep.mubr.msk.f32.mxu0 %vm23856_vm10, %v24123_v14  ;;  %v18949_v14 = vpack.c.bf16 %v13781_v37, %v13780_v51  ;;  %v13970_v57 = vld [vmem:[#allocation25 + $0x440] sm:$0xff] }
 0xdc2   : > { %18930 = vmatprep.subr.bf16.mxu0 %v18929_v26  ;;  %v19005_v61 = vpack.c.bf16 %v13971_v22, %v13970_v57 }
 0xdc5   : > { %18932 = vmatpush3.bf16.msra.mxu0 %v18929_v26  ;;  %v13972_v26 = vld [vmem:[#allocation25 + $0x450] sm:$0xff] }
 0xdc6   : > { %18934 = vmatprep.subr.bf16.mxu0 %v18933_v18  ;;  %v19009_v54 = vpack.c.bf16 %v13973_v49, %v13972_v26 }
 0xdc9   : > { %18936 = vmatpush3.bf16.msra.mxu0 %v18933_v18  ;;  %v13976_v18 = vld [vmem:[#allocation25 + $0x470] sm:$0xff] }
 0xdca   : > { %18938 = vmatprep.subr.bf16.mxu0 %v18937_v39  ;;  %v19017_v45 = vpack.c.bf16 %v13977_v55, %v13976_v18 }
 0xdcd   : > { %18940 = vmatpush3.bf16.msra.mxu0 %v18937_v39  ;;  %v13958_v39 = vld [vmem:[#allocation9 + $0x15] sm:$0xff] }
 0xdce   : > { %18942 = vmatprep.subr.bf16.mxu0 %v18941_v6 }
 0xdd1   : > { %18944 = vmatpush3.bf16.msra.mxu0 %v18941_v6 }
 0xdd2   : > { %18946 = vmatprep.subr.bf16.mxu0 %v18945_v53 }
 0xdd5   : > { %18948 = vmatpush3.bf16.msra.mxu0 %v18945_v53 }
 0xdd6   : > { %18950 = vmatprep.subr.bf16.mxu0 %v18949_v14 }
 0xdd9   : > { %18952 = vmatpush3.bf16.msra.mxu0 %v18949_v14 }
 0xdda   : > { %18954 = vmatprep.subr.bf16.mxu0 %v18953_v33 }
 0xddd   : > { %18956 = vmatpush3.bf16.msra.mxu0 %v18953_v33 }
 0xdde   : > { %18958 = vmatprep.subr.bf16.mxu0 %v18957_v9 }
 0xde0   : > { %18164 = vmatmul.mubr.msk.f32.vlgmr.msra.gmra.mrb[56].mxu0 %vm23893_vm14, %v13764_v35 }
 0xde1   : > { %18960 = vmatpush3.bf16.msra.mxu0 %v18957_v9  ;;  %18198 = vmatprep.mubr.f32.mxu0 %v24118_v7  ;;  %v18981_v7 = vpack.c.bf16 %v13877_v58, %v13876_v3 }
 0xde2   : > { %18962 = vmatprep.subr.bf16.mxu0 %v18961_v40 }
 0xde5   : > { %18964 = vmatpush3.bf16.msra.mxu0 %v18961_v40 }
 0xde6   : > { %18966 = vmatprep.subr.bf16.mxu0 %v18965_v41 }
 0xde9   : > { %18968 = vmatpush3.bf16.msra.mxu0 %v18965_v41  ;;  %v14082_v41 = vld [vmem:[%s25289_s18] sm:$0xf] }
 0xdea   : > { %18970 = vmatprep.subr.bf16.mxu0 %v18969_v31 }
 0xded   : > { %18972 = vmatpush3.bf16.msra.mxu0 %v18969_v31 }
 0xdee   : > { %18974 = vmatprep.subr.bf16.mxu0 %v18973_v20 }
 0xdf1   : > { %18976 = vmatpush3.bf16.msra.mxu0 %v18973_v20 }
 0xdf2   : > { %18978 = vmatprep.subr.bf16.mxu0 %v18977_v60 }
 0xdf5   : > { %18980 = vmatpush3.bf16.msra.mxu0 %v18977_v60 }
 0xdf6   : > { %18982 = vmatprep.subr.bf16.mxu0 %v18981_v7 }
 0xdf9   : > { %18984 = vmatpush3.bf16.msra.mxu0 %v18981_v7 }
 0xdfa   : > { %18986 = vmatprep.subr.bf16.mxu0 %v18985_v34 }
 0xdfd   : > { %18988 = vmatpush3.bf16.msra.mxu0 %v18985_v34 }
 0xdfe   : > { %18990 = vmatprep.subr.bf16.mxu0 %v18989_v38 }
 0xe00   : > { %18199 = vmatmul.mubr.f32.vlgmr.msra.gmra.mrb[56].mxu0 %v13862_v17 }
 0xe01   : > { %18992 = vmatpush3.bf16.msra.mxu0 %v18989_v38  ;;  %18233 = vmatprep.mubr.msk.f32.mxu0 %vm23899_vm6, %v24130_v8  ;;  %v19013_v8 = vpack.c.bf16 %v13975_v13, %v13974_v1 }
 0xe02   : > { %18994 = vmatprep.subr.bf16.mxu0 %v18993_v5 }
 0xe05   : > { %18996 = vmatpush3.bf16.msra.mxu0 %v18993_v5 }
 0xe06   : > { %18998 = vmatprep.subr.bf16.mxu0 %v18997_v24 }
 0xe09   : > { %19000 = vmatpush3.bf16.msra.mxu0 %v18997_v24 }
 0xe0a   : > { %19002 = vmatprep.subr.bf16.mxu0 %v19001_v48 }
 0xe0d   : > { %19004 = vmatpush3.bf16.msra.mxu0 %v19001_v48 }
 0xe0e   : > { %19006 = vmatprep.subr.bf16.mxu0 %v19005_v61 }
 0xe11   : > { %19008 = vmatpush3.bf16.msra.mxu0 %v19005_v61 }
 0xe12   : > { %19010 = vmatprep.subr.bf16.mxu0 %v19009_v54 }
 0xe15   : > { %19012 = vmatpush3.bf16.msra.mxu0 %v19009_v54 }
 0xe16   : > { %19014 = vmatprep.subr.bf16.mxu0 %v19013_v8 }
 0xe19   : > { %19016 = vmatpush3.bf16.msra.mxu0 %v19013_v8 }
 0xe1a   : > { %19018 = vmatprep.subr.bf16.mxu0 %v19017_v45 }
 0xe1d   : > { %19020 = vmatpush3.bf16.msra.mxu0 %v19017_v45 }
 0xe20   : > { %18234 = vmatmul.mubr.msk.f32.vlgmr.msra.gmra.mrb[56].mxu0 %vm23934_vm15, %v13958_v39 }
 0xef3   : > { %v18235_v6 = vpop.f32.mrb[56].mxu0 }
 0xef4   : > { %v14063_v43 = vadd.f32 %v18235_v6, %v15204_v12  ;;  %v14044_v15 = vpop.f32.mrb[57].mxu0 }
 0xef5   : > { %v14062_v53 = vadd.f32 %v15204_v12, %v14044_v15 }
 0xef6   : > { %v14065_v51 = vmax.f32 %v14063_v43, 0.0 }
 0xef7   : > { %v14064_v37 = vmax.f32 %v14062_v53, 0.0 }
 0xef8   : > { %14067 = vst [vmem:[#allocation10 + $0x8] sm:$0xff] %v14065_v51 }
 0xef9   : > { %14066 = vst [vmem:[#allocation10] sm:$0xff] %v14064_v37 }
 0xeff   : > { %v14069_v14 = vld [vmem:[#allocation10 + $0x8] sm:$0x7]  ;;  %v14075_v23 = vld [vmem:[#allocation10 + $0xc] sm:$0x7] }
 0xf00   : > { %v14071_v63 = vld [vmem:[#allocation10 + $0x9] sm:$0x7]  ;;  %v14070_v33 = vld [vmem:[#allocation10 + $0x1] sm:$0xff]  ;;  %v14077_v19 = vld [vmem:[#allocation10 + $0xd] sm:$0x7] }
 0xf01   : > { %v14073_v46 = vmax.f32 %v14069_v14, %v14071_v63  ;;  %v14074_v10 = vld [vmem:[#allocation10 + $0x4] sm:$0xff]  ;;  %v14072_v9 = vmax.f32 %v14064_v37, %v14070_v33  ;;  %v14079_v40 = vmax.f32 %v14075_v23, %v14077_v19 }
 0xf02   : > { %v14076_v32 = vld [vmem:[#allocation10 + $0x5] sm:$0xff] }
 0xf03   : > { %v14078_v21 = vmax.f32 %v14074_v10, %v14076_v32  ;;  %v14081_v36 = vmax.f32 %v14073_v46, %v14079_v40 }
 0xf05   : > { %v14080_v35 = vmax.f32 %v14072_v9, %v14078_v21 }
 0xf07   : > { %v19022_v59 = vpack.c.bf16 %v14081_v36, %v14080_v35 }
 0xf09   : > { %19024 = vmatpush3.bf16.msk.msra.mxu1 %vm19023_vm5, %v19022_v59 }
 0xf0c   : > { %18241 = vmatmul.mubr.msk.f32.vlgmr.msra.gmra.mrb[76].mxu1 %vm14083_vm13, %v14082_v41 }
 0xfdf   : > { %v14157_v62 = vpop.f32.mrb[76].mxu1 }
 0xfe0   : > { %14161 = vst [vmem:[%s682_s22] sm:$0xf] %v14157_v62  ;;  %v18242_v42 = vpop.f32.mrb[77].mxu1 }
 0xfe1 PF: > { %s25291_s21 = sld [smem:[#allocation37_spill]] }
 0xfe7   : > { %s33_s21 = sadd.s32 1, %s25291_s21  }
 0xfe8   : > { %p30_p3 = scmp.ge.s32.totalorder %s33_s21, 4  }
 0xfea   :  { %32 = sbr.rel (!%p30_p3) target bundleno = 14 (0xe), region = 211 }
 0xff1   :  { %14181 = vsyncpa [#allocation12], 1 }
 0xff2   :  { %14183 = vsyncpa [#allocation12 + $0x1], 1 }
 0xff3   :  { %14184 = vsyncpa [#allocation14], 1 }
 0xff4   :  { %14185 = vsyncpa [#allocation17], 1 }
 0xff5   :  { %14186 = vsyncpa [#allocation20], 1 }
 0xff6   :  { %14187 = vsyncpa [#allocation23], 1 }
 0xff7   :  { %14188 = vsyncpa [#allocation26], 1 }
 0xff8   :  { %14189 = vsyncpa [#allocation29], 1 }

</bundles_post_ra>
